<compile_context>
chip_gen: v7x
topology: tpu7x:2x2x1
jax: 0.10.0
libtpu: 0.0.40
codegen_flags: <defaults>
</compile_context>

<pallas_src>
import functools

import jax
import jax.numpy as jnp
from jax.experimental import pallas as pl
from jax.experimental.pallas import tpu as pltpu


_MOSAIC_PARAMS = pltpu.CompilerParams(
    dimension_semantics=("parallel",),       # batch grid axis -> megacore
    vmem_limit_bytes=32 * 1024 * 1024,       # headroom on v5e (16 MiB default)
)


def _round_up(x, m):
    return (x + m - 1) // m * m


def _bcast_spec(shape):
    """Full-array block, same block index for every grid step (weights/BN)."""
    n = len(shape)
    return pl.BlockSpec(shape, lambda b, _n=n: (0,) * _n)


# ----------------------------------------------------------------------------
# Kernels (one pallas_call per block; grid = (batch,), marked "parallel")
# ----------------------------------------------------------------------------
def _in_kernel(x_ref, w_ref, o_ref):
    """Interleaved (real,imag) channels + 1x1 in_conv as ONE K=2F matmul."""
    x = x_ref[0].astype(jnp.bfloat16)
    o_ref[0] = jnp.dot(
        x, w_ref[...], preferred_element_type=jnp.float32).astype(o_ref.dtype)


def _make_res_kernel(L, Lr, C):
    """Whole ResNetBlock for ONE sample: 3x (3-tap conv + BN [+ReLU]) + add.

    bf16 ping-pong scratch layout (rows x C):
      rows [0, 8)        : zero left pad        (8-sublane aligned)
      rows [8, 8+L)      : data (x / h1 / h2)
      rows [8+L, Lr+16)  : zero right pad / tail
    Tap k reads rows [7+k, 7+k+Lr); output row l is the Conv1d(k=3,
    padding='same') result for time step l.  Only pad rows are zeroed (once);
    data rows are fully overwritten by every scatter.
    """
    rows = Lr + 16
    tail = rows - 8 - L                        # >= 8

    def kernel(x_ref, w_ref, ss_ref, o_ref, a_ref, b_ref):
        zpad = jnp.zeros((8, C), jnp.bfloat16)
        ztail = jnp.zeros((tail, C), jnp.bfloat16)
        for ref in (a_ref, b_ref):             # zero ONLY the pad rows
            ref[0:8, :] = zpad
            ref[pl.ds(8 + L, tail), :] = ztail
        a_ref[pl.ds(8, L), :] = x_ref[0].astype(jnp.bfloat16)

        def conv(i, src_ref, relu):
            # acc initialized from tap 0 (no zeros+add pass); f32 MXU accum.
            acc = jnp.dot(src_ref[7:7 + Lr, :], w_ref[i, 0],
                          preferred_element_type=jnp.float32)
            acc = acc + jnp.dot(src_ref[8:8 + Lr, :], w_ref[i, 1],
                                preferred_element_type=jnp.float32)
            acc = acc + jnp.dot(src_ref[9:9 + Lr, :], w_ref[i, 2],
                                preferred_element_type=jnp.float32)
            ss = ss_ref[i]                      # (2, C): [scale; shift]
            acc = acc * ss[0:1, :] + ss[1:2, :]  # fused BatchNorm affine
            if relu:
                acc = jnp.maximum(acc, 0.0)
            return acc                          # (Lr, C) f32

        h = conv(0, a_ref, relu=True)
        b_ref[pl.ds(8, L), :] = h[:L].astype(jnp.bfloat16)     # ping
        h = conv(1, b_ref, relu=True)
        a_ref[pl.ds(8, L), :] = h[:L].astype(jnp.bfloat16)     # pong
        h = conv(2, a_ref, relu=False)
        o_ref[0] = (h[:L] + x_ref[0].astype(jnp.float32)).astype(o_ref.dtype)

    return kernel


def _make_down_kernel(Lh, Lhr, C):
    """Stride-2, k=3, pad=1 conv + BN for ONE sample as a dense 2-tap conv.

    Input arrives pre-reshaped to (Lh=L/2, 2C) (adjacent time steps packed on
    channels; free HBM reshape).  With T0 = [0 ; W0], T1 = [W1 ; W2] (each
    (2C, C)) and Q[j] = [x[2j]; x[2j+1]]:
        y[j] = Q[j-1] @ T0 + Q[j] @ T1
             = x[2j-1] @ W0 + x[2j] @ W1 + x[2j+1] @ W2
    which is exactly Conv1d(k=3, stride=2, padding=1) with no strided reads.
    Scratch layout: rows [0,8) zero pad, rows [8, 8+Lh) = Q; taps read rows
    [7, 7+Lhr) and [8, 8+Lhr).
    """
    rows = Lhr + 8
    tail = rows - 8 - Lh

    def kernel(xq_ref, w_ref, ss_ref, o_ref, q_ref):
        q_ref[0:8, :] = jnp.zeros((8, 2 * C), jnp.bfloat16)
        if tail > 0:
            q_ref[pl.ds(8 + Lh, tail), :] = jnp.zeros((tail, 2 * C),
                                                      jnp.bfloat16)
        q_ref[pl.ds(8, Lh), :] = xq_ref[0].astype(jnp.bfloat16)

        acc = jnp.dot(q_ref[7:7 + Lhr, :], w_ref[0],
                      preferred_element_type=jnp.float32)
        acc = acc + jnp.dot(q_ref[8:8 + Lhr, :], w_ref[1],
                            preferred_element_type=jnp.float32)
        ss = ss_ref[...]
        acc = acc * ss[0:1, :] + ss[1:2, :]      # BN affine, no ReLU
        o_ref[0] = acc[:Lh].astype(o_ref.dtype)

    return kernel


def _out_kernel(x_ref, w_ref, ss_ref, o_ref):
    """1x1 out_conv + out_norm; Cout zero-padded to 128 for lane-dense store."""
    acc = jnp.dot(x_ref[0], w_ref[...], preferred_element_type=jnp.float32)
    ss = ss_ref[...]
    o_ref[0] = acc * ss[0:1, :] + ss[1:2, :]


# ----------------------------------------------------------------------------
# Layer wrappers (one pallas_call each, grid over batch)
# ----------------------------------------------------------------------------
def in_conv(spectrogram, w):
    B, L, F = spectrogram.shape
    C = w.shape[1]
    # Interleave real/imag on the channel axis (one fused XLA pass) so the
    # kernel does a single (L, 2F) @ (2F, C) matmul; weights were interleaved
    # to match at init time.  Pallas refs cannot be complex.
    x = jnp.stack([jnp.real(spectrogram), jnp.imag(spectrogram)],
                  axis=-1).reshape(B, L, 2 * F)
    return pl.pallas_call(
        _in_kernel,
        out_shape=jax.ShapeDtypeStruct((B, L, C), jnp.bfloat16),
        grid=(B,),
        in_specs=[pl.BlockSpec((1, L, 2 * F), lambda b: (b, 0, 0)),
                  _bcast_spec(w.shape)],
        out_specs=pl.BlockSpec((1, L, C), lambda b: (b, 0, 0)),
        compiler_params=_MOSAIC_PARAMS,
    )(x, w)


def res_block(x, w, ss):
    B, L, C = x.shape
    Lr = _round_up(L, 8)
    rows = Lr + 16
    return pl.pallas_call(
        _make_res_kernel(L, Lr, C),
        out_shape=jax.ShapeDtypeStruct((B, L, C), x.dtype),
        grid=(B,),
        in_specs=[pl.BlockSpec((1, L, C), lambda b: (b, 0, 0)),
                  _bcast_spec(w.shape),
                  _bcast_spec(ss.shape)],
        out_specs=pl.BlockSpec((1, L, C), lambda b: (b, 0, 0)),
        scratch_shapes=[pltpu.VMEM((rows, C), jnp.bfloat16),
                        pltpu.VMEM((rows, C), jnp.bfloat16)],
        compiler_params=_MOSAIC_PARAMS,
    )(x, w, ss)


def downsample(x, w, ss):
    B, L, C = x.shape
    assert L % 2 == 0, "stride-2 downsample expects an even length"
    Lh = L // 2
    Lhr = _round_up(Lh, 8)
    xq = x.reshape(B, Lh, 2 * C)            # free pair-packing reshape in HBM
    return pl.pallas_call(
        _make_down_kernel(Lh, Lhr, C),
        out_shape=jax.ShapeDtypeStruct((B, Lh, C), x.dtype),
        grid=(B,),
        in_specs=[pl.BlockSpec((1, Lh, 2 * C), lambda b: (b, 0, 0)),
                  _bcast_spec(w.shape),
                  _bcast_spec(ss.shape)],
        out_specs=pl.BlockSpec((1, Lh, C), lambda b: (b, 0, 0)),
        scratch_shapes=[pltpu.VMEM((Lhr + 8, 2 * C), jnp.bfloat16)],
        compiler_params=_MOSAIC_PARAMS,
    )(xq, w, ss)


def out_conv(x, w, ss, cout):
    B, L, C = x.shape
    Cp = w.shape[1]                         # 128 (lane-dense, zero-padded)
    y = pl.pallas_call(
        _out_kernel,
        out_shape=jax.ShapeDtypeStruct((B, L, Cp), jnp.float32),
        grid=(B,),
        in_specs=[pl.BlockSpec((1, L, C), lambda b: (b, 0, 0)),
                  _bcast_spec(w.shape),
                  _bcast_spec(ss.shape)],
        out_specs=pl.BlockSpec((1, L, Cp), lambda b: (b, 0, 0)),
        compiler_params=_MOSAIC_PARAMS,
    )(x, w, ss)
    return y[:, :, :cout]                   # tiny (L is /8 by now)


# ----------------------------------------------------------------------------
# Deterministic parameter construction (shapes follow the PyTorch __init__)
# ----------------------------------------------------------------------------
def _conv_w(key, K, cin, cout):
    bound = 1.0 / jnp.sqrt(jnp.float32(cin * K))
    return jax.random.uniform(key, (K, cin, cout), jnp.float32, -bound, bound)


def _bn_scale_shift(key, c, eps=1e-5):
    k1, k2, k3, k4 = jax.random.split(key, 4)
    gamma = 1.0 + 0.1 * jax.random.normal(k1, (c,), jnp.float32)
    beta = 0.1 * jax.random.normal(k2, (c,), jnp.float32)
    mean = 0.1 * jax.random.normal(k3, (c,), jnp.float32)
    var = 1.0 + 0.1 * jax.random.uniform(k4, (c,), jnp.float32)
    scale = gamma / jnp.sqrt(var + eps)
    shift = beta - mean * scale
    return jnp.stack([scale, shift], axis=0)        # (2, c) f32


def init_encoder_params(key, n_freqs):
    C = 256
    F = n_freqs
    keys = iter(jax.random.split(key, 64))
    params = {}

    # in_conv: Conv1d(2*n_freqs, 256, k=1, bias=False); rows [real; imag] are
    # interleaved to [r0,i0,r1,i1,...] to match the interleaved input layout.
    w_in = _conv_w(next(keys), 1, 2 * F, C)[0]                  # (2F, C)
    w_il = jnp.stack([w_in[:F], w_in[F:]], axis=1).reshape(2 * F, C)
    params["in"] = dict(w=w_il.astype(jnp.bfloat16))

    def resblock():
        ws, sss = [], []
        for _ in range(3):
            ws.append(_conv_w(next(keys), 3, C, C))             # (3, C, C)
            sss.append(_bn_scale_shift(next(keys), C))          # (2, C)
        return dict(kind="res",
                    w=jnp.stack(ws, 0).astype(jnp.bfloat16),    # (3, 3, C, C)
                    ss=jnp.stack(sss, 0))                       # (3, 2, C) f32

    def down():
        w = _conv_w(next(keys), 3, C, C)                        # taps (3, C, C)
        t0 = jnp.concatenate([jnp.zeros_like(w[0]), w[0]], axis=0)   # (2C, C)
        t1 = jnp.concatenate([w[1], w[2]], axis=0)                   # (2C, C)
        return dict(kind="down",
                    w=jnp.stack([t0, t1], 0).astype(jnp.bfloat16),   # (2,2C,C)
                    ss=_bn_scale_shift(next(keys), C))
    blocks = []
    for b in ["res", "down", "res", "res", "down",
              "res", "res", "down", "res", "res"]:
        blocks.append(resblock() if b == "res" else down())
    params["blocks"] = blocks

    # out_conv (k=1, bias=False) fused with out_norm; padded 64 -> 128 lanes.
    w_out = _conv_w(next(keys), 1, C, 64)[0]                    # (C, 64)
    ss_out = _bn_scale_shift(next(keys), 64)                    # (2, 64)
    params["out"] = dict(
        w=jnp.pad(w_out, ((0, 0), (0, 64))).astype(jnp.bfloat16),    # (C, 128)
        ss=jnp.pad(ss_out, ((0, 0), (0, 64))),                       # (2, 128)
        cout=64)
    return params


# ----------------------------------------------------------------------------
# Encoder forward (composition of fused Pallas block kernels)
# ----------------------------------------------------------------------------
def encoder_forward(params, spectrogram):
    """spectrogram: complex64 (B, L, n_freqs).

    Returns (B, L_out, 64), i.e. the PyTorch (B, 64, L_out) output transposed.
    """
    x = in_conv(spectrogram, params["in"]["w"])
    for blk in params["blocks"]:
        if blk["kind"] == "res":
            x = res_block(x, blk["w"], blk["ss"])
        else:
            x = downsample(x, blk["w"], blk["ss"])
    return out_conv(x, params["out"]["w"], params["out"]["ss"],
                    params["out"]["cout"])


if __name__ == "__main__":
    key = jax.random.PRNGKey(0)
    n_freqs = 64
    B, L = 2, 16

    kp, kr, ki = jax.random.split(key, 3)
    params = init_encoder_params(kp, n_freqs)

    spec = (jax.random.normal(kr, (B, L, n_freqs), jnp.float32)
            + 1j * jax.random.normal(ki, (B, L, n_freqs), jnp.float32)
            ).astype(jnp.complex64)

    fwd = jax.jit(functools.partial(encoder_forward, params))
    out = jax.block_until_ready(fwd(spec))

    # Three stride-2 downsamples: 16 -> 8 -> 4 -> 2; PyTorch returns (B, 64, 2).
    assert out.shape == (B, 2, 64), out.shape
    assert bool(jnp.all(jnp.isfinite(out)))
    print("KERNEL_OK")
</pallas_src>

<mosaic_0001>
module attributes {stable_mosaic.version = 11 : i64} {
  func.func @_in_kernel(%arg0: i32, %arg1: memref<1x16x128xf32, #tpu.memory_space<vmem>>, %arg2: memref<128x256xbf16, #tpu.memory_space<vmem>>, %arg3: memref<1x16x256xbf16, #tpu.memory_space<vmem>>) attributes {dimension_semantics = [#tpu.dimension_semantics<parallel>], iteration_bounds = array<i64: 2>, scalar_prefetch = 0 : i64, scratch_operands = 0 : i64, tpu.core_type = #tpu.core_type<tc>, window_params = [{transform_indices = @transform_0, window_bounds = array<i64: 1, 16, 128>}, {pipeline_mode = #tpu.pipeline_mode<synchronous>, transform_indices = @transform_1, window_bounds = array<i64: 128, 256>}, {transform_indices = @transform_2, window_bounds = array<i64: 1, 16, 256>}]} {
    %c0 = arith.constant 0 : index
    %c0_0 = arith.constant 0 : index
    %c0_1 = arith.constant 0 : index
    %0 = vector.load %arg1[%c0, %c0_0, %c0_1] : memref<1x16x128xf32, #tpu.memory_space<vmem>>, vector<1x16x128xf32>
    %1 = vector.shape_cast %0 : vector<1x16x128xf32> to vector<16x128xf32>
    %2 = arith.truncf %1 : vector<16x128xf32> to vector<16x128xbf16>
    %c0_2 = arith.constant 0 : index
    %c0_3 = arith.constant 0 : index
    %3 = vector.load %arg2[%c0_2, %c0_3] : memref<128x256xbf16, #tpu.memory_space<vmem>>, vector<128x256xbf16>
    %cst = arith.constant dense<0.000000e+00> : vector<16x256xf32>
    %4 = tpu.matmul %2, %3, %cst {dimension_numbers = #tpu.dot_dimension_numbers<[1], [0], [0], [1], [0, 0, 1, 1], [], []>} : vector<16x128xbf16>, vector<128x256xbf16>, vector<16x256xf32> -> vector<16x256xf32>
    %5 = arith.truncf %4 : vector<16x256xf32> to vector<16x256xbf16>
    %c0_4 = arith.constant 0 : index
    %c0_5 = arith.constant 0 : index
    %c0_6 = arith.constant 0 : index
    %6 = vector.load %arg3[%c0_4, %c0_5, %c0_6] : memref<1x16x256xbf16, #tpu.memory_space<vmem>>, vector<1x16x256xbf16>
    %7 = vector.shape_cast %6 : vector<1x16x256xbf16> to vector<16x256xbf16>
    %8 = vector.shape_cast %5 : vector<16x256xbf16> to vector<1x16x256xbf16>
    tpu.vector_store %arg3[%c0_4, %c0_5, %c0_6], %8 {strides = array<i32>} : memref<1x16x256xbf16, #tpu.memory_space<vmem>>, vector<1x16x256xbf16>,
    return
  }
  func.func @transform_0(%arg0: i32) -> (i32, i32, i32) {
    %c0_i32 = arith.constant 0 : i32
    %c0_i32_0 = arith.constant 0 : i32
    %c0_i32_1 = arith.constant 0 : i32
    return %arg0, %c0_i32, %c0_i32_0 : i32, i32, i32
  }
  func.func @transform_1(%arg0: i32) -> (i32, i32) {
    %c0_i32 = arith.constant 0 : i32
    %c0_i32_0 = arith.constant 0 : i32
    %c0_i32_1 = arith.constant 0 : i32
    return %c0_i32, %c0_i32_0 : i32, i32
  }
  func.func @transform_2(%arg0: i32) -> (i32, i32, i32) {
    %c0_i32 = arith.constant 0 : i32
    %c0_i32_0 = arith.constant 0 : i32
    %c0_i32_1 = arith.constant 0 : i32
    return %arg0, %c0_i32, %c0_i32_0 : i32, i32, i32
  }
}

module attributes {stable_mosaic.version = 11 : i64} {
  func.func @kernel(%arg0: i32, %arg1: memref<1x16x256xbf16, #tpu.memory_space<vmem>>, %arg2: memref<3x3x256x256xbf16, #tpu.memory_space<vmem>>, %arg3: memref<3x2x256xf32, #tpu.memory_space<vmem>>, %arg4: memref<1x16x256xbf16, #tpu.memory_space<vmem>>, %arg5: memref<32x256xbf16, #tpu.memory_space<vmem>>, %arg6: memref<32x256xbf16, #tpu.memory_space<vmem>>) attributes {dimension_semantics = [#tpu.dimension_semantics<parallel>], iteration_bounds = array<i64: 2>, scalar_prefetch = 0 : i64, scratch_operands = 2 : i64, tpu.core_type = #tpu.core_type<tc>, window_params = [{transform_indices = @transform_0, window_bounds = array<i64: 1, 16, 256>}, {pipeline_mode = #tpu.pipeline_mode<synchronous>, transform_indices = @transform_1, window_bounds = array<i64: 3, 3, 256, 256>}, {pipeline_mode = #tpu.pipeline_mode<synchronous>, transform_indices = @transform_2, window_bounds = array<i64: 3, 2, 256>}, {transform_indices = @transform_3, window_bounds = array<i64: 1, 16, 256>}]} {
    %cst = arith.constant 0.000000e+00 : bf16
    %0 = vector.broadcast %cst : bf16 to vector<8x256xbf16>
    %cst_0 = arith.constant 0.000000e+00 : bf16
    %1 = vector.broadcast %cst_0 : bf16 to vector<8x256xbf16>
    %c0 = arith.constant 0 : index
    %c0_1 = arith.constant 0 : index
    %2 = vector.load %arg5[%c0, %c0_1] : memref<32x256xbf16, #tpu.memory_space<vmem>>, vector<8x256xbf16>
    tpu.vector_store %arg5[%c0, %c0_1], %0 {strides = array<i32>} : memref<32x256xbf16, #tpu.memory_space<vmem>>, vector<8x256xbf16>,
    %c24 = arith.constant 24 : index
    %c0_2 = arith.constant 0 : index
    %3 = vector.load %arg5[%c24, %c0_2] : memref<32x256xbf16, #tpu.memory_space<vmem>>, vector<8x256xbf16>
    tpu.vector_store %arg5[%c24, %c0_2], %1 {strides = array<i32>} : memref<32x256xbf16, #tpu.memory_space<vmem>>, vector<8x256xbf16>,
    %c0_3 = arith.constant 0 : index
    %c0_4 = arith.constant 0 : index
    %4 = vector.load %arg6[%c0_3, %c0_4] : memref<32x256xbf16, #tpu.memory_space<vmem>>, vector<8x256xbf16>
    tpu.vector_store %arg6[%c0_3, %c0_4], %0 {strides = array<i32>} : memref<32x256xbf16, #tpu.memory_space<vmem>>, vector<8x256xbf16>,
    %c24_5 = arith.constant 24 : index
    %c0_6 = arith.constant 0 : index
    %5 = vector.load %arg6[%c24_5, %c0_6] : memref<32x256xbf16, #tpu.memory_space<vmem>>, vector<8x256xbf16>
    tpu.vector_store %arg6[%c24_5, %c0_6], %1 {strides = array<i32>} : memref<32x256xbf16, #tpu.memory_space<vmem>>, vector<8x256xbf16>,
    %c0_7 = arith.constant 0 : index
    %c0_8 = arith.constant 0 : index
    %c0_9 = arith.constant 0 : index
    %6 = vector.load %arg1[%c0_7, %c0_8, %c0_9] : memref<1x16x256xbf16, #tpu.memory_space<vmem>>, vector<1x16x256xbf16>
    %7 = vector.shape_cast %6 : vector<1x16x256xbf16> to vector<16x256xbf16>
    %c8 = arith.constant 8 : index
    %c0_10 = arith.constant 0 : index
    %8 = vector.load %arg5[%c8, %c0_10] : memref<32x256xbf16, #tpu.memory_space<vmem>>, vector<16x256xbf16>
    tpu.vector_store %arg5[%c8, %c0_10], %7 {strides = array<i32>} : memref<32x256xbf16, #tpu.memory_space<vmem>>, vector<16x256xbf16>,
    %c7 = arith.constant 7 : index
    %c0_11 = arith.constant 0 : index
    %9 = vector.load %arg5[%c7, %c0_11] : memref<32x256xbf16, #tpu.memory_space<vmem>>, vector<16x256xbf16>
    %c0_12 = arith.constant 0 : index
    %c0_13 = arith.constant 0 : index
    %c0_14 = arith.constant 0 : index
    %c0_15 = arith.constant 0 : index
    %10 = vector.load %arg2[%c0_12, %c0_13, %c0_14, %c0_15] : memref<3x3x256x256xbf16, #tpu.memory_space<vmem>>, vector<1x1x256x256xbf16>
    %11 = vector.shape_cast %10 : vector<1x1x256x256xbf16> to vector<256x256xbf16>
    %cst_16 = arith.constant dense<0.000000e+00> : vector<16x256xf32>
    %12 = tpu.matmul %9, %11, %cst_16 {dimension_numbers = #tpu.dot_dimension_numbers<[1], [0], [0], [1], [0, 0, 1, 1], [], []>} : vector<16x256xbf16>, vector<256x256xbf16>, vector<16x256xf32> -> vector<16x256xf32>
    %c8_17 = arith.constant 8 : index
    %c0_18 = arith.constant 0 : index
    %13 = vector.load %arg5[%c8_17, %c0_18] : memref<32x256xbf16, #tpu.memory_space<vmem>>, vector<16x256xbf16>
    %c0_19 = arith.constant 0 : index
    %c1 = arith.constant 1 : index
    %c0_20 = arith.constant 0 : index
    %c0_21 = arith.constant 0 : index
    %14 = vector.load %arg2[%c0_19, %c1, %c0_20, %c0_21] : memref<3x3x256x256xbf16, #tpu.memory_space<vmem>>, vector<1x1x256x256xbf16>
    %15 = vector.shape_cast %14 : vector<1x1x256x256xbf16> to vector<256x256xbf16>
    %cst_22 = arith.constant dense<0.000000e+00> : vector<16x256xf32>
    %16 = tpu.matmul %13, %15, %cst_22 {dimension_numbers = #tpu.dot_dimension_numbers<[1], [0], [0], [1], [0, 0, 1, 1], [], []>} : vector<16x256xbf16>, vector<256x256xbf16>, vector<16x256xf32> -> vector<16x256xf32>
    %17 = arith.addf %12, %16 : vector<16x256xf32>
    %c9 = arith.constant 9 : index
    %c0_23 = arith.constant 0 : index
    %18 = vector.load %arg5[%c9, %c0_23] : memref<32x256xbf16, #tpu.memory_space<vmem>>, vector<16x256xbf16>
    %c0_24 = arith.constant 0 : index
    %c2 = arith.constant 2 : index
    %c0_25 = arith.constant 0 : index
    %c0_26 = arith.constant 0 : index
    %19 = vector.load %arg2[%c0_24, %c2, %c0_25, %c0_26] : memref<3x3x256x256xbf16, #tpu.memory_space<vmem>>, vector<1x1x256x256xbf16>
    %20 = vector.shape_cast %19 : vector<1x1x256x256xbf16> to vector<256x256xbf16>
    %cst_27 = arith.constant dense<0.000000e+00> : vector<16x256xf32>
    %21 = tpu.matmul %18, %20, %cst_27 {dimension_numbers = #tpu.dot_dimension_numbers<[1], [0], [0], [1], [0, 0, 1, 1], [], []>} : vector<16x256xbf16>, vector<256x256xbf16>, vector<16x256xf32> -> vector<16x256xf32>
    %22 = arith.addf %17, %21 : vector<16x256xf32>
    %c0_28 = arith.constant 0 : index
    %c0_29 = arith.constant 0 : index
    %c0_30 = arith.constant 0 : index
    %23 = vector.load %arg3[%c0_28, %c0_29, %c0_30] : memref<3x2x256xf32, #tpu.memory_space<vmem>>, vector<1x2x256xf32>
    %24 = vector.shape_cast %23 : vector<1x2x256xf32> to vector<2x256xf32>
    %25 = vector.extract_strided_slice %24 {offsets = [0, 0], sizes = [1, 256], strides = [1, 1]} : vector<2x256xf32> to vector<1x256xf32>
    %26 = vector.broadcast %25 : vector<1x256xf32> to vector<16x256xf32>
    %27 = arith.mulf %22, %26 : vector<16x256xf32>
    %28 = vector.extract_strided_slice %24 {offsets = [1, 0], sizes = [1, 256], strides = [1, 1]} : vector<2x256xf32> to vector<1x256xf32>
    %29 = vector.broadcast %28 : vector<1x256xf32> to vector<16x256xf32>
    %30 = arith.addf %27, %29 : vector<16x256xf32>
    %cst_31 = arith.constant 0.000000e+00 : f32
    %31 = vector.broadcast %cst_31 : f32 to vector<16x256xf32>
    %32 = arith.maximumf %30, %31 : vector<16x256xf32>
    %33 = arith.truncf %32 : vector<16x256xf32> to vector<16x256xbf16>
    %c8_32 = arith.constant 8 : index
    %c0_33 = arith.constant 0 : index
    %34 = vector.load %arg6[%c8_32, %c0_33] : memref<32x256xbf16, #tpu.memory_space<vmem>>, vector<16x256xbf16>
    tpu.vector_store %arg6[%c8_32, %c0_33], %33 {strides = array<i32>} : memref<32x256xbf16, #tpu.memory_space<vmem>>, vector<16x256xbf16>,
    %c7_34 = arith.constant 7 : index
    %c0_35 = arith.constant 0 : index
    %35 = vector.load %arg6[%c7_34, %c0_35] : memref<32x256xbf16, #tpu.memory_space<vmem>>, vector<16x256xbf16>
    %c1_36 = arith.constant 1 : index
    %c0_37 = arith.constant 0 : index
    %c0_38 = arith.constant 0 : index
    %c0_39 = arith.constant 0 : index
    %36 = vector.load %arg2[%c1_36, %c0_37, %c0_38, %c0_39] : memref<3x3x256x256xbf16, #tpu.memory_space<vmem>>, vector<1x1x256x256xbf16>
    %37 = vector.shape_cast %36 : vector<1x1x256x256xbf16> to vector<256x256xbf16>
    %cst_40 = arith.constant dense<0.000000e+00> : vector<16x256xf32>
    %38 = tpu.matmul %35, %37, %cst_40 {dimension_numbers = #tpu.dot_dimension_numbers<[1], [0], [0], [1], [0, 0, 1, 1], [], []>} : vector<16x256xbf16>, vector<256x256xbf16>, vector<16x256xf32> -> vector<16x256xf32>
    %c8_41 = arith.constant 8 : index
    %c0_42 = arith.constant 0 : index
    %39 = vector.load %arg6[%c8_41, %c0_42] : memref<32x256xbf16, #tpu.memory_space<vmem>>, vector<16x256xbf16>
    %c1_43 = arith.constant 1 : index
    %c1_44 = arith.constant 1 : index
    %c0_45 = arith.constant 0 : index
    %c0_46 = arith.constant 0 : index
    %40 = vector.load %arg2[%c1_43, %c1_44, %c0_45, %c0_46] : memref<3x3x256x256xbf16, #tpu.memory_space<vmem>>, vector<1x1x256x256xbf16>
    %41 = vector.shape_cast %40 : vector<1x1x256x256xbf16> to vector<256x256xbf16>
    %cst_47 = arith.constant dense<0.000000e+00> : vector<16x256xf32>
    %42 = tpu.matmul %39, %41, %cst_47 {dimension_numbers = #tpu.dot_dimension_numbers<[1], [0], [0], [1], [0, 0, 1, 1], [], []>} : vector<16x256xbf16>, vector<256x256xbf16>, vector<16x256xf32> -> vector<16x256xf32>
    %43 = arith.addf %38, %42 : vector<16x256xf32>
    %c9_48 = arith.constant 9 : index
    %c0_49 = arith.constant 0 : index
    %44 = vector.load %arg6[%c9_48, %c0_49] : memref<32x256xbf16, #tpu.memory_space<vmem>>, vector<16x256xbf16>
    %c1_50 = arith.constant 1 : index
    %c2_51 = arith.constant 2 : index
    %c0_52 = arith.constant 0 : index
    %c0_53 = arith.constant 0 : index
    %45 = vector.load %arg2[%c1_50, %c2_51, %c0_52, %c0_53] : memref<3x3x256x256xbf16, #tpu.memory_space<vmem>>, vector<1x1x256x256xbf16>
    %46 = vector.shape_cast %45 : vector<1x1x256x256xbf16> to vector<256x256xbf16>
    %cst_54 = arith.constant dense<0.000000e+00> : vector<16x256xf32>
    %47 = tpu.matmul %44, %46, %cst_54 {dimension_numbers = #tpu.dot_dimension_numbers<[1], [0], [0], [1], [0, 0, 1, 1], [], []>} : vector<16x256xbf16>, vector<256x256xbf16>, vector<16x256xf32> -> vector<16x256xf32>
    %48 = arith.addf %43, %47 : vector<16x256xf32>
    %c1_55 = arith.constant 1 : index
    %c0_56 = arith.constant 0 : index
    %c0_57 = arith.constant 0 : index
    %49 = vector.load %arg3[%c1_55, %c0_56, %c0_57] : memref<3x2x256xf32, #tpu.memory_space<vmem>>, vector<1x2x256xf32>
    %50 = vector.shape_cast %49 : vector<1x2x256xf32> to vector<2x256xf32>
    %51 = vector.extract_strided_slice %50 {offsets = [0, 0], sizes = [1, 256], strides = [1, 1]} : vector<2x256xf32> to vector<1x256xf32>
    %52 = vector.broadcast %51 : vector<1x256xf32> to vector<16x256xf32>
    %53 = arith.mulf %48, %52 : vector<16x256xf32>
    %54 = vector.extract_strided_slice %50 {offsets = [1, 0], sizes = [1, 256], strides = [1, 1]} : vector<2x256xf32> to vector<1x256xf32>
    %55 = vector.broadcast %54 : vector<1x256xf32> to vector<16x256xf32>
    %56 = arith.addf %53, %55 : vector<16x256xf32>
    %cst_58 = arith.constant 0.000000e+00 : f32
    %57 = vector.broadcast %cst_58 : f32 to vector<16x256xf32>
    %58 = arith.maximumf %56, %57 : vector<16x256xf32>
    %59 = arith.truncf %58 : vector<16x256xf32> to vector<16x256xbf16>
    %c8_59 = arith.constant 8 : index
    %c0_60 = arith.constant 0 : index
    %60 = vector.load %arg5[%c8_59, %c0_60] : memref<32x256xbf16, #tpu.memory_space<vmem>>, vector<16x256xbf16>
    tpu.vector_store %arg5[%c8_59, %c0_60], %59 {strides = array<i32>} : memref<32x256xbf16, #tpu.memory_space<vmem>>, vector<16x256xbf16>,
    %c7_61 = arith.constant 7 : index
    %c0_62 = arith.constant 0 : index
    %61 = vector.load %arg5[%c7_61, %c0_62] : memref<32x256xbf16, #tpu.memory_space<vmem>>, vector<16x256xbf16>
    %c2_63 = arith.constant 2 : index
    %c0_64 = arith.constant 0 : index
    %c0_65 = arith.constant 0 : index
    %c0_66 = arith.constant 0 : index
    %62 = vector.load %arg2[%c2_63, %c0_64, %c0_65, %c0_66] : memref<3x3x256x256xbf16, #tpu.memory_space<vmem>>, vector<1x1x256x256xbf16>
    %63 = vector.shape_cast %62 : vector<1x1x256x256xbf16> to vector<256x256xbf16>
    %cst_67 = arith.constant dense<0.000000e+00> : vector<16x256xf32>
    %64 = tpu.matmul %61, %63, %cst_67 {dimension_numbers = #tpu.dot_dimension_numbers<[1], [0], [0], [1], [0, 0, 1, 1], [], []>} : vector<16x256xbf16>, vector<256x256xbf16>, vector<16x256xf32> -> vector<16x256xf32>
    %c8_68 = arith.constant 8 : index
    %c0_69 = arith.constant 0 : index
    %65 = vector.load %arg5[%c8_68, %c0_69] : memref<32x256xbf16, #tpu.memory_space<vmem>>, vector<16x256xbf16>
    %c2_70 = arith.constant 2 : index
    %c1_71 = arith.constant 1 : index
    %c0_72 = arith.constant 0 : index
    %c0_73 = arith.constant 0 : index
    %66 = vector.load %arg2[%c2_70, %c1_71, %c0_72, %c0_73] : memref<3x3x256x256xbf16, #tpu.memory_space<vmem>>, vector<1x1x256x256xbf16>
    %67 = vector.shape_cast %66 : vector<1x1x256x256xbf16> to vector<256x256xbf16>
    %cst_74 = arith.constant dense<0.000000e+00> : vector<16x256xf32>
    %68 = tpu.matmul %65, %67, %cst_74 {dimension_numbers = #tpu.dot_dimension_numbers<[1], [0], [0], [1], [0, 0, 1, 1], [], []>} : vector<16x256xbf16>, vector<256x256xbf16>, vector<16x256xf32> -> vector<16x256xf32>
    %69 = arith.addf %64, %68 : vector<16x256xf32>
    %c9_75 = arith.constant 9 : index
    %c0_76 = arith.constant 0 : index
    %70 = vector.load %arg5[%c9_75, %c0_76] : memref<32x256xbf16, #tpu.memory_space<vmem>>, vector<16x256xbf16>
    %c2_77 = arith.constant 2 : index
    %c2_78 = arith.constant 2 : index
    %c0_79 = arith.constant 0 : index
    %c0_80 = arith.constant 0 : index
    %71 = vector.load %arg2[%c2_77, %c2_78, %c0_79, %c0_80] : memref<3x3x256x256xbf16, #tpu.memory_space<vmem>>, vector<1x1x256x256xbf16>
    %72 = vector.shape_cast %71 : vector<1x1x256x256xbf16> to vector<256x256xbf16>
    %cst_81 = arith.constant dense<0.000000e+00> : vector<16x256xf32>
    %73 = tpu.matmul %70, %72, %cst_81 {dimension_numbers = #tpu.dot_dimension_numbers<[1], [0], [0], [1], [0, 0, 1, 1], [], []>} : vector<16x256xbf16>, vector<256x256xbf16>, vector<16x256xf32> -> vector<16x256xf32>
    %74 = arith.addf %69, %73 : vector<16x256xf32>
    %c2_82 = arith.constant 2 : index
    %c0_83 = arith.constant 0 : index
    %c0_84 = arith.constant 0 : index
    %75 = vector.load %arg3[%c2_82, %c0_83, %c0_84] : memref<3x2x256xf32, #tpu.memory_space<vmem>>, vector<1x2x256xf32>
    %76 = vector.shape_cast %75 : vector<1x2x256xf32> to vector<2x256xf32>
    %77 = vector.extract_strided_slice %76 {offsets = [0, 0], sizes = [1, 256], strides = [1, 1]} : vector<2x256xf32> to vector<1x256xf32>
    %78 = vector.broadcast %77 : vector<1x256xf32> to vector<16x256xf32>
    %79 = arith.mulf %74, %78 : vector<16x256xf32>
    %80 = vector.extract_strided_slice %76 {offsets = [1, 0], sizes = [1, 256], strides = [1, 1]} : vector<2x256xf32> to vector<1x256xf32>
    %81 = vector.broadcast %80 : vector<1x256xf32> to vector<16x256xf32>
    %82 = arith.addf %79, %81 : vector<16x256xf32>
    %c0_85 = arith.constant 0 : index
    %c0_86 = arith.constant 0 : index
    %c0_87 = arith.constant 0 : index
    %83 = vector.load %arg1[%c0_85, %c0_86, %c0_87] : memref<1x16x256xbf16, #tpu.memory_space<vmem>>, vector<1x16x256xbf16>
    %84 = vector.shape_cast %83 : vector<1x16x256xbf16> to vector<16x256xbf16>
    %85 = arith.extf %84 : vector<16x256xbf16> to vector<16x256xf32>
    %86 = arith.addf %82, %85 : vector<16x256xf32>
    %87 = arith.truncf %86 : vector<16x256xf32> to vector<16x256xbf16>
    %c0_88 = arith.constant 0 : index
    %c0_89 = arith.constant 0 : index
    %c0_90 = arith.constant 0 : index
    %88 = vector.load %arg4[%c0_88, %c0_89, %c0_90] : memref<1x16x256xbf16, #tpu.memory_space<vmem>>, vector<1x16x256xbf16>
    %89 = vector.shape_cast %88 : vector<1x16x256xbf16> to vector<16x256xbf16>
    %90 = vector.shape_cast %87 : vector<16x256xbf16> to vector<1x16x256xbf16>
    tpu.vector_store %arg4[%c0_88, %c0_89, %c0_90], %90 {strides = array<i32>} : memref<1x16x256xbf16, #tpu.memory_space<vmem>>, vector<1x16x256xbf16>,
    return
  }
  func.func @transform_0(%arg0: i32) -> (i32, i32, i32) {
    %c0_i32 = arith.constant 0 : i32
    %c0_i32_0 = arith.constant 0 : i32
    %c0_i32_1 = arith.constant 0 : i32
    return %arg0, %c0_i32, %c0_i32_0 : i32, i32, i32
  }
  func.func @transform_1(%arg0: i32) -> (i32, i32, i32, i32) {
    %c0_i32 = arith.constant 0 : i32
    %c0_i32_0 = arith.constant 0 : i32
    %c0_i32_1 = arith.constant 0 : i32
    %c0_i32_2 = arith.constant 0 : i32
    %c0_i32_3 = arith.constant 0 : i32
    return %c0_i32, %c0_i32_0, %c0_i32_1, %c0_i32_2 : i32, i32, i32, i32
  }
  func.func @transform_2(%arg0: i32) -> (i32, i32, i32) {
    %c0_i32 = arith.constant 0 : i32
    %c0_i32_0 = arith.constant 0 : i32
    %c0_i32_1 = arith.constant 0 : i32
    %c0_i32_2 = arith.constant 0 : i32
    return %c0_i32, %c0_i32_0, %c0_i32_1 : i32, i32, i32
  }
  func.func @transform_3(%arg0: i32) -> (i32, i32, i32) {
    %c0_i32 = arith.constant 0 : i32
    %c0_i32_0 = arith.constant 0 : i32
    %c0_i32_1 = arith.constant 0 : i32
    return %arg0, %c0_i32, %c0_i32_0 : i32, i32, i32
  }
}

module attributes {stable_mosaic.version = 11 : i64} {
  func.func @kernel(%arg0: i32, %arg1: memref<1x8x512xbf16, #tpu.memory_space<vmem>>, %arg2: memref<2x512x256xbf16, #tpu.memory_space<vmem>>, %arg3: memref<2x256xf32, #tpu.memory_space<vmem>>, %arg4: memref<1x8x256xbf16, #tpu.memory_space<vmem>>, %arg5: memref<16x512xbf16, #tpu.memory_space<vmem>>) attributes {dimension_semantics = [#tpu.dimension_semantics<parallel>], iteration_bounds = array<i64: 2>, scalar_prefetch = 0 : i64, scratch_operands = 1 : i64, tpu.core_type = #tpu.core_type<tc>, window_params = [{transform_indices = @transform_0, window_bounds = array<i64: 1, 8, 512>}, {pipeline_mode = #tpu.pipeline_mode<synchronous>, transform_indices = @transform_1, window_bounds = array<i64: 2, 512, 256>}, {pipeline_mode = #tpu.pipeline_mode<synchronous>, transform_indices = @transform_2, window_bounds = array<i64: 2, 256>}, {transform_indices = @transform_3, window_bounds = array<i64: 1, 8, 256>}]} {
    %cst = arith.constant 0.000000e+00 : bf16
    %0 = vector.broadcast %cst : bf16 to vector<8x512xbf16>
    %c0 = arith.constant 0 : index
    %c0_0 = arith.constant 0 : index
    %1 = vector.load %arg5[%c0, %c0_0] : memref<16x512xbf16, #tpu.memory_space<vmem>>, vector<8x512xbf16>
    tpu.vector_store %arg5[%c0, %c0_0], %0 {strides = array<i32>} : memref<16x512xbf16, #tpu.memory_space<vmem>>, vector<8x512xbf16>,
    %c0_1 = arith.constant 0 : index
    %c0_2 = arith.constant 0 : index
    %c0_3 = arith.constant 0 : index
    %2 = vector.load %arg1[%c0_1, %c0_2, %c0_3] : memref<1x8x512xbf16, #tpu.memory_space<vmem>>, vector<1x8x512xbf16>
    %3 = vector.shape_cast %2 : vector<1x8x512xbf16> to vector<8x512xbf16>
    %c8 = arith.constant 8 : index
    %c0_4 = arith.constant 0 : index
    %4 = vector.load %arg5[%c8, %c0_4] : memref<16x512xbf16, #tpu.memory_space<vmem>>, vector<8x512xbf16>
    tpu.vector_store %arg5[%c8, %c0_4], %3 {strides = array<i32>} : memref<16x512xbf16, #tpu.memory_space<vmem>>, vector<8x512xbf16>,
    %c7 = arith.constant 7 : index
    %c0_5 = arith.constant 0 : index
    %5 = vector.load %arg5[%c7, %c0_5] : memref<16x512xbf16, #tpu.memory_space<vmem>>, vector<8x512xbf16>
    %c0_6 = arith.constant 0 : index
    %c0_7 = arith.constant 0 : index
    %c0_8 = arith.constant 0 : index
    %6 = vector.load %arg2[%c0_6, %c0_7, %c0_8] : memref<2x512x256xbf16, #tpu.memory_space<vmem>>, vector<1x512x256xbf16>
    %7 = vector.shape_cast %6 : vector<1x512x256xbf16> to vector<512x256xbf16>
    %cst_9 = arith.constant dense<0.000000e+00> : vector<8x256xf32>
    %8 = tpu.matmul %5, %7, %cst_9 {dimension_numbers = #tpu.dot_dimension_numbers<[1], [0], [0], [1], [0, 0, 1, 1], [], []>} : vector<8x512xbf16>, vector<512x256xbf16>, vector<8x256xf32> -> vector<8x256xf32>
    %c8_10 = arith.constant 8 : index
    %c0_11 = arith.constant 0 : index
    %9 = vector.load %arg5[%c8_10, %c0_11] : memref<16x512xbf16, #tpu.memory_space<vmem>>, vector<8x512xbf16>
    %c1 = arith.constant 1 : index
    %c0_12 = arith.constant 0 : index
    %c0_13 = arith.constant 0 : index
    %10 = vector.load %arg2[%c1, %c0_12, %c0_13] : memref<2x512x256xbf16, #tpu.memory_space<vmem>>, vector<1x512x256xbf16>
    %11 = vector.shape_cast %10 : vector<1x512x256xbf16> to vector<512x256xbf16>
    %cst_14 = arith.constant dense<0.000000e+00> : vector<8x256xf32>
    %12 = tpu.matmul %9, %11, %cst_14 {dimension_numbers = #tpu.dot_dimension_numbers<[1], [0], [0], [1], [0, 0, 1, 1], [], []>} : vector<8x512xbf16>, vector<512x256xbf16>, vector<8x256xf32> -> vector<8x256xf32>
    %13 = arith.addf %8, %12 : vector<8x256xf32>
    %c0_15 = arith.constant 0 : index
    %c0_16 = arith.constant 0 : index
    %14 = vector.load %arg3[%c0_15, %c0_16] : memref<2x256xf32, #tpu.memory_space<vmem>>, vector<2x256xf32>
    %15 = vector.extract_strided_slice %14 {offsets = [0, 0], sizes = [1, 256], strides = [1, 1]} : vector<2x256xf32> to vector<1x256xf32>
    %16 = vector.broadcast %15 : vector<1x256xf32> to vector<8x256xf32>
    %17 = arith.mulf %13, %16 : vector<8x256xf32>
    %18 = vector.extract_strided_slice %14 {offsets = [1, 0], sizes = [1, 256], strides = [1, 1]} : vector<2x256xf32> to vector<1x256xf32>
    %19 = vector.broadcast %18 : vector<1x256xf32> to vector<8x256xf32>
    %20 = arith.addf %17, %19 : vector<8x256xf32>
    %21 = arith.truncf %20 : vector<8x256xf32> to vector<8x256xbf16>
    %c0_17 = arith.constant 0 : index
    %c0_18 = arith.constant 0 : index
    %c0_19 = arith.constant 0 : index
    %22 = vector.load %arg4[%c0_17, %c0_18, %c0_19] : memref<1x8x256xbf16, #tpu.memory_space<vmem>>, vector<1x8x256xbf16>
    %23 = vector.shape_cast %22 : vector<1x8x256xbf16> to vector<8x256xbf16>
    %24 = vector.shape_cast %21 : vector<8x256xbf16> to vector<1x8x256xbf16>
    tpu.vector_store %arg4[%c0_17, %c0_18, %c0_19], %24 {strides = array<i32>} : memref<1x8x256xbf16, #tpu.memory_space<vmem>>, vector<1x8x256xbf16>,
    return
  }
  func.func @transform_0(%arg0: i32) -> (i32, i32, i32) {
    %c0_i32 = arith.constant 0 : i32
    %c0_i32_0 = arith.constant 0 : i32
    %c0_i32_1 = arith.constant 0 : i32
    return %arg0, %c0_i32, %c0_i32_0 : i32, i32, i32
  }
  func.func @transform_1(%arg0: i32) -> (i32, i32, i32) {
    %c0_i32 = arith.constant 0 : i32
    %c0_i32_0 = arith.constant 0 : i32
    %c0_i32_1 = arith.constant 0 : i32
    %c0_i32_2 = arith.constant 0 : i32
    return %c0_i32, %c0_i32_0, %c0_i32_1 : i32, i32, i32
  }
  func.func @transform_2(%arg0: i32) -> (i32, i32) {
    %c0_i32 = arith.constant 0 : i32
    %c0_i32_0 = arith.constant 0 : i32
    %c0_i32_1 = arith.constant 0 : i32
    return %c0_i32, %c0_i32_0 : i32, i32
  }
  func.func @transform_3(%arg0: i32) -> (i32, i32, i32) {
    %c0_i32 = arith.constant 0 : i32
    %c0_i32_0 = arith.constant 0 : i32
    %c0_i32_1 = arith.constant 0 : i32
    return %arg0, %c0_i32, %c0_i32_0 : i32, i32, i32
  }
}

module attributes {stable_mosaic.version = 11 : i64} {
  func.func @kernel(%arg0: i32, %arg1: memref<1x8x256xbf16, #tpu.memory_space<vmem>>, %arg2: memref<3x3x256x256xbf16, #tpu.memory_space<vmem>>, %arg3: memref<3x2x256xf32, #tpu.memory_space<vmem>>, %arg4: memref<1x8x256xbf16, #tpu.memory_space<vmem>>, %arg5: memref<24x256xbf16, #tpu.memory_space<vmem>>, %arg6: memref<24x256xbf16, #tpu.memory_space<vmem>>) attributes {dimension_semantics = [#tpu.dimension_semantics<parallel>], iteration_bounds = array<i64: 2>, scalar_prefetch = 0 : i64, scratch_operands = 2 : i64, tpu.core_type = #tpu.core_type<tc>, window_params = [{transform_indices = @transform_0, window_bounds = array<i64: 1, 8, 256>}, {pipeline_mode = #tpu.pipeline_mode<synchronous>, transform_indices = @transform_1, window_bounds = array<i64: 3, 3, 256, 256>}, {pipeline_mode = #tpu.pipeline_mode<synchronous>, transform_indices = @transform_2, window_bounds = array<i64: 3, 2, 256>}, {transform_indices = @transform_3, window_bounds = array<i64: 1, 8, 256>}]} {
    %cst = arith.constant 0.000000e+00 : bf16
    %0 = vector.broadcast %cst : bf16 to vector<8x256xbf16>
    %cst_0 = arith.constant 0.000000e+00 : bf16
    %1 = vector.broadcast %cst_0 : bf16 to vector<8x256xbf16>
    %c0 = arith.constant 0 : index
    %c0_1 = arith.constant 0 : index
    %2 = vector.load %arg5[%c0, %c0_1] : memref<24x256xbf16, #tpu.memory_space<vmem>>, vector<8x256xbf16>
    tpu.vector_store %arg5[%c0, %c0_1], %0 {strides = array<i32>} : memref<24x256xbf16, #tpu.memory_space<vmem>>, vector<8x256xbf16>,
    %c16 = arith.constant 16 : index
    %c0_2 = arith.constant 0 : index
    %3 = vector.load %arg5[%c16, %c0_2] : memref<24x256xbf16, #tpu.memory_space<vmem>>, vector<8x256xbf16>
    tpu.vector_store %arg5[%c16, %c0_2], %1 {strides = array<i32>} : memref<24x256xbf16, #tpu.memory_space<vmem>>, vector<8x256xbf16>,
    %c0_3 = arith.constant 0 : index
    %c0_4 = arith.constant 0 : index
    %4 = vector.load %arg6[%c0_3, %c0_4] : memref<24x256xbf16, #tpu.memory_space<vmem>>, vector<8x256xbf16>
    tpu.vector_store %arg6[%c0_3, %c0_4], %0 {strides = array<i32>} : memref<24x256xbf16, #tpu.memory_space<vmem>>, vector<8x256xbf16>,
    %c16_5 = arith.constant 16 : index
    %c0_6 = arith.constant 0 : index
    %5 = vector.load %arg6[%c16_5, %c0_6] : memref<24x256xbf16, #tpu.memory_space<vmem>>, vector<8x256xbf16>
    tpu.vector_store %arg6[%c16_5, %c0_6], %1 {strides = array<i32>} : memref<24x256xbf16, #tpu.memory_space<vmem>>, vector<8x256xbf16>,
    %c0_7 = arith.constant 0 : index
    %c0_8 = arith.constant 0 : index
    %c0_9 = arith.constant 0 : index
    %6 = vector.load %arg1[%c0_7, %c0_8, %c0_9] : memref<1x8x256xbf16, #tpu.memory_space<vmem>>, vector<1x8x256xbf16>
    %7 = vector.shape_cast %6 : vector<1x8x256xbf16> to vector<8x256xbf16>
    %c8 = arith.constant 8 : index
    %c0_10 = arith.constant 0 : index
    %8 = vector.load %arg5[%c8, %c0_10] : memref<24x256xbf16, #tpu.memory_space<vmem>>, vector<8x256xbf16>
    tpu.vector_store %arg5[%c8, %c0_10], %7 {strides = array<i32>} : memref<24x256xbf16, #tpu.memory_space<vmem>>, vector<8x256xbf16>,
    %c7 = arith.constant 7 : index
    %c0_11 = arith.constant 0 : index
    %9 = vector.load %arg5[%c7, %c0_11] : memref<24x256xbf16, #tpu.memory_space<vmem>>, vector<8x256xbf16>
    %c0_12 = arith.constant 0 : index
    %c0_13 = arith.constant 0 : index
    %c0_14 = arith.constant 0 : index
    %c0_15 = arith.constant 0 : index
    %10 = vector.load %arg2[%c0_12, %c0_13, %c0_14, %c0_15] : memref<3x3x256x256xbf16, #tpu.memory_space<vmem>>, vector<1x1x256x256xbf16>
    %11 = vector.shape_cast %10 : vector<1x1x256x256xbf16> to vector<256x256xbf16>
    %cst_16 = arith.constant dense<0.000000e+00> : vector<8x256xf32>
    %12 = tpu.matmul %9, %11, %cst_16 {dimension_numbers = #tpu.dot_dimension_numbers<[1], [0], [0], [1], [0, 0, 1, 1], [], []>} : vector<8x256xbf16>, vector<256x256xbf16>, vector<8x256xf32> -> vector<8x256xf32>
    %c8_17 = arith.constant 8 : index
    %c0_18 = arith.constant 0 : index
    %13 = vector.load %arg5[%c8_17, %c0_18] : memref<24x256xbf16, #tpu.memory_space<vmem>>, vector<8x256xbf16>
    %c0_19 = arith.constant 0 : index
    %c1 = arith.constant 1 : index
    %c0_20 = arith.constant 0 : index
    %c0_21 = arith.constant 0 : index
    %14 = vector.load %arg2[%c0_19, %c1, %c0_20, %c0_21] : memref<3x3x256x256xbf16, #tpu.memory_space<vmem>>, vector<1x1x256x256xbf16>
    %15 = vector.shape_cast %14 : vector<1x1x256x256xbf16> to vector<256x256xbf16>
    %cst_22 = arith.constant dense<0.000000e+00> : vector<8x256xf32>
    %16 = tpu.matmul %13, %15, %cst_22 {dimension_numbers = #tpu.dot_dimension_numbers<[1], [0], [0], [1], [0, 0, 1, 1], [], []>} : vector<8x256xbf16>, vector<256x256xbf16>, vector<8x256xf32> -> vector<8x256xf32>
    %17 = arith.addf %12, %16 : vector<8x256xf32>
    %c9 = arith.constant 9 : index
    %c0_23 = arith.constant 0 : index
    %18 = vector.load %arg5[%c9, %c0_23] : memref<24x256xbf16, #tpu.memory_space<vmem>>, vector<8x256xbf16>
    %c0_24 = arith.constant 0 : index
    %c2 = arith.constant 2 : index
    %c0_25 = arith.constant 0 : index
    %c0_26 = arith.constant 0 : index
    %19 = vector.load %arg2[%c0_24, %c2, %c0_25, %c0_26] : memref<3x3x256x256xbf16, #tpu.memory_space<vmem>>, vector<1x1x256x256xbf16>
    %20 = vector.shape_cast %19 : vector<1x1x256x256xbf16> to vector<256x256xbf16>
    %cst_27 = arith.constant dense<0.000000e+00> : vector<8x256xf32>
    %21 = tpu.matmul %18, %20, %cst_27 {dimension_numbers = #tpu.dot_dimension_numbers<[1], [0], [0], [1], [0, 0, 1, 1], [], []>} : vector<8x256xbf16>, vector<256x256xbf16>, vector<8x256xf32> -> vector<8x256xf32>
    %22 = arith.addf %17, %21 : vector<8x256xf32>
    %c0_28 = arith.constant 0 : index
    %c0_29 = arith.constant 0 : index
    %c0_30 = arith.constant 0 : index
    %23 = vector.load %arg3[%c0_28, %c0_29, %c0_30] : memref<3x2x256xf32, #tpu.memory_space<vmem>>, vector<1x2x256xf32>
    %24 = vector.shape_cast %23 : vector<1x2x256xf32> to vector<2x256xf32>
    %25 = vector.extract_strided_slice %24 {offsets = [0, 0], sizes = [1, 256], strides = [1, 1]} : vector<2x256xf32> to vector<1x256xf32>
    %26 = vector.broadcast %25 : vector<1x256xf32> to vector<8x256xf32>
    %27 = arith.mulf %22, %26 : vector<8x256xf32>
    %28 = vector.extract_strided_slice %24 {offsets = [1, 0], sizes = [1, 256], strides = [1, 1]} : vector<2x256xf32> to vector<1x256xf32>
    %29 = vector.broadcast %28 : vector<1x256xf32> to vector<8x256xf32>
    %30 = arith.addf %27, %29 : vector<8x256xf32>
    %cst_31 = arith.constant 0.000000e+00 : f32
    %31 = vector.broadcast %cst_31 : f32 to vector<8x256xf32>
    %32 = arith.maximumf %30, %31 : vector<8x256xf32>
    %33 = arith.truncf %32 : vector<8x256xf32> to vector<8x256xbf16>
    %c8_32 = arith.constant 8 : index
    %c0_33 = arith.constant 0 : index
    %34 = vector.load %arg6[%c8_32, %c0_33] : memref<24x256xbf16, #tpu.memory_space<vmem>>, vector<8x256xbf16>
    tpu.vector_store %arg6[%c8_32, %c0_33], %33 {strides = array<i32>} : memref<24x256xbf16, #tpu.memory_space<vmem>>, vector<8x256xbf16>,
    %c7_34 = arith.constant 7 : index
    %c0_35 = arith.constant 0 : index
    %35 = vector.load %arg6[%c7_34, %c0_35] : memref<24x256xbf16, #tpu.memory_space<vmem>>, vector<8x256xbf16>
    %c1_36 = arith.constant 1 : index
    %c0_37 = arith.constant 0 : index
    %c0_38 = arith.constant 0 : index
    %c0_39 = arith.constant 0 : index
    %36 = vector.load %arg2[%c1_36, %c0_37, %c0_38, %c0_39] : memref<3x3x256x256xbf16, #tpu.memory_space<vmem>>, vector<1x1x256x256xbf16>
    %37 = vector.shape_cast %36 : vector<1x1x256x256xbf16> to vector<256x256xbf16>
    %cst_40 = arith.constant dense<0.000000e+00> : vector<8x256xf32>
    %38 = tpu.matmul %35, %37, %cst_40 {dimension_numbers = #tpu.dot_dimension_numbers<[1], [0], [0], [1], [0, 0, 1, 1], [], []>} : vector<8x256xbf16>, vector<256x256xbf16>, vector<8x256xf32> -> vector<8x256xf32>
    %c8_41 = arith.constant 8 : index
    %c0_42 = arith.constant 0 : index
    %39 = vector.load %arg6[%c8_41, %c0_42] : memref<24x256xbf16, #tpu.memory_space<vmem>>, vector<8x256xbf16>
    %c1_43 = arith.constant 1 : index
    %c1_44 = arith.constant 1 : index
    %c0_45 = arith.constant 0 : index
    %c0_46 = arith.constant 0 : index
    %40 = vector.load %arg2[%c1_43, %c1_44, %c0_45, %c0_46] : memref<3x3x256x256xbf16, #tpu.memory_space<vmem>>, vector<1x1x256x256xbf16>
    %41 = vector.shape_cast %40 : vector<1x1x256x256xbf16> to vector<256x256xbf16>
    %cst_47 = arith.constant dense<0.000000e+00> : vector<8x256xf32>
    %42 = tpu.matmul %39, %41, %cst_47 {dimension_numbers = #tpu.dot_dimension_numbers<[1], [0], [0], [1], [0, 0, 1, 1], [], []>} : vector<8x256xbf16>, vector<256x256xbf16>, vector<8x256xf32> -> vector<8x256xf32>
    %43 = arith.addf %38, %42 : vector<8x256xf32>
    %c9_48 = arith.constant 9 : index
    %c0_49 = arith.constant 0 : index
    %44 = vector.load %arg6[%c9_48, %c0_49] : memref<24x256xbf16, #tpu.memory_space<vmem>>, vector<8x256xbf16>
    %c1_50 = arith.constant 1 : index
    %c2_51 = arith.constant 2 : index
    %c0_52 = arith.constant 0 : index
    %c0_53 = arith.constant 0 : index
    %45 = vector.load %arg2[%c1_50, %c2_51, %c0_52, %c0_53] : memref<3x3x256x256xbf16, #tpu.memory_space<vmem>>, vector<1x1x256x256xbf16>
    %46 = vector.shape_cast %45 : vector<1x1x256x256xbf16> to vector<256x256xbf16>
    %cst_54 = arith.constant dense<0.000000e+00> : vector<8x256xf32>
    %47 = tpu.matmul %44, %46, %cst_54 {dimension_numbers = #tpu.dot_dimension_numbers<[1], [0], [0], [1], [0, 0, 1, 1], [], []>} : vector<8x256xbf16>, vector<256x256xbf16>, vector<8x256xf32> -> vector<8x256xf32>
    %48 = arith.addf %43, %47 : vector<8x256xf32>
    %c1_55 = arith.constant 1 : index
    %c0_56 = arith.constant 0 : index
    %c0_57 = arith.constant 0 : index
    %49 = vector.load %arg3[%c1_55, %c0_56, %c0_57] : memref<3x2x256xf32, #tpu.memory_space<vmem>>, vector<1x2x256xf32>
    %50 = vector.shape_cast %49 : vector<1x2x256xf32> to vector<2x256xf32>
    %51 = vector.extract_strided_slice %50 {offsets = [0, 0], sizes = [1, 256], strides = [1, 1]} : vector<2x256xf32> to vector<1x256xf32>
    %52 = vector.broadcast %51 : vector<1x256xf32> to vector<8x256xf32>
    %53 = arith.mulf %48, %52 : vector<8x256xf32>
    %54 = vector.extract_strided_slice %50 {offsets = [1, 0], sizes = [1, 256], strides = [1, 1]} : vector<2x256xf32> to vector<1x256xf32>
    %55 = vector.broadcast %54 : vector<1x256xf32> to vector<8x256xf32>
    %56 = arith.addf %53, %55 : vector<8x256xf32>
    %cst_58 = arith.constant 0.000000e+00 : f32
    %57 = vector.broadcast %cst_58 : f32 to vector<8x256xf32>
    %58 = arith.maximumf %56, %57 : vector<8x256xf32>
    %59 = arith.truncf %58 : vector<8x256xf32> to vector<8x256xbf16>
    %c8_59 = arith.constant 8 : index
    %c0_60 = arith.constant 0 : index
    %60 = vector.load %arg5[%c8_59, %c0_60] : memref<24x256xbf16, #tpu.memory_space<vmem>>, vector<8x256xbf16>
    tpu.vector_store %arg5[%c8_59, %c0_60], %59 {strides = array<i32>} : memref<24x256xbf16, #tpu.memory_space<vmem>>, vector<8x256xbf16>,
    %c7_61 = arith.constant 7 : index
    %c0_62 = arith.constant 0 : index
    %61 = vector.load %arg5[%c7_61, %c0_62] : memref<24x256xbf16, #tpu.memory_space<vmem>>, vector<8x256xbf16>
    %c2_63 = arith.constant 2 : index
    %c0_64 = arith.constant 0 : index
    %c0_65 = arith.constant 0 : index
    %c0_66 = arith.constant 0 : index
    %62 = vector.load %arg2[%c2_63, %c0_64, %c0_65, %c0_66] : memref<3x3x256x256xbf16, #tpu.memory_space<vmem>>, vector<1x1x256x256xbf16>
    %63 = vector.shape_cast %62 : vector<1x1x256x256xbf16> to vector<256x256xbf16>
    %cst_67 = arith.constant dense<0.000000e+00> : vector<8x256xf32>
    %64 = tpu.matmul %61, %63, %cst_67 {dimension_numbers = #tpu.dot_dimension_numbers<[1], [0], [0], [1], [0, 0, 1, 1], [], []>} : vector<8x256xbf16>, vector<256x256xbf16>, vector<8x256xf32> -> vector<8x256xf32>
    %c8_68 = arith.constant 8 : index
    %c0_69 = arith.constant 0 : index
    %65 = vector.load %arg5[%c8_68, %c0_69] : memref<24x256xbf16, #tpu.memory_space<vmem>>, vector<8x256xbf16>
    %c2_70 = arith.constant 2 : index
    %c1_71 = arith.constant 1 : index
    %c0_72 = arith.constant 0 : index
    %c0_73 = arith.constant 0 : index
    %66 = vector.load %arg2[%c2_70, %c1_71, %c0_72, %c0_73] : memref<3x3x256x256xbf16, #tpu.memory_space<vmem>>, vector<1x1x256x256xbf16>
    %67 = vector.shape_cast %66 : vector<1x1x256x256xbf16> to vector<256x256xbf16>
    %cst_74 = arith.constant dense<0.000000e+00> : vector<8x256xf32>
    %68 = tpu.matmul %65, %67, %cst_74 {dimension_numbers = #tpu.dot_dimension_numbers<[1], [0], [0], [1], [0, 0, 1, 1], [], []>} : vector<8x256xbf16>, vector<256x256xbf16>, vector<8x256xf32> -> vector<8x256xf32>
    %69 = arith.addf %64, %68 : vector<8x256xf32>
    %c9_75 = arith.constant 9 : index
    %c0_76 = arith.constant 0 : index
    %70 = vector.load %arg5[%c9_75, %c0_76] : memref<24x256xbf16, #tpu.memory_space<vmem>>, vector<8x256xbf16>
    %c2_77 = arith.constant 2 : index
    %c2_78 = arith.constant 2 : index
    %c0_79 = arith.constant 0 : index
    %c0_80 = arith.constant 0 : index
    %71 = vector.load %arg2[%c2_77, %c2_78, %c0_79, %c0_80] : memref<3x3x256x256xbf16, #tpu.memory_space<vmem>>, vector<1x1x256x256xbf16>
    %72 = vector.shape_cast %71 : vector<1x1x256x256xbf16> to vector<256x256xbf16>
    %cst_81 = arith.constant dense<0.000000e+00> : vector<8x256xf32>
    %73 = tpu.matmul %70, %72, %cst_81 {dimension_numbers = #tpu.dot_dimension_numbers<[1], [0], [0], [1], [0, 0, 1, 1], [], []>} : vector<8x256xbf16>, vector<256x256xbf16>, vector<8x256xf32> -> vector<8x256xf32>
    %74 = arith.addf %69, %73 : vector<8x256xf32>
    %c2_82 = arith.constant 2 : index
    %c0_83 = arith.constant 0 : index
    %c0_84 = arith.constant 0 : index
    %75 = vector.load %arg3[%c2_82, %c0_83, %c0_84] : memref<3x2x256xf32, #tpu.memory_space<vmem>>, vector<1x2x256xf32>
    %76 = vector.shape_cast %75 : vector<1x2x256xf32> to vector<2x256xf32>
    %77 = vector.extract_strided_slice %76 {offsets = [0, 0], sizes = [1, 256], strides = [1, 1]} : vector<2x256xf32> to vector<1x256xf32>
    %78 = vector.broadcast %77 : vector<1x256xf32> to vector<8x256xf32>
    %79 = arith.mulf %74, %78 : vector<8x256xf32>
    %80 = vector.extract_strided_slice %76 {offsets = [1, 0], sizes = [1, 256], strides = [1, 1]} : vector<2x256xf32> to vector<1x256xf32>
    %81 = vector.broadcast %80 : vector<1x256xf32> to vector<8x256xf32>
    %82 = arith.addf %79, %81 : vector<8x256xf32>
    %c0_85 = arith.constant 0 : index
    %c0_86 = arith.constant 0 : index
    %c0_87 = arith.constant 0 : index
    %83 = vector.load %arg1[%c0_85, %c0_86, %c0_87] : memref<1x8x256xbf16, #tpu.memory_space<vmem>>, vector<1x8x256xbf16>
    %84 = vector.shape_cast %83 : vector<1x8x256xbf16> to vector<8x256xbf16>
    %85 = arith.extf %84 : vector<8x256xbf16> to vector<8x256xf32>
    %86 = arith.addf %82, %85 : vector<8x256xf32>
    %87 = arith.truncf %86 : vector<8x256xf32> to vector<8x256xbf16>
    %c0_88 = arith.constant 0 : index
    %c0_89 = arith.constant 0 : index
    %c0_90 = arith.constant 0 : index
    %88 = vector.load %arg4[%c0_88, %c0_89, %c0_90] : memref<1x8x256xbf16, #tpu.memory_space<vmem>>, vector<1x8x256xbf16>
    %89 = vector.shape_cast %88 : vector<1x8x256xbf16> to vector<8x256xbf16>
    %90 = vector.shape_cast %87 : vector<8x256xbf16> to vector<1x8x256xbf16>
    tpu.vector_store %arg4[%c0_88, %c0_89, %c0_90], %90 {strides = array<i32>} : memref<1x8x256xbf16, #tpu.memory_space<vmem>>, vector<1x8x256xbf16>,
    return
  }
  func.func @transform_0(%arg0: i32) -> (i32, i32, i32) {
    %c0_i32 = arith.constant 0 : i32
    %c0_i32_0 = arith.constant 0 : i32
    %c0_i32_1 = arith.constant 0 : i32
    return %arg0, %c0_i32, %c0_i32_0 : i32, i32, i32
  }
  func.func @transform_1(%arg0: i32) -> (i32, i32, i32, i32) {
    %c0_i32 = arith.constant 0 : i32
    %c0_i32_0 = arith.constant 0 : i32
    %c0_i32_1 = arith.constant 0 : i32
    %c0_i32_2 = arith.constant 0 : i32
    %c0_i32_3 = arith.constant 0 : i32
    return %c0_i32, %c0_i32_0, %c0_i32_1, %c0_i32_2 : i32, i32, i32, i32
  }
  func.func @transform_2(%arg0: i32) -> (i32, i32, i32) {
    %c0_i32 = arith.constant 0 : i32
    %c0_i32_0 = arith.constant 0 : i32
    %c0_i32_1 = arith.constant 0 : i32
    %c0_i32_2 = arith.constant 0 : i32
    return %c0_i32, %c0_i32_0, %c0_i32_1 : i32, i32, i32
  }
  func.func @transform_3(%arg0: i32) -> (i32, i32, i32) {
    %c0_i32 = arith.constant 0 : i32
    %c0_i32_0 = arith.constant 0 : i32
    %c0_i32_1 = arith.constant 0 : i32
    return %arg0, %c0_i32, %c0_i32_0 : i32, i32, i32
  }
}

module attributes {stable_mosaic.version = 11 : i64} {
  func.func @kernel(%arg0: i32, %arg1: memref<1x4x512xbf16, #tpu.memory_space<vmem>>, %arg2: memref<2x512x256xbf16, #tpu.memory_space<vmem>>, %arg3: memref<2x256xf32, #tpu.memory_space<vmem>>, %arg4: memref<1x4x256xbf16, #tpu.memory_space<vmem>>, %arg5: memref<16x512xbf16, #tpu.memory_space<vmem>>) attributes {dimension_semantics = [#tpu.dimension_semantics<parallel>], iteration_bounds = array<i64: 2>, scalar_prefetch = 0 : i64, scratch_operands = 1 : i64, tpu.core_type = #tpu.core_type<tc>, window_params = [{transform_indices = @transform_0, window_bounds = array<i64: 1, 4, 512>}, {pipeline_mode = #tpu.pipeline_mode<synchronous>, transform_indices = @transform_1, window_bounds = array<i64: 2, 512, 256>}, {pipeline_mode = #tpu.pipeline_mode<synchronous>, transform_indices = @transform_2, window_bounds = array<i64: 2, 256>}, {transform_indices = @transform_3, window_bounds = array<i64: 1, 4, 256>}]} {
    %cst = arith.constant 0.000000e+00 : bf16
    %0 = vector.broadcast %cst : bf16 to vector<8x512xbf16>
    %c0 = arith.constant 0 : index
    %c0_0 = arith.constant 0 : index
    %1 = vector.load %arg5[%c0, %c0_0] : memref<16x512xbf16, #tpu.memory_space<vmem>>, vector<8x512xbf16>
    tpu.vector_store %arg5[%c0, %c0_0], %0 {strides = array<i32>} : memref<16x512xbf16, #tpu.memory_space<vmem>>, vector<8x512xbf16>,
    %cst_1 = arith.constant 0.000000e+00 : bf16
    %2 = vector.broadcast %cst_1 : bf16 to vector<4x512xbf16>
    %c12 = arith.constant 12 : index
    %c0_2 = arith.constant 0 : index
    %3 = vector.load %arg5[%c12, %c0_2] : memref<16x512xbf16, #tpu.memory_space<vmem>>, vector<4x512xbf16>
    tpu.vector_store %arg5[%c12, %c0_2], %2 {strides = array<i32>} : memref<16x512xbf16, #tpu.memory_space<vmem>>, vector<4x512xbf16>,
    %c0_3 = arith.constant 0 : index
    %c0_4 = arith.constant 0 : index
    %c0_5 = arith.constant 0 : index
    %4 = vector.load %arg1[%c0_3, %c0_4, %c0_5] : memref<1x4x512xbf16, #tpu.memory_space<vmem>>, vector<1x4x512xbf16>
    %5 = vector.shape_cast %4 : vector<1x4x512xbf16> to vector<4x512xbf16>
    %c8 = arith.constant 8 : index
    %c0_6 = arith.constant 0 : index
    %6 = vector.load %arg5[%c8, %c0_6] : memref<16x512xbf16, #tpu.memory_space<vmem>>, vector<4x512xbf16>
    tpu.vector_store %arg5[%c8, %c0_6], %5 {strides = array<i32>} : memref<16x512xbf16, #tpu.memory_space<vmem>>, vector<4x512xbf16>,
    %c7 = arith.constant 7 : index
    %c0_7 = arith.constant 0 : index
    %7 = vector.load %arg5[%c7, %c0_7] : memref<16x512xbf16, #tpu.memory_space<vmem>>, vector<8x512xbf16>
    %c0_8 = arith.constant 0 : index
    %c0_9 = arith.constant 0 : index
    %c0_10 = arith.constant 0 : index
    %8 = vector.load %arg2[%c0_8, %c0_9, %c0_10] : memref<2x512x256xbf16, #tpu.memory_space<vmem>>, vector<1x512x256xbf16>
    %9 = vector.shape_cast %8 : vector<1x512x256xbf16> to vector<512x256xbf16>
    %cst_11 = arith.constant dense<0.000000e+00> : vector<8x256xf32>
    %10 = tpu.matmul %7, %9, %cst_11 {dimension_numbers = #tpu.dot_dimension_numbers<[1], [0], [0], [1], [0, 0, 1, 1], [], []>} : vector<8x512xbf16>, vector<512x256xbf16>, vector<8x256xf32> -> vector<8x256xf32>
    %c8_12 = arith.constant 8 : index
    %c0_13 = arith.constant 0 : index
    %11 = vector.load %arg5[%c8_12, %c0_13] : memref<16x512xbf16, #tpu.memory_space<vmem>>, vector<8x512xbf16>
    %c1 = arith.constant 1 : index
    %c0_14 = arith.constant 0 : index
    %c0_15 = arith.constant 0 : index
    %12 = vector.load %arg2[%c1, %c0_14, %c0_15] : memref<2x512x256xbf16, #tpu.memory_space<vmem>>, vector<1x512x256xbf16>
    %13 = vector.shape_cast %12 : vector<1x512x256xbf16> to vector<512x256xbf16>
    %cst_16 = arith.constant dense<0.000000e+00> : vector<8x256xf32>
    %14 = tpu.matmul %11, %13, %cst_16 {dimension_numbers = #tpu.dot_dimension_numbers<[1], [0], [0], [1], [0, 0, 1, 1], [], []>} : vector<8x512xbf16>, vector<512x256xbf16>, vector<8x256xf32> -> vector<8x256xf32>
    %15 = arith.addf %10, %14 : vector<8x256xf32>
    %c0_17 = arith.constant 0 : index
    %c0_18 = arith.constant 0 : index
    %16 = vector.load %arg3[%c0_17, %c0_18] : memref<2x256xf32, #tpu.memory_space<vmem>>, vector<2x256xf32>
    %17 = vector.extract_strided_slice %16 {offsets = [0, 0], sizes = [1, 256], strides = [1, 1]} : vector<2x256xf32> to vector<1x256xf32>
    %18 = vector.broadcast %17 : vector<1x256xf32> to vector<8x256xf32>
    %19 = arith.mulf %15, %18 : vector<8x256xf32>
    %20 = vector.extract_strided_slice %16 {offsets = [1, 0], sizes = [1, 256], strides = [1, 1]} : vector<2x256xf32> to vector<1x256xf32>
    %21 = vector.broadcast %20 : vector<1x256xf32> to vector<8x256xf32>
    %22 = arith.addf %19, %21 : vector<8x256xf32>
    %23 = vector.extract_strided_slice %22 {offsets = [0, 0], sizes = [4, 256], strides = [1, 1]} : vector<8x256xf32> to vector<4x256xf32>
    %24 = arith.truncf %23 : vector<4x256xf32> to vector<4x256xbf16>
    %c0_19 = arith.constant 0 : index
    %c0_20 = arith.constant 0 : index
    %c0_21 = arith.constant 0 : index
    %25 = vector.load %arg4[%c0_19, %c0_20, %c0_21] : memref<1x4x256xbf16, #tpu.memory_space<vmem>>, vector<1x4x256xbf16>
    %26 = vector.shape_cast %25 : vector<1x4x256xbf16> to vector<4x256xbf16>
    %27 = vector.shape_cast %24 : vector<4x256xbf16> to vector<1x4x256xbf16>
    tpu.vector_store %arg4[%c0_19, %c0_20, %c0_21], %27 {strides = array<i32>} : memref<1x4x256xbf16, #tpu.memory_space<vmem>>, vector<1x4x256xbf16>,
    return
  }
  func.func @transform_0(%arg0: i32) -> (i32, i32, i32) {
    %c0_i32 = arith.constant 0 : i32
    %c0_i32_0 = arith.constant 0 : i32
    %c0_i32_1 = arith.constant 0 : i32
    return %arg0, %c0_i32, %c0_i32_0 : i32, i32, i32
  }
  func.func @transform_1(%arg0: i32) -> (i32, i32, i32) {
    %c0_i32 = arith.constant 0 : i32
    %c0_i32_0 = arith.constant 0 : i32
    %c0_i32_1 = arith.constant 0 : i32
    %c0_i32_2 = arith.constant 0 : i32
    return %c0_i32, %c0_i32_0, %c0_i32_1 : i32, i32, i32
  }
  func.func @transform_2(%arg0: i32) -> (i32, i32) {
    %c0_i32 = arith.constant 0 : i32
    %c0_i32_0 = arith.constant 0 : i32
    %c0_i32_1 = arith.constant 0 : i32
    return %c0_i32, %c0_i32_0 : i32, i32
  }
  func.func @transform_3(%arg0: i32) -> (i32, i32, i32) {
    %c0_i32 = arith.constant 0 : i32
    %c0_i32_0 = arith.constant 0 : i32
    %c0_i32_1 = arith.constant 0 : i32
    return %arg0, %c0_i32, %c0_i32_0 : i32, i32, i32
  }
}

module attributes {stable_mosaic.version = 11 : i64} {
  func.func @kernel(%arg0: i32, %arg1: memref<1x2x512xbf16, #tpu.memory_space<vmem>>, %arg2: memref<2x512x256xbf16, #tpu.memory_space<vmem>>, %arg3: memref<2x256xf32, #tpu.memory_space<vmem>>, %arg4: memref<1x2x256xbf16, #tpu.memory_space<vmem>>, %arg5: memref<16x512xbf16, #tpu.memory_space<vmem>>) attributes {dimension_semantics = [#tpu.dimension_semantics<parallel>], iteration_bounds = array<i64: 2>, scalar_prefetch = 0 : i64, scratch_operands = 1 : i64, tpu.core_type = #tpu.core_type<tc>, window_params = [{transform_indices = @transform_0, window_bounds = array<i64: 1, 2, 512>}, {pipeline_mode = #tpu.pipeline_mode<synchronous>, transform_indices = @transform_1, window_bounds = array<i64: 2, 512, 256>}, {pipeline_mode = #tpu.pipeline_mode<synchronous>, transform_indices = @transform_2, window_bounds = array<i64: 2, 256>}, {transform_indices = @transform_3, window_bounds = array<i64: 1, 2, 256>}]} {
    %cst = arith.constant 0.000000e+00 : bf16
    %0 = vector.broadcast %cst : bf16 to vector<8x512xbf16>
    %c0 = arith.constant 0 : index
    %c0_0 = arith.constant 0 : index
    %1 = vector.load %arg5[%c0, %c0_0] : memref<16x512xbf16, #tpu.memory_space<vmem>>, vector<8x512xbf16>
    tpu.vector_store %arg5[%c0, %c0_0], %0 {strides = array<i32>} : memref<16x512xbf16, #tpu.memory_space<vmem>>, vector<8x512xbf16>,
    %cst_1 = arith.constant 0.000000e+00 : bf16
    %2 = vector.broadcast %cst_1 : bf16 to vector<6x512xbf16>
    %c10 = arith.constant 10 : index
    %c0_2 = arith.constant 0 : index
    %3 = vector.load %arg5[%c10, %c0_2] : memref<16x512xbf16, #tpu.memory_space<vmem>>, vector<6x512xbf16>
    tpu.vector_store %arg5[%c10, %c0_2], %2 {strides = array<i32>} : memref<16x512xbf16, #tpu.memory_space<vmem>>, vector<6x512xbf16>,
    %c0_3 = arith.constant 0 : index
    %c0_4 = arith.constant 0 : index
    %c0_5 = arith.constant 0 : index
    %4 = vector.load %arg1[%c0_3, %c0_4, %c0_5] : memref<1x2x512xbf16, #tpu.memory_space<vmem>>, vector<1x2x512xbf16>
    %5 = vector.shape_cast %4 : vector<1x2x512xbf16> to vector<2x512xbf16>
    %c8 = arith.constant 8 : index
    %c0_6 = arith.constant 0 : index
    %6 = vector.load %arg5[%c8, %c0_6] : memref<16x512xbf16, #tpu.memory_space<vmem>>, vector<2x512xbf16>
    tpu.vector_store %arg5[%c8, %c0_6], %5 {strides = array<i32>} : memref<16x512xbf16, #tpu.memory_space<vmem>>, vector<2x512xbf16>,
    %c7 = arith.constant 7 : index
    %c0_7 = arith.constant 0 : index
    %7 = vector.load %arg5[%c7, %c0_7] : memref<16x512xbf16, #tpu.memory_space<vmem>>, vector<8x512xbf16>
    %c0_8 = arith.constant 0 : index
    %c0_9 = arith.constant 0 : index
    %c0_10 = arith.constant 0 : index
    %8 = vector.load %arg2[%c0_8, %c0_9, %c0_10] : memref<2x512x256xbf16, #tpu.memory_space<vmem>>, vector<1x512x256xbf16>
    %9 = vector.shape_cast %8 : vector<1x512x256xbf16> to vector<512x256xbf16>
    %cst_11 = arith.constant dense<0.000000e+00> : vector<8x256xf32>
    %10 = tpu.matmul %7, %9, %cst_11 {dimension_numbers = #tpu.dot_dimension_numbers<[1], [0], [0], [1], [0, 0, 1, 1], [], []>} : vector<8x512xbf16>, vector<512x256xbf16>, vector<8x256xf32> -> vector<8x256xf32>
    %c8_12 = arith.constant 8 : index
    %c0_13 = arith.constant 0 : index
    %11 = vector.load %arg5[%c8_12, %c0_13] : memref<16x512xbf16, #tpu.memory_space<vmem>>, vector<8x512xbf16>
    %c1 = arith.constant 1 : index
    %c0_14 = arith.constant 0 : index
    %c0_15 = arith.constant 0 : index
    %12 = vector.load %arg2[%c1, %c0_14, %c0_15] : memref<2x512x256xbf16, #tpu.memory_space<vmem>>, vector<1x512x256xbf16>
    %13 = vector.shape_cast %12 : vector<1x512x256xbf16> to vector<512x256xbf16>
    %cst_16 = arith.constant dense<0.000000e+00> : vector<8x256xf32>
    %14 = tpu.matmul %11, %13, %cst_16 {dimension_numbers = #tpu.dot_dimension_numbers<[1], [0], [0], [1], [0, 0, 1, 1], [], []>} : vector<8x512xbf16>, vector<512x256xbf16>, vector<8x256xf32> -> vector<8x256xf32>
    %15 = arith.addf %10, %14 : vector<8x256xf32>
    %c0_17 = arith.constant 0 : index
    %c0_18 = arith.constant 0 : index
    %16 = vector.load %arg3[%c0_17, %c0_18] : memref<2x256xf32, #tpu.memory_space<vmem>>, vector<2x256xf32>
    %17 = vector.extract_strided_slice %16 {offsets = [0, 0], sizes = [1, 256], strides = [1, 1]} : vector<2x256xf32> to vector<1x256xf32>
    %18 = vector.broadcast %17 : vector<1x256xf32> to vector<8x256xf32>
    %19 = arith.mulf %15, %18 : vector<8x256xf32>
    %20 = vector.extract_strided_slice %16 {offsets = [1, 0], sizes = [1, 256], strides = [1, 1]} : vector<2x256xf32> to vector<1x256xf32>
    %21 = vector.broadcast %20 : vector<1x256xf32> to vector<8x256xf32>
    %22 = arith.addf %19, %21 : vector<8x256xf32>
    %23 = vector.extract_strided_slice %22 {offsets = [0, 0], sizes = [2, 256], strides = [1, 1]} : vector<8x256xf32> to vector<2x256xf32>
    %24 = arith.truncf %23 : vector<2x256xf32> to vector<2x256xbf16>
    %c0_19 = arith.constant 0 : index
    %c0_20 = arith.constant 0 : index
    %c0_21 = arith.constant 0 : index
    %25 = vector.load %arg4[%c0_19, %c0_20, %c0_21] : memref<1x2x256xbf16, #tpu.memory_space<vmem>>, vector<1x2x256xbf16>
    %26 = vector.shape_cast %25 : vector<1x2x256xbf16> to vector<2x256xbf16>
    %27 = vector.shape_cast %24 : vector<2x256xbf16> to vector<1x2x256xbf16>
    tpu.vector_store %arg4[%c0_19, %c0_20, %c0_21], %27 {strides = array<i32>} : memref<1x2x256xbf16, #tpu.memory_space<vmem>>, vector<1x2x256xbf16>,
    return
  }
  func.func @transform_0(%arg0: i32) -> (i32, i32, i32) {
    %c0_i32 = arith.constant 0 : i32
    %c0_i32_0 = arith.constant 0 : i32
    %c0_i32_1 = arith.constant 0 : i32
    return %arg0, %c0_i32, %c0_i32_0 : i32, i32, i32
  }
  func.func @transform_1(%arg0: i32) -> (i32, i32, i32) {
    %c0_i32 = arith.constant 0 : i32
    %c0_i32_0 = arith.constant 0 : i32
    %c0_i32_1 = arith.constant 0 : i32
    %c0_i32_2 = arith.constant 0 : i32
    return %c0_i32, %c0_i32_0, %c0_i32_1 : i32, i32, i32
  }
  func.func @transform_2(%arg0: i32) -> (i32, i32) {
    %c0_i32 = arith.constant 0 : i32
    %c0_i32_0 = arith.constant 0 : i32
    %c0_i32_1 = arith.constant 0 : i32
    return %c0_i32, %c0_i32_0 : i32, i32
  }
  func.func @transform_3(%arg0: i32) -> (i32, i32, i32) {
    %c0_i32 = arith.constant 0 : i32
    %c0_i32_0 = arith.constant 0 : i32
    %c0_i32_1 = arith.constant 0 : i32
    return %arg0, %c0_i32, %c0_i32_0 : i32, i32, i32
  }
}

module attributes {stable_mosaic.version = 11 : i64} {
  func.func @kernel(%arg0: i32, %arg1: memref<1x4x256xbf16, #tpu.memory_space<vmem>>, %arg2: memref<3x3x256x256xbf16, #tpu.memory_space<vmem>>, %arg3: memref<3x2x256xf32, #tpu.memory_space<vmem>>, %arg4: memref<1x4x256xbf16, #tpu.memory_space<vmem>>, %arg5: memref<24x256xbf16, #tpu.memory_space<vmem>>, %arg6: memref<24x256xbf16, #tpu.memory_space<vmem>>) attributes {dimension_semantics = [#tpu.dimension_semantics<parallel>], iteration_bounds = array<i64: 2>, scalar_prefetch = 0 : i64, scratch_operands = 2 : i64, tpu.core_type = #tpu.core_type<tc>, window_params = [{transform_indices = @transform_0, window_bounds = array<i64: 1, 4, 256>}, {pipeline_mode = #tpu.pipeline_mode<synchronous>, transform_indices = @transform_1, window_bounds = array<i64: 3, 3, 256, 256>}, {pipeline_mode = #tpu.pipeline_mode<synchronous>, transform_indices = @transform_2, window_bounds = array<i64: 3, 2, 256>}, {transform_indices = @transform_3, window_bounds = array<i64: 1, 4, 256>}]} {
    %cst = arith.constant 0.000000e+00 : bf16
    %0 = vector.broadcast %cst : bf16 to vector<8x256xbf16>
    %cst_0 = arith.constant 0.000000e+00 : bf16
    %1 = vector.broadcast %cst_0 : bf16 to vector<12x256xbf16>
    %c0 = arith.constant 0 : index
    %c0_1 = arith.constant 0 : index
    %2 = vector.load %arg5[%c0, %c0_1] : memref<24x256xbf16, #tpu.memory_space<vmem>>, vector<8x256xbf16>
    tpu.vector_store %arg5[%c0, %c0_1], %0 {strides = array<i32>} : memref<24x256xbf16, #tpu.memory_space<vmem>>, vector<8x256xbf16>,
    %c12 = arith.constant 12 : index
    %c0_2 = arith.constant 0 : index
    %3 = vector.load %arg5[%c12, %c0_2] : memref<24x256xbf16, #tpu.memory_space<vmem>>, vector<12x256xbf16>
    tpu.vector_store %arg5[%c12, %c0_2], %1 {strides = array<i32>} : memref<24x256xbf16, #tpu.memory_space<vmem>>, vector<12x256xbf16>,
    %c0_3 = arith.constant 0 : index
    %c0_4 = arith.constant 0 : index
    %4 = vector.load %arg6[%c0_3, %c0_4] : memref<24x256xbf16, #tpu.memory_space<vmem>>, vector<8x256xbf16>
    tpu.vector_store %arg6[%c0_3, %c0_4], %0 {strides = array<i32>} : memref<24x256xbf16, #tpu.memory_space<vmem>>, vector<8x256xbf16>,
    %c12_5 = arith.constant 12 : index
    %c0_6 = arith.constant 0 : index
    %5 = vector.load %arg6[%c12_5, %c0_6] : memref<24x256xbf16, #tpu.memory_space<vmem>>, vector<12x256xbf16>
    tpu.vector_store %arg6[%c12_5, %c0_6], %1 {strides = array<i32>} : memref<24x256xbf16, #tpu.memory_space<vmem>>, vector<12x256xbf16>,
    %c0_7 = arith.constant 0 : index
    %c0_8 = arith.constant 0 : index
    %c0_9 = arith.constant 0 : index
    %6 = vector.load %arg1[%c0_7, %c0_8, %c0_9] : memref<1x4x256xbf16, #tpu.memory_space<vmem>>, vector<1x4x256xbf16>
    %7 = vector.shape_cast %6 : vector<1x4x256xbf16> to vector<4x256xbf16>
    %c8 = arith.constant 8 : index
    %c0_10 = arith.constant 0 : index
    %8 = vector.load %arg5[%c8, %c0_10] : memref<24x256xbf16, #tpu.memory_space<vmem>>, vector<4x256xbf16>
    tpu.vector_store %arg5[%c8, %c0_10], %7 {strides = array<i32>} : memref<24x256xbf16, #tpu.memory_space<vmem>>, vector<4x256xbf16>,
    %c7 = arith.constant 7 : index
    %c0_11 = arith.constant 0 : index
    %9 = vector.load %arg5[%c7, %c0_11] : memref<24x256xbf16, #tpu.memory_space<vmem>>, vector<8x256xbf16>
    %c0_12 = arith.constant 0 : index
    %c0_13 = arith.constant 0 : index
    %c0_14 = arith.constant 0 : index
    %c0_15 = arith.constant 0 : index
    %10 = vector.load %arg2[%c0_12, %c0_13, %c0_14, %c0_15] : memref<3x3x256x256xbf16, #tpu.memory_space<vmem>>, vector<1x1x256x256xbf16>
    %11 = vector.shape_cast %10 : vector<1x1x256x256xbf16> to vector<256x256xbf16>
    %cst_16 = arith.constant dense<0.000000e+00> : vector<8x256xf32>
    %12 = tpu.matmul %9, %11, %cst_16 {dimension_numbers = #tpu.dot_dimension_numbers<[1], [0], [0], [1], [0, 0, 1, 1], [], []>} : vector<8x256xbf16>, vector<256x256xbf16>, vector<8x256xf32> -> vector<8x256xf32>
    %c8_17 = arith.constant 8 : index
    %c0_18 = arith.constant 0 : index
    %13 = vector.load %arg5[%c8_17, %c0_18] : memref<24x256xbf16, #tpu.memory_space<vmem>>, vector<8x256xbf16>
    %c0_19 = arith.constant 0 : index
    %c1 = arith.constant 1 : index
    %c0_20 = arith.constant 0 : index
    %c0_21 = arith.constant 0 : index
    %14 = vector.load %arg2[%c0_19, %c1, %c0_20, %c0_21] : memref<3x3x256x256xbf16, #tpu.memory_space<vmem>>, vector<1x1x256x256xbf16>
    %15 = vector.shape_cast %14 : vector<1x1x256x256xbf16> to vector<256x256xbf16>
    %cst_22 = arith.constant dense<0.000000e+00> : vector<8x256xf32>
    %16 = tpu.matmul %13, %15, %cst_22 {dimension_numbers = #tpu.dot_dimension_numbers<[1], [0], [0], [1], [0, 0, 1, 1], [], []>} : vector<8x256xbf16>, vector<256x256xbf16>, vector<8x256xf32> -> vector<8x256xf32>
    %17 = arith.addf %12, %16 : vector<8x256xf32>
    %c9 = arith.constant 9 : index
    %c0_23 = arith.constant 0 : index
    %18 = vector.load %arg5[%c9, %c0_23] : memref<24x256xbf16, #tpu.memory_space<vmem>>, vector<8x256xbf16>
    %c0_24 = arith.constant 0 : index
    %c2 = arith.constant 2 : index
    %c0_25 = arith.constant 0 : index
    %c0_26 = arith.constant 0 : index
    %19 = vector.load %arg2[%c0_24, %c2, %c0_25, %c0_26] : memref<3x3x256x256xbf16, #tpu.memory_space<vmem>>, vector<1x1x256x256xbf16>
    %20 = vector.shape_cast %19 : vector<1x1x256x256xbf16> to vector<256x256xbf16>
    %cst_27 = arith.constant dense<0.000000e+00> : vector<8x256xf32>
    %21 = tpu.matmul %18, %20, %cst_27 {dimension_numbers = #tpu.dot_dimension_numbers<[1], [0], [0], [1], [0, 0, 1, 1], [], []>} : vector<8x256xbf16>, vector<256x256xbf16>, vector<8x256xf32> -> vector<8x256xf32>
    %22 = arith.addf %17, %21 : vector<8x256xf32>
    %c0_28 = arith.constant 0 : index
    %c0_29 = arith.constant 0 : index
    %c0_30 = arith.constant 0 : index
    %23 = vector.load %arg3[%c0_28, %c0_29, %c0_30] : memref<3x2x256xf32, #tpu.memory_space<vmem>>, vector<1x2x256xf32>
    %24 = vector.shape_cast %23 : vector<1x2x256xf32> to vector<2x256xf32>
    %25 = vector.extract_strided_slice %24 {offsets = [0, 0], sizes = [1, 256], strides = [1, 1]} : vector<2x256xf32> to vector<1x256xf32>
    %26 = vector.broadcast %25 : vector<1x256xf32> to vector<8x256xf32>
    %27 = arith.mulf %22, %26 : vector<8x256xf32>
    %28 = vector.extract_strided_slice %24 {offsets = [1, 0], sizes = [1, 256], strides = [1, 1]} : vector<2x256xf32> to vector<1x256xf32>
    %29 = vector.broadcast %28 : vector<1x256xf32> to vector<8x256xf32>
    %30 = arith.addf %27, %29 : vector<8x256xf32>
    %cst_31 = arith.constant 0.000000e+00 : f32
    %31 = vector.broadcast %cst_31 : f32 to vector<8x256xf32>
    %32 = arith.maximumf %30, %31 : vector<8x256xf32>
    %33 = vector.extract_strided_slice %32 {offsets = [0, 0], sizes = [4, 256], strides = [1, 1]} : vector<8x256xf32> to vector<4x256xf32>
    %34 = arith.truncf %33 : vector<4x256xf32> to vector<4x256xbf16>
    %c8_32 = arith.constant 8 : index
    %c0_33 = arith.constant 0 : index
    %35 = vector.load %arg6[%c8_32, %c0_33] : memref<24x256xbf16, #tpu.memory_space<vmem>>, vector<4x256xbf16>
    tpu.vector_store %arg6[%c8_32, %c0_33], %34 {strides = array<i32>} : memref<24x256xbf16, #tpu.memory_space<vmem>>, vector<4x256xbf16>,
    %c7_34 = arith.constant 7 : index
    %c0_35 = arith.constant 0 : index
    %36 = vector.load %arg6[%c7_34, %c0_35] : memref<24x256xbf16, #tpu.memory_space<vmem>>, vector<8x256xbf16>
    %c1_36 = arith.constant 1 : index
    %c0_37 = arith.constant 0 : index
    %c0_38 = arith.constant 0 : index
    %c0_39 = arith.constant 0 : index
    %37 = vector.load %arg2[%c1_36, %c0_37, %c0_38, %c0_39] : memref<3x3x256x256xbf16, #tpu.memory_space<vmem>>, vector<1x1x256x256xbf16>
    %38 = vector.shape_cast %37 : vector<1x1x256x256xbf16> to vector<256x256xbf16>
    %cst_40 = arith.constant dense<0.000000e+00> : vector<8x256xf32>
    %39 = tpu.matmul %36, %38, %cst_40 {dimension_numbers = #tpu.dot_dimension_numbers<[1], [0], [0], [1], [0, 0, 1, 1], [], []>} : vector<8x256xbf16>, vector<256x256xbf16>, vector<8x256xf32> -> vector<8x256xf32>
    %c8_41 = arith.constant 8 : index
    %c0_42 = arith.constant 0 : index
    %40 = vector.load %arg6[%c8_41, %c0_42] : memref<24x256xbf16, #tpu.memory_space<vmem>>, vector<8x256xbf16>
    %c1_43 = arith.constant 1 : index
    %c1_44 = arith.constant 1 : index
    %c0_45 = arith.constant 0 : index
    %c0_46 = arith.constant 0 : index
    %41 = vector.load %arg2[%c1_43, %c1_44, %c0_45, %c0_46] : memref<3x3x256x256xbf16, #tpu.memory_space<vmem>>, vector<1x1x256x256xbf16>
    %42 = vector.shape_cast %41 : vector<1x1x256x256xbf16> to vector<256x256xbf16>
    %cst_47 = arith.constant dense<0.000000e+00> : vector<8x256xf32>
    %43 = tpu.matmul %40, %42, %cst_47 {dimension_numbers = #tpu.dot_dimension_numbers<[1], [0], [0], [1], [0, 0, 1, 1], [], []>} : vector<8x256xbf16>, vector<256x256xbf16>, vector<8x256xf32> -> vector<8x256xf32>
    %44 = arith.addf %39, %43 : vector<8x256xf32>
    %c9_48 = arith.constant 9 : index
    %c0_49 = arith.constant 0 : index
    %45 = vector.load %arg6[%c9_48, %c0_49] : memref<24x256xbf16, #tpu.memory_space<vmem>>, vector<8x256xbf16>
    %c1_50 = arith.constant 1 : index
    %c2_51 = arith.constant 2 : index
    %c0_52 = arith.constant 0 : index
    %c0_53 = arith.constant 0 : index
    %46 = vector.load %arg2[%c1_50, %c2_51, %c0_52, %c0_53] : memref<3x3x256x256xbf16, #tpu.memory_space<vmem>>, vector<1x1x256x256xbf16>
    %47 = vector.shape_cast %46 : vector<1x1x256x256xbf16> to vector<256x256xbf16>
    %cst_54 = arith.constant dense<0.000000e+00> : vector<8x256xf32>
    %48 = tpu.matmul %45, %47, %cst_54 {dimension_numbers = #tpu.dot_dimension_numbers<[1], [0], [0], [1], [0, 0, 1, 1], [], []>} : vector<8x256xbf16>, vector<256x256xbf16>, vector<8x256xf32> -> vector<8x256xf32>
    %49 = arith.addf %44, %48 : vector<8x256xf32>
    %c1_55 = arith.constant 1 : index
    %c0_56 = arith.constant 0 : index
    %c0_57 = arith.constant 0 : index
    %50 = vector.load %arg3[%c1_55, %c0_56, %c0_57] : memref<3x2x256xf32, #tpu.memory_space<vmem>>, vector<1x2x256xf32>
    %51 = vector.shape_cast %50 : vector<1x2x256xf32> to vector<2x256xf32>
    %52 = vector.extract_strided_slice %51 {offsets = [0, 0], sizes = [1, 256], strides = [1, 1]} : vector<2x256xf32> to vector<1x256xf32>
    %53 = vector.broadcast %52 : vector<1x256xf32> to vector<8x256xf32>
    %54 = arith.mulf %49, %53 : vector<8x256xf32>
    %55 = vector.extract_strided_slice %51 {offsets = [1, 0], sizes = [1, 256], strides = [1, 1]} : vector<2x256xf32> to vector<1x256xf32>
    %56 = vector.broadcast %55 : vector<1x256xf32> to vector<8x256xf32>
    %57 = arith.addf %54, %56 : vector<8x256xf32>
    %cst_58 = arith.constant 0.000000e+00 : f32
    %58 = vector.broadcast %cst_58 : f32 to vector<8x256xf32>
    %59 = arith.maximumf %57, %58 : vector<8x256xf32>
    %60 = vector.extract_strided_slice %59 {offsets = [0, 0], sizes = [4, 256], strides = [1, 1]} : vector<8x256xf32> to vector<4x256xf32>
    %61 = arith.truncf %60 : vector<4x256xf32> to vector<4x256xbf16>
    %c8_59 = arith.constant 8 : index
    %c0_60 = arith.constant 0 : index
    %62 = vector.load %arg5[%c8_59, %c0_60] : memref<24x256xbf16, #tpu.memory_space<vmem>>, vector<4x256xbf16>
    tpu.vector_store %arg5[%c8_59, %c0_60], %61 {strides = array<i32>} : memref<24x256xbf16, #tpu.memory_space<vmem>>, vector<4x256xbf16>,
    %c7_61 = arith.constant 7 : index
    %c0_62 = arith.constant 0 : index
    %63 = vector.load %arg5[%c7_61, %c0_62] : memref<24x256xbf16, #tpu.memory_space<vmem>>, vector<8x256xbf16>
    %c2_63 = arith.constant 2 : index
    %c0_64 = arith.constant 0 : index
    %c0_65 = arith.constant 0 : index
    %c0_66 = arith.constant 0 : index
    %64 = vector.load %arg2[%c2_63, %c0_64, %c0_65, %c0_66] : memref<3x3x256x256xbf16, #tpu.memory_space<vmem>>, vector<1x1x256x256xbf16>
    %65 = vector.shape_cast %64 : vector<1x1x256x256xbf16> to vector<256x256xbf16>
    %cst_67 = arith.constant dense<0.000000e+00> : vector<8x256xf32>
    %66 = tpu.matmul %63, %65, %cst_67 {dimension_numbers = #tpu.dot_dimension_numbers<[1], [0], [0], [1], [0, 0, 1, 1], [], []>} : vector<8x256xbf16>, vector<256x256xbf16>, vector<8x256xf32> -> vector<8x256xf32>
    %c8_68 = arith.constant 8 : index
    %c0_69 = arith.constant 0 : index
    %67 = vector.load %arg5[%c8_68, %c0_69] : memref<24x256xbf16, #tpu.memory_space<vmem>>, vector<8x256xbf16>
    %c2_70 = arith.constant 2 : index
    %c1_71 = arith.constant 1 : index
    %c0_72 = arith.constant 0 : index
    %c0_73 = arith.constant 0 : index
    %68 = vector.load %arg2[%c2_70, %c1_71, %c0_72, %c0_73] : memref<3x3x256x256xbf16, #tpu.memory_space<vmem>>, vector<1x1x256x256xbf16>
    %69 = vector.shape_cast %68 : vector<1x1x256x256xbf16> to vector<256x256xbf16>
    %cst_74 = arith.constant dense<0.000000e+00> : vector<8x256xf32>
    %70 = tpu.matmul %67, %69, %cst_74 {dimension_numbers = #tpu.dot_dimension_numbers<[1], [0], [0], [1], [0, 0, 1, 1], [], []>} : vector<8x256xbf16>, vector<256x256xbf16>, vector<8x256xf32> -> vector<8x256xf32>
    %71 = arith.addf %66, %70 : vector<8x256xf32>
    %c9_75 = arith.constant 9 : index
    %c0_76 = arith.constant 0 : index
    %72 = vector.load %arg5[%c9_75, %c0_76] : memref<24x256xbf16, #tpu.memory_space<vmem>>, vector<8x256xbf16>
    %c2_77 = arith.constant 2 : index
    %c2_78 = arith.constant 2 : index
    %c0_79 = arith.constant 0 : index
    %c0_80 = arith.constant 0 : index
    %73 = vector.load %arg2[%c2_77, %c2_78, %c0_79, %c0_80] : memref<3x3x256x256xbf16, #tpu.memory_space<vmem>>, vector<1x1x256x256xbf16>
    %74 = vector.shape_cast %73 : vector<1x1x256x256xbf16> to vector<256x256xbf16>
    %cst_81 = arith.constant dense<0.000000e+00> : vector<8x256xf32>
    %75 = tpu.matmul %72, %74, %cst_81 {dimension_numbers = #tpu.dot_dimension_numbers<[1], [0], [0], [1], [0, 0, 1, 1], [], []>} : vector<8x256xbf16>, vector<256x256xbf16>, vector<8x256xf32> -> vector<8x256xf32>
    %76 = arith.addf %71, %75 : vector<8x256xf32>
    %c2_82 = arith.constant 2 : index
    %c0_83 = arith.constant 0 : index
    %c0_84 = arith.constant 0 : index
    %77 = vector.load %arg3[%c2_82, %c0_83, %c0_84] : memref<3x2x256xf32, #tpu.memory_space<vmem>>, vector<1x2x256xf32>
    %78 = vector.shape_cast %77 : vector<1x2x256xf32> to vector<2x256xf32>
    %79 = vector.extract_strided_slice %78 {offsets = [0, 0], sizes = [1, 256], strides = [1, 1]} : vector<2x256xf32> to vector<1x256xf32>
    %80 = vector.broadcast %79 : vector<1x256xf32> to vector<8x256xf32>
    %81 = arith.mulf %76, %80 : vector<8x256xf32>
    %82 = vector.extract_strided_slice %78 {offsets = [1, 0], sizes = [1, 256], strides = [1, 1]} : vector<2x256xf32> to vector<1x256xf32>
    %83 = vector.broadcast %82 : vector<1x256xf32> to vector<8x256xf32>
    %84 = arith.addf %81, %83 : vector<8x256xf32>
    %85 = vector.extract_strided_slice %84 {offsets = [0, 0], sizes = [4, 256], strides = [1, 1]} : vector<8x256xf32> to vector<4x256xf32>
    %c0_85 = arith.constant 0 : index
    %c0_86 = arith.constant 0 : index
    %c0_87 = arith.constant 0 : index
    %86 = vector.load %arg1[%c0_85, %c0_86, %c0_87] : memref<1x4x256xbf16, #tpu.memory_space<vmem>>, vector<1x4x256xbf16>
    %87 = vector.shape_cast %86 : vector<1x4x256xbf16> to vector<4x256xbf16>
    %88 = arith.extf %87 : vector<4x256xbf16> to vector<4x256xf32>
    %89 = arith.addf %85, %88 : vector<4x256xf32>
    %90 = arith.truncf %89 : vector<4x256xf32> to vector<4x256xbf16>
    %c0_88 = arith.constant 0 : index
    %c0_89 = arith.constant 0 : index
    %c0_90 = arith.constant 0 : index
    %91 = vector.load %arg4[%c0_88, %c0_89, %c0_90] : memref<1x4x256xbf16, #tpu.memory_space<vmem>>, vector<1x4x256xbf16>
    %92 = vector.shape_cast %91 : vector<1x4x256xbf16> to vector<4x256xbf16>
    %93 = vector.shape_cast %90 : vector<4x256xbf16> to vector<1x4x256xbf16>
    tpu.vector_store %arg4[%c0_88, %c0_89, %c0_90], %93 {strides = array<i32>} : memref<1x4x256xbf16, #tpu.memory_space<vmem>>, vector<1x4x256xbf16>,
    return
  }
  func.func @transform_0(%arg0: i32) -> (i32, i32, i32) {
    %c0_i32 = arith.constant 0 : i32
    %c0_i32_0 = arith.constant 0 : i32
    %c0_i32_1 = arith.constant 0 : i32
    return %arg0, %c0_i32, %c0_i32_0 : i32, i32, i32
  }
  func.func @transform_1(%arg0: i32) -> (i32, i32, i32, i32) {
    %c0_i32 = arith.constant 0 : i32
    %c0_i32_0 = arith.constant 0 : i32
    %c0_i32_1 = arith.constant 0 : i32
    %c0_i32_2 = arith.constant 0 : i32
    %c0_i32_3 = arith.constant 0 : i32
    return %c0_i32, %c0_i32_0, %c0_i32_1, %c0_i32_2 : i32, i32, i32, i32
  }
  func.func @transform_2(%arg0: i32) -> (i32, i32, i32) {
    %c0_i32 = arith.constant 0 : i32
    %c0_i32_0 = arith.constant 0 : i32
    %c0_i32_1 = arith.constant 0 : i32
    %c0_i32_2 = arith.constant 0 : i32
    return %c0_i32, %c0_i32_0, %c0_i32_1 : i32, i32, i32
  }
  func.func @transform_3(%arg0: i32) -> (i32, i32, i32) {
    %c0_i32 = arith.constant 0 : i32
    %c0_i32_0 = arith.constant 0 : i32
    %c0_i32_1 = arith.constant 0 : i32
    return %arg0, %c0_i32, %c0_i32_0 : i32, i32, i32
  }
}

module attributes {stable_mosaic.version = 11 : i64} {
  func.func @kernel(%arg0: i32, %arg1: memref<1x2x256xbf16, #tpu.memory_space<vmem>>, %arg2: memref<3x3x256x256xbf16, #tpu.memory_space<vmem>>, %arg3: memref<3x2x256xf32, #tpu.memory_space<vmem>>, %arg4: memref<1x2x256xbf16, #tpu.memory_space<vmem>>, %arg5: memref<24x256xbf16, #tpu.memory_space<vmem>>, %arg6: memref<24x256xbf16, #tpu.memory_space<vmem>>) attributes {dimension_semantics = [#tpu.dimension_semantics<parallel>], iteration_bounds = array<i64: 2>, scalar_prefetch = 0 : i64, scratch_operands = 2 : i64, tpu.core_type = #tpu.core_type<tc>, window_params = [{transform_indices = @transform_0, window_bounds = array<i64: 1, 2, 256>}, {pipeline_mode = #tpu.pipeline_mode<synchronous>, transform_indices = @transform_1, window_bounds = array<i64: 3, 3, 256, 256>}, {pipeline_mode = #tpu.pipeline_mode<synchronous>, transform_indices = @transform_2, window_bounds = array<i64: 3, 2, 256>}, {transform_indices = @transform_3, window_bounds = array<i64: 1, 2, 256>}]} {
    %cst = arith.constant 0.000000e+00 : bf16
    %0 = vector.broadcast %cst : bf16 to vector<8x256xbf16>
    %cst_0 = arith.constant 0.000000e+00 : bf16
    %1 = vector.broadcast %cst_0 : bf16 to vector<14x256xbf16>
    %c0 = arith.constant 0 : index
    %c0_1 = arith.constant 0 : index
    %2 = vector.load %arg5[%c0, %c0_1] : memref<24x256xbf16, #tpu.memory_space<vmem>>, vector<8x256xbf16>
    tpu.vector_store %arg5[%c0, %c0_1], %0 {strides = array<i32>} : memref<24x256xbf16, #tpu.memory_space<vmem>>, vector<8x256xbf16>,
    %c10 = arith.constant 10 : index
    %c0_2 = arith.constant 0 : index
    %3 = vector.load %arg5[%c10, %c0_2] : memref<24x256xbf16, #tpu.memory_space<vmem>>, vector<14x256xbf16>
    tpu.vector_store %arg5[%c10, %c0_2], %1 {strides = array<i32>} : memref<24x256xbf16, #tpu.memory_space<vmem>>, vector<14x256xbf16>,
    %c0_3 = arith.constant 0 : index
    %c0_4 = arith.constant 0 : index
    %4 = vector.load %arg6[%c0_3, %c0_4] : memref<24x256xbf16, #tpu.memory_space<vmem>>, vector<8x256xbf16>
    tpu.vector_store %arg6[%c0_3, %c0_4], %0 {strides = array<i32>} : memref<24x256xbf16, #tpu.memory_space<vmem>>, vector<8x256xbf16>,
    %c10_5 = arith.constant 10 : index
    %c0_6 = arith.constant 0 : index
    %5 = vector.load %arg6[%c10_5, %c0_6] : memref<24x256xbf16, #tpu.memory_space<vmem>>, vector<14x256xbf16>
    tpu.vector_store %arg6[%c10_5, %c0_6], %1 {strides = array<i32>} : memref<24x256xbf16, #tpu.memory_space<vmem>>, vector<14x256xbf16>,
    %c0_7 = arith.constant 0 : index
    %c0_8 = arith.constant 0 : index
    %c0_9 = arith.constant 0 : index
    %6 = vector.load %arg1[%c0_7, %c0_8, %c0_9] : memref<1x2x256xbf16, #tpu.memory_space<vmem>>, vector<1x2x256xbf16>
    %7 = vector.shape_cast %6 : vector<1x2x256xbf16> to vector<2x256xbf16>
    %c8 = arith.constant 8 : index
    %c0_10 = arith.constant 0 : index
    %8 = vector.load %arg5[%c8, %c0_10] : memref<24x256xbf16, #tpu.memory_space<vmem>>, vector<2x256xbf16>
    tpu.vector_store %arg5[%c8, %c0_10], %7 {strides = array<i32>} : memref<24x256xbf16, #tpu.memory_space<vmem>>, vector<2x256xbf16>,
    %c7 = arith.constant 7 : index
    %c0_11 = arith.constant 0 : index
    %9 = vector.load %arg5[%c7, %c0_11] : memref<24x256xbf16, #tpu.memory_space<vmem>>, vector<8x256xbf16>
    %c0_12 = arith.constant 0 : index
    %c0_13 = arith.constant 0 : index
    %c0_14 = arith.constant 0 : index
    %c0_15 = arith.constant 0 : index
    %10 = vector.load %arg2[%c0_12, %c0_13, %c0_14, %c0_15] : memref<3x3x256x256xbf16, #tpu.memory_space<vmem>>, vector<1x1x256x256xbf16>
    %11 = vector.shape_cast %10 : vector<1x1x256x256xbf16> to vector<256x256xbf16>
    %cst_16 = arith.constant dense<0.000000e+00> : vector<8x256xf32>
    %12 = tpu.matmul %9, %11, %cst_16 {dimension_numbers = #tpu.dot_dimension_numbers<[1], [0], [0], [1], [0, 0, 1, 1], [], []>} : vector<8x256xbf16>, vector<256x256xbf16>, vector<8x256xf32> -> vector<8x256xf32>
    %c8_17 = arith.constant 8 : index
    %c0_18 = arith.constant 0 : index
    %13 = vector.load %arg5[%c8_17, %c0_18] : memref<24x256xbf16, #tpu.memory_space<vmem>>, vector<8x256xbf16>
    %c0_19 = arith.constant 0 : index
    %c1 = arith.constant 1 : index
    %c0_20 = arith.constant 0 : index
    %c0_21 = arith.constant 0 : index
    %14 = vector.load %arg2[%c0_19, %c1, %c0_20, %c0_21] : memref<3x3x256x256xbf16, #tpu.memory_space<vmem>>, vector<1x1x256x256xbf16>
    %15 = vector.shape_cast %14 : vector<1x1x256x256xbf16> to vector<256x256xbf16>
    %cst_22 = arith.constant dense<0.000000e+00> : vector<8x256xf32>
    %16 = tpu.matmul %13, %15, %cst_22 {dimension_numbers = #tpu.dot_dimension_numbers<[1], [0], [0], [1], [0, 0, 1, 1], [], []>} : vector<8x256xbf16>, vector<256x256xbf16>, vector<8x256xf32> -> vector<8x256xf32>
    %17 = arith.addf %12, %16 : vector<8x256xf32>
    %c9 = arith.constant 9 : index
    %c0_23 = arith.constant 0 : index
    %18 = vector.load %arg5[%c9, %c0_23] : memref<24x256xbf16, #tpu.memory_space<vmem>>, vector<8x256xbf16>
    %c0_24 = arith.constant 0 : index
    %c2 = arith.constant 2 : index
    %c0_25 = arith.constant 0 : index
    %c0_26 = arith.constant 0 : index
    %19 = vector.load %arg2[%c0_24, %c2, %c0_25, %c0_26] : memref<3x3x256x256xbf16, #tpu.memory_space<vmem>>, vector<1x1x256x256xbf16>
    %20 = vector.shape_cast %19 : vector<1x1x256x256xbf16> to vector<256x256xbf16>
    %cst_27 = arith.constant dense<0.000000e+00> : vector<8x256xf32>
    %21 = tpu.matmul %18, %20, %cst_27 {dimension_numbers = #tpu.dot_dimension_numbers<[1], [0], [0], [1], [0, 0, 1, 1], [], []>} : vector<8x256xbf16>, vector<256x256xbf16>, vector<8x256xf32> -> vector<8x256xf32>
    %22 = arith.addf %17, %21 : vector<8x256xf32>
    %c0_28 = arith.constant 0 : index
    %c0_29 = arith.constant 0 : index
    %c0_30 = arith.constant 0 : index
    %23 = vector.load %arg3[%c0_28, %c0_29, %c0_30] : memref<3x2x256xf32, #tpu.memory_space<vmem>>, vector<1x2x256xf32>
    %24 = vector.shape_cast %23 : vector<1x2x256xf32> to vector<2x256xf32>
    %25 = vector.extract_strided_slice %24 {offsets = [0, 0], sizes = [1, 256], strides = [1, 1]} : vector<2x256xf32> to vector<1x256xf32>
    %26 = vector.broadcast %25 : vector<1x256xf32> to vector<8x256xf32>
    %27 = arith.mulf %22, %26 : vector<8x256xf32>
    %28 = vector.extract_strided_slice %24 {offsets = [1, 0], sizes = [1, 256], strides = [1, 1]} : vector<2x256xf32> to vector<1x256xf32>
    %29 = vector.broadcast %28 : vector<1x256xf32> to vector<8x256xf32>
    %30 = arith.addf %27, %29 : vector<8x256xf32>
    %cst_31 = arith.constant 0.000000e+00 : f32
    %31 = vector.broadcast %cst_31 : f32 to vector<8x256xf32>
    %32 = arith.maximumf %30, %31 : vector<8x256xf32>
    %33 = vector.extract_strided_slice %32 {offsets = [0, 0], sizes = [2, 256], strides = [1, 1]} : vector<8x256xf32> to vector<2x256xf32>
    %34 = arith.truncf %33 : vector<2x256xf32> to vector<2x256xbf16>
    %c8_32 = arith.constant 8 : index
    %c0_33 = arith.constant 0 : index
    %35 = vector.load %arg6[%c8_32, %c0_33] : memref<24x256xbf16, #tpu.memory_space<vmem>>, vector<2x256xbf16>
    tpu.vector_store %arg6[%c8_32, %c0_33], %34 {strides = array<i32>} : memref<24x256xbf16, #tpu.memory_space<vmem>>, vector<2x256xbf16>,
    %c7_34 = arith.constant 7 : index
    %c0_35 = arith.constant 0 : index
    %36 = vector.load %arg6[%c7_34, %c0_35] : memref<24x256xbf16, #tpu.memory_space<vmem>>, vector<8x256xbf16>
    %c1_36 = arith.constant 1 : index
    %c0_37 = arith.constant 0 : index
    %c0_38 = arith.constant 0 : index
    %c0_39 = arith.constant 0 : index
    %37 = vector.load %arg2[%c1_36, %c0_37, %c0_38, %c0_39] : memref<3x3x256x256xbf16, #tpu.memory_space<vmem>>, vector<1x1x256x256xbf16>
    %38 = vector.shape_cast %37 : vector<1x1x256x256xbf16> to vector<256x256xbf16>
    %cst_40 = arith.constant dense<0.000000e+00> : vector<8x256xf32>
    %39 = tpu.matmul %36, %38, %cst_40 {dimension_numbers = #tpu.dot_dimension_numbers<[1], [0], [0], [1], [0, 0, 1, 1], [], []>} : vector<8x256xbf16>, vector<256x256xbf16>, vector<8x256xf32> -> vector<8x256xf32>
    %c8_41 = arith.constant 8 : index
    %c0_42 = arith.constant 0 : index
    %40 = vector.load %arg6[%c8_41, %c0_42] : memref<24x256xbf16, #tpu.memory_space<vmem>>, vector<8x256xbf16>
    %c1_43 = arith.constant 1 : index
    %c1_44 = arith.constant 1 : index
    %c0_45 = arith.constant 0 : index
    %c0_46 = arith.constant 0 : index
    %41 = vector.load %arg2[%c1_43, %c1_44, %c0_45, %c0_46] : memref<3x3x256x256xbf16, #tpu.memory_space<vmem>>, vector<1x1x256x256xbf16>
    %42 = vector.shape_cast %41 : vector<1x1x256x256xbf16> to vector<256x256xbf16>
    %cst_47 = arith.constant dense<0.000000e+00> : vector<8x256xf32>
    %43 = tpu.matmul %40, %42, %cst_47 {dimension_numbers = #tpu.dot_dimension_numbers<[1], [0], [0], [1], [0, 0, 1, 1], [], []>} : vector<8x256xbf16>, vector<256x256xbf16>, vector<8x256xf32> -> vector<8x256xf32>
    %44 = arith.addf %39, %43 : vector<8x256xf32>
    %c9_48 = arith.constant 9 : index
    %c0_49 = arith.constant 0 : index
    %45 = vector.load %arg6[%c9_48, %c0_49] : memref<24x256xbf16, #tpu.memory_space<vmem>>, vector<8x256xbf16>
    %c1_50 = arith.constant 1 : index
    %c2_51 = arith.constant 2 : index
    %c0_52 = arith.constant 0 : index
    %c0_53 = arith.constant 0 : index
    %46 = vector.load %arg2[%c1_50, %c2_51, %c0_52, %c0_53] : memref<3x3x256x256xbf16, #tpu.memory_space<vmem>>, vector<1x1x256x256xbf16>
    %47 = vector.shape_cast %46 : vector<1x1x256x256xbf16> to vector<256x256xbf16>
    %cst_54 = arith.constant dense<0.000000e+00> : vector<8x256xf32>
    %48 = tpu.matmul %45, %47, %cst_54 {dimension_numbers = #tpu.dot_dimension_numbers<[1], [0], [0], [1], [0, 0, 1, 1], [], []>} : vector<8x256xbf16>, vector<256x256xbf16>, vector<8x256xf32> -> vector<8x256xf32>
    %49 = arith.addf %44, %48 : vector<8x256xf32>
    %c1_55 = arith.constant 1 : index
    %c0_56 = arith.constant 0 : index
    %c0_57 = arith.constant 0 : index
    %50 = vector.load %arg3[%c1_55, %c0_56, %c0_57] : memref<3x2x256xf32, #tpu.memory_space<vmem>>, vector<1x2x256xf32>
    %51 = vector.shape_cast %50 : vector<1x2x256xf32> to vector<2x256xf32>
    %52 = vector.extract_strided_slice %51 {offsets = [0, 0], sizes = [1, 256], strides = [1, 1]} : vector<2x256xf32> to vector<1x256xf32>
    %53 = vector.broadcast %52 : vector<1x256xf32> to vector<8x256xf32>
    %54 = arith.mulf %49, %53 : vector<8x256xf32>
    %55 = vector.extract_strided_slice %51 {offsets = [1, 0], sizes = [1, 256], strides = [1, 1]} : vector<2x256xf32> to vector<1x256xf32>
    %56 = vector.broadcast %55 : vector<1x256xf32> to vector<8x256xf32>
    %57 = arith.addf %54, %56 : vector<8x256xf32>
    %cst_58 = arith.constant 0.000000e+00 : f32
    %58 = vector.broadcast %cst_58 : f32 to vector<8x256xf32>
    %59 = arith.maximumf %57, %58 : vector<8x256xf32>
    %60 = vector.extract_strided_slice %59 {offsets = [0, 0], sizes = [2, 256], strides = [1, 1]} : vector<8x256xf32> to vector<2x256xf32>
    %61 = arith.truncf %60 : vector<2x256xf32> to vector<2x256xbf16>
    %c8_59 = arith.constant 8 : index
    %c0_60 = arith.constant 0 : index
    %62 = vector.load %arg5[%c8_59, %c0_60] : memref<24x256xbf16, #tpu.memory_space<vmem>>, vector<2x256xbf16>
    tpu.vector_store %arg5[%c8_59, %c0_60], %61 {strides = array<i32>} : memref<24x256xbf16, #tpu.memory_space<vmem>>, vector<2x256xbf16>,
    %c7_61 = arith.constant 7 : index
    %c0_62 = arith.constant 0 : index
    %63 = vector.load %arg5[%c7_61, %c0_62] : memref<24x256xbf16, #tpu.memory_space<vmem>>, vector<8x256xbf16>
    %c2_63 = arith.constant 2 : index
    %c0_64 = arith.constant 0 : index
    %c0_65 = arith.constant 0 : index
    %c0_66 = arith.constant 0 : index
    %64 = vector.load %arg2[%c2_63, %c0_64, %c0_65, %c0_66] : memref<3x3x256x256xbf16, #tpu.memory_space<vmem>>, vector<1x1x256x256xbf16>
    %65 = vector.shape_cast %64 : vector<1x1x256x256xbf16> to vector<256x256xbf16>
    %cst_67 = arith.constant dense<0.000000e+00> : vector<8x256xf32>
    %66 = tpu.matmul %63, %65, %cst_67 {dimension_numbers = #tpu.dot_dimension_numbers<[1], [0], [0], [1], [0, 0, 1, 1], [], []>} : vector<8x256xbf16>, vector<256x256xbf16>, vector<8x256xf32> -> vector<8x256xf32>
    %c8_68 = arith.constant 8 : index
    %c0_69 = arith.constant 0 : index
    %67 = vector.load %arg5[%c8_68, %c0_69] : memref<24x256xbf16, #tpu.memory_space<vmem>>, vector<8x256xbf16>
    %c2_70 = arith.constant 2 : index
    %c1_71 = arith.constant 1 : index
    %c0_72 = arith.constant 0 : index
    %c0_73 = arith.constant 0 : index
    %68 = vector.load %arg2[%c2_70, %c1_71, %c0_72, %c0_73] : memref<3x3x256x256xbf16, #tpu.memory_space<vmem>>, vector<1x1x256x256xbf16>
    %69 = vector.shape_cast %68 : vector<1x1x256x256xbf16> to vector<256x256xbf16>
    %cst_74 = arith.constant dense<0.000000e+00> : vector<8x256xf32>
    %70 = tpu.matmul %67, %69, %cst_74 {dimension_numbers = #tpu.dot_dimension_numbers<[1], [0], [0], [1], [0, 0, 1, 1], [], []>} : vector<8x256xbf16>, vector<256x256xbf16>, vector<8x256xf32> -> vector<8x256xf32>
    %71 = arith.addf %66, %70 : vector<8x256xf32>
    %c9_75 = arith.constant 9 : index
    %c0_76 = arith.constant 0 : index
    %72 = vector.load %arg5[%c9_75, %c0_76] : memref<24x256xbf16, #tpu.memory_space<vmem>>, vector<8x256xbf16>
    %c2_77 = arith.constant 2 : index
    %c2_78 = arith.constant 2 : index
    %c0_79 = arith.constant 0 : index
    %c0_80 = arith.constant 0 : index
    %73 = vector.load %arg2[%c2_77, %c2_78, %c0_79, %c0_80] : memref<3x3x256x256xbf16, #tpu.memory_space<vmem>>, vector<1x1x256x256xbf16>
    %74 = vector.shape_cast %73 : vector<1x1x256x256xbf16> to vector<256x256xbf16>
    %cst_81 = arith.constant dense<0.000000e+00> : vector<8x256xf32>
    %75 = tpu.matmul %72, %74, %cst_81 {dimension_numbers = #tpu.dot_dimension_numbers<[1], [0], [0], [1], [0, 0, 1, 1], [], []>} : vector<8x256xbf16>, vector<256x256xbf16>, vector<8x256xf32> -> vector<8x256xf32>
    %76 = arith.addf %71, %75 : vector<8x256xf32>
    %c2_82 = arith.constant 2 : index
    %c0_83 = arith.constant 0 : index
    %c0_84 = arith.constant 0 : index
    %77 = vector.load %arg3[%c2_82, %c0_83, %c0_84] : memref<3x2x256xf32, #tpu.memory_space<vmem>>, vector<1x2x256xf32>
    %78 = vector.shape_cast %77 : vector<1x2x256xf32> to vector<2x256xf32>
    %79 = vector.extract_strided_slice %78 {offsets = [0, 0], sizes = [1, 256], strides = [1, 1]} : vector<2x256xf32> to vector<1x256xf32>
    %80 = vector.broadcast %79 : vector<1x256xf32> to vector<8x256xf32>
    %81 = arith.mulf %76, %80 : vector<8x256xf32>
    %82 = vector.extract_strided_slice %78 {offsets = [1, 0], sizes = [1, 256], strides = [1, 1]} : vector<2x256xf32> to vector<1x256xf32>
    %83 = vector.broadcast %82 : vector<1x256xf32> to vector<8x256xf32>
    %84 = arith.addf %81, %83 : vector<8x256xf32>
    %85 = vector.extract_strided_slice %84 {offsets = [0, 0], sizes = [2, 256], strides = [1, 1]} : vector<8x256xf32> to vector<2x256xf32>
    %c0_85 = arith.constant 0 : index
    %c0_86 = arith.constant 0 : index
    %c0_87 = arith.constant 0 : index
    %86 = vector.load %arg1[%c0_85, %c0_86, %c0_87] : memref<1x2x256xbf16, #tpu.memory_space<vmem>>, vector<1x2x256xbf16>
    %87 = vector.shape_cast %86 : vector<1x2x256xbf16> to vector<2x256xbf16>
    %88 = arith.extf %87 : vector<2x256xbf16> to vector<2x256xf32>
    %89 = arith.addf %85, %88 : vector<2x256xf32>
    %90 = arith.truncf %89 : vector<2x256xf32> to vector<2x256xbf16>
    %c0_88 = arith.constant 0 : index
    %c0_89 = arith.constant 0 : index
    %c0_90 = arith.constant 0 : index
    %91 = vector.load %arg4[%c0_88, %c0_89, %c0_90] : memref<1x2x256xbf16, #tpu.memory_space<vmem>>, vector<1x2x256xbf16>
    %92 = vector.shape_cast %91 : vector<1x2x256xbf16> to vector<2x256xbf16>
    %93 = vector.shape_cast %90 : vector<2x256xbf16> to vector<1x2x256xbf16>
    tpu.vector_store %arg4[%c0_88, %c0_89, %c0_90], %93 {strides = array<i32>} : memref<1x2x256xbf16, #tpu.memory_space<vmem>>, vector<1x2x256xbf16>,
    return
  }
  func.func @transform_0(%arg0: i32) -> (i32, i32, i32) {
    %c0_i32 = arith.constant 0 : i32
    %c0_i32_0 = arith.constant 0 : i32
    %c0_i32_1 = arith.constant 0 : i32
    return %arg0, %c0_i32, %c0_i32_0 : i32, i32, i32
  }
  func.func @transform_1(%arg0: i32) -> (i32, i32, i32, i32) {
    %c0_i32 = arith.constant 0 : i32
    %c0_i32_0 = arith.constant 0 : i32
    %c0_i32_1 = arith.constant 0 : i32
    %c0_i32_2 = arith.constant 0 : i32
    %c0_i32_3 = arith.constant 0 : i32
    return %c0_i32, %c0_i32_0, %c0_i32_1, %c0_i32_2 : i32, i32, i32, i32
  }
  func.func @transform_2(%arg0: i32) -> (i32, i32, i32) {
    %c0_i32 = arith.constant 0 : i32
    %c0_i32_0 = arith.constant 0 : i32
    %c0_i32_1 = arith.constant 0 : i32
    %c0_i32_2 = arith.constant 0 : i32
    return %c0_i32, %c0_i32_0, %c0_i32_1 : i32, i32, i32
  }
  func.func @transform_3(%arg0: i32) -> (i32, i32, i32) {
    %c0_i32 = arith.constant 0 : i32
    %c0_i32_0 = arith.constant 0 : i32
    %c0_i32_1 = arith.constant 0 : i32
    return %arg0, %c0_i32, %c0_i32_0 : i32, i32, i32
  }
}

module attributes {stable_mosaic.version = 11 : i64} {
  func.func @_out_kernel(%arg0: i32, %arg1: memref<1x2x256xbf16, #tpu.memory_space<vmem>>, %arg2: memref<256x128xbf16, #tpu.memory_space<vmem>>, %arg3: memref<2x128xf32, #tpu.memory_space<vmem>>, %arg4: memref<1x2x128xf32, #tpu.memory_space<vmem>>) attributes {dimension_semantics = [#tpu.dimension_semantics<parallel>], iteration_bounds = array<i64: 2>, scalar_prefetch = 0 : i64, scratch_operands = 0 : i64, tpu.core_type = #tpu.core_type<tc>, window_params = [{transform_indices = @transform_0, window_bounds = array<i64: 1, 2, 256>}, {pipeline_mode = #tpu.pipeline_mode<synchronous>, transform_indices = @transform_1, window_bounds = array<i64: 256, 128>}, {pipeline_mode = #tpu.pipeline_mode<synchronous>, transform_indices = @transform_2, window_bounds = array<i64: 2, 128>}, {transform_indices = @transform_3, window_bounds = array<i64: 1, 2, 128>}]} {
    %c0 = arith.constant 0 : index
    %c0_0 = arith.constant 0 : index
    %c0_1 = arith.constant 0 : index
    %0 = vector.load %arg1[%c0, %c0_0, %c0_1] : memref<1x2x256xbf16, #tpu.memory_space<vmem>>, vector<1x2x256xbf16>
    %1 = vector.shape_cast %0 : vector<1x2x256xbf16> to vector<2x256xbf16>
    %c0_2 = arith.constant 0 : index
    %c0_3 = arith.constant 0 : index
    %2 = vector.load %arg2[%c0_2, %c0_3] : memref<256x128xbf16, #tpu.memory_space<vmem>>, vector<256x128xbf16>
    %cst = arith.constant dense<0.000000e+00> : vector<2x128xf32>
    %3 = tpu.matmul %1, %2, %cst {dimension_numbers = #tpu.dot_dimension_numbers<[1], [0], [0], [1], [0, 0, 1, 1], [], []>} : vector<2x256xbf16>, vector<256x128xbf16>, vector<2x128xf32> -> vector<2x128xf32>
    %c0_4 = arith.constant 0 : index
    %c0_5 = arith.constant 0 : index
    %4 = vector.load %arg3[%c0_4, %c0_5] : memref<2x128xf32, #tpu.memory_space<vmem>>, vector<2x128xf32>
    %5 = vector.extract_strided_slice %4 {offsets = [0, 0], sizes = [1, 128], strides = [1, 1]} : vector<2x128xf32> to vector<1x128xf32>
    %6 = vector.broadcast %5 : vector<1x128xf32> to vector<2x128xf32>
    %7 = arith.mulf %3, %6 : vector<2x128xf32>
    %8 = vector.extract_strided_slice %4 {offsets = [1, 0], sizes = [1, 128], strides = [1, 1]} : vector<2x128xf32> to vector<1x128xf32>
    %9 = vector.broadcast %8 : vector<1x128xf32> to vector<2x128xf32>
    %10 = arith.addf %7, %9 : vector<2x128xf32>
    %c0_6 = arith.constant 0 : index
    %c0_7 = arith.constant 0 : index
    %c0_8 = arith.constant 0 : index
    %11 = vector.load %arg4[%c0_6, %c0_7, %c0_8] : memref<1x2x128xf32, #tpu.memory_space<vmem>>, vector<1x2x128xf32>
    %12 = vector.shape_cast %11 : vector<1x2x128xf32> to vector<2x128xf32>
    %13 = vector.shape_cast %10 : vector<2x128xf32> to vector<1x2x128xf32>
    tpu.vector_store %arg4[%c0_6, %c0_7, %c0_8], %13 {strides = array<i32>} : memref<1x2x128xf32, #tpu.memory_space<vmem>>, vector<1x2x128xf32>,
    return
  }
  func.func @transform_0(%arg0: i32) -> (i32, i32, i32) {
    %c0_i32 = arith.constant 0 : i32
    %c0_i32_0 = arith.constant 0 : i32
    %c0_i32_1 = arith.constant 0 : i32
    return %arg0, %c0_i32, %c0_i32_0 : i32, i32, i32
  }
  func.func @transform_1(%arg0: i32) -> (i32, i32) {
    %c0_i32 = arith.constant 0 : i32
    %c0_i32_0 = arith.constant 0 : i32
    %c0_i32_1 = arith.constant 0 : i32
    return %c0_i32, %c0_i32_0 : i32, i32
  }
  func.func @transform_2(%arg0: i32) -> (i32, i32) {
    %c0_i32 = arith.constant 0 : i32
    %c0_i32_0 = arith.constant 0 : i32
    %c0_i32_1 = arith.constant 0 : i32
    return %c0_i32, %c0_i32_0 : i32, i32
  }
  func.func @transform_3(%arg0: i32) -> (i32, i32, i32) {
    %c0_i32 = arith.constant 0 : i32
    %c0_i32_0 = arith.constant 0 : i32
    %c0_i32_1 = arith.constant 0 : i32
    return %arg0, %c0_i32, %c0_i32_0 : i32, i32, i32
  }
}

</mosaic_0001>

<bundles_post_ra>
// kernel: custom-call.1
= control target key start
LH: loop header
LB: loop body
LE: loop exit
PB: predicated region body
PF: predicated region fallthrough
CT: control target
= control target key end

     0   :  { %s59_s0 = inlined_call_operand.hbm [shape: c64[2,16,64], index: 0, kind: input, shape index: {}]   ;;  %s60_s1 = inlined_call_operand.vmem [shape: f32[2,16,64], index: 1, kind: output, shape index: {}]  }
   0x1   :  { %s2_s8 = scalar_lea.hbm %s59_s0, 512 }
   0x2   :  { %3 = vsyncpa [#allocation0], 0  ;;  %s4_s11 = sshll.u32 %s60_s1, 4  ;;  %s34_s14 = scalar_lea.hbm %s59_s0, 1024  ;;  %s5_s11 = int_to_ptr.vmem [resolvable:$true] %s4_s11 }
   0x3   :  { %p11_p0 = scmp.ne.s32.totalorder %s2_s8, %s34_s14  ;;  %p13_p1 = scmp.lt.u32.totalorder %s2_s8, %s59_s0 }
   0x4   :  { %p14_p2 = scmp.lt.u32.totalorder %s34_s14, %s34_s14  ;;  %p16_p4 = scmp.lt.u32.totalorder %s34_s14, %s2_s8 }
   0x6   :  { %p15_p3 = por %p14_p2, %p13_p1 }
   0x8   :  { %p17_p5 = por %p16_p4, %p15_p3 }
   0xa   :  { %p18_p6 = pnand %p17_p5, %p11_p0 }
   0xc   :  { %21 = shalt.err (!%p18_p6)  }
   0xd   :  { %s22_s17 = scalar_lea.vmem %s5_s11, 512  ;;  %p27_p8 = scmp.lt.s32.totalorder %s5_s11, %s5_s11 }
   0xe   :  { %p23_p7 = scmp.ne.s32.totalorder %s5_s11, %s22_s17  ;;  %p28_p9 = scmp.lt.s32.totalorder %s22_s17, %s22_s17 }
  0x10   :  { %p29_p10 = por %p28_p9, %p27_p8 }
  0x12   :  { %p30_p11 = pnand %p29_p10, %p23_p7 }
  0x14   :  { %33 = shalt.err (!%p30_p11)  }
  0x15   :  { %7 = dma.hbm_to_vmem [thread:$0]  %s2_s8, 512, %s5_s11, [#allocation0] }
  0x16   :  { %35 = dma.done.wait [#allocation0], 512  }
  0x17   :  { %36 = vsyncadd [#allocation0], 4294966784 }
  0x18   :  { %9 = vsyncpa [#allocation0], 1 }

// kernel: custom-call
= control target key start
LH: loop header
LB: loop body
LE: loop exit
PB: predicated region body
PF: predicated region fallthrough
CT: control target
= control target key end

     0   :  { %2 = vsyncpa [#allocation0], 0  ;;  %s61_s0 = inlined_call_operand.hbm [shape: c64[2,16,64], index: 0, kind: input, shape index: {}]   ;;  %s62_s1 = inlined_call_operand.vmem [shape: f32[2,16,64], index: 1, kind: output, shape index: {}]  }
   0x1   :  { %s3_s8 = sshll.u32 %s62_s1, 4  ;;  %s9_s11 = scalar_lea.hbm %s61_s0, 512  ;;  %s4_s8 = int_to_ptr.vmem [resolvable:$true] %s3_s8 }
   0x2   :  { %p10_p0 = scmp.ne.s32.totalorder %s61_s0, %s9_s11  ;;  %s11_s16 = scalar_lea.hbm %s61_s0, 1024 }
   0x3   :  { %p12_p1 = scmp.lt.u32.totalorder %s11_s16, %s9_s11  ;;  %p13_p2 = scmp.lt.u32.totalorder %s9_s11, %s61_s0 }
   0x5   :  { %p14_p3 = por %p13_p2, %p12_p1 }
   0x7   :  { %p15_p4 = pnand %p14_p3, %p10_p0 }
   0x9   :  { %18 = shalt.err (!%p15_p4)  }
   0xa   :  { %s19_s1 = scalar_lea.vmem %s4_s8, 512  ;;  %p24_p6 = scmp.lt.s32.totalorder %s4_s8, %s4_s8 }
   0xb   :  { %p20_p5 = scmp.ne.s32.totalorder %s4_s8, %s19_s1  ;;  %p25_p7 = scmp.lt.s32.totalorder %s19_s1, %s19_s1 }
   0xd   :  { %p26_p8 = por %p25_p7, %p24_p6 }
   0xf   :  { %p27_p9 = pnand %p26_p8, %p20_p5 }
  0x11   :  { %30 = shalt.err (!%p27_p9)  }
  0x12   :  { %6 = dma.hbm_to_vmem [thread:$0]  %s61_s0, 512, %s4_s8, [#allocation0] }
  0x13   :  { %31 = dma.done.wait [#allocation0], 512  }
  0x14   :  { %32 = vsyncadd [#allocation0], 4294966784 }
  0x15   :  { %8 = vsyncpa [#allocation0], 1 }

// kernel: encoder_forward.12
= control target key start
LH: loop header
LB: loop body
LE: loop exit
PB: predicated region body
PF: predicated region fallthrough
CT: control target
= control target key end

     0   :  { %s446_s9 = smov 0   ;;  %s511_s0 = inlined_call_operand.vmem [shape: f32[2,16,128], index: 0, kind: input, shape index: {}]   ;;  %s512_s1 = inlined_call_operand.vmem [shape: bf16[128,256], index: 1, kind: input, shape index: {}]   ;;  %s513_s2 = inlined_call_operand.vmem [shape: bf16[2,16,256], index: 2, kind: output, shape index: {}]  }
   0x1 LB: > { %s356_s10 = sadd.s32 4294967295, %s428_s9   ;;  %p360_p0 = scmp.ge.s32.totalorder %s428_s9, 1  ;;  %s428_s9 = sphi %s446_s9, %s12_s9  }
   0x2   : > { %p112_p1 = scmp.lt.s32.totalorder %s428_s9, 3 }
   0x4   : > { %p113_p2 = pnand %p360_p0, %p112_p1 }
   0x5   : > { %v398_v0 = vld [vmem:[%s512_s1 + $0x4] ss:$8 sps:$4 sm:$0xff] (!%p113_p2)   ;;  %v400_v1 = vld [vmem:[%s512_s1] ss:$8 sps:$4 sm:$0xff] (!%p113_p2)   ;;  %v430_v2 = vmov (!%p113_p2), 0   ;;  %p134_p3 = scmp.lt.s32.totalorder (!%p113_p2), %s356_s10, 1 }
   0x6   : > { %116 = sbr.rel (%p113_p2) target bundleno = 256 (0x100), region = 28  ;;  %276 = vmatprep.mubr.bf16.mxu0 (!%p113_p2), %v430_v2  ;;  %244 = vmatprep.subr.bf16.mxu0 (!%p113_p2), %v398_v0  ;;  %v401_v3 = vld [vmem:[%s512_s1 + $0x14] ss:$8 sps:$4 sm:$0xff] (!%p113_p2)   ;;  %v403_v4 = vld [vmem:[%s512_s1 + $0x10] ss:$8 sps:$4 sm:$0xff] (!%p113_p2)  }
   0x7   : > { %245 = vmatpush1.bf16.msra.mxu0 (!%p113_p2), %v400_v1  ;;  %v404_v5 = vld [vmem:[%s512_s1 + $0x24] ss:$8 sps:$4 sm:$0xff] (!%p113_p2)   ;;  %v406_v6 = vld [vmem:[%s512_s1 + $0x20] ss:$8 sps:$4 sm:$0xff] (!%p113_p2)   ;;  %v407_v7 = vld [vmem:[%s512_s1 + $0x34] ss:$8 sps:$4 sm:$0xff] (!%p113_p2)  }
   0x8   : > { %246 = vmatprep.subr.bf16.mxu0 (!%p113_p2), %v401_v3  ;;  %v409_v8 = vld [vmem:[%s512_s1 + $0x30] ss:$8 sps:$4 sm:$0xff] (!%p113_p2)   ;;  %v410_v9 = vld [vmem:[%s512_s1 + $0x44] ss:$8 sps:$4 sm:$0xff] (!%p113_p2)   ;;  %v412_v10 = vld [vmem:[%s512_s1 + $0x40] ss:$8 sps:$4 sm:$0xff] (!%p113_p2)  }
   0x9   : > { %v413_v11 = vld [vmem:[%s512_s1 + $0x54] ss:$8 sps:$4 sm:$0xff] (!%p113_p2)   ;;  %v415_v12 = vld [vmem:[%s512_s1 + $0x50] ss:$8 sps:$4 sm:$0xff] (!%p113_p2)   ;;  %v416_v13 = vld [vmem:[%s512_s1 + $0x64] ss:$8 sps:$4 sm:$0xff] (!%p113_p2)  }
   0xa   : > { %v418_v14 = vld [vmem:[%s512_s1 + $0x60] ss:$8 sps:$4 sm:$0xff] (!%p113_p2)   ;;  %v419_v15 = vld [vmem:[%s512_s1 + $0x74] ss:$8 sps:$4 sm:$0xff] (!%p113_p2)   ;;  %v421_v16 = vld [vmem:[%s512_s1 + $0x70] ss:$8 sps:$4 sm:$0xff] (!%p113_p2)  }
   0xb   : > { %247 = vmatpush1.bf16.msra.mxu0 (!%p113_p2), %v403_v4 }
   0xc   : > { %248 = vmatprep.subr.bf16.mxu0 (!%p113_p2), %v404_v5 }
   0xd   : > { %s515_s10 = smov (!%p134_p3, %s356_s10), 1 }
   0xe   : > { %s385_s11 = sshll.u32 %s515_s10, 4 }
   0xf   : > { %249 = vmatpush1.bf16.msra.mxu0 %v406_v6  ;;  %s138_s18 = scalar_lea.vmem %s511_s0, %s385_s11  ;;  %s143_s22 = scalar_lea.vmem %s513_s2, %s385_s11 }
  0x10   : > { %250 = vmatprep.subr.bf16.mxu0 %v407_v7  ;;  %v145_v17 = vld [vmem:[%s138_s18] sm:$0xff]  ;;  %v146_v18 = vld [vmem:[%s138_s18 + $0x8] sm:$0xff] }
  0x11   : > { %v147_v19 = vpack.c.bf16 %v146_v18, %v145_v17 }
  0x13   : > { %251 = vmatpush1.bf16.msra.mxu0 %v409_v8 }
  0x14   : > { %252 = vmatprep.subr.bf16.mxu0 %v410_v9 }
  0x17   : > { %253 = vmatpush1.bf16.msra.mxu0 %v412_v10 }
  0x18   : > { %254 = vmatprep.subr.bf16.mxu0 %v413_v11 }
  0x1b   : > { %255 = vmatpush1.bf16.msra.mxu0 %v415_v12 }
  0x1c   : > { %256 = vmatprep.subr.bf16.mxu0 %v416_v13 }
  0x1f   : > { %257 = vmatpush1.bf16.msra.mxu0 %v418_v14 }
  0x20   : > { %258 = vmatprep.subr.bf16.mxu0 %v419_v15 }
  0x23   : > { %259 = vmatpush1.bf16.msra.mxu0 %v421_v16 }
  0x26   : > { %277 = vmatmul.mubr.bf16.vlgmr.msra.gmra.mrb[0].mxu0 %v147_v19 }
  0xf9   : > { %v278_v20 = vpop.f32.mrb[0].mxu0 }
  0xfa   : > { %v280_v21 = vpop.f32.mrb[1].mxu0 }
  0xfb   : > { %v387_v22 = vpack.c.bf16 %v280_v21, %v278_v20  ;;  %v282_v23 = vpop.f32.mrb[2].mxu0 }
  0xfc   : > { %v284_v24 = vpop.f32.mrb[3].mxu0 }
  0xfd   : > { %299 = vst [vmem:[%s143_s22] sm:$0xff] %v387_v22  ;;  %v388_v25 = vpack.c.bf16 %v284_v24, %v282_v23 }
  0xff   : > { %300 = vst [vmem:[%s143_s22 + $0x8] sm:$0xff] %v388_v25 }
 0x100 PF: > { %s12_s9 = sadd.s32 1, %s428_s9  }
 0x101   : > { %p9_p4 = scmp.ge.s32.totalorder %s12_s9, 4  }
 0x103   :  { %11 = sbr.rel (!%p9_p4) target bundleno = 1 (0x1), region = 58 }

// kernel: encoder_forward.13
= control target key start
LH: loop header
LB: loop body
LE: loop exit
PB: predicated region body
PF: predicated region fallthrough
CT: control target
= control target key end

     0   :  { %s3930_s12 = smov 0   ;;  %s4932_s0 = inlined_call_operand.vmem [shape: bf16[2,16,256], index: 0, kind: input, shape index: {}]   ;;  %s4933_s1 = inlined_call_operand.vmem [shape: bf16[3,3,256,256], index: 1, kind: input, shape index: {}]   ;;  %s4934_s2 = inlined_call_operand.vmem [shape: f32[3,2,256], index: 2, kind: input, shape index: {}]   ;;  %s4935_s3 = inlined_call_operand.vmem [shape: bf16[2,16,256], index: 3, kind: output, shape index: {}]  }
   0x1 LB: > { %s2865_s13 = sadd.s32 4294967295, %s3907_s12   ;;  %p2869_p0 = scmp.ge.s32.totalorder %s3907_s12, 1  ;;  %s3907_s12 = sphi %s3930_s12, %s13_s12  }
   0x2   : > { %p137_p1 = scmp.lt.s32.totalorder %s3907_s12, 3 }
   0x4   : > { %p138_p2 = pnand %p2869_p0, %p137_p1 }
   0x5   : > { %v3465_v0 = vld [vmem:[%s4933_s1 + $0x4] ss:$8 sps:$4 sm:$0xff] (!%p138_p2)   ;;  %v3467_v1 = vld [vmem:[%s4933_s1] ss:$8 sps:$4 sm:$0xff] (!%p138_p2)   ;;  %v3909_v2 = vmov (!%p138_p2), 0   ;;  %p161_p3 = scmp.lt.s32.totalorder (!%p138_p2), %s2865_s13, 1 }
   0x6   : > { %141 = sbr.rel (%p138_p2) target bundleno = 1090 (0x442), region = 32  ;;  %173 = vst [vmem:[#allocation2 + $0x8] sm:$0xf] (!%p138_p2), %v3909_v2  ;;  %172 = vst [vmem:[#allocation2] sm:$0xf] (!%p138_p2), %v3909_v2  ;;  %684 = vmatprep.subr.bf16.mxu0 (!%p138_p2), %v3465_v0  ;;  %vm275_vm1 = vcmask (!%p138_p2), 1043456  }
   0x7   : > { %174 = vst [vmem:[#allocation2 + $0x10] sm:$0xf0] (!%p138_p2), %v3909_v2  ;;  %175 = vst [vmem:[#allocation2 + $0x18] sm:$0xf0] (!%p138_p2), %v3909_v2  ;;  %v3468_v3 = vld [vmem:[%s4933_s1 + $0x14] ss:$8 sps:$4 sm:$0xff] (!%p138_p2)   ;;  %685 = vmatpush1.bf16.msra.mxu0 (!%p138_p2), %v3467_v1 }
   0x8   : > { %176 = vst [vmem:[#allocation3] sm:$0xf] (!%p138_p2), %v3909_v2  ;;  %177 = vst [vmem:[#allocation3 + $0x8] sm:$0xf] (!%p138_p2), %v3909_v2  ;;  %v3470_v4 = vld [vmem:[%s4933_s1 + $0x10] ss:$8 sps:$4 sm:$0xff] (!%p138_p2)   ;;  %686 = vmatprep.subr.bf16.mxu0 (!%p138_p2), %v3468_v3 }
   0x9   : > { %178 = vst [vmem:[#allocation3 + $0x10] sm:$0xf0] (!%p138_p2), %v3909_v2  ;;  %179 = vst [vmem:[#allocation3 + $0x18] sm:$0xf0] (!%p138_p2), %v3909_v2  ;;  %v3471_v5 = vld [vmem:[%s4933_s1 + $0x24] ss:$8 sps:$4 sm:$0xff] (!%p138_p2)  }
   0xa   : > { %v3473_v6 = vld [vmem:[%s4933_s1 + $0x20] ss:$8 sps:$4 sm:$0xff] (!%p138_p2)   ;;  %v3474_v7 = vld [vmem:[%s4933_s1 + $0x34] ss:$8 sps:$4 sm:$0xff] (!%p138_p2)   ;;  %v3476_v8 = vld [vmem:[%s4933_s1 + $0x30] ss:$8 sps:$4 sm:$0xff] (!%p138_p2)  }
   0xb   : > { %687 = vmatpush1.bf16.msra.mxu0 (!%p138_p2), %v3470_v4  ;;  %v3477_v9 = vld [vmem:[%s4933_s1 + $0x44] ss:$8 sps:$4 sm:$0xff] (!%p138_p2)   ;;  %v3479_v10 = vld [vmem:[%s4933_s1 + $0x40] ss:$8 sps:$4 sm:$0xff] (!%p138_p2)   ;;  %v3480_v11 = vld [vmem:[%s4933_s1 + $0x54] ss:$8 sps:$4 sm:$0xff] (!%p138_p2)  }
   0xc   : > { %688 = vmatprep.subr.bf16.mxu0 (!%p138_p2), %v3471_v5  ;;  %v3482_v12 = vld [vmem:[%s4933_s1 + $0x50] ss:$8 sps:$4 sm:$0xff] (!%p138_p2)   ;;  %v3483_v13 = vld [vmem:[%s4933_s1 + $0x64] ss:$8 sps:$4 sm:$0xff] (!%p138_p2)   ;;  %v3485_v15 = vld [vmem:[%s4933_s1 + $0x60] ss:$8 sps:$4 sm:$0xff] (!%p138_p2)  }
   0xd   : > { %s4937_s13 = smov (!%p161_p3, %s2865_s13), 1  ;;  %v3512_v14 = vld [vmem:[%s4933_s1 + $0x104] ss:$8 sps:$4 sm:$0xff]   ;;  %v3515_v16 = vld [vmem:[%s4933_s1 + $0x100] ss:$8 sps:$4 sm:$0xff]  }
   0xe   : > { %s3428_s9 = sshll.u32 %s4937_s13, 4  ;;  %444 = vmatprep.subr.bf16.mxu1 %v3512_v14  ;;  %v3486_v21 = vld [vmem:[%s4933_s1 + $0x74] ss:$8 sps:$4 sm:$0xff]   ;;  %v3525_v25 = vld [vmem:[%s4933_s1 + $0x110] ss:$8 sps:$4 sm:$0xff]  }
   0xf   : > { %689 = vmatpush1.bf16.msra.mxu0 %v3473_v6  ;;  %s3986_s16 = scalar_lea.vmem %s4932_s0, %s3428_s9  ;;  %445 = vmatpush1.bf16.msra.mxu1 %v3515_v16  ;;  %v3521_v24 = vld [vmem:[%s4933_s1 + $0x114] ss:$8 sps:$4 sm:$0xff]   ;;  %v3488_v26 = vld [vmem:[%s4933_s1 + $0x70] ss:$8 sps:$4 sm:$0xff]   ;;  %v3489_v27 = vld [vmem:[%s4933_s1 + $0x84] ss:$8 sps:$4 sm:$0xff]   ;;  %s170_s24 = scalar_lea.vmem %s4935_s3, %s3428_s9 }
  0x10   : > { %690 = vmatprep.subr.bf16.mxu0 %v3474_v7  ;;  %v180_v17 = vld [vmem:[%s3986_s16] sm:$0xff]  ;;  %v181_v18 = vld [vmem:[%s3986_s16 + $0x8] sm:$0xff]  ;;  %446 = vmatprep.subr.bf16.mxu1 %v3521_v24  ;;  %v3535_v30 = vld [vmem:[%s4933_s1 + $0x134] ss:$8 sps:$4 sm:$0xff]   ;;  %vm487_vm0 = vsmask.f32 4352 }
  0x11   : > { %v2875_v19 = vcombine.high %v180_v17, %v180_v17  ;;  %v2874_v20 = vcombine.low %v180_v17, %v180_v17  ;;  %v2877_v22 = vcombine.high %v181_v18, %v181_v18  ;;  %v2876_v23 = vcombine.low %v181_v18, %v181_v18  ;;  %v3529_v28 = vld [vmem:[%s4933_s1 + $0x124] ss:$8 sps:$4 sm:$0xff]   ;;  %v3531_v29 = vld [vmem:[%s4933_s1 + $0x120] ss:$8 sps:$4 sm:$0xff]   ;;  %v3492_v32 = vld [vmem:[%s4933_s1 + $0x94] ss:$8 sps:$4 sm:$0xff]  }
  0x12   : > { %v3491_v31 = vld [vmem:[%s4933_s1 + $0x80] ss:$8 sps:$4 sm:$0xff]   ;;  %v3537_v34 = vld [vmem:[%s4933_s1 + $0x130] ss:$8 sps:$4 sm:$0xff]   ;;  %v3495_v43 = vld [vmem:[%s4933_s1 + $0xa4] ss:$8 sps:$4 sm:$0xff]  }
  0x13   : > { %691 = vmatpush1.bf16.msra.mxu0 %v3476_v8  ;;  %197 = vst [vmem:[#allocation2 + $0x8] sm:$0xf0] %v2875_v19  ;;  %196 = vst [vmem:[#allocation2] sm:$0xf0] %v2874_v20  ;;  %447 = vmatpush1.bf16.msra.mxu1 %v3525_v25  ;;  %v3494_v40 = vld [vmem:[%s4933_s1 + $0x90] ss:$8 sps:$4 sm:$0xff]  }
  0x14   : > { %692 = vmatprep.subr.bf16.mxu0 %v3477_v9  ;;  %199 = vst [vmem:[#allocation2 + $0x18] sm:$0xf] %v2877_v22  ;;  %198 = vst [vmem:[#allocation2 + $0x10] sm:$0xf] %v2876_v23  ;;  %448 = vmatprep.subr.bf16.mxu1 %v3529_v28  ;;  %v3541_v46 = vld [vmem:[%s4933_s1 + $0x144] ss:$8 sps:$4 sm:$0xff]  }
  0x15   : > { %v3543_v48 = vld [vmem:[%s4933_s1 + $0x140] ss:$8 sps:$4 sm:$0xff]   ;;  %v3498_v51 = vld [vmem:[%s4933_s1 + $0xb4] ss:$8 sps:$4 sm:$0xff]   ;;  %v3549_v54 = vld [vmem:[%s4933_s1 + $0x150] ss:$8 sps:$4 sm:$0xff]  }
  0x16   : > { %v3497_v49 = vld [vmem:[%s4933_s1 + $0xa0] ss:$8 sps:$4 sm:$0xff]   ;;  %v3547_v52 = vld [vmem:[%s4933_s1 + $0x154] ss:$8 sps:$4 sm:$0xff]   ;;  %v3553_v55 = vld [vmem:[%s4933_s1 + $0x164] ss:$8 sps:$4 sm:$0xff]  }
  0x17   : > { %693 = vmatpush1.bf16.msra.mxu0 %v3479_v10  ;;  %449 = vmatpush1.bf16.msra.mxu1 %v3531_v29  ;;  %v3500_v56 = vld [vmem:[%s4933_s1 + $0xb0] ss:$8 sps:$4 sm:$0xff]   ;;  %v3501_v57 = vld [vmem:[%s4933_s1 + $0xc4] ss:$8 sps:$4 sm:$0xff]   ;;  %v3555_v58 = vld [vmem:[%s4933_s1 + $0x160] ss:$8 sps:$4 sm:$0xff]  }
  0x18   : > { %694 = vmatprep.subr.bf16.mxu0 %v3480_v11  ;;  %450 = vmatprep.subr.bf16.mxu1 %v3535_v30  ;;  %v3559_v59 = vld [vmem:[%s4933_s1 + $0x174] ss:$8 sps:$4 sm:$0xff]   ;;  %v3503_v60 = vld [vmem:[%s4933_s1 + $0xc0] ss:$8 sps:$4 sm:$0xff]   ;;  %v3561_v0 = vld [vmem:[%s4933_s1 + $0x170] ss:$8 sps:$4 sm:$0xff]  }
  0x19   : > { %v3504_v61 = vld [vmem:[%s4933_s1 + $0xd4] ss:$8 sps:$4 sm:$0xff]   ;;  %v3565_v1 = vld [vmem:[%s4933_s1 + $0x184] ss:$8 sps:$4 sm:$0xff]   ;;  %v3506_v2 = vld [vmem:[%s4933_s1 + $0xd0] ss:$8 sps:$4 sm:$0xff]  }
  0x1a   : > { %v201_v33 = vld [vmem:[#allocation2 + $0x8] sm:$0xf8]  ;;  %v200_v62 = vld [vmem:[#allocation2] sm:$0xf8]  ;;  %v3571_v9 = vld [vmem:[%s4933_s1 + $0x194] ss:$8 sps:$4 sm:$0xff]  }
  0x1b   : > { %695 = vmatpush1.bf16.msra.mxu0 %v3482_v12  ;;  %v4035_v35 = vld [vmem:[#allocation2 + $0x18] sm:$0xf]  ;;  %v506_v36 = vshrl.u32 %v201_v33, 16  ;;  %v509_v37 = vshll.u32 %v201_v33, 16  ;;  %451 = vmatpush1.bf16.msra.mxu1 %v3537_v34  ;;  %v4085_v63 = vld [vmem:[#allocation2 + $0x10] sm:$0xf] }
  0x1c   : > { %696 = vmatprep.subr.bf16.mxu0 %v3483_v13  ;;  %v514_v38 = vshrl.u32 %v4035_v35, 16  ;;  %v517_v39 = vshll.u32 %v4035_v35, 16  ;;  %452 = vmatprep.subr.bf16.mxu1 %v3541_v46  ;;  %v3507_v3 = vld [vmem:[%s4933_s1 + $0xe4] ss:$8 sps:$4 sm:$0xff]   ;;  %v489_v4 = vshrl.u32 %v200_v62, 16  ;;  %v492_v5 = vshll.u32 %v200_v62, 16 }
  0x1d   : > { %v508_v41 = vrot.slane %v506_v36, 3  ;;  %v511_v42 = vrot.slane %v509_v37, 4  ;;  %v497_v6 = vshrl.u32 %v4085_v63, 16  ;;  %v500_v7 = vshll.u32 %v4085_v63, 16  ;;  %v3567_v8 = vld [vmem:[%s4933_s1 + $0x180] ss:$8 sps:$4 sm:$0xff]  }
  0x1e   : > { %v516_v44 = vrot.slane %v514_v38, 3  ;;  %v519_v45 = vrot.slane %v517_v39, 4  ;;  %v3509_v10 = vld [vmem:[%s4933_s1 + $0xe0] ss:$8 sps:$4 sm:$0xff]   ;;  %v3510_v11 = vld [vmem:[%s4933_s1 + $0xf4] ss:$8 sps:$4 sm:$0xff]  }
  0x1f   : > { %697 = vmatpush1.bf16.msra.mxu0 %v3485_v15  ;;  %v512_v47 = vor.u32 %v511_v42, %v508_v41  ;;  %453 = vmatpush1.bf16.msra.mxu1 %v3543_v48  ;;  %v491_v12 = vrot.slane %v489_v4, 3  ;;  %v494_v13 = vrot.slane %v492_v5, 4  ;;  %v499_v14 = vrot.slane %v497_v6, 3  ;;  %v3573_v16 = vld [vmem:[%s4933_s1 + $0x190] ss:$8 sps:$4 sm:$0xff]  }
  0x20   : > { %698 = vmatprep.subr.bf16.mxu0 %v3486_v21  ;;  %v520_v50 = vor.u32 %v519_v45, %v516_v44  ;;  %454 = vmatprep.subr.bf16.mxu1 %v3547_v52  ;;  %v502_v15 = vrot.slane %v500_v7, 4  ;;  %v3577_v17 = vld [vmem:[%s4933_s1 + $0x1a4] ss:$8 sps:$4 sm:$0xff]   ;;  %v3514_v18 = vld [vmem:[%s4933_s1 + $0xf0] ss:$8 sps:$4 sm:$0xff]   ;;  %v280_v29 = vrot.slane %v4035_v35, 4 }
  0x21   : > { %v3520_v19 = vld [vmem:[%s4933_s1 + $0x204] ss:$8 sps:$4 sm:$0xff]   ;;  %v495_v20 = vor.u32 %v494_v13, %v491_v12  ;;  %v3579_v22 = vld [vmem:[%s4933_s1 + $0x1a0] ss:$8 sps:$4 sm:$0xff]   ;;  %v3583_v23 = vld [vmem:[%s4933_s1 + $0x1b4] ss:$8 sps:$4 sm:$0xff]  }
  0x22   : > { %v521_v53 = vsel %vm487_vm0, %v512_v47, %v520_v50  ;;  %v503_v21 = vor.u32 %v502_v15, %v499_v14  ;;  %v3518_v24 = vld [vmem:[%s4933_s1 + $0x200] ss:$8 sps:$4 sm:$0xff]   ;;  %v3589_v28 = vld [vmem:[%s4933_s1 + $0x1c4] ss:$8 sps:$4 sm:$0xff]   ;;  %v728_v36 = vld [vmem:[#allocation2 + $0x18] sm:$0x1f] }
  0x23   : > { %699 = vmatpush1.bf16.msra.mxu0 %v3488_v26  ;;  %716 = vmatprep.mubr.bf16.mxu0 %v521_v53  ;;  %v3528_v26 = vld [vmem:[%s4933_s1 + $0x214] ss:$8 sps:$4 sm:$0xff]   ;;  %v237_v30 = vld [vmem:[#allocation2 + $0x8] sm:$0xf0]  ;;  %v3591_v35 = vld [vmem:[%s4933_s1 + $0x1c0] ss:$8 sps:$4 sm:$0xff]  }
  0x24   : > { %700 = vmatprep.subr.bf16.mxu0 %v3489_v27  ;;  %455 = vmatpush1.bf16.msra.mxu1 %v3549_v54  ;;  %v504_v25 = vsel %vm487_vm0, %v495_v20, %v503_v21  ;;  %v3585_v27 = vld [vmem:[%s4933_s1 + $0x1b0] ss:$8 sps:$4 sm:$0xff]   ;;  %v781_v33 = vshrl.u32 %v237_v30, 16  ;;  %v3534_v34 = vld [vmem:[%s4933_s1 + $0x224] ss:$8 sps:$4 sm:$0xff]   ;;  %v789_v41 = vshrl.u32 %v728_v36, 16 }
  0x25   : > { %456 = vmatprep.subr.bf16.mxu1 %v3553_v55  ;;  %v3595_v37 = vld [vmem:[%s4933_s1 + $0x1d4] ss:$8 sps:$4 sm:$0xff]   ;;  %v792_v42 = vshll.u32 %v728_v36, 16  ;;  %v3597_v46 = vld [vmem:[%s4933_s1 + $0x1d0] ss:$8 sps:$4 sm:$0xff]  }
  0x26   : > { %v783_v39 = vrot.slane %v781_v33, 4  ;;  %v3540_v45 = vld [vmem:[%s4933_s1 + $0x234] ss:$8 sps:$4 sm:$0xff]   ;;  %v791_v47 = vrot.slane %v789_v41, 4  ;;  %vm762_vm2 = vsmask.f32 3328 }
  0x27   : > { %701 = vmatpush1.bf16.msra.mxu0 %v3491_v31  ;;  %v3526_v31 = vld [vmem:[%s4933_s1 + $0x210] ss:$8 sps:$4 sm:$0xff]   ;;  %v794_v48 = vrot.slane %v792_v42, 5  ;;  %v3546_v53 = vld [vmem:[%s4933_s1 + $0x244] ss:$8 sps:$4 sm:$0xff]  }
  0x28   : > { %702 = vmatprep.subr.bf16.mxu0 %v3492_v32  ;;  %457 = vmatpush1.bf16.msra.mxu1 %v3555_v58  ;;  %v279_v32 = vrot.slane %v237_v30, 4  ;;  %v3538_v52 = vld [vmem:[%s4933_s1 + $0x230] ss:$8 sps:$4 sm:$0xff]   ;;  %v3603_v54 = vld [vmem:[%s4933_s1 + $0x1e0] ss:$8 sps:$4 sm:$0xff]  }
  0x29   : > { %458 = vmatprep.subr.bf16.mxu1 %v3559_v59  ;;  %v3544_v58 = vld [vmem:[%s4933_s1 + $0x240] ss:$8 sps:$4 sm:$0xff]   ;;  %v277_v59 = vrot.slane %v4085_v63, 4  ;;  %v3615_v63 = vld [vmem:[%s4933_s1 + $0x404] ss:$8 sps:$4 sm:$0xff]  }
  0x2a   : > { %v281_v38 = vsel %vm275_vm1, %v279_v32, %v280_v29  ;;  %v3556_v5 = vld [vmem:[%s4933_s1 + $0x260] ss:$8 sps:$4 sm:$0xff]   ;;  %v3564_v6 = vld [vmem:[%s4933_s1 + $0x274] ss:$8 sps:$4 sm:$0xff]   ;;  %v3616_v7 = vld [vmem:[%s4933_s1 + $0x410] ss:$8 sps:$4 sm:$0xff]  }
  0x2b   : > { %703 = vmatpush1.bf16.msra.mxu0 %v3494_v40  ;;  %v784_v40 = vshll.u32 %v237_v30, 16  ;;  %476 = vmatprep.mubr.bf16.mxu1 %v281_v38  ;;  %v3624_v12 = vld [vmem:[%s4933_s1 + $0x434] ss:$8 sps:$4 sm:$0xff]   ;;  %v3568_v13 = vld [vmem:[%s4933_s1 + $0x280] ss:$8 sps:$4 sm:$0xff]  }
  0x2c   : > { %704 = vmatprep.subr.bf16.mxu0 %v3495_v43  ;;  %459 = vmatpush1.bf16.msra.mxu1 %v3561_v0  ;;  %v3532_v43 = vld [vmem:[%s4933_s1 + $0x220] ss:$8 sps:$4 sm:$0xff]   ;;  %v3550_v0 = vld [vmem:[%s4933_s1 + $0x250] ss:$8 sps:$4 sm:$0xff]   ;;  %v3576_v14 = vld [vmem:[%s4933_s1 + $0x294] ss:$8 sps:$4 sm:$0xff]  }
  0x2d   : > { %460 = vmatprep.subr.bf16.mxu1 %v3565_v1  ;;  %v786_v44 = vrot.slane %v784_v40, 5  ;;  %v3558_v1 = vld [vmem:[%s4933_s1 + $0x264] ss:$8 sps:$4 sm:$0xff]   ;;  %v3622_v15 = vld [vmem:[%s4933_s1 + $0x430] ss:$8 sps:$4 sm:$0xff]  }
  0x2e   : > { %v3630_v20 = vld [vmem:[%s4933_s1 + $0x454] ss:$8 sps:$4 sm:$0xff]   ;;  %v3580_v21 = vld [vmem:[%s4933_s1 + $0x2a0] ss:$8 sps:$4 sm:$0xff]   ;;  %v3634_v32 = vld [vmem:[%s4933_s1 + $0x470] ss:$8 sps:$4 sm:$0xff]  }
  0x2f   : > { %705 = vmatpush1.bf16.msra.mxu0 %v3497_v49  ;;  %v3601_v49 = vld [vmem:[%s4933_s1 + $0x1e4] ss:$8 sps:$4 sm:$0xff]   ;;  %v787_v50 = vor.u32 %v786_v44, %v783_v39  ;;  %v3592_v29 = vld [vmem:[%s4933_s1 + $0x2c0] ss:$8 sps:$4 sm:$0xff]   ;;  %v3600_v30 = vld [vmem:[%s4933_s1 + $0x2d4] ss:$8 sps:$4 sm:$0xff]  }
  0x30   : > { %706 = vmatprep.subr.bf16.mxu0 %v3498_v51  ;;  %461 = vmatpush1.bf16.msra.mxu1 %v3567_v8  ;;  %v795_v51 = vor.u32 %v794_v48, %v791_v47  ;;  %v3621_v8 = vld [vmem:[%s4933_s1 + $0x424] ss:$8 sps:$4 sm:$0xff]   ;;  %v3604_v41 = vld [vmem:[%s4933_s1 + $0x2e0] ss:$8 sps:$4 sm:$0xff]   ;;  %v3612_v42 = vld [vmem:[%s4933_s1 + $0x2f4] ss:$8 sps:$4 sm:$0xff]  }
  0x31   : > { %462 = vmatprep.subr.bf16.mxu1 %v3571_v9  ;;  %v3562_v9 = vld [vmem:[%s4933_s1 + $0x270] ss:$8 sps:$4 sm:$0xff]   ;;  %v3639_v33 = vld [vmem:[%s4933_s1 + $0x484] ss:$8 sps:$4 sm:$0xff]  }
  0x32   : > { %v796_v55 = vsel %vm762_vm2, %v787_v50, %v795_v51  ;;  %v3610_v47 = vld [vmem:[%s4933_s1 + $0x2f0] ss:$8 sps:$4 sm:$0xff]  }
  0x33   : > { %707 = vmatpush1.bf16.msra.mxu0 %v3500_v56  ;;  %v3607_v56 = vld [vmem:[%s4933_s1 + $0x1f4] ss:$8 sps:$4 sm:$0xff]   ;;  %v3640_v51 = vld [vmem:[%s4933_s1 + $0x490] ss:$8 sps:$4 sm:$0xff]  }
  0x34   : > { %708 = vmatprep.subr.bf16.mxu0 %v3501_v57  ;;  %463 = vmatpush1.bf16.msra.mxu1 %v3573_v16  ;;  %v4183_v57 = vld [vmem:[#allocation2] sm:$0xf0] }
  0x35   : > { %464 = vmatprep.subr.bf16.mxu1 %v3577_v17  ;;  %v276_v62 = vrot.slane %v4183_v57, 4  ;;  %v3627_v16 = vld [vmem:[%s4933_s1 + $0x444] ss:$8 sps:$4 sm:$0xff]   ;;  %v3574_v17 = vld [vmem:[%s4933_s1 + $0x290] ss:$8 sps:$4 sm:$0xff]   ;;  %v764_v36 = vshrl.u32 %v4183_v57, 16 }
  0x36   : > { %v767_v38 = vshll.u32 %v4183_v57, 16  ;;  %v3651_v57 = vld [vmem:[%s4933_s1 + $0x4c4] ss:$8 sps:$4 sm:$0xff]  }
  0x37   : > { %709 = vmatpush1.bf16.msra.mxu0 %v3503_v60  ;;  %v3552_v60 = vld [vmem:[%s4933_s1 + $0x254] ss:$8 sps:$4 sm:$0xff]   ;;  %v278_v4 = vsel %vm275_vm1, %v276_v62, %v277_v59  ;;  %v3657_v62 = vld [vmem:[%s4933_s1 + $0x4e4] ss:$8 sps:$4 sm:$0xff]  }
  0x38   : > { %710 = vmatprep.subr.bf16.mxu0 %v3504_v61  ;;  %465 = vmatpush1.bf16.msra.mxu1 %v3579_v22  ;;  %v3609_v61 = vld [vmem:[%s4933_s1 + $0x1f0] ss:$8 sps:$4 sm:$0xff]   ;;  %v3588_v22 = vld [vmem:[%s4933_s1 + $0x2b4] ss:$8 sps:$4 sm:$0xff]   ;;  %v769_v44 = vrot.slane %v767_v38, 5 }
  0x39   : > { %466 = vmatprep.subr.bf16.mxu1 %v3583_v23  ;;  %v3628_v23 = vld [vmem:[%s4933_s1 + $0x450] ss:$8 sps:$4 sm:$0xff]   ;;  %v3654_v59 = vld [vmem:[%s4933_s1 + $0x4d4] ss:$8 sps:$4 sm:$0xff]  }
  0x3b   : > { %711 = vmatpush1.bf16.msra.mxu0 %v3506_v2  ;;  %v3613_v2 = vld [vmem:[%s4933_s1 + $0x400] ss:$8 sps:$4 sm:$0xff]  }
  0x3c   : > { %712 = vmatprep.subr.bf16.mxu0 %v3507_v3  ;;  %467 = vmatpush1.bf16.msra.mxu1 %v3585_v27  ;;  %v3618_v3 = vld [vmem:[%s4933_s1 + $0x414] ss:$8 sps:$4 sm:$0xff]   ;;  %v3631_v27 = vld [vmem:[%s4933_s1 + $0x460] ss:$8 sps:$4 sm:$0xff]  }
  0x3d   : > { %468 = vmatprep.subr.bf16.mxu1 %v3589_v28  ;;  %v3636_v28 = vld [vmem:[%s4933_s1 + $0x474] ss:$8 sps:$4 sm:$0xff]  }
  0x3f   : > { %713 = vmatpush1.bf16.msra.mxu0 %v3509_v10  ;;  %v3570_v10 = vld [vmem:[%s4933_s1 + $0x284] ss:$8 sps:$4 sm:$0xff]  }
  0x40   : > { %714 = vmatprep.subr.bf16.mxu0 %v3510_v11  ;;  %469 = vmatpush1.bf16.msra.mxu1 %v3591_v35  ;;  %v3619_v11 = vld [vmem:[%s4933_s1 + $0x420] ss:$8 sps:$4 sm:$0xff]   ;;  %v3606_v35 = vld [vmem:[%s4933_s1 + $0x2e4] ss:$8 sps:$4 sm:$0xff]  }
  0x41   : > { %470 = vmatprep.subr.bf16.mxu1 %v3595_v37  ;;  %v3637_v37 = vld [vmem:[%s4933_s1 + $0x480] ss:$8 sps:$4 sm:$0xff]  }
  0x43   : > { %715 = vmatpush1.bf16.msra.mxu0 %v3514_v18  ;;  %v3582_v18 = vld [vmem:[%s4933_s1 + $0x2a4] ss:$8 sps:$4 sm:$0xff]  }
  0x44   : > { %959 = vmatprep.subr.bf16.mxu0 %v3520_v19  ;;  %471 = vmatpush1.bf16.msra.mxu1 %v3597_v46  ;;  %v3625_v19 = vld [vmem:[%s4933_s1 + $0x440] ss:$8 sps:$4 sm:$0xff]  }
  0x45   : > { %472 = vmatprep.subr.bf16.mxu1 %v3601_v49 }
  0x46   : > { %717 = vmatmul.mubr.bf16.vlgmr.msra.gmra.mrb[0].mxu0 %v504_v25  ;;  %v3586_v25 = vld [vmem:[%s4933_s1 + $0x2b0] ss:$8 sps:$4 sm:$0xff]  }
  0x47   : > { %960 = vmatpush1.bf16.msra.mxu0 %v3518_v24  ;;  %991 = vmatprep.mubr.bf16.mxu0 %v796_v55  ;;  %v3633_v24 = vld [vmem:[%s4933_s1 + $0x464] ss:$8 sps:$4 sm:$0xff]   ;;  %v3648_v55 = vld [vmem:[%s4933_s1 + $0x4b4] ss:$8 sps:$4 sm:$0xff]  }
  0x48   : > { %961 = vmatprep.subr.bf16.mxu0 %v3528_v26  ;;  %473 = vmatpush1.bf16.msra.mxu1 %v3603_v54  ;;  %v3594_v26 = vld [vmem:[%s4933_s1 + $0x2c4] ss:$8 sps:$4 sm:$0xff]   ;;  %v3643_v54 = vld [vmem:[%s4933_s1 + $0x4a0] ss:$8 sps:$4 sm:$0xff]  }
  0x49   : > { %474 = vmatprep.subr.bf16.mxu1 %v3607_v56  ;;  %v3646_v56 = vld [vmem:[%s4933_s1 + $0x4b0] ss:$8 sps:$4 sm:$0xff]  }
  0x4b   : > { %962 = vmatpush1.bf16.msra.mxu0 %v3526_v31  ;;  %v727_v31 = vld [vmem:[#allocation2 + $0x10] sm:$0x1f] }
  0x4c   : > { %963 = vmatprep.subr.bf16.mxu0 %v3534_v34  ;;  %475 = vmatpush1.bf16.msra.mxu1 %v3609_v61  ;;  %v3598_v34 = vld [vmem:[%s4933_s1 + $0x2d0] ss:$8 sps:$4 sm:$0xff]   ;;  %v772_v39 = vshrl.u32 %v727_v31, 16  ;;  %v775_v40 = vshll.u32 %v727_v31, 16  ;;  %v3655_v61 = vld [vmem:[%s4933_s1 + $0x4e0] ss:$8 sps:$4 sm:$0xff]  }
  0x4d   : > { %1312 = vmatprep.subr.bf16.mxu1 %v3615_v63  ;;  %v3658_v63 = vld [vmem:[%s4933_s1 + $0x4f0] ss:$8 sps:$4 sm:$0xff]  }
  0x4e   : > { %v777_v46 = vrot.slane %v775_v40, 5 }
  0x4f   : > { %964 = vmatpush1.bf16.msra.mxu0 %v3532_v43  ;;  %477 = vmatmul.mubr.bf16.vlgmr.msra.gmra.mrb[0].mxu1 %v278_v4  ;;  %v766_v43 = vrot.slane %v764_v36, 4 }
  0x50   : > { %965 = vmatprep.subr.bf16.mxu0 %v3540_v45  ;;  %1313 = vmatpush1.bf16.msra.mxu1 %v3613_v2  ;;  %v774_v45 = vrot.slane %v772_v39, 4 }
  0x51   : > { %1314 = vmatprep.subr.bf16.mxu1 %v3618_v3  ;;  %v770_v48 = vor.u32 %v769_v44, %v766_v43 }
  0x52   : > { %v778_v49 = vor.u32 %v777_v46, %v774_v45 }
  0x53   : > { %966 = vmatpush1.bf16.msra.mxu0 %v3538_v52  ;;  %v3642_v52 = vld [vmem:[%s4933_s1 + $0x494] ss:$8 sps:$4 sm:$0xff]  }
  0x54   : > { %967 = vmatprep.subr.bf16.mxu0 %v3546_v53  ;;  %1315 = vmatpush1.bf16.msra.mxu1 %v3616_v7  ;;  %v779_v50 = vsel %vm762_vm2, %v770_v48, %v778_v49  ;;  %v3645_v53 = vld [vmem:[%s4933_s1 + $0x4a4] ss:$8 sps:$4 sm:$0xff]  }
  0x55   : > { %1316 = vmatprep.subr.bf16.mxu1 %v3621_v8 }
  0x57   : > { %968 = vmatpush1.bf16.msra.mxu0 %v3544_v58  ;;  %v3649_v58 = vld [vmem:[%s4933_s1 + $0x4c0] ss:$8 sps:$4 sm:$0xff]  }
  0x58   : > { %969 = vmatprep.subr.bf16.mxu0 %v3552_v60  ;;  %1317 = vmatpush1.bf16.msra.mxu1 %v3619_v11  ;;  %v3652_v60 = vld [vmem:[%s4933_s1 + $0x4d0] ss:$8 sps:$4 sm:$0xff]  }
  0x59   : > { %1318 = vmatprep.subr.bf16.mxu1 %v3624_v12 }
  0x5b   : > { %970 = vmatpush1.bf16.msra.mxu0 %v3550_v0  ;;  %v3660_v0 = vld [vmem:[%s4933_s1 + $0x4f4] ss:$8 sps:$4 sm:$0xff]  }
  0x5c   : > { %971 = vmatprep.subr.bf16.mxu0 %v3558_v1  ;;  %1319 = vmatpush1.bf16.msra.mxu1 %v3622_v15  ;;  %v3663_v1 = vld [vmem:[%s4933_s1 + $0x304] ss:$8 sps:$4 sm:$0xff]  }
  0x5d   : > { %1320 = vmatprep.subr.bf16.mxu1 %v3627_v16 }
  0x5f   : > { %972 = vmatpush1.bf16.msra.mxu0 %v3556_v5 }
  0x60   : > { %973 = vmatprep.subr.bf16.mxu0 %v3564_v6  ;;  %1321 = vmatpush1.bf16.msra.mxu1 %v3625_v19  ;;  %v1008_v6 = vlaneseq }
  0x61   : > { %1322 = vmatprep.subr.bf16.mxu1 %v3630_v20 }
  0x62   : > { %v1009_v7 = vshrl.u32 %v1008_v6, 7  ;;  %v3759_v6 = vld [vmem:[%s4933_s1 + $0x704] ss:$8 sps:$4 sm:$0xff]  }
  0x63   : > { %974 = vmatpush1.bf16.msra.mxu0 %v3562_v9  ;;  %v1006_v9 = vld [vmem:[%s4934_s2] sm:$0xf] }
  0x64   : > { %975 = vmatprep.subr.bf16.mxu0 %v3570_v10  ;;  %1323 = vmatpush1.bf16.msra.mxu1 %v3628_v23  ;;  %v4362_v8 = vsub.s32 0, %v1009_v7  ;;  %v4367_v10 = vsub.s32 2, %v1009_v7  ;;  %v4369_v11 = vsub.s32 1, %v1009_v7  ;;  %v4371_v12 = vsub.s32 3, %v1009_v7  ;;  %v3669_v7 = vld [vmem:[%s4933_s1 + $0x324] ss:$8 sps:$4 sm:$0xff]  }
  0x65   : > { %1324 = vmatprep.subr.bf16.mxu1 %v3633_v24 }
  0x66   : > { %v1033_v15 = vrot.slane %v1006_v9, %v4369_v11  ;;  %v1037_v16 = vrot.slane %v1006_v9, %v4371_v12 }
  0x67   : > { %976 = vmatpush1.bf16.msra.mxu0 %v3568_v13  ;;  %v1011_v13 = vrot.slane %v1006_v9, %v4362_v8 }
  0x68   : > { %977 = vmatprep.subr.bf16.mxu0 %v3576_v14  ;;  %1325 = vmatpush1.bf16.msra.mxu1 %v3631_v27  ;;  %v1015_v14 = vrot.slane %v1006_v9, %v4367_v10  ;;  %v1047_v24 = vrot.slane %v1037_v16, %v4369_v11  ;;  %v3765_v16 = vld [vmem:[%s4933_s1 + $0x724] ss:$8 sps:$4 sm:$0xff]  }
  0x69   : > { %1326 = vmatprep.subr.bf16.mxu1 %v3636_v28 }
  0x6a   : > { %v1025_v19 = vrot.slane %v1015_v14, %v4362_v8  ;;  %v3760_v14 = vld [vmem:[%s4933_s1 + $0x710] ss:$8 sps:$4 sm:$0xff]  }
  0x6b   : > { %978 = vmatpush1.bf16.msra.mxu0 %v3574_v17  ;;  %v1021_v17 = vrot.slane %v1011_v13, %v4362_v8  ;;  %v3762_v13 = vld [vmem:[%s4933_s1 + $0x714] ss:$8 sps:$4 sm:$0xff]  }
  0x6c   : > { %979 = vmatprep.subr.bf16.mxu0 %v3582_v18  ;;  %1327 = vmatpush1.bf16.msra.mxu1 %v3634_v32 }
  0x6d   : > { %1328 = vmatprep.subr.bf16.mxu1 %v3639_v33 }
  0x6f   : > { %980 = vmatpush1.bf16.msra.mxu0 %v3580_v21  ;;  %v1043_v21 = vrot.slane %v1033_v15, %v4369_v11  ;;  %v3667_v15 = vld [vmem:[%s4933_s1 + $0x320] ss:$8 sps:$4 sm:$0xff]  }
  0x70   : > { %981 = vmatprep.subr.bf16.mxu0 %v3588_v22  ;;  %1329 = vmatpush1.bf16.msra.mxu1 %v3637_v37 }
  0x71   : > { %1330 = vmatprep.subr.bf16.mxu1 %v3642_v52 }
  0x73   : > { %982 = vmatpush1.bf16.msra.mxu0 %v3586_v25 }
  0x74   : > { %983 = vmatprep.subr.bf16.mxu0 %v3594_v26  ;;  %1331 = vmatpush1.bf16.msra.mxu1 %v3640_v51 }
  0x75   : > { %1332 = vmatprep.subr.bf16.mxu1 %v3645_v53 }
  0x77   : > { %984 = vmatpush1.bf16.msra.mxu0 %v3592_v29 }
  0x78   : > { %985 = vmatprep.subr.bf16.mxu0 %v3600_v30  ;;  %1333 = vmatpush1.bf16.msra.mxu1 %v3643_v54 }
  0x79   : > { %1334 = vmatprep.subr.bf16.mxu1 %v3648_v55 }
  0x7b   : > { %986 = vmatpush1.bf16.msra.mxu0 %v3598_v34 }
  0x7c   : > { %987 = vmatprep.subr.bf16.mxu0 %v3606_v35  ;;  %1335 = vmatpush1.bf16.msra.mxu1 %v3646_v56  ;;  %v3661_v56 = vld [vmem:[%s4933_s1 + $0x300] ss:$8 sps:$4 sm:$0xff]  }
  0x7d   : > { %1336 = vmatprep.subr.bf16.mxu1 %v3651_v57 }
  0x7f   : > { %988 = vmatpush1.bf16.msra.mxu0 %v3604_v41 }
  0x80   : > { %989 = vmatprep.subr.bf16.mxu0 %v3612_v42  ;;  %1337 = vmatpush1.bf16.msra.mxu1 %v3649_v58 }
  0x81   : > { %1338 = vmatprep.subr.bf16.mxu1 %v3654_v59 }
  0x83   : > { %990 = vmatpush1.bf16.msra.mxu0 %v3610_v47 }
  0x84   : > { %1339 = vmatpush1.bf16.msra.mxu1 %v3652_v60  ;;  %v3666_v60 = vld [vmem:[%s4933_s1 + $0x314] ss:$8 sps:$4 sm:$0xff]   ;;  %2179 = vmatprep.subr.bf16.mxu0 %v3759_v6 }
  0x85   : > { %1340 = vmatprep.subr.bf16.mxu1 %v3657_v62 }
  0x86   : > { %992 = vmatmul.mubr.bf16.vlgmr.msra.gmra.mrb[0].mxu0 %v779_v50 }
  0x88   : > { %1341 = vmatpush1.bf16.msra.mxu1 %v3655_v61 }
  0x89   : > { %1342 = vmatprep.subr.bf16.mxu1 %v3660_v0 }
  0x8c   : > { %1343 = vmatpush1.bf16.msra.mxu1 %v3658_v63 }
  0x8d   : > { %1551 = vmatprep.subr.bf16.mxu1 %v3663_v1 }
 0x122   : > { %v478_v2 = vpop.f32.mrb[0].mxu1 }
 0x123   : > { %v480_v3 = vpop.f32.mrb[1].mxu1 }
 0x124   : > { %v482_v4 = vpop.f32.mrb[2].mxu1 }
 0x125   : > { %v484_v5 = vpop.f32.mrb[3].mxu1 }
 0x159   : > { %v993_v18 = vpop.f32.mrb[0].mxu0 }
 0x15a   : > { %v3432_v20 = vadd.f32 %v993_v18, %v478_v2  ;;  %v995_v22 = vpop.f32.mrb[1].mxu0  ;;  %v3763_v18 = vld [vmem:[%s4933_s1 + $0x720] ss:$8 sps:$4 sm:$0xff]  }
 0x15b   : > { %v3433_v23 = vadd.f32 %v995_v22, %v480_v3  ;;  %v997_v25 = vpop.f32.mrb[2].mxu0  ;;  %v3757_v3 = vld [vmem:[%s4933_s1 + $0x700] ss:$8 sps:$4 sm:$0xff]   ;;  %v3766_v22 = vld [vmem:[%s4933_s1 + $0x730] ss:$8 sps:$4 sm:$0xff]  }
 0x15c   : > { %v1026_v26 = vmul.f32 %v3432_v20, %v1021_v17  ;;  %v3434_v27 = vadd.f32 %v997_v25, %v482_v4  ;;  %v999_v28 = vpop.f32.mrb[3].mxu0  ;;  %v3664_v4 = vld [vmem:[%s4933_s1 + $0x310] ss:$8 sps:$4 sm:$0xff]   ;;  %2180 = vmatpush1.bf16.msra.mxu0 %v3757_v3  ;;  %v3768_v20 = vld [vmem:[%s4933_s1 + $0x734] ss:$8 sps:$4 sm:$0xff]  }
 0x15d   : > { %v1027_v29 = vmul.f32 %v3433_v23, %v1025_v19  ;;  %v3435_v30 = vadd.f32 %v999_v28, %v484_v5  ;;  %2181 = vmatprep.subr.bf16.mxu0 %v3762_v13  ;;  %v3673_v23 = vld [vmem:[%s4933_s1 + $0x340] ss:$8 sps:$4 sm:$0xff]   ;;  %v3678_v25 = vld [vmem:[%s4933_s1 + $0x354] ss:$8 sps:$4 sm:$0xff]  }
 0x15e   : > { %v1048_v31 = vadd.f32 %v1043_v21, %v1026_v26  ;;  %v1028_v32 = vmul.f32 %v3434_v27, %v1021_v17  ;;  %v3672_v17 = vld [vmem:[%s4933_s1 + $0x334] ss:$8 sps:$4 sm:$0xff]   ;;  %v3769_v26 = vld [vmem:[%s4933_s1 + $0x740] ss:$8 sps:$4 sm:$0xff]   ;;  %v3676_v27 = vld [vmem:[%s4933_s1 + $0x350] ss:$8 sps:$4 sm:$0xff]  }
 0x15f   : > { %v1049_v33 = vadd.f32 %v1047_v24, %v1027_v29  ;;  %v1029_v34 = vmul.f32 %v3435_v30, %v1025_v19  ;;  %v3670_v19 = vld [vmem:[%s4933_s1 + $0x330] ss:$8 sps:$4 sm:$0xff]   ;;  %v3774_v28 = vld [vmem:[%s4933_s1 + $0x754] ss:$8 sps:$4 sm:$0xff]   ;;  %v3681_v29 = vld [vmem:[%s4933_s1 + $0x364] ss:$8 sps:$4 sm:$0xff]  }
 0x160   : > { %v1050_v35 = vadd.f32 %v1043_v21, %v1028_v32  ;;  %v1052_v37 = vmax.f32 %v1048_v31, 0.0  ;;  %2182 = vmatpush1.bf16.msra.mxu0 %v3760_v14  ;;  %v3675_v21 = vld [vmem:[%s4933_s1 + $0x344] ss:$8 sps:$4 sm:$0xff]   ;;  %v3772_v30 = vld [vmem:[%s4933_s1 + $0x750] ss:$8 sps:$4 sm:$0xff]  }
 0x161   : > { %v1051_v36 = vadd.f32 %v1047_v24, %v1029_v34  ;;  %v1053_v39 = vmax.f32 %v1049_v33, 0.0  ;;  %2183 = vmatprep.subr.bf16.mxu0 %v3765_v16  ;;  %v3771_v24 = vld [vmem:[%s4933_s1 + $0x744] ss:$8 sps:$4 sm:$0xff]   ;;  %v3679_v31 = vld [vmem:[%s4933_s1 + $0x360] ss:$8 sps:$4 sm:$0xff]  }
 0x162   : > { %v1054_v38 = vmax.f32 %v1050_v35, 0.0  ;;  %v3777_v32 = vld [vmem:[%s4933_s1 + $0x764] ss:$8 sps:$4 sm:$0xff]   ;;  %v3684_v33 = vld [vmem:[%s4933_s1 + $0x374] ss:$8 sps:$4 sm:$0xff]  }
 0x163   : > { %v1055_v40 = vmax.f32 %v1051_v36, 0.0  ;;  %v3775_v34 = vld [vmem:[%s4933_s1 + $0x760] ss:$8 sps:$4 sm:$0xff]   ;;  %v3682_v35 = vld [vmem:[%s4933_s1 + $0x370] ss:$8 sps:$4 sm:$0xff]  }
 0x164   : > { %v1056_v41 = vpack.c.bf16 %v1054_v38, %v1052_v37  ;;  %2184 = vmatpush1.bf16.msra.mxu0 %v3763_v18  ;;  %v3780_v36 = vld [vmem:[%s4933_s1 + $0x774] ss:$8 sps:$4 sm:$0xff]   ;;  %v3687_v37 = vld [vmem:[%s4933_s1 + $0x384] ss:$8 sps:$4 sm:$0xff]   ;;  %v3778_v38 = vld [vmem:[%s4933_s1 + $0x770] ss:$8 sps:$4 sm:$0xff]  }
 0x165   : > { %v1057_v42 = vpack.c.bf16 %v1055_v40, %v1053_v39  ;;  %2185 = vmatprep.subr.bf16.mxu0 %v3768_v20  ;;  %v3685_v39 = vld [vmem:[%s4933_s1 + $0x380] ss:$8 sps:$4 sm:$0xff]   ;;  %v3783_v40 = vld [vmem:[%s4933_s1 + $0x784] ss:$8 sps:$4 sm:$0xff]   ;;  %v3706_v16 = vld [vmem:[%s4933_s1 + $0x3f0] ss:$8 sps:$4 sm:$0xff]  }
 0x166   : > { %v1060_v43 = vrot.slane %v1056_v41, 4  ;;  %v3690_v41 = vld [vmem:[%s4933_s1 + $0x394] ss:$8 sps:$4 sm:$0xff]  }
 0x167   : > { %v1061_v44 = vrot.slane %v1057_v42, 4  ;;  %v3781_v42 = vld [vmem:[%s4933_s1 + $0x780] ss:$8 sps:$4 sm:$0xff]  }
 0x168   : > { %1064 = vst [vmem:[#allocation3 + $0x10] ss:$-12 sps:$4 sm:$0xff] %v1060_v43   ;;  %2186 = vmatpush1.bf16.msra.mxu0 %v3766_v22  ;;  %v3688_v43 = vld [vmem:[%s4933_s1 + $0x390] ss:$8 sps:$4 sm:$0xff]   ;;  %v3709_v22 = vld [vmem:[%s4933_s1 + $0x500] ss:$8 sps:$4 sm:$0xff]  }
 0x169   : > { %1065 = vst [vmem:[#allocation3 + $0x18] ss:$-12 sps:$4 sm:$0xff] %v1061_v44   ;;  %2187 = vmatprep.subr.bf16.mxu0 %v3771_v24  ;;  %v3786_v44 = vld [vmem:[%s4933_s1 + $0x794] ss:$8 sps:$4 sm:$0xff]  }
 0x16c   : > { %2188 = vmatpush1.bf16.msra.mxu0 %v3769_v26  ;;  %v3712_v26 = vld [vmem:[%s4933_s1 + $0x510] ss:$8 sps:$4 sm:$0xff]  }
 0x16d   : > { %2189 = vmatprep.subr.bf16.mxu0 %v3774_v28  ;;  %v3715_v28 = vld [vmem:[%s4933_s1 + $0x520] ss:$8 sps:$4 sm:$0xff]  }
 0x16f   : > { %v4381_v45 = vld [vmem:[#allocation3 + $0x10] sm:$0xf]  ;;  %v4383_v46 = vld [vmem:[#allocation3] sm:$0xf0] }
 0x170   : > { %v1071_v47 = vld [vmem:[#allocation3 + $0x18] sm:$0xf]  ;;  %v4385_v48 = vld [vmem:[#allocation3 + $0x8] sm:$0xf0]  ;;  %v1144_v49 = vrot.slane %v4383_v46, 4  ;;  %v1145_v50 = vrot.slane %v4381_v45, 4  ;;  %2190 = vmatpush1.bf16.msra.mxu0 %v3772_v30 }
 0x171   : > { %v1147_v51 = vrot.slane %v4385_v48, 4  ;;  %v1148_v52 = vrot.slane %v1071_v47, 4  ;;  %v1069_v53 = vld [vmem:[#allocation3 + $0x8] sm:$0xf8]  ;;  %v1381_v54 = vshrl.u32 %v1071_v47, 16  ;;  %v1384_v55 = vshll.u32 %v1071_v47, 16  ;;  %2191 = vmatprep.subr.bf16.mxu0 %v3777_v32 }
 0x172   : > { %v1373_v57 = vshrl.u32 %v1069_v53, 16  ;;  %v1376_v58 = vshll.u32 %v1069_v53, 16  ;;  %v1146_v0 = vsel %vm275_vm1, %v1144_v49, %v1145_v50  ;;  %v3693_v47 = vld [vmem:[%s4933_s1 + $0x3a4] ss:$8 sps:$4 sm:$0xff]   ;;  %v3784_v49 = vld [vmem:[%s4933_s1 + $0x790] ss:$8 sps:$4 sm:$0xff]  }
 0x173   : > { %v1149_v59 = vsel %vm275_vm1, %v1147_v51, %v1148_v52  ;;  %v1383_v61 = vrot.slane %v1381_v54, 3  ;;  %v1386_v62 = vrot.slane %v1384_v55, 4  ;;  %v3691_v50 = vld [vmem:[%s4933_s1 + $0x3a0] ss:$8 sps:$4 sm:$0xff]   ;;  %v3696_v51 = vld [vmem:[%s4933_s1 + $0x3b4] ss:$8 sps:$4 sm:$0xff]  }
 0x174   : > { %1344 = vmatprep.mubr.bf16.mxu1 %v1149_v59  ;;  %v1375_v63 = vrot.slane %v1373_v57, 3  ;;  %v1378_v1 = vrot.slane %v1376_v58, 4  ;;  %2192 = vmatpush1.bf16.msra.mxu0 %v3775_v34  ;;  %v3694_v52 = vld [vmem:[%s4933_s1 + $0x3b0] ss:$8 sps:$4 sm:$0xff]   ;;  %v3699_v53 = vld [vmem:[%s4933_s1 + $0x3c4] ss:$8 sps:$4 sm:$0xff]  }
 0x175   : > { %1345 = vmatmul.mubr.bf16.vlgmr.msra.gmra.mrb[4].mxu1 %v1146_v0  ;;  %v1387_v2 = vor.u32 %v1386_v62, %v1383_v61  ;;  %2193 = vmatprep.subr.bf16.mxu0 %v3780_v36  ;;  %v3697_v54 = vld [vmem:[%s4933_s1 + $0x3c0] ss:$8 sps:$4 sm:$0xff]   ;;  %v3702_v55 = vld [vmem:[%s4933_s1 + $0x3d4] ss:$8 sps:$4 sm:$0xff]   ;;  %v3700_v57 = vld [vmem:[%s4933_s1 + $0x3d0] ss:$8 sps:$4 sm:$0xff]  }
 0x176   : > { %1552 = vmatpush1.bf16.msra.mxu1 %v3661_v56  ;;  %v1379_v5 = vor.u32 %v1378_v1, %v1375_v63  ;;  %v1068_v56 = vld [vmem:[#allocation3] sm:$0xf8]  ;;  %v1595_v58 = vld [vmem:[#allocation3 + $0x18] sm:$0x1f]  ;;  %v1364_v62 = vshrl.u32 %v4381_v45, 16  ;;  %v1367_v0 = vshll.u32 %v4381_v45, 16 }
 0x177   : > { %1553 = vmatprep.subr.bf16.mxu1 %v3666_v60  ;;  %v3705_v59 = vld [vmem:[%s4933_s1 + $0x3e4] ss:$8 sps:$4 sm:$0xff]   ;;  %v1356_v60 = vshrl.u32 %v1068_v56, 16  ;;  %v1359_v61 = vshll.u32 %v1068_v56, 16  ;;  %v1647_v63 = vshrl.u32 %v4385_v48, 16  ;;  %v1650_v1 = vshll.u32 %v4385_v48, 16 }
 0x178   : > { %v1388_v9 = vsel %vm487_vm0, %v1379_v5, %v1387_v2  ;;  %2194 = vmatpush1.bf16.msra.mxu0 %v3778_v38  ;;  %v1655_v2 = vshrl.u32 %v1595_v58, 16  ;;  %v1658_v3 = vshll.u32 %v1595_v58, 16  ;;  %v3708_v5 = vld [vmem:[%s4933_s1 + $0x3f4] ss:$8 sps:$4 sm:$0xff]   ;;  %v1369_v45 = vrot.slane %v1367_v0, 4 }
 0x179   : > { %1583 = vmatprep.mubr.bf16.mxu1 %v1388_v9  ;;  %2195 = vmatprep.subr.bf16.mxu0 %v3783_v40  ;;  %v1358_v6 = vrot.slane %v1356_v60, 3  ;;  %v1366_v9 = vrot.slane %v1364_v62, 3  ;;  %v1649_v13 = vrot.slane %v1647_v63, 4  ;;  %v1652_v14 = vrot.slane %v1650_v1, 5  ;;  %v3718_v30 = vld [vmem:[%s4933_s1 + $0x530] ss:$8 sps:$4 sm:$0xff]  }
 0x17a   : > { %1554 = vmatpush1.bf16.msra.mxu1 %v3664_v4  ;;  %v3703_v4 = vld [vmem:[%s4933_s1 + $0x3e0] ss:$8 sps:$4 sm:$0xff]   ;;  %v1660_v48 = vrot.slane %v1658_v3, 5  ;;  %v3724_v34 = vld [vmem:[%s4933_s1 + $0x550] ss:$8 sps:$4 sm:$0xff]   ;;  %v1630_v56 = vshrl.u32 %v4383_v46, 16 }
 0x17b   : > { %1555 = vmatprep.subr.bf16.mxu1 %v3669_v7  ;;  %v1361_v7 = vrot.slane %v1359_v61, 4  ;;  %v1653_v20 = vor.u32 %v1652_v14, %v1649_v13  ;;  %v3721_v32 = vld [vmem:[%s4933_s1 + $0x540] ss:$8 sps:$4 sm:$0xff]   ;;  %v3730_v38 = vld [vmem:[%s4933_s1 + $0x570] ss:$8 sps:$4 sm:$0xff]  }
 0x17c   : > { %2196 = vmatpush1.bf16.msra.mxu0 %v3781_v42  ;;  %v3727_v36 = vld [vmem:[%s4933_s1 + $0x560] ss:$8 sps:$4 sm:$0xff]   ;;  %v3736_v42 = vld [vmem:[%s4933_s1 + $0x590] ss:$8 sps:$4 sm:$0xff]   ;;  %v3756_v61 = vld [vmem:[%s4933_s1 + $0x5f4] ss:$8 sps:$4 sm:$0xff]  }
 0x17d   : > { %2197 = vmatprep.subr.bf16.mxu0 %v3786_v44  ;;  %v1362_v18 = vor.u32 %v1361_v7, %v1358_v6  ;;  %v3733_v40 = vld [vmem:[%s4933_s1 + $0x580] ss:$8 sps:$4 sm:$0xff]   ;;  %v1632_v62 = vrot.slane %v1630_v56, 4  ;;  %v3789_v6 = vld [vmem:[%s4933_s1 + $0x7a4] ss:$8 sps:$4 sm:$0xff]  }
 0x17e   : > { %1556 = vmatpush1.bf16.msra.mxu1 %v3667_v15  ;;  %v1657_v15 = vrot.slane %v1655_v2, 4  ;;  %v3739_v44 = vld [vmem:[%s4933_s1 + $0x5a0] ss:$8 sps:$4 sm:$0xff]   ;;  %v3792_v7 = vld [vmem:[%s4933_s1 + $0x7b4] ss:$8 sps:$4 sm:$0xff]  }
 0x17f   : > { %1557 = vmatprep.subr.bf16.mxu1 %v3672_v17  ;;  %v3711_v17 = vld [vmem:[%s4933_s1 + $0x504] ss:$8 sps:$4 sm:$0xff]   ;;  %v3751_v60 = vld [vmem:[%s4933_s1 + $0x5e0] ss:$8 sps:$4 sm:$0xff]   ;;  %v3798_v14 = vld [vmem:[%s4933_s1 + $0x7d4] ss:$8 sps:$4 sm:$0xff]  }
 0x180   : > { %2198 = vmatpush1.bf16.msra.mxu0 %v3784_v49  ;;  %v3742_v49 = vld [vmem:[%s4933_s1 + $0x5b0] ss:$8 sps:$4 sm:$0xff]   ;;  %v3793_v13 = vld [vmem:[%s4933_s1 + $0x7c0] ss:$8 sps:$4 sm:$0xff]  }
 0x181   : > { %2199 = vmatprep.subr.bf16.mxu0 %v3789_v6 }
 0x182   : > { %1558 = vmatpush1.bf16.msra.mxu1 %v3670_v19  ;;  %v1370_v19 = vor.u32 %v1369_v45, %v1366_v9  ;;  %v3790_v9 = vld [vmem:[%s4933_s1 + $0x7b0] ss:$8 sps:$4 sm:$0xff]   ;;  %v3795_v45 = vld [vmem:[%s4933_s1 + $0x7c4] ss:$8 sps:$4 sm:$0xff]  }
 0x183   : > { %1559 = vmatprep.subr.bf16.mxu1 %v3675_v21  ;;  %v1661_v21 = vor.u32 %v1660_v48, %v1657_v15  ;;  %v3796_v15 = vld [vmem:[%s4933_s1 + $0x7d0] ss:$8 sps:$4 sm:$0xff]   ;;  %v3801_v48 = vld [vmem:[%s4933_s1 + $0x7e4] ss:$8 sps:$4 sm:$0xff]  }
 0x184   : > { %v1371_v24 = vsel %vm487_vm0, %v1362_v18, %v1370_v19  ;;  %v3802_v18 = vld [vmem:[%s4933_s1 + $0x7f0] ss:$8 sps:$4 sm:$0xff]   ;;  %v3807_v19 = vld [vmem:[%s4933_s1 + $0x604] ss:$8 sps:$4 sm:$0xff]  }
 0x186   : > { %1560 = vmatpush1.bf16.msra.mxu1 %v3673_v23  ;;  %v3714_v23 = vld [vmem:[%s4933_s1 + $0x514] ss:$8 sps:$4 sm:$0xff]  }
 0x187   : > { %1561 = vmatprep.subr.bf16.mxu1 %v3678_v25  ;;  %v1662_v25 = vsel %vm762_vm2, %v1653_v20, %v1661_v21  ;;  %v3230_v20 = vld [vmem:[%s4934_s2 + $0x4] sm:$0xf] }
 0x188   : > { %v1878_v21 = vrot.slane %v3230_v20, %v4362_v8 }
 0x18a   : > { %1562 = vmatpush1.bf16.msra.mxu1 %v3676_v27  ;;  %v3717_v27 = vld [vmem:[%s4933_s1 + $0x524] ss:$8 sps:$4 sm:$0xff]  }
 0x18b   : > { %1563 = vmatprep.subr.bf16.mxu1 %v3681_v29  ;;  %v3720_v29 = vld [vmem:[%s4933_s1 + $0x534] ss:$8 sps:$4 sm:$0xff]  }
 0x18e   : > { %1564 = vmatpush1.bf16.msra.mxu1 %v3679_v31  ;;  %v3723_v31 = vld [vmem:[%s4933_s1 + $0x544] ss:$8 sps:$4 sm:$0xff]  }
 0x18f   : > { %1565 = vmatprep.subr.bf16.mxu1 %v3684_v33  ;;  %v3726_v33 = vld [vmem:[%s4933_s1 + $0x554] ss:$8 sps:$4 sm:$0xff]  }
 0x192   : > { %1566 = vmatpush1.bf16.msra.mxu1 %v3682_v35  ;;  %v3729_v35 = vld [vmem:[%s4933_s1 + $0x564] ss:$8 sps:$4 sm:$0xff]  }
 0x193   : > { %1567 = vmatprep.subr.bf16.mxu1 %v3687_v37  ;;  %v3732_v37 = vld [vmem:[%s4933_s1 + $0x574] ss:$8 sps:$4 sm:$0xff]  }
 0x196   : > { %1568 = vmatpush1.bf16.msra.mxu1 %v3685_v39  ;;  %v3735_v39 = vld [vmem:[%s4933_s1 + $0x584] ss:$8 sps:$4 sm:$0xff]  }
 0x197   : > { %1569 = vmatprep.subr.bf16.mxu1 %v3690_v41  ;;  %v3738_v41 = vld [vmem:[%s4933_s1 + $0x594] ss:$8 sps:$4 sm:$0xff]  }
 0x19a   : > { %1570 = vmatpush1.bf16.msra.mxu1 %v3688_v43  ;;  %v3741_v43 = vld [vmem:[%s4933_s1 + $0x5a4] ss:$8 sps:$4 sm:$0xff]  }
 0x19b   : > { %1571 = vmatprep.subr.bf16.mxu1 %v3693_v47  ;;  %v3744_v47 = vld [vmem:[%s4933_s1 + $0x5b4] ss:$8 sps:$4 sm:$0xff]  }
 0x19e   : > { %1572 = vmatpush1.bf16.msra.mxu1 %v3691_v50  ;;  %v3747_v50 = vld [vmem:[%s4933_s1 + $0x5c4] ss:$8 sps:$4 sm:$0xff]  }
 0x19f   : > { %1573 = vmatprep.subr.bf16.mxu1 %v3696_v51  ;;  %v3745_v51 = vld [vmem:[%s4933_s1 + $0x5c0] ss:$8 sps:$4 sm:$0xff]  }
 0x1a2   : > { %1574 = vmatpush1.bf16.msra.mxu1 %v3694_v52  ;;  %v3750_v52 = vld [vmem:[%s4933_s1 + $0x5d4] ss:$8 sps:$4 sm:$0xff]  }
 0x1a3   : > { %1575 = vmatprep.subr.bf16.mxu1 %v3699_v53  ;;  %v1594_v53 = vld [vmem:[#allocation3 + $0x10] sm:$0x1f] }
 0x1a4   : > { %v1638_v58 = vshrl.u32 %v1594_v53, 16 }
 0x1a6   : > { %1576 = vmatpush1.bf16.msra.mxu1 %v3697_v54  ;;  %v3748_v54 = vld [vmem:[%s4933_s1 + $0x5d0] ss:$8 sps:$4 sm:$0xff]   ;;  %v1640_v63 = vrot.slane %v1638_v58, 4 }
 0x1a7   : > { %1577 = vmatprep.subr.bf16.mxu1 %v3702_v55  ;;  %v3753_v55 = vld [vmem:[%s4933_s1 + $0x5e4] ss:$8 sps:$4 sm:$0xff]  }
 0x1aa   : > { %1578 = vmatpush1.bf16.msra.mxu1 %v3700_v57  ;;  %v1633_v57 = vshll.u32 %v4383_v46, 16  ;;  %v3754_v46 = vld [vmem:[%s4933_s1 + $0x5f0] ss:$8 sps:$4 sm:$0xff]  }
 0x1ab   : > { %1579 = vmatprep.subr.bf16.mxu1 %v3705_v59  ;;  %v1641_v59 = vshll.u32 %v1594_v53, 16 }
 0x1ac   : > { %v1635_v0 = vrot.slane %v1633_v57, 5 }
 0x1ad   : > { %v1643_v1 = vrot.slane %v1641_v59, 5 }
 0x1ae   : > { %1580 = vmatpush1.bf16.msra.mxu1 %v3703_v4  ;;  %v1636_v2 = vor.u32 %v1635_v0, %v1632_v62  ;;  %v3805_v0 = vld [vmem:[%s4933_s1 + $0x600] ss:$8 sps:$4 sm:$0xff]  }
 0x1af   : > { %1581 = vmatprep.subr.bf16.mxu1 %v3708_v5  ;;  %v1644_v3 = vor.u32 %v1643_v1, %v1640_v63  ;;  %v3787_v5 = vld [vmem:[%s4933_s1 + $0x7a0] ss:$8 sps:$4 sm:$0xff]  }
 0x1b0   : > { %2200 = vmatpush1.bf16.msra.mxu0 %v3787_v5 }
 0x1b1   : > { %v1645_v4 = vsel %vm762_vm2, %v1636_v2, %v1644_v3  ;;  %2201 = vmatprep.subr.bf16.mxu0 %v3792_v7  ;;  %v3810_v2 = vld [vmem:[%s4933_s1 + $0x614] ss:$8 sps:$4 sm:$0xff]  }
 0x1b2   : > { %1582 = vmatpush1.bf16.msra.mxu1 %v3706_v16  ;;  %v3799_v16 = vld [vmem:[%s4933_s1 + $0x7e0] ss:$8 sps:$4 sm:$0xff]  }
 0x1b3   : > { %1825 = vmatprep.subr.bf16.mxu1 %v3711_v17  ;;  %v3804_v17 = vld [vmem:[%s4933_s1 + $0x7f4] ss:$8 sps:$4 sm:$0xff]  }
 0x1b4   : > { %2202 = vmatpush1.bf16.msra.mxu0 %v3790_v9 }
 0x1b5   : > { %1584 = vmatmul.mubr.bf16.vlgmr.msra.gmra.mrb[4].mxu1 %v1371_v24  ;;  %2203 = vmatprep.subr.bf16.mxu0 %v3795_v45  ;;  %v1904_v24 = vrot.slane %v3230_v20, %v4371_v12  ;;  %v3808_v45 = vld [vmem:[%s4933_s1 + $0x610] ss:$8 sps:$4 sm:$0xff]  }
 0x1b6   : > { %1826 = vmatpush1.bf16.msra.mxu1 %v3709_v22  ;;  %1857 = vmatprep.mubr.bf16.mxu1 %v1662_v25  ;;  %v1882_v22 = vrot.slane %v3230_v20, %v4367_v10  ;;  %v1888_v25 = vrot.slane %v1878_v21, %v4362_v8  ;;  %v3820_v21 = vld [vmem:[%s4933_s1 + $0x650] ss:$8 sps:$4 sm:$0xff]  }
 0x1b7   : > { %1827 = vmatprep.subr.bf16.mxu1 %v3714_v23  ;;  %v1900_v23 = vrot.slane %v3230_v20, %v4369_v11  ;;  %v3822_v20 = vld [vmem:[%s4933_s1 + $0x654] ss:$8 sps:$4 sm:$0xff]  }
 0x1b8   : > { %2204 = vmatpush1.bf16.msra.mxu0 %v3793_v13 }
 0x1b9   : > { %2205 = vmatprep.subr.bf16.mxu0 %v3798_v14  ;;  %v3813_v14 = vld [vmem:[%s4933_s1 + $0x624] ss:$8 sps:$4 sm:$0xff]  }
 0x1ba   : > { %1828 = vmatpush1.bf16.msra.mxu1 %v3712_v26  ;;  %v1892_v26 = vrot.slane %v1882_v22, %v4362_v8  ;;  %v3825_v22 = vld [vmem:[%s4933_s1 + $0x664] ss:$8 sps:$4 sm:$0xff]  }
 0x1bb   : > { %1829 = vmatprep.subr.bf16.mxu1 %v3717_v27  ;;  %v1910_v27 = vrot.slane %v1900_v23, %v4369_v11  ;;  %v3823_v23 = vld [vmem:[%s4933_s1 + $0x660] ss:$8 sps:$4 sm:$0xff]  }
 0x1bc   : > { %2206 = vmatpush1.bf16.msra.mxu0 %v3796_v15 }
 0x1bd   : > { %2207 = vmatprep.subr.bf16.mxu0 %v3801_v48  ;;  %v3811_v48 = vld [vmem:[%s4933_s1 + $0x620] ss:$8 sps:$4 sm:$0xff]  }
 0x1be   : > { %1830 = vmatpush1.bf16.msra.mxu1 %v3715_v28 }
 0x1bf   : > { %1831 = vmatprep.subr.bf16.mxu1 %v3720_v29  ;;  %v1914_v29 = vrot.slane %v1904_v24, %v4369_v11  ;;  %v3828_v24 = vld [vmem:[%s4933_s1 + $0x674] ss:$8 sps:$4 sm:$0xff]  }
 0x1c0   : > { %2208 = vmatpush1.bf16.msra.mxu0 %v3799_v16  ;;  %v3816_v16 = vld [vmem:[%s4933_s1 + $0x634] ss:$8 sps:$4 sm:$0xff]  }
 0x1c1   : > { %2209 = vmatprep.subr.bf16.mxu0 %v3804_v17  ;;  %v3814_v17 = vld [vmem:[%s4933_s1 + $0x630] ss:$8 sps:$4 sm:$0xff]  }
 0x1c2   : > { %1832 = vmatpush1.bf16.msra.mxu1 %v3718_v30 }
 0x1c3   : > { %1833 = vmatprep.subr.bf16.mxu1 %v3723_v31 }
 0x1c4   : > { %2210 = vmatpush1.bf16.msra.mxu0 %v3802_v18  ;;  %v3819_v18 = vld [vmem:[%s4933_s1 + $0x644] ss:$8 sps:$4 sm:$0xff]  }
 0x1c5   : > { %2418 = vmatprep.subr.bf16.mxu0 %v3807_v19  ;;  %v3817_v19 = vld [vmem:[%s4933_s1 + $0x640] ss:$8 sps:$4 sm:$0xff]  }
 0x1c6   : > { %1834 = vmatpush1.bf16.msra.mxu1 %v3721_v32 }
 0x1c7   : > { %1835 = vmatprep.subr.bf16.mxu1 %v3726_v33 }
 0x1ca   : > { %1836 = vmatpush1.bf16.msra.mxu1 %v3724_v34 }
 0x1cb   : > { %1837 = vmatprep.subr.bf16.mxu1 %v3729_v35 }
 0x1ce   : > { %1838 = vmatpush1.bf16.msra.mxu1 %v3727_v36 }
 0x1cf   : > { %1839 = vmatprep.subr.bf16.mxu1 %v3732_v37 }
 0x1d2   : > { %1840 = vmatpush1.bf16.msra.mxu1 %v3730_v38 }
 0x1d3   : > { %1841 = vmatprep.subr.bf16.mxu1 %v3735_v39 }
 0x1d6   : > { %1842 = vmatpush1.bf16.msra.mxu1 %v3733_v40 }
 0x1d7   : > { %1843 = vmatprep.subr.bf16.mxu1 %v3738_v41 }
 0x1da   : > { %1844 = vmatpush1.bf16.msra.mxu1 %v3736_v42 }
 0x1db   : > { %1845 = vmatprep.subr.bf16.mxu1 %v3741_v43 }
 0x1de   : > { %1846 = vmatpush1.bf16.msra.mxu1 %v3739_v44 }
 0x1df   : > { %1847 = vmatprep.subr.bf16.mxu1 %v3744_v47 }
 0x1e2   : > { %1848 = vmatpush1.bf16.msra.mxu1 %v3742_v49 }
 0x1e3   : > { %1849 = vmatprep.subr.bf16.mxu1 %v3747_v50 }
 0x1e6   : > { %1850 = vmatpush1.bf16.msra.mxu1 %v3745_v51 }
 0x1e7   : > { %1851 = vmatprep.subr.bf16.mxu1 %v3750_v52 }
 0x1ea   : > { %1852 = vmatpush1.bf16.msra.mxu1 %v3748_v54 }
 0x1eb   : > { %1853 = vmatprep.subr.bf16.mxu1 %v3753_v55 }
 0x1ee   : > { %1854 = vmatpush1.bf16.msra.mxu1 %v3751_v60 }
 0x1ef   : > { %1855 = vmatprep.subr.bf16.mxu1 %v3756_v61 }
 0x1f2   : > { %1856 = vmatpush1.bf16.msra.mxu1 %v3754_v46 }
 0x1f5   : > { %1858 = vmatmul.mubr.bf16.vlgmr.msra.gmra.mrb[4].mxu1 %v1645_v4 }
 0x2c8   : > { %v1859_v28 = vpop.f32.mrb[4].mxu1 }
 0x2c9   : > { %v1893_v30 = vmul.f32 %v1888_v25, %v1859_v28  ;;  %v1861_v31 = vpop.f32.mrb[5].mxu1  ;;  %v3834_v28 = vld [vmem:[%s4933_s1 + $0x694] ss:$8 sps:$4 sm:$0xff]  }
 0x2ca   : > { %v1894_v32 = vmul.f32 %v1892_v26, %v1861_v31  ;;  %v1863_v33 = vpop.f32.mrb[6].mxu1  ;;  %v3835_v31 = vld [vmem:[%s4933_s1 + $0x6a0] ss:$8 sps:$4 sm:$0xff]  }
 0x2cb   : > { %v1915_v34 = vadd.f32 %v1910_v27, %v1893_v30  ;;  %v1895_v35 = vmul.f32 %v1888_v25, %v1863_v33  ;;  %v1865_v36 = vpop.f32.mrb[7].mxu1  ;;  %v3826_v25 = vld [vmem:[%s4933_s1 + $0x670] ss:$8 sps:$4 sm:$0xff]   ;;  %v3837_v30 = vld [vmem:[%s4933_s1 + $0x6a4] ss:$8 sps:$4 sm:$0xff]  }
 0x2cc   : > { %v1916_v37 = vadd.f32 %v1914_v29, %v1894_v32  ;;  %v1896_v38 = vmul.f32 %v1892_v26, %v1865_v36  ;;  %v3831_v26 = vld [vmem:[%s4933_s1 + $0x684] ss:$8 sps:$4 sm:$0xff]   ;;  %v3840_v32 = vld [vmem:[%s4933_s1 + $0x6b4] ss:$8 sps:$4 sm:$0xff]   ;;  %v3838_v33 = vld [vmem:[%s4933_s1 + $0x6b0] ss:$8 sps:$4 sm:$0xff]  }
 0x2cd   : > { %v1917_v39 = vadd.f32 %v1910_v27, %v1895_v35  ;;  %v1919_v41 = vmax.f32 %v1915_v34, 0.0  ;;  %v3829_v27 = vld [vmem:[%s4933_s1 + $0x680] ss:$8 sps:$4 sm:$0xff]   ;;  %v3843_v34 = vld [vmem:[%s4933_s1 + $0x6c4] ss:$8 sps:$4 sm:$0xff]  }
 0x2ce   : > { %v1918_v40 = vadd.f32 %v1914_v29, %v1896_v38  ;;  %v1920_v43 = vmax.f32 %v1916_v37, 0.0  ;;  %v3832_v29 = vld [vmem:[%s4933_s1 + $0x690] ss:$8 sps:$4 sm:$0xff]   ;;  %v3841_v35 = vld [vmem:[%s4933_s1 + $0x6c0] ss:$8 sps:$4 sm:$0xff]  }
 0x2cf   : > { %v1921_v42 = vmax.f32 %v1917_v39, 0.0  ;;  %v3846_v36 = vld [vmem:[%s4933_s1 + $0x6d4] ss:$8 sps:$4 sm:$0xff]   ;;  %v3844_v38 = vld [vmem:[%s4933_s1 + $0x6d0] ss:$8 sps:$4 sm:$0xff]  }
 0x2d0   : > { %v1922_v44 = vmax.f32 %v1918_v40, 0.0  ;;  %v3849_v40 = vld [vmem:[%s4933_s1 + $0x6e4] ss:$8 sps:$4 sm:$0xff]  }
 0x2d1   : > { %v1923_v47 = vpack.c.bf16 %v1921_v42, %v1919_v41 }
 0x2d2   : > { %v1924_v49 = vpack.c.bf16 %v1922_v44, %v1920_v43 }
 0x2d3   : > { %v1927_v50 = vrot.slane %v1923_v47, 4 }
 0x2d4   : > { %v1928_v51 = vrot.slane %v1924_v49, 4 }
 0x2d5   : > { %1931 = vst [vmem:[#allocation2 + $0x10] ss:$-12 sps:$4 sm:$0xff] %v1927_v50  }
 0x2d6   : > { %1932 = vst [vmem:[#allocation2 + $0x18] ss:$-12 sps:$4 sm:$0xff] %v1928_v51  }
 0x2dc   : > { %v4701_v52 = vld [vmem:[#allocation2 + $0x10] sm:$0xf]  ;;  %v4703_v53 = vld [vmem:[#allocation2] sm:$0xf0] }
 0x2dd   : > { %v1938_v54 = vld [vmem:[#allocation2 + $0x18] sm:$0xf]  ;;  %v4705_v55 = vld [vmem:[#allocation2 + $0x8] sm:$0xf0]  ;;  %v2011_v56 = vrot.slane %v4703_v53, 4  ;;  %v2012_v57 = vrot.slane %v4701_v52, 4 }
 0x2de   : > { %v2014_v58 = vrot.slane %v4705_v55, 4  ;;  %v2015_v59 = vrot.slane %v1938_v54, 4  ;;  %v1936_v60 = vld [vmem:[#allocation2 + $0x8] sm:$0xf8]  ;;  %v2248_v61 = vshrl.u32 %v1938_v54, 16  ;;  %v2251_v62 = vshll.u32 %v1938_v54, 16 }
 0x2df   : > { %v2240_v63 = vshrl.u32 %v1936_v60, 16  ;;  %v2243_v1 = vshll.u32 %v1936_v60, 16  ;;  %v2013_v5 = vsel %vm275_vm1, %v2011_v56, %v2012_v57  ;;  %v1935_v37 = vld [vmem:[#allocation2] sm:$0xf8]  ;;  %v2462_v39 = vld [vmem:[#allocation2 + $0x18] sm:$0x1f] }
 0x2e0   : > { %v2016_v46 = vsel %vm275_vm1, %v2014_v58, %v2015_v59  ;;  %v2250_v3 = vrot.slane %v2248_v61, 3  ;;  %v2253_v4 = vrot.slane %v2251_v62, 4  ;;  %v2223_v41 = vshrl.u32 %v1935_v37, 16  ;;  %v3847_v54 = vld [vmem:[%s4933_s1 + $0x6e0] ss:$8 sps:$4 sm:$0xff]  }
 0x2e1   : > { %2211 = vmatprep.mubr.bf16.mxu0 %v2016_v46  ;;  %v2242_v6 = vrot.slane %v2240_v63, 3  ;;  %v2245_v7 = vrot.slane %v2243_v1, 4  ;;  %v2226_v42 = vshll.u32 %v1935_v37, 16  ;;  %v2231_v43 = vshrl.u32 %v4701_v52, 16  ;;  %v3852_v56 = vld [vmem:[%s4933_s1 + $0x6f4] ss:$8 sps:$4 sm:$0xff]  }
 0x2e2   : > { %2212 = vmatmul.mubr.bf16.vlgmr.msra.gmra.mrb[4].mxu0 %v2013_v5  ;;  %v2254_v9 = vor.u32 %v2253_v4, %v2250_v3  ;;  %v2234_v44 = vshll.u32 %v4701_v52, 16  ;;  %v2514_v47 = vshrl.u32 %v4705_v55, 16  ;;  %v2517_v49 = vshll.u32 %v4705_v55, 16  ;;  %v3855_v63 = vld [vmem:[%s4933_s1 + $0x804] ss:$8 sps:$4 sm:$0xff]  }
 0x2e3   : > { %2419 = vmatpush1.bf16.msra.mxu0 %v3805_v0  ;;  %v2246_v13 = vor.u32 %v2245_v7, %v2242_v6  ;;  %v2522_v50 = vshrl.u32 %v2462_v39, 16  ;;  %v2525_v51 = vshll.u32 %v2462_v39, 16  ;;  %v2225_v57 = vrot.slane %v2223_v41, 3  ;;  %v3850_v0 = vld [vmem:[%s4933_s1 + $0x6f0] ss:$8 sps:$4 sm:$0xff]  }
 0x2e4   : > { %2420 = vmatprep.subr.bf16.mxu0 %v3810_v2  ;;  %v2228_v58 = vrot.slane %v2226_v42, 4  ;;  %v2233_v59 = vrot.slane %v2231_v43, 3  ;;  %v2236_v52 = vrot.slane %v2234_v44, 4  ;;  %v2516_v60 = vrot.slane %v2514_v47, 4  ;;  %v3853_v4 = vld [vmem:[%s4933_s1 + $0x800] ss:$8 sps:$4 sm:$0xff]  }
 0x2e5   : > { %v2255_v15 = vsel %vm487_vm0, %v2246_v13, %v2254_v9  ;;  %v2519_v61 = vrot.slane %v2517_v49, 5  ;;  %v2524_v62 = vrot.slane %v2522_v50, 4  ;;  %v2527_v55 = vrot.slane %v2525_v51, 5  ;;  %v3858_v5 = vld [vmem:[%s4933_s1 + $0x814] ss:$8 sps:$4 sm:$0xff]  }
 0x2e6   : > { %2450 = vmatprep.mubr.bf16.mxu0 %v2255_v15  ;;  %v2229_v1 = vor.u32 %v2228_v58, %v2225_v57  ;;  %v2237_v46 = vor.u32 %v2236_v52, %v2233_v59  ;;  %v3856_v9 = vld [vmem:[%s4933_s1 + $0x810] ss:$8 sps:$4 sm:$0xff]   ;;  %v3859_v13 = vld [vmem:[%s4933_s1 + $0x820] ss:$8 sps:$4 sm:$0xff]   ;;  %v2497_v37 = vshrl.u32 %v4703_v53, 16 }
 0x2e7   : > { %2421 = vmatpush1.bf16.msra.mxu0 %v3808_v45  ;;  %v2520_v2 = vor.u32 %v2519_v61, %v2516_v60  ;;  %v2528_v3 = vor.u32 %v2527_v55, %v2524_v62  ;;  %v3861_v45 = vld [vmem:[%s4933_s1 + $0x824] ss:$8 sps:$4 sm:$0xff]   ;;  %v3862_v15 = vld [vmem:[%s4933_s1 + $0x830] ss:$8 sps:$4 sm:$0xff]   ;;  %v3895_v41 = vld [vmem:[%s4933_s1 + $0x8e0] ss:$8 sps:$4 sm:$0xff]  }
 0x2e8   : > { %2422 = vmatprep.subr.bf16.mxu0 %v3813_v14  ;;  %v2238_v6 = vsel %vm487_vm0, %v2229_v1, %v2237_v46  ;;  %v3864_v14 = vld [vmem:[%s4933_s1 + $0x834] ss:$8 sps:$4 sm:$0xff]   ;;  %v2499_v43 = vrot.slane %v2497_v37, 4  ;;  %v2786_v61 = vld [vmem:[%s3986_s16] sm:$0xff]  ;;  %v2787_v1 = vld [vmem:[%s3986_s16 + $0x8] sm:$0xff] }
 0x2e9   : > { %v2529_v7 = vsel %vm762_vm2, %v2520_v2, %v2528_v3  ;;  %v3900_v42 = vld [vmem:[%s4933_s1 + $0x8f4] ss:$8 sps:$4 sm:$0xff]   ;;  %v2788_v2 = vunpack.c.l.bf16 %v2786_v61 }
 0x2eb   : > { %2423 = vmatpush1.bf16.msra.mxu0 %v3811_v48  ;;  %v3867_v48 = vld [vmem:[%s4933_s1 + $0x844] ss:$8 sps:$4 sm:$0xff]  }
 0x2ec   : > { %2424 = vmatprep.subr.bf16.mxu0 %v3816_v16  ;;  %v3865_v16 = vld [vmem:[%s4933_s1 + $0x840] ss:$8 sps:$4 sm:$0xff]  }
 0x2ef   : > { %2425 = vmatpush1.bf16.msra.mxu0 %v3814_v17  ;;  %v3870_v17 = vld [vmem:[%s4933_s1 + $0x854] ss:$8 sps:$4 sm:$0xff]  }
 0x2f0   : > { %2426 = vmatprep.subr.bf16.mxu0 %v3819_v18  ;;  %v3868_v18 = vld [vmem:[%s4933_s1 + $0x850] ss:$8 sps:$4 sm:$0xff]  }
 0x2f3   : > { %2427 = vmatpush1.bf16.msra.mxu0 %v3817_v19  ;;  %v3873_v19 = vld [vmem:[%s4933_s1 + $0x864] ss:$8 sps:$4 sm:$0xff]  }
 0x2f4   : > { %2428 = vmatprep.subr.bf16.mxu0 %v3822_v20  ;;  %v3871_v20 = vld [vmem:[%s4933_s1 + $0x860] ss:$8 sps:$4 sm:$0xff]  }
 0x2f7   : > { %2429 = vmatpush1.bf16.msra.mxu0 %v3820_v21  ;;  %v3876_v21 = vld [vmem:[%s4933_s1 + $0x874] ss:$8 sps:$4 sm:$0xff]  }
 0x2f8   : > { %2430 = vmatprep.subr.bf16.mxu0 %v3825_v22  ;;  %v3874_v22 = vld [vmem:[%s4933_s1 + $0x870] ss:$8 sps:$4 sm:$0xff]  }
 0x2fb   : > { %2431 = vmatpush1.bf16.msra.mxu0 %v3823_v23  ;;  %v3879_v23 = vld [vmem:[%s4933_s1 + $0x884] ss:$8 sps:$4 sm:$0xff]  }
 0x2fc   : > { %2432 = vmatprep.subr.bf16.mxu0 %v3828_v24  ;;  %v3877_v24 = vld [vmem:[%s4933_s1 + $0x880] ss:$8 sps:$4 sm:$0xff]  }
 0x2ff   : > { %2433 = vmatpush1.bf16.msra.mxu0 %v3826_v25  ;;  %v3882_v25 = vld [vmem:[%s4933_s1 + $0x894] ss:$8 sps:$4 sm:$0xff]  }
 0x300   : > { %2434 = vmatprep.subr.bf16.mxu0 %v3831_v26  ;;  %v3880_v26 = vld [vmem:[%s4933_s1 + $0x890] ss:$8 sps:$4 sm:$0xff]  }
 0x303   : > { %2435 = vmatpush1.bf16.msra.mxu0 %v3829_v27  ;;  %v3885_v27 = vld [vmem:[%s4933_s1 + $0x8a4] ss:$8 sps:$4 sm:$0xff]  }
 0x304   : > { %2436 = vmatprep.subr.bf16.mxu0 %v3834_v28  ;;  %v3883_v28 = vld [vmem:[%s4933_s1 + $0x8a0] ss:$8 sps:$4 sm:$0xff]  }
 0x307   : > { %2437 = vmatpush1.bf16.msra.mxu0 %v3832_v29  ;;  %v3888_v29 = vld [vmem:[%s4933_s1 + $0x8b4] ss:$8 sps:$4 sm:$0xff]  }
 0x308   : > { %2438 = vmatprep.subr.bf16.mxu0 %v3837_v30  ;;  %v3886_v30 = vld [vmem:[%s4933_s1 + $0x8b0] ss:$8 sps:$4 sm:$0xff]  }
 0x30b   : > { %2439 = vmatpush1.bf16.msra.mxu0 %v3835_v31  ;;  %v3891_v31 = vld [vmem:[%s4933_s1 + $0x8c4] ss:$8 sps:$4 sm:$0xff]  }
 0x30c   : > { %2440 = vmatprep.subr.bf16.mxu0 %v3840_v32  ;;  %v3889_v32 = vld [vmem:[%s4933_s1 + $0x8c0] ss:$8 sps:$4 sm:$0xff]  }
 0x30f   : > { %2441 = vmatpush1.bf16.msra.mxu0 %v3838_v33  ;;  %v3894_v33 = vld [vmem:[%s4933_s1 + $0x8d4] ss:$8 sps:$4 sm:$0xff]  }
 0x310   : > { %2442 = vmatprep.subr.bf16.mxu0 %v3843_v34  ;;  %v2461_v34 = vld [vmem:[#allocation2 + $0x10] sm:$0x1f] }
 0x311   : > { %v2505_v39 = vshrl.u32 %v2461_v34, 16 }
 0x313   : > { %2443 = vmatpush1.bf16.msra.mxu0 %v3841_v35  ;;  %v3892_v35 = vld [vmem:[%s4933_s1 + $0x8d0] ss:$8 sps:$4 sm:$0xff]   ;;  %v2507_v47 = vrot.slane %v2505_v39, 4 }
 0x314   : > { %2444 = vmatprep.subr.bf16.mxu0 %v3846_v36  ;;  %v3897_v36 = vld [vmem:[%s4933_s1 + $0x8e4] ss:$8 sps:$4 sm:$0xff]  }
 0x317   : > { %2445 = vmatpush1.bf16.msra.mxu0 %v3844_v38  ;;  %v2500_v38 = vshll.u32 %v4703_v53, 16  ;;  %v3898_v53 = vld [vmem:[%s4933_s1 + $0x8f0] ss:$8 sps:$4 sm:$0xff]  }
 0x318   : > { %2446 = vmatprep.subr.bf16.mxu0 %v3849_v40  ;;  %v2508_v40 = vshll.u32 %v2461_v34, 16 }
 0x319   : > { %v2502_v44 = vrot.slane %v2500_v38, 5 }
 0x31a   : > { %v2510_v49 = vrot.slane %v2508_v40, 5 }
 0x31b   : > { %2447 = vmatpush1.bf16.msra.mxu0 %v3847_v54  ;;  %v2503_v50 = vor.u32 %v2502_v44, %v2499_v43 }
 0x31c   : > { %2448 = vmatprep.subr.bf16.mxu0 %v3852_v56  ;;  %v2511_v51 = vor.u32 %v2510_v49, %v2507_v47  ;;  %v3423_v56 = vld [vmem:[%s4934_s2 + $0x8] sm:$0xf] }
 0x31d   : > { %v2745_v57 = vrot.slane %v3423_v56, %v4362_v8  ;;  %v2749_v58 = vrot.slane %v3423_v56, %v4367_v10  ;;  %v2767_v59 = vrot.slane %v3423_v56, %v4369_v11  ;;  %v2771_v52 = vrot.slane %v3423_v56, %v4371_v12 }
 0x31e   : > { %v2512_v54 = vsel %vm762_vm2, %v2503_v50, %v2511_v51 }
 0x31f   : > { %2449 = vmatpush1.bf16.msra.mxu0 %v3850_v0  ;;  %v2755_v60 = vrot.slane %v2745_v57, %v4362_v8  ;;  %v2759_v62 = vrot.slane %v2749_v58, %v4362_v8  ;;  %v2777_v55 = vrot.slane %v2767_v59, %v4369_v11  ;;  %v2791_v8 = vunpack.c.h.bf16 %v2787_v1 }
 0x320   : > { %2692 = vmatprep.subr.bf16.mxu0 %v3855_v63  ;;  %v2781_v63 = vrot.slane %v2771_v52, %v4369_v11 }
 0x322   : > { %2451 = vmatmul.mubr.bf16.vlgmr.msra.gmra.mrb[4].mxu0 %v2238_v6 }
 0x323   : > { %2693 = vmatpush1.bf16.msra.mxu0 %v3853_v4  ;;  %2724 = vmatprep.mubr.bf16.mxu0 %v2529_v7  ;;  %v2789_v4 = vunpack.c.h.bf16 %v2786_v61  ;;  %v2790_v7 = vunpack.c.l.bf16 %v2787_v1 }
 0x324   : > { %2694 = vmatprep.subr.bf16.mxu0 %v3858_v5 }
 0x327   : > { %2695 = vmatpush1.bf16.msra.mxu0 %v3856_v9 }
 0x328   : > { %2696 = vmatprep.subr.bf16.mxu0 %v3861_v45 }
 0x32b   : > { %2697 = vmatpush1.bf16.msra.mxu0 %v3859_v13 }
 0x32c   : > { %2698 = vmatprep.subr.bf16.mxu0 %v3864_v14 }
 0x32f   : > { %2699 = vmatpush1.bf16.msra.mxu0 %v3862_v15 }
 0x330   : > { %2700 = vmatprep.subr.bf16.mxu0 %v3867_v48 }
 0x333   : > { %2701 = vmatpush1.bf16.msra.mxu0 %v3865_v16 }
 0x334   : > { %2702 = vmatprep.subr.bf16.mxu0 %v3870_v17 }
 0x337   : > { %2703 = vmatpush1.bf16.msra.mxu0 %v3868_v18 }
 0x338   : > { %2704 = vmatprep.subr.bf16.mxu0 %v3873_v19 }
 0x33b   : > { %2705 = vmatpush1.bf16.msra.mxu0 %v3871_v20 }
 0x33c   : > { %2706 = vmatprep.subr.bf16.mxu0 %v3876_v21 }
 0x33f   : > { %2707 = vmatpush1.bf16.msra.mxu0 %v3874_v22 }
 0x340   : > { %2708 = vmatprep.subr.bf16.mxu0 %v3879_v23 }
 0x343   : > { %2709 = vmatpush1.bf16.msra.mxu0 %v3877_v24 }
 0x344   : > { %2710 = vmatprep.subr.bf16.mxu0 %v3882_v25 }
 0x347   : > { %2711 = vmatpush1.bf16.msra.mxu0 %v3880_v26 }
 0x348   : > { %2712 = vmatprep.subr.bf16.mxu0 %v3885_v27 }
 0x34b   : > { %2713 = vmatpush1.bf16.msra.mxu0 %v3883_v28 }
 0x34c   : > { %2714 = vmatprep.subr.bf16.mxu0 %v3888_v29 }
 0x34f   : > { %2715 = vmatpush1.bf16.msra.mxu0 %v3886_v30 }
 0x350   : > { %2716 = vmatprep.subr.bf16.mxu0 %v3891_v31 }
 0x353   : > { %2717 = vmatpush1.bf16.msra.mxu0 %v3889_v32 }
 0x354   : > { %2718 = vmatprep.subr.bf16.mxu0 %v3894_v33 }
 0x357   : > { %2719 = vmatpush1.bf16.msra.mxu0 %v3892_v35 }
 0x358   : > { %2720 = vmatprep.subr.bf16.mxu0 %v3897_v36 }
 0x35b   : > { %2721 = vmatpush1.bf16.msra.mxu0 %v3895_v41 }
 0x35c   : > { %2722 = vmatprep.subr.bf16.mxu0 %v3900_v42 }
 0x35f   : > { %2723 = vmatpush1.bf16.msra.mxu0 %v3898_v53 }
 0x362   : > { %2725 = vmatmul.mubr.bf16.vlgmr.msra.gmra.mrb[4].mxu0 %v2512_v54 }
 0x435   : > { %v2726_v0 = vpop.f32.mrb[4].mxu0 }
 0x436   : > { %v2760_v46 = vmul.f32 %v2755_v60, %v2726_v0  ;;  %v2728_v3 = vpop.f32.mrb[5].mxu0 }
 0x437   : > { %v2761_v10 = vmul.f32 %v2759_v62, %v2728_v3  ;;  %v2730_v5 = vpop.f32.mrb[6].mxu0 }
 0x438   : > { %v2782_v6 = vadd.f32 %v2777_v55, %v2760_v46  ;;  %v2762_v12 = vmul.f32 %v2755_v60, %v2730_v5  ;;  %v2732_v9 = vpop.f32.mrb[7].mxu0 }
 0x439   : > { %v2783_v45 = vadd.f32 %v2781_v63, %v2761_v10  ;;  %v2763_v13 = vmul.f32 %v2759_v62, %v2732_v9 }
 0x43a   : > { %v2792_v14 = vadd.f32 %v2788_v2, %v2782_v6  ;;  %v2784_v15 = vadd.f32 %v2777_v55, %v2762_v12 }
 0x43b   : > { %v2793_v48 = vadd.f32 %v2789_v4, %v2783_v45  ;;  %v2785_v16 = vadd.f32 %v2781_v63, %v2763_v13 }
 0x43c   : > { %v2794_v11 = vadd.f32 %v2790_v7, %v2784_v15 }
 0x43d   : > { %v3430_v17 = vpack.c.bf16 %v2793_v48, %v2792_v14  ;;  %v2795_v18 = vadd.f32 %v2791_v8, %v2785_v16 }
 0x43f   : > { %2808 = vst [vmem:[%s170_s24] sm:$0xff] %v3430_v17  ;;  %v3431_v19 = vpack.c.bf16 %v2795_v18, %v2794_v11 }
 0x441   : > { %2809 = vst [vmem:[%s170_s24 + $0x8] sm:$0xff] %v3431_v19 }
 0x442 PF: > { %s13_s12 = sadd.s32 1, %s3907_s12  }
 0x443   : > { %p10_p4 = scmp.ge.s32.totalorder %s13_s12, 4  }
 0x445   :  { %12 = sbr.rel (!%p10_p4) target bundleno = 1 (0x1), region = 72 }

// kernel: encoder_forward.14
= control target key start
LH: loop header
LB: loop body
LE: loop exit
PB: predicated region body
PF: predicated region fallthrough
CT: control target
= control target key end

     0   :  { %s1746_s12 = smov 0   ;;  %s2158_s0 = inlined_call_operand.vmem [shape: bf16[2,8,512], index: 0, kind: input, shape index: {}]   ;;  %s2159_s1 = inlined_call_operand.vmem [shape: bf16[2,512,256], index: 1, kind: input, shape index: {}]   ;;  %s2160_s2 = inlined_call_operand.vmem [shape: f32[2,256], index: 2, kind: input, shape index: {}]   ;;  %s2161_s3 = inlined_call_operand.vmem [shape: bf16[2,8,256], index: 3, kind: output, shape index: {}]  }
   0x1 LB: > { %s1291_s13 = sadd.s32 4294967295, %s1723_s12   ;;  %p1295_p0 = scmp.ge.s32.totalorder %s1723_s12, 1  ;;  %s1723_s12 = sphi %s1746_s12, %s13_s12  }
   0x2   : > { %p137_p1 = scmp.lt.s32.totalorder %s1723_s12, 3 }
   0x4   : > { %p138_p2 = pnand %p1295_p0, %p137_p1 }
   0x5   : > { %v1521_v0 = vld [vmem:[%s2159_s1 + $0x204] ss:$8 sps:$4 sm:$0xff] (!%p138_p2)   ;;  %v1725_v2 = vmov (!%p138_p2), 0   ;;  %v1525_v3 = vld [vmem:[%s2159_s1 + $0x200] ss:$8 sps:$4 sm:$0xff] (!%p138_p2)   ;;  %p161_p3 = scmp.lt.s32.totalorder (!%p138_p2), %s1291_s13, 1 }
   0x6   : > { %141 = sbr.rel (%p138_p2) target bundleno = 357 (0x165), region = 32  ;;  %v1523_v1 = vld [vmem:[%s2159_s1 + $0x4] ss:$8 sps:$4 sm:$0xff] (!%p138_p2)   ;;  %173 = vst [vmem:[#allocation2 + $0x8] sm:$0xf] (!%p138_p2), %v1725_v2  ;;  %665 = vmatprep.subr.bf16.mxu1 (!%p138_p2), %v1521_v0 }
   0x7   : > { %172 = vst [vmem:[#allocation2] sm:$0xf] (!%p138_p2), %v1725_v2  ;;  %174 = vst [vmem:[#allocation2 + $0x10] sm:$0xf] (!%p138_p2), %v1725_v2  ;;  %v1526_v4 = vld [vmem:[%s2159_s1] ss:$8 sps:$4 sm:$0xff] (!%p138_p2)   ;;  %1103 = vmatprep.subr.bf16.mxu0 (!%p138_p2), %v1523_v1  ;;  %666 = vmatpush1.bf16.msra.mxu1 (!%p138_p2), %v1525_v3 }
   0x8   : > { %175 = vst [vmem:[#allocation2 + $0x18] sm:$0xf] (!%p138_p2), %v1725_v2  ;;  %v1527_v5 = vld [vmem:[%s2159_s1 + $0x214] ss:$8 sps:$4 sm:$0xff] (!%p138_p2)   ;;  %1104 = vmatpush1.bf16.msra.mxu0 (!%p138_p2), %v1526_v4  ;;  %v1531_v7 = vld [vmem:[%s2159_s1 + $0x210] ss:$8 sps:$4 sm:$0xff] (!%p138_p2)  }
   0x9   : > { %v1529_v6 = vld [vmem:[%s2159_s1 + $0x14] ss:$8 sps:$4 sm:$0xff] (!%p138_p2)   ;;  %667 = vmatprep.subr.bf16.mxu1 (!%p138_p2), %v1527_v5  ;;  %v1532_v8 = vld [vmem:[%s2159_s1 + $0x10] ss:$8 sps:$4 sm:$0xff] (!%p138_p2)   ;;  %v1533_v9 = vld [vmem:[%s2159_s1 + $0x224] ss:$8 sps:$4 sm:$0xff] (!%p138_p2)  }
   0xa   : > { %1105 = vmatprep.subr.bf16.mxu0 (!%p138_p2), %v1529_v6  ;;  %v1535_v10 = vld [vmem:[%s2159_s1 + $0x24] ss:$8 sps:$4 sm:$0xff] (!%p138_p2)   ;;  %v1537_v11 = vld [vmem:[%s2159_s1 + $0x220] ss:$8 sps:$4 sm:$0xff] (!%p138_p2)   ;;  %v1539_v13 = vld [vmem:[%s2159_s1 + $0x234] ss:$8 sps:$4 sm:$0xff] (!%p138_p2)  }
   0xb   : > { %v1538_v12 = vld [vmem:[%s2159_s1 + $0x20] ss:$8 sps:$4 sm:$0xff] (!%p138_p2)   ;;  %668 = vmatpush1.bf16.msra.mxu1 (!%p138_p2), %v1531_v7  ;;  %v1541_v14 = vld [vmem:[%s2159_s1 + $0x34] ss:$8 sps:$4 sm:$0xff] (!%p138_p2)   ;;  %v1543_v15 = vld [vmem:[%s2159_s1 + $0x230] ss:$8 sps:$4 sm:$0xff] (!%p138_p2)  }
   0xc   : > { %1106 = vmatpush1.bf16.msra.mxu0 (!%p138_p2), %v1532_v8  ;;  %669 = vmatprep.subr.bf16.mxu1 (!%p138_p2), %v1533_v9  ;;  %v1544_v16 = vld [vmem:[%s2159_s1 + $0x30] ss:$8 sps:$4 sm:$0xff] (!%p138_p2)   ;;  %v1545_v17 = vld [vmem:[%s2159_s1 + $0x244] ss:$8 sps:$4 sm:$0xff] (!%p138_p2)   ;;  %v1549_v19 = vld [vmem:[%s2159_s1 + $0x240] ss:$8 sps:$4 sm:$0xff] (!%p138_p2)  }
   0xd   : > { %1107 = vmatprep.subr.bf16.mxu0 %v1535_v10  ;;  %v1547_v18 = vld [vmem:[%s2159_s1 + $0x44] ss:$8 sps:$4 sm:$0xff]   ;;  %v1550_v20 = vld [vmem:[%s2159_s1 + $0x40] ss:$8 sps:$4 sm:$0xff]   ;;  %v1551_v21 = vld [vmem:[%s2159_s1 + $0x254] ss:$8 sps:$4 sm:$0xff]  }
   0xe   : > { %v1553_v22 = vld [vmem:[%s2159_s1 + $0x54] ss:$8 sps:$4 sm:$0xff]   ;;  %v1555_v23 = vld [vmem:[%s2159_s1 + $0x250] ss:$8 sps:$4 sm:$0xff]   ;;  %v1557_v25 = vld [vmem:[%s2159_s1 + $0x264] ss:$8 sps:$4 sm:$0xff]  }
   0xf   : > { %670 = vmatpush1.bf16.msra.mxu1 %v1537_v11  ;;  %v1556_v24 = vld [vmem:[%s2159_s1 + $0x50] ss:$8 sps:$4 sm:$0xff]   ;;  %v1559_v26 = vld [vmem:[%s2159_s1 + $0x64] ss:$8 sps:$4 sm:$0xff]   ;;  %v1561_v27 = vld [vmem:[%s2159_s1 + $0x260] ss:$8 sps:$4 sm:$0xff]  }
  0x10   : > { %1108 = vmatpush1.bf16.msra.mxu0 %v1538_v12  ;;  %671 = vmatprep.subr.bf16.mxu1 %v1539_v13  ;;  %v1562_v28 = vld [vmem:[%s2159_s1 + $0x60] ss:$8 sps:$4 sm:$0xff]   ;;  %v1563_v29 = vld [vmem:[%s2159_s1 + $0x274] ss:$8 sps:$4 sm:$0xff]   ;;  %v1567_v31 = vld [vmem:[%s2159_s1 + $0x270] ss:$8 sps:$4 sm:$0xff]  }
  0x11   : > { %1109 = vmatprep.subr.bf16.mxu0 %v1541_v14  ;;  %v1565_v30 = vld [vmem:[%s2159_s1 + $0x74] ss:$8 sps:$4 sm:$0xff]   ;;  %v1568_v32 = vld [vmem:[%s2159_s1 + $0x70] ss:$8 sps:$4 sm:$0xff]   ;;  %v1569_v33 = vld [vmem:[%s2159_s1 + $0x284] ss:$8 sps:$4 sm:$0xff]  }
  0x12   : > { %v1571_v34 = vld [vmem:[%s2159_s1 + $0x84] ss:$8 sps:$4 sm:$0xff]   ;;  %v1573_v35 = vld [vmem:[%s2159_s1 + $0x280] ss:$8 sps:$4 sm:$0xff]   ;;  %v1575_v37 = vld [vmem:[%s2159_s1 + $0x294] ss:$8 sps:$4 sm:$0xff]  }
  0x13   : > { %672 = vmatpush1.bf16.msra.mxu1 %v1543_v15  ;;  %v1574_v36 = vld [vmem:[%s2159_s1 + $0x80] ss:$8 sps:$4 sm:$0xff]   ;;  %s2163_s13 = smov (!%p161_p3, %s1291_s13), 1  ;;  %v1577_v38 = vld [vmem:[%s2159_s1 + $0x94] ss:$8 sps:$4 sm:$0xff]  }
  0x14   : > { %1110 = vmatpush1.bf16.msra.mxu0 %v1544_v16  ;;  %673 = vmatprep.subr.bf16.mxu1 %v1545_v17  ;;  %v1579_v39 = vld [vmem:[%s2159_s1 + $0x290] ss:$8 sps:$4 sm:$0xff]   ;;  %v1581_v41 = vld [vmem:[%s2159_s1 + $0x2a4] ss:$8 sps:$4 sm:$0xff]   ;;  %s1499_s21 = sshll.u32 %s2163_s13, 4  ;;  %s1500_s26 = sshll.u32 %s2163_s13, 3 }
  0x15   : > { %1111 = vmatprep.subr.bf16.mxu0 %v1547_v18  ;;  %v1580_v40 = vld [vmem:[%s2159_s1 + $0x90] ss:$8 sps:$4 sm:$0xff]   ;;  %v1583_v42 = vld [vmem:[%s2159_s1 + $0xa4] ss:$8 sps:$4 sm:$0xff]   ;;  %v1585_v43 = vld [vmem:[%s2159_s1 + $0x2a0] ss:$8 sps:$4 sm:$0xff]   ;;  %s165_s30 = scalar_lea.vmem %s2158_s0, %s1499_s21  ;;  %s170_s29 = scalar_lea.vmem %s2161_s3, %s1500_s26 }
  0x16   : > { %v1586_v44 = vld [vmem:[%s2159_s1 + $0xa0] ss:$8 sps:$4 sm:$0xff]   ;;  %v1587_v45 = vld [vmem:[%s2159_s1 + $0x2b4] ss:$8 sps:$4 sm:$0xff]   ;;  %v1591_v51 = vld [vmem:[%s2159_s1 + $0x2b0] ss:$8 sps:$4 sm:$0xff]  }
  0x17   : > { %674 = vmatpush1.bf16.msra.mxu1 %v1549_v19  ;;  %v1589_v46 = vld [vmem:[%s2159_s1 + $0xb4] ss:$8 sps:$4 sm:$0xff]   ;;  %v176_v47 = vld [vmem:[%s165_s30] sm:$0xff]  ;;  %v177_v48 = vld [vmem:[%s165_s30 + $0x8] sm:$0xff] }
  0x18   : > { %1112 = vmatpush1.bf16.msra.mxu0 %v1550_v20  ;;  %675 = vmatprep.subr.bf16.mxu1 %v1551_v21  ;;  %v1300_v49 = vcombine.low %v176_v47, %v176_v47  ;;  %v1301_v50 = vcombine.high %v176_v47, %v176_v47  ;;  %v1592_v52 = vld [vmem:[%s2159_s1 + $0xb0] ss:$8 sps:$4 sm:$0xff]   ;;  %v1302_v53 = vcombine.low %v177_v48, %v177_v48  ;;  %v1593_v55 = vld [vmem:[%s2159_s1 + $0x2c4] ss:$8 sps:$4 sm:$0xff]   ;;  %v1597_v57 = vld [vmem:[%s2159_s1 + $0x2c0] ss:$8 sps:$4 sm:$0xff]  }
  0x19   : > { %1113 = vmatprep.subr.bf16.mxu0 %v1553_v22  ;;  %v1303_v54 = vcombine.high %v177_v48, %v177_v48  ;;  %v1595_v56 = vld [vmem:[%s2159_s1 + $0xc4] ss:$8 sps:$4 sm:$0xff]   ;;  %v1598_v58 = vld [vmem:[%s2159_s1 + $0xc0] ss:$8 sps:$4 sm:$0xff]   ;;  %v1599_v59 = vld [vmem:[%s2159_s1 + $0x2d4] ss:$8 sps:$4 sm:$0xff]  }
  0x1a   : > { %192 = vst [vmem:[#allocation2] sm:$0xf0] %v1300_v49  ;;  %193 = vst [vmem:[#allocation2 + $0x8] sm:$0xf0] %v1301_v50  ;;  %v1601_v60 = vld [vmem:[%s2159_s1 + $0xd4] ss:$8 sps:$4 sm:$0xff]  }
  0x1b   : > { %676 = vmatpush1.bf16.msra.mxu1 %v1555_v23  ;;  %194 = vst [vmem:[#allocation2 + $0x10] sm:$0xf0] %v1302_v53  ;;  %195 = vst [vmem:[#allocation2 + $0x18] sm:$0xf0] %v1303_v54  ;;  %v1603_v61 = vld [vmem:[%s2159_s1 + $0x2d0] ss:$8 sps:$4 sm:$0xff]  }
  0x1c   : > { %1114 = vmatpush1.bf16.msra.mxu0 %v1556_v24  ;;  %677 = vmatprep.subr.bf16.mxu1 %v1557_v25  ;;  %v1604_v62 = vld [vmem:[%s2159_s1 + $0xd0] ss:$8 sps:$4 sm:$0xff]   ;;  %v1605_v63 = vld [vmem:[%s2159_s1 + $0x2e4] ss:$8 sps:$4 sm:$0xff]   ;;  %v1609_v7 = vld [vmem:[%s2159_s1 + $0x2e0] ss:$8 sps:$4 sm:$0xff]  }
  0x1d   : > { %1115 = vmatprep.subr.bf16.mxu0 %v1559_v26  ;;  %v1607_v0 = vld [vmem:[%s2159_s1 + $0xe4] ss:$8 sps:$4 sm:$0xff]   ;;  %v1610_v12 = vld [vmem:[%s2159_s1 + $0xe0] ss:$8 sps:$4 sm:$0xff]   ;;  %v1611_v13 = vld [vmem:[%s2159_s1 + $0x2f4] ss:$8 sps:$4 sm:$0xff]  }
  0x1e   : > { %v1613_v14 = vld [vmem:[%s2159_s1 + $0xf4] ss:$8 sps:$4 sm:$0xff]   ;;  %v1615_v16 = vld [vmem:[%s2159_s1 + $0x2f0] ss:$8 sps:$4 sm:$0xff]   ;;  %v1622_v21 = vld [vmem:[%s2159_s1 + $0x304] ss:$8 sps:$4 sm:$0xff]  }
  0x1f   : > { %678 = vmatpush1.bf16.msra.mxu1 %v1561_v27  ;;  %v1616_v17 = vld [vmem:[%s2159_s1 + $0xf0] ss:$8 sps:$4 sm:$0xff]   ;;  %v1625_v22 = vld [vmem:[%s2159_s1 + $0x104] ss:$8 sps:$4 sm:$0xff]   ;;  %v1620_v23 = vld [vmem:[%s2159_s1 + $0x300] ss:$8 sps:$4 sm:$0xff]  }
  0x20   : > { %1116 = vmatpush1.bf16.msra.mxu0 %v1562_v28  ;;  %679 = vmatprep.subr.bf16.mxu1 %v1563_v29  ;;  %v1623_v26 = vld [vmem:[%s2159_s1 + $0x100] ss:$8 sps:$4 sm:$0xff]   ;;  %v1628_v27 = vld [vmem:[%s2159_s1 + $0x314] ss:$8 sps:$4 sm:$0xff]   ;;  %v1626_v29 = vld [vmem:[%s2159_s1 + $0x310] ss:$8 sps:$4 sm:$0xff]  }
  0x21   : > { %1117 = vmatprep.subr.bf16.mxu0 %v1565_v30  ;;  %v265_v1 = vld [vmem:[#allocation2 + $0x8] sm:$0xf0]  ;;  %v196_v6 = vld [vmem:[#allocation2] sm:$0xf8]  ;;  %v1631_v28 = vld [vmem:[%s2159_s1 + $0x114] ss:$8 sps:$4 sm:$0xff]  }
  0x22   : > { %v197_v2 = vld [vmem:[#allocation2 + $0x8] sm:$0xf8]  ;;  %v338_v3 = vrot.slane %v265_v1, 4  ;;  %v748_v10 = vshrl.u32 %v196_v6, 16  ;;  %v751_v11 = vshll.u32 %v196_v6, 16 }
  0x23   : > { %680 = vmatpush1.bf16.msra.mxu1 %v1567_v31  ;;  %v756_v4 = vshrl.u32 %v197_v2, 16  ;;  %v759_v5 = vshll.u32 %v197_v2, 16  ;;  %v264_v20 = vld [vmem:[#allocation2] sm:$0xf0]  ;;  %v1629_v30 = vld [vmem:[%s2159_s1 + $0x110] ss:$8 sps:$4 sm:$0xff]  }
  0x24   : > { %1118 = vmatpush1.bf16.msra.mxu0 %v1568_v32  ;;  %681 = vmatprep.subr.bf16.mxu1 %v1569_v33  ;;  %v750_v18 = vrot.slane %v748_v10, 3  ;;  %v753_v19 = vrot.slane %v751_v11, 4  ;;  %v337_v24 = vrot.slane %v264_v20, 4  ;;  %v1634_v31 = vld [vmem:[%s2159_s1 + $0x324] ss:$8 sps:$4 sm:$0xff]  }
  0x25   : > { %1119 = vmatprep.subr.bf16.mxu0 %v1571_v34  ;;  %697 = vmatprep.mubr.bf16.mxu1 %v338_v3  ;;  %v758_v8 = vrot.slane %v756_v4, 3  ;;  %v761_v9 = vrot.slane %v759_v5, 4  ;;  %v1637_v32 = vld [vmem:[%s2159_s1 + $0x124] ss:$8 sps:$4 sm:$0xff]   ;;  %v1632_v33 = vld [vmem:[%s2159_s1 + $0x320] ss:$8 sps:$4 sm:$0xff]  }
  0x26   : > { %v754_v25 = vor.u32 %v753_v19, %v750_v18  ;;  %v1635_v34 = vld [vmem:[%s2159_s1 + $0x120] ss:$8 sps:$4 sm:$0xff]   ;;  %v1658_v47 = vld [vmem:[%s2159_s1 + $0x364] ss:$8 sps:$4 sm:$0xff]   ;;  %v199_v53 = vld [vmem:[#allocation2 + $0x18] sm:$0xf8] }
  0x27   : > { %682 = vmatpush1.bf16.msra.mxu1 %v1573_v35  ;;  %v762_v15 = vor.u32 %v761_v9, %v758_v8  ;;  %v1640_v35 = vld [vmem:[%s2159_s1 + $0x334] ss:$8 sps:$4 sm:$0xff]   ;;  %v1661_v48 = vld [vmem:[%s2159_s1 + $0x164] ss:$8 sps:$4 sm:$0xff]   ;;  %v1656_v49 = vld [vmem:[%s2159_s1 + $0x360] ss:$8 sps:$4 sm:$0xff]  }
  0x28   : > { %1120 = vmatpush1.bf16.msra.mxu0 %v1574_v36  ;;  %683 = vmatprep.subr.bf16.mxu1 %v1575_v37  ;;  %v1643_v36 = vld [vmem:[%s2159_s1 + $0x134] ss:$8 sps:$4 sm:$0xff]   ;;  %v1638_v37 = vld [vmem:[%s2159_s1 + $0x330] ss:$8 sps:$4 sm:$0xff]   ;;  %v1659_v50 = vld [vmem:[%s2159_s1 + $0x160] ss:$8 sps:$4 sm:$0xff]  }
  0x29   : > { %1121 = vmatprep.subr.bf16.mxu0 %v1577_v38  ;;  %1135 = vmatprep.mubr.bf16.mxu0 %v762_v15  ;;  %v1641_v38 = vld [vmem:[%s2159_s1 + $0x130] ss:$8 sps:$4 sm:$0xff]   ;;  %v1667_v54 = vld [vmem:[%s2159_s1 + $0x174] ss:$8 sps:$4 sm:$0xff]   ;;  %v1668_v1 = vld [vmem:[%s2159_s1 + $0x380] ss:$8 sps:$4 sm:$0xff]  }
  0x2a   : > { %v1671_v2 = vld [vmem:[%s2159_s1 + $0x180] ss:$8 sps:$4 sm:$0xff]   ;;  %v1676_v3 = vld [vmem:[%s2159_s1 + $0x394] ss:$8 sps:$4 sm:$0xff]   ;;  %v1674_v5 = vld [vmem:[%s2159_s1 + $0x390] ss:$8 sps:$4 sm:$0xff]  }
  0x2b   : > { %684 = vmatpush1.bf16.msra.mxu1 %v1579_v39  ;;  %v1646_v39 = vld [vmem:[%s2159_s1 + $0x344] ss:$8 sps:$4 sm:$0xff]   ;;  %v1679_v4 = vld [vmem:[%s2159_s1 + $0x194] ss:$8 sps:$4 sm:$0xff]   ;;  %v1677_v6 = vld [vmem:[%s2159_s1 + $0x190] ss:$8 sps:$4 sm:$0xff]  }
  0x2c   : > { %1122 = vmatpush1.bf16.msra.mxu0 %v1580_v40  ;;  %685 = vmatprep.subr.bf16.mxu1 %v1581_v41  ;;  %v1649_v40 = vld [vmem:[%s2159_s1 + $0x144] ss:$8 sps:$4 sm:$0xff]   ;;  %v1644_v41 = vld [vmem:[%s2159_s1 + $0x340] ss:$8 sps:$4 sm:$0xff]   ;;  %v1688_v11 = vld [vmem:[%s2159_s1 + $0x3b4] ss:$8 sps:$4 sm:$0xff]  }
  0x2d   : > { %1123 = vmatprep.subr.bf16.mxu0 %v1583_v42  ;;  %v1647_v42 = vld [vmem:[%s2159_s1 + $0x140] ss:$8 sps:$4 sm:$0xff]   ;;  %v1685_v8 = vld [vmem:[%s2159_s1 + $0x1a4] ss:$8 sps:$4 sm:$0xff]   ;;  %v1700_v19 = vld [vmem:[%s2159_s1 + $0x3d4] ss:$8 sps:$4 sm:$0xff]  }
  0x2e   : > { %v1680_v9 = vld [vmem:[%s2159_s1 + $0x3a0] ss:$8 sps:$4 sm:$0xff]   ;;  %v1694_v15 = vld [vmem:[%s2159_s1 + $0x3c4] ss:$8 sps:$4 sm:$0xff]   ;;  %v1703_v20 = vld [vmem:[%s2159_s1 + $0x1d4] ss:$8 sps:$4 sm:$0xff]  }
  0x2f   : > { %686 = vmatpush1.bf16.msra.mxu1 %v1585_v43  ;;  %v1652_v43 = vld [vmem:[%s2159_s1 + $0x354] ss:$8 sps:$4 sm:$0xff]   ;;  %v1683_v10 = vld [vmem:[%s2159_s1 + $0x1a0] ss:$8 sps:$4 sm:$0xff]  }
  0x30   : > { %1124 = vmatpush1.bf16.msra.mxu0 %v1586_v44  ;;  %687 = vmatprep.subr.bf16.mxu1 %v1587_v45  ;;  %v1655_v44 = vld [vmem:[%s2159_s1 + $0x154] ss:$8 sps:$4 sm:$0xff]   ;;  %v1650_v45 = vld [vmem:[%s2159_s1 + $0x350] ss:$8 sps:$4 sm:$0xff]   ;;  %v1695_v18 = vld [vmem:[%s2159_s1 + $0x1c0] ss:$8 sps:$4 sm:$0xff]  }
  0x31   : > { %1125 = vmatprep.subr.bf16.mxu0 %v1589_v46  ;;  %v1653_v46 = vld [vmem:[%s2159_s1 + $0x150] ss:$8 sps:$4 sm:$0xff]  }
  0x33   : > { %688 = vmatpush1.bf16.msra.mxu1 %v1591_v51  ;;  %v1664_v51 = vld [vmem:[%s2159_s1 + $0x374] ss:$8 sps:$4 sm:$0xff]  }
  0x34   : > { %1126 = vmatpush1.bf16.msra.mxu0 %v1592_v52  ;;  %689 = vmatprep.subr.bf16.mxu1 %v1593_v55  ;;  %v267_v52 = vld [vmem:[#allocation2 + $0x18] sm:$0xf0] }
  0x35   : > { %1127 = vmatprep.subr.bf16.mxu0 %v1595_v56  ;;  %v340_v55 = vrot.slane %v267_v52, 4  ;;  %v772_v56 = vshrl.u32 %v199_v53, 16 }
  0x37   : > { %690 = vmatpush1.bf16.msra.mxu1 %v1597_v57  ;;  %v775_v57 = vshll.u32 %v199_v53, 16 }
  0x38   : > { %1128 = vmatpush1.bf16.msra.mxu0 %v1598_v58  ;;  %691 = vmatprep.subr.bf16.mxu1 %v1599_v59  ;;  %v774_v58 = vrot.slane %v772_v56, 3 }
  0x39   : > { %1129 = vmatprep.subr.bf16.mxu0 %v1601_v60  ;;  %v777_v59 = vrot.slane %v775_v57, 4  ;;  %v1662_v60 = vld [vmem:[%s2159_s1 + $0x370] ss:$8 sps:$4 sm:$0xff]  }
  0x3b   : > { %692 = vmatpush1.bf16.msra.mxu1 %v1603_v61  ;;  %v1665_v61 = vld [vmem:[%s2159_s1 + $0x170] ss:$8 sps:$4 sm:$0xff]  }
  0x3c   : > { %1130 = vmatpush1.bf16.msra.mxu0 %v1604_v62  ;;  %693 = vmatprep.subr.bf16.mxu1 %v1605_v63  ;;  %v1670_v62 = vld [vmem:[%s2159_s1 + $0x384] ss:$8 sps:$4 sm:$0xff]  }
  0x3d   : > { %1131 = vmatprep.subr.bf16.mxu0 %v1607_v0  ;;  %v1673_v63 = vld [vmem:[%s2159_s1 + $0x184] ss:$8 sps:$4 sm:$0xff]   ;;  %v778_v0 = vor.u32 %v777_v59, %v774_v58 }
  0x3f   : > { %694 = vmatpush1.bf16.msra.mxu1 %v1609_v7  ;;  %v1682_v7 = vld [vmem:[%s2159_s1 + $0x3a4] ss:$8 sps:$4 sm:$0xff]  }
  0x40   : > { %1132 = vmatpush1.bf16.msra.mxu0 %v1610_v12  ;;  %695 = vmatprep.subr.bf16.mxu1 %v1611_v13  ;;  %v1691_v12 = vld [vmem:[%s2159_s1 + $0x1b4] ss:$8 sps:$4 sm:$0xff]   ;;  %v1686_v13 = vld [vmem:[%s2159_s1 + $0x3b0] ss:$8 sps:$4 sm:$0xff]  }
  0x41   : > { %1133 = vmatprep.subr.bf16.mxu0 %v1613_v14  ;;  %v1689_v14 = vld [vmem:[%s2159_s1 + $0x1b0] ss:$8 sps:$4 sm:$0xff]  }
  0x43   : > { %696 = vmatpush1.bf16.msra.mxu1 %v1615_v16  ;;  %v1697_v16 = vld [vmem:[%s2159_s1 + $0x1c4] ss:$8 sps:$4 sm:$0xff]  }
  0x44   : > { %1134 = vmatpush1.bf16.msra.mxu0 %v1616_v17  ;;  %706 = vmatprep.subr.bf16.mxu1 %v1622_v21  ;;  %v1692_v17 = vld [vmem:[%s2159_s1 + $0x3c0] ss:$8 sps:$4 sm:$0xff]   ;;  %v1698_v21 = vld [vmem:[%s2159_s1 + $0x3d0] ss:$8 sps:$4 sm:$0xff]  }
  0x45   : > { %1144 = vmatprep.subr.bf16.mxu0 %v1625_v22  ;;  %v1701_v22 = vld [vmem:[%s2159_s1 + $0x1d0] ss:$8 sps:$4 sm:$0xff]  }
  0x46   : > { %698 = vmatmul.mubr.bf16.vlgmr.msra.gmra.mrb[0].mxu1 %v337_v24  ;;  %v1706_v24 = vld [vmem:[%s2159_s1 + $0x3e4] ss:$8 sps:$4 sm:$0xff]  }
  0x47   : > { %1136 = vmatmul.mubr.bf16.vlgmr.msra.gmra.mrb[0].mxu0 %v754_v25  ;;  %707 = vmatpush1.bf16.msra.mxu1 %v1620_v23  ;;  %v198_v23 = vld [vmem:[#allocation2 + $0x10] sm:$0xf8]  ;;  %v1709_v25 = vld [vmem:[%s2159_s1 + $0x1e4] ss:$8 sps:$4 sm:$0xff]  }
  0x48   : > { %1145 = vmatpush1.bf16.msra.mxu0 %v1623_v26  ;;  %708 = vmatprep.subr.bf16.mxu1 %v1628_v27  ;;  %v764_v26 = vshrl.u32 %v198_v23, 16  ;;  %v767_v27 = vshll.u32 %v198_v23, 16 }
  0x49   : > { %1146 = vmatprep.subr.bf16.mxu0 %v1631_v28  ;;  %738 = vmatprep.mubr.bf16.mxu1 %v340_v55  ;;  %v1704_v28 = vld [vmem:[%s2159_s1 + $0x3e0] ss:$8 sps:$4 sm:$0xff]  }
  0x4a   : > { %1176 = vmatprep.mubr.bf16.mxu0 %v778_v0 }
  0x4b   : > { %709 = vmatpush1.bf16.msra.mxu1 %v1626_v29  ;;  %v1707_v29 = vld [vmem:[%s2159_s1 + $0x1e0] ss:$8 sps:$4 sm:$0xff]  }
  0x4c   : > { %1147 = vmatpush1.bf16.msra.mxu0 %v1629_v30  ;;  %710 = vmatprep.subr.bf16.mxu1 %v1634_v31  ;;  %v1712_v30 = vld [vmem:[%s2159_s1 + $0x3f4] ss:$8 sps:$4 sm:$0xff]  }
  0x4d   : > { %1148 = vmatprep.subr.bf16.mxu0 %v1637_v32  ;;  %v1715_v31 = vld [vmem:[%s2159_s1 + $0x1f4] ss:$8 sps:$4 sm:$0xff]   ;;  %v766_v32 = vrot.slane %v764_v26, 3 }
  0x4f   : > { %711 = vmatpush1.bf16.msra.mxu1 %v1632_v33  ;;  %v769_v33 = vrot.slane %v767_v27, 4 }
  0x50   : > { %1149 = vmatpush1.bf16.msra.mxu0 %v1635_v34  ;;  %712 = vmatprep.subr.bf16.mxu1 %v1640_v35  ;;  %v1710_v34 = vld [vmem:[%s2159_s1 + $0x3f0] ss:$8 sps:$4 sm:$0xff]  }
  0x51   : > { %1150 = vmatprep.subr.bf16.mxu0 %v1643_v36  ;;  %v1713_v35 = vld [vmem:[%s2159_s1 + $0x1f0] ss:$8 sps:$4 sm:$0xff]   ;;  %v266_v36 = vld [vmem:[#allocation2 + $0x10] sm:$0xf0] }
  0x53   : > { %713 = vmatpush1.bf16.msra.mxu1 %v1638_v37  ;;  %v339_v37 = vrot.slane %v266_v36, 4 }
  0x54   : > { %1151 = vmatpush1.bf16.msra.mxu0 %v1641_v38  ;;  %714 = vmatprep.subr.bf16.mxu1 %v1646_v39  ;;  %v770_v38 = vor.u32 %v769_v33, %v766_v32  ;;  %v1187_v39 = vlaneseq }
  0x55   : > { %1152 = vmatprep.subr.bf16.mxu0 %v1649_v40 }
  0x56   : > { %v1188_v40 = vshrl.u32 %v1187_v39, 7 }
  0x57   : > { %715 = vmatpush1.bf16.msra.mxu1 %v1644_v41 }
  0x58   : > { %1153 = vmatpush1.bf16.msra.mxu0 %v1647_v42  ;;  %716 = vmatprep.subr.bf16.mxu1 %v1652_v43  ;;  %v1189_v41 = vsub.s32 0, %v1188_v40  ;;  %v1185_v42 = vld [vmem:[%s2160_s2] sm:$0xf]  ;;  %v1193_v43 = vsub.s32 2, %v1188_v40 }
  0x59   : > { %1154 = vmatprep.subr.bf16.mxu0 %v1655_v44  ;;  %v1209_v44 = vsub.s32 1, %v1188_v40 }
  0x5b   : > { %717 = vmatpush1.bf16.msra.mxu1 %v1650_v45  ;;  %v1213_v45 = vsub.s32 3, %v1188_v40 }
  0x5c   : > { %1155 = vmatpush1.bf16.msra.mxu0 %v1653_v46  ;;  %718 = vmatprep.subr.bf16.mxu1 %v1658_v47  ;;  %v1190_v46 = vrot.slane %v1185_v42, %v1189_v41  ;;  %v1194_v47 = vrot.slane %v1185_v42, %v1193_v43 }
  0x5d   : > { %1156 = vmatprep.subr.bf16.mxu0 %v1661_v48  ;;  %v1210_v48 = vrot.slane %v1185_v42, %v1209_v44 }
  0x5e   : > { %v1204_v53 = vrot.slane %v1194_v47, %v1189_v41 }
  0x5f   : > { %719 = vmatpush1.bf16.msra.mxu1 %v1656_v49  ;;  %v1214_v49 = vrot.slane %v1185_v42, %v1213_v45  ;;  %v1220_v55 = vrot.slane %v1210_v48, %v1209_v44 }
  0x60   : > { %1157 = vmatpush1.bf16.msra.mxu0 %v1659_v50  ;;  %720 = vmatprep.subr.bf16.mxu1 %v1664_v51  ;;  %v1200_v50 = vrot.slane %v1190_v46, %v1189_v41 }
  0x61   : > { %1158 = vmatprep.subr.bf16.mxu0 %v1667_v54  ;;  %v1224_v59 = vrot.slane %v1214_v49, %v1209_v44 }
  0x63   : > { %721 = vmatpush1.bf16.msra.mxu1 %v1662_v60 }
  0x64   : > { %1159 = vmatpush1.bf16.msra.mxu0 %v1665_v61  ;;  %722 = vmatprep.subr.bf16.mxu1 %v1670_v62 }
  0x65   : > { %1160 = vmatprep.subr.bf16.mxu0 %v1673_v63 }
  0x67   : > { %723 = vmatpush1.bf16.msra.mxu1 %v1668_v1 }
  0x68   : > { %1161 = vmatpush1.bf16.msra.mxu0 %v1671_v2  ;;  %724 = vmatprep.subr.bf16.mxu1 %v1676_v3 }
  0x69   : > { %1162 = vmatprep.subr.bf16.mxu0 %v1679_v4 }
  0x6b   : > { %725 = vmatpush1.bf16.msra.mxu1 %v1674_v5 }
  0x6c   : > { %1163 = vmatpush1.bf16.msra.mxu0 %v1677_v6  ;;  %726 = vmatprep.subr.bf16.mxu1 %v1682_v7 }
  0x6d   : > { %1164 = vmatprep.subr.bf16.mxu0 %v1685_v8 }
  0x6f   : > { %727 = vmatpush1.bf16.msra.mxu1 %v1680_v9 }
  0x70   : > { %1165 = vmatpush1.bf16.msra.mxu0 %v1683_v10  ;;  %728 = vmatprep.subr.bf16.mxu1 %v1688_v11 }
  0x71   : > { %1166 = vmatprep.subr.bf16.mxu0 %v1691_v12 }
  0x73   : > { %729 = vmatpush1.bf16.msra.mxu1 %v1686_v13 }
  0x74   : > { %1167 = vmatpush1.bf16.msra.mxu0 %v1689_v14  ;;  %730 = vmatprep.subr.bf16.mxu1 %v1694_v15 }
  0x75   : > { %1168 = vmatprep.subr.bf16.mxu0 %v1697_v16 }
  0x77   : > { %731 = vmatpush1.bf16.msra.mxu1 %v1692_v17 }
  0x78   : > { %1169 = vmatpush1.bf16.msra.mxu0 %v1695_v18  ;;  %732 = vmatprep.subr.bf16.mxu1 %v1700_v19 }
  0x79   : > { %1170 = vmatprep.subr.bf16.mxu0 %v1703_v20 }
  0x7b   : > { %733 = vmatpush1.bf16.msra.mxu1 %v1698_v21 }
  0x7c   : > { %1171 = vmatpush1.bf16.msra.mxu0 %v1701_v22  ;;  %734 = vmatprep.subr.bf16.mxu1 %v1706_v24 }
  0x7d   : > { %1172 = vmatprep.subr.bf16.mxu0 %v1709_v25 }
  0x7f   : > { %735 = vmatpush1.bf16.msra.mxu1 %v1704_v28 }
  0x80   : > { %1173 = vmatpush1.bf16.msra.mxu0 %v1707_v29  ;;  %736 = vmatprep.subr.bf16.mxu1 %v1712_v30 }
  0x81   : > { %1174 = vmatprep.subr.bf16.mxu0 %v1715_v31 }
  0x83   : > { %737 = vmatpush1.bf16.msra.mxu1 %v1710_v34 }
  0x84   : > { %1175 = vmatpush1.bf16.msra.mxu0 %v1713_v35 }
  0x86   : > { %739 = vmatmul.mubr.bf16.vlgmr.msra.gmra.mrb[0].mxu1 %v339_v37 }
  0x87   : > { %1177 = vmatmul.mubr.bf16.vlgmr.msra.gmra.mrb[0].mxu0 %v770_v38 }
 0x159   : > { %v740_v51 = vpop.f32.mrb[0].mxu1 }
 0x15a   : > { %v1178_v52 = vpop.f32.mrb[0].mxu0  ;;  %v742_v56 = vpop.f32.mrb[1].mxu1 }
 0x15b   : > { %v1502_v54 = vadd.f32 %v1178_v52, %v740_v51  ;;  %v1180_v57 = vpop.f32.mrb[1].mxu0  ;;  %v744_v60 = vpop.f32.mrb[2].mxu1 }
 0x15c   : > { %v1503_v58 = vadd.f32 %v1180_v57, %v742_v56  ;;  %v1182_v61 = vpop.f32.mrb[2].mxu0  ;;  %v745_v63 = vpop.f32.mrb[3].mxu1 }
 0x15d   : > { %v1205_v62 = vmul.f32 %v1502_v54, %v1200_v50  ;;  %v1183_v0 = vpop.f32.mrb[3].mxu0 }
 0x15e   : > { %v1206_v1 = vmul.f32 %v1503_v58, %v1204_v53 }
 0x15f   : > { %v1225_v2 = vadd.f32 %v1220_v55, %v1205_v62 }
 0x160   : > { %v1226_v3 = vadd.f32 %v1224_v59, %v1206_v1 }
 0x162   : > { %v1501_v4 = vpack.c.bf16 %v1226_v3, %v1225_v2 }
 0x164   : > { %1235 = vst [vmem:[%s170_s29] sm:$0xff] %v1501_v4 }
 0x165 PF: > { %s13_s12 = sadd.s32 1, %s1723_s12  }
 0x166   : > { %p10_p4 = scmp.ge.s32.totalorder %s13_s12, 4  }
 0x168   :  { %12 = sbr.rel (!%p10_p4) target bundleno = 1 (0x1), region = 63 }

// kernel: encoder_forward.20
= control target key start
LH: loop header
LB: loop body
LE: loop exit
PB: predicated region body
PF: predicated region fallthrough
CT: control target
= control target key end

     0   :  { %s1762_s12 = smov 0   ;;  %s2192_s0 = inlined_call_operand.vmem [shape: bf16[2,2,512], index: 0, kind: input, shape index: {}]   ;;  %s2193_s1 = inlined_call_operand.vmem [shape: bf16[2,512,256], index: 1, kind: input, shape index: {}]   ;;  %s2194_s2 = inlined_call_operand.vmem [shape: f32[2,256], index: 2, kind: input, shape index: {}]   ;;  %s2195_s3 = inlined_call_operand.vmem [shape: bf16[2,2,256], index: 3, kind: output, shape index: {}]  }
   0x1 LB: > { %s1314_s13 = sadd.s32 4294967295, %s1738_s12   ;;  %p1318_p0 = scmp.ge.s32.totalorder %s1738_s12, 1  ;;  %s1738_s12 = sphi %s1762_s12, %s13_s12  }
   0x2   : > { %p136_p1 = scmp.lt.s32.totalorder %s1738_s12, 3 }
   0x4   : > { %p137_p2 = pnand %p1318_p0, %p136_p1 }
   0x5   : > { %v1540_v0 = vld [vmem:[%s2193_s1 + $0x204] ss:$8 sps:$4 sm:$0xff] (!%p137_p2)   ;;  %v1740_v2 = vmov (!%p137_p2), 0   ;;  %v1544_v3 = vld [vmem:[%s2193_s1 + $0x200] ss:$8 sps:$4 sm:$0xff] (!%p137_p2)   ;;  %p1871_p3 = scmp.lt.s32.totalorder (!%p137_p2), %s1314_s13, 1  ;;  %v188_v40 = vlaneseq (!%p137_p2) }
   0x6   : > { %140 = sbr.rel (%p137_p2) target bundleno = 359 (0x167), region = 32  ;;  %v1542_v1 = vld [vmem:[%s2193_s1 + $0x4] ss:$8 sps:$4 sm:$0xff] (!%p137_p2)   ;;  %172 = vst [vmem:[#allocation2 + $0x8] sm:$0xe0] (!%p137_p2), %v1740_v2  ;;  %678 = vmatprep.subr.bf16.mxu1 (!%p137_p2), %v1540_v0 }
   0x7   : > { %167 = vst [vmem:[#allocation2] sm:$0xf] (!%p137_p2), %v1740_v2  ;;  %168 = vst [vmem:[#allocation2 + $0x8] sm:$0xf] (!%p137_p2), %v1740_v2  ;;  %v1545_v4 = vld [vmem:[%s2193_s1] ss:$8 sps:$4 sm:$0xff] (!%p137_p2)   ;;  %1116 = vmatprep.subr.bf16.mxu0 (!%p137_p2), %v1542_v1  ;;  %679 = vmatpush1.bf16.msra.mxu1 (!%p137_p2), %v1544_v3 }
   0x8   : > { %169 = vst [vmem:[#allocation2 + $0x10] sm:$0xf] (!%p137_p2), %v1740_v2  ;;  %170 = vst [vmem:[#allocation2 + $0x18] sm:$0xf] (!%p137_p2), %v1740_v2  ;;  %v1546_v5 = vld [vmem:[%s2193_s1 + $0x214] ss:$8 sps:$4 sm:$0xff] (!%p137_p2)   ;;  %1117 = vmatpush1.bf16.msra.mxu0 (!%p137_p2), %v1545_v4 }
   0x9   : > { %171 = vst [vmem:[#allocation2] sm:$0xe0] (!%p137_p2), %v1740_v2  ;;  %173 = vst [vmem:[#allocation2 + $0x10] sm:$0xe0] (!%p137_p2), %v1740_v2  ;;  %v1548_v6 = vld [vmem:[%s2193_s1 + $0x14] ss:$8 sps:$4 sm:$0xff] (!%p137_p2)   ;;  %680 = vmatprep.subr.bf16.mxu1 (!%p137_p2), %v1546_v5 }
   0xa   : > { %174 = vst [vmem:[#allocation2 + $0x18] sm:$0xe0] (!%p137_p2), %v1740_v2  ;;  %v1550_v7 = vld [vmem:[%s2193_s1 + $0x210] ss:$8 sps:$4 sm:$0xff] (!%p137_p2)   ;;  %1118 = vmatprep.subr.bf16.mxu0 (!%p137_p2), %v1548_v6  ;;  %v1552_v9 = vld [vmem:[%s2193_s1 + $0x224] ss:$8 sps:$4 sm:$0xff] (!%p137_p2)  }
   0xb   : > { %v1551_v8 = vld [vmem:[%s2193_s1 + $0x10] ss:$8 sps:$4 sm:$0xff] (!%p137_p2)   ;;  %v1554_v10 = vld [vmem:[%s2193_s1 + $0x24] ss:$8 sps:$4 sm:$0xff] (!%p137_p2)   ;;  %v1556_v11 = vld [vmem:[%s2193_s1 + $0x220] ss:$8 sps:$4 sm:$0xff] (!%p137_p2)   ;;  %681 = vmatpush1.bf16.msra.mxu1 (!%p137_p2), %v1550_v7 }
   0xc   : > { %v1557_v12 = vld [vmem:[%s2193_s1 + $0x20] ss:$8 sps:$4 sm:$0xff] (!%p137_p2)   ;;  %1119 = vmatpush1.bf16.msra.mxu0 (!%p137_p2), %v1551_v8  ;;  %v1558_v13 = vld [vmem:[%s2193_s1 + $0x234] ss:$8 sps:$4 sm:$0xff] (!%p137_p2)   ;;  %682 = vmatprep.subr.bf16.mxu1 (!%p137_p2), %v1552_v9  ;;  %v1562_v15 = vld [vmem:[%s2193_s1 + $0x230] ss:$8 sps:$4 sm:$0xff] (!%p137_p2)  }
   0xd   : > { %1120 = vmatprep.subr.bf16.mxu0 %v1554_v10  ;;  %v1560_v14 = vld [vmem:[%s2193_s1 + $0x34] ss:$8 sps:$4 sm:$0xff]   ;;  %v1563_v16 = vld [vmem:[%s2193_s1 + $0x30] ss:$8 sps:$4 sm:$0xff]   ;;  %v1564_v17 = vld [vmem:[%s2193_s1 + $0x244] ss:$8 sps:$4 sm:$0xff]  }
   0xe   : > { %v1566_v18 = vld [vmem:[%s2193_s1 + $0x44] ss:$8 sps:$4 sm:$0xff]   ;;  %v1568_v19 = vld [vmem:[%s2193_s1 + $0x240] ss:$8 sps:$4 sm:$0xff]   ;;  %v1570_v21 = vld [vmem:[%s2193_s1 + $0x254] ss:$8 sps:$4 sm:$0xff]  }
   0xf   : > { %683 = vmatpush1.bf16.msra.mxu1 %v1556_v11  ;;  %v1569_v20 = vld [vmem:[%s2193_s1 + $0x40] ss:$8 sps:$4 sm:$0xff]   ;;  %v1572_v22 = vld [vmem:[%s2193_s1 + $0x54] ss:$8 sps:$4 sm:$0xff]   ;;  %v1574_v23 = vld [vmem:[%s2193_s1 + $0x250] ss:$8 sps:$4 sm:$0xff]  }
  0x10   : > { %1121 = vmatpush1.bf16.msra.mxu0 %v1557_v12  ;;  %684 = vmatprep.subr.bf16.mxu1 %v1558_v13  ;;  %v1575_v24 = vld [vmem:[%s2193_s1 + $0x50] ss:$8 sps:$4 sm:$0xff]   ;;  %v1576_v25 = vld [vmem:[%s2193_s1 + $0x264] ss:$8 sps:$4 sm:$0xff]   ;;  %v1580_v27 = vld [vmem:[%s2193_s1 + $0x260] ss:$8 sps:$4 sm:$0xff]  }
  0x11   : > { %1122 = vmatprep.subr.bf16.mxu0 %v1560_v14  ;;  %v1578_v26 = vld [vmem:[%s2193_s1 + $0x64] ss:$8 sps:$4 sm:$0xff]   ;;  %v1581_v28 = vld [vmem:[%s2193_s1 + $0x60] ss:$8 sps:$4 sm:$0xff]   ;;  %v1582_v29 = vld [vmem:[%s2193_s1 + $0x274] ss:$8 sps:$4 sm:$0xff]  }
  0x12   : > { %v1584_v30 = vld [vmem:[%s2193_s1 + $0x74] ss:$8 sps:$4 sm:$0xff]   ;;  %v1586_v31 = vld [vmem:[%s2193_s1 + $0x270] ss:$8 sps:$4 sm:$0xff]   ;;  %v1588_v33 = vld [vmem:[%s2193_s1 + $0x284] ss:$8 sps:$4 sm:$0xff]  }
  0x13   : > { %685 = vmatpush1.bf16.msra.mxu1 %v1562_v15  ;;  %v1587_v32 = vld [vmem:[%s2193_s1 + $0x70] ss:$8 sps:$4 sm:$0xff]   ;;  %v1590_v34 = vld [vmem:[%s2193_s1 + $0x84] ss:$8 sps:$4 sm:$0xff]   ;;  %v1592_v35 = vld [vmem:[%s2193_s1 + $0x280] ss:$8 sps:$4 sm:$0xff]  }
  0x14   : > { %1123 = vmatpush1.bf16.msra.mxu0 %v1563_v16  ;;  %686 = vmatprep.subr.bf16.mxu1 %v1564_v17  ;;  %v1593_v36 = vld [vmem:[%s2193_s1 + $0x80] ss:$8 sps:$4 sm:$0xff]   ;;  %v1594_v37 = vld [vmem:[%s2193_s1 + $0x294] ss:$8 sps:$4 sm:$0xff]   ;;  %v1741_v38 = vmov 1966171168  }
  0x15   : > { %1124 = vmatprep.subr.bf16.mxu0 %v1566_v18  ;;  %v186_v39 = vunpack.c.l.s4 %v1741_v38  ;;  %v1596_v41 = vld [vmem:[%s2193_s1 + $0x94] ss:$8 sps:$4 sm:$0xff]   ;;  %s2198_s13 = smov (!%p1871_p3, %s1314_s13), 1  ;;  %v1598_v42 = vld [vmem:[%s2193_s1 + $0x290] ss:$8 sps:$4 sm:$0xff]   ;;  %v1905_v46 = vshrl.u32 %v188_v40, 7 }
  0x16   : > { %v1599_v43 = vld [vmem:[%s2193_s1 + $0x90] ss:$8 sps:$4 sm:$0xff]   ;;  %v1600_v44 = vld [vmem:[%s2193_s1 + $0x2a4] ss:$8 sps:$4 sm:$0xff]   ;;  %s1319_s24 = sshll.u32 %s2198_s13, 2  ;;  %s1320_s27 = sshll.u32 %s2198_s13, 1 }
  0x17   : > { %687 = vmatpush1.bf16.msra.mxu1 %v1568_v19  ;;  %v187_v45 = vunpack.c.0.s8 %v186_v39  ;;  %v1602_v47 = vld [vmem:[%s2193_s1 + $0xa4] ss:$8 sps:$4 sm:$0xff]   ;;  %v1604_v48 = vld [vmem:[%s2193_s1 + $0x2a0] ss:$8 sps:$4 sm:$0xff]   ;;  %v1606_v50 = vld [vmem:[%s2193_s1 + $0x2b4] ss:$8 sps:$4 sm:$0xff]   ;;  %s161_s6 = scalar_lea.vmem %s2192_s0, %s1319_s24  ;;  %s165_s30 = scalar_lea.vmem %s2195_s3, %s1320_s27 }
  0x18   : > { %1125 = vmatpush1.bf16.msra.mxu0 %v1569_v20  ;;  %688 = vmatprep.subr.bf16.mxu1 %v1570_v21  ;;  %v1605_v49 = vld [vmem:[%s2193_s1 + $0xa0] ss:$8 sps:$4 sm:$0xff]   ;;  %v1608_v52 = vld [vmem:[%s2193_s1 + $0xb4] ss:$8 sps:$4 sm:$0xff]   ;;  %v1610_v54 = vld [vmem:[%s2193_s1 + $0x2b0] ss:$8 sps:$4 sm:$0xff]  }
  0x19   : > { %1126 = vmatprep.subr.bf16.mxu0 %v1572_v22  ;;  %v1924_v51 = vsub.s32 %v187_v45, %v1905_v46  ;;  %v1321_v53 = vld.sshfl [vmem:[%s161_s6] sm:$0x33 pattern:$0x75316420]  ;;  %v1611_v55 = vld [vmem:[%s2193_s1 + $0xb0] ss:$8 sps:$4 sm:$0xff]  }
  0x1a   : > { %v184_v56 = vcombine.high %v1321_v53, %v1321_v53  ;;  %1322 = vst.sshfl [vmem:[#allocation2 + $0x10] sm:$0x2 pattern:$0x73625140] %v1321_v53  ;;  %v1612_v58 = vld [vmem:[%s2193_s1 + $0x2c4] ss:$8 sps:$4 sm:$0xff]  }
  0x1b   : > { %689 = vmatpush1.bf16.msra.mxu1 %v1574_v23  ;;  %v191_v57 = vrot.slane %v1321_v53, %v1924_v51  ;;  %v1614_v59 = vld [vmem:[%s2193_s1 + $0xc4] ss:$8 sps:$4 sm:$0xff]   ;;  %v1616_v62 = vld [vmem:[%s2193_s1 + $0x2c0] ss:$8 sps:$4 sm:$0xff]   ;;  %v1618_v1 = vld [vmem:[%s2193_s1 + $0x2d4] ss:$8 sps:$4 sm:$0xff]  }
  0x1c   : > { %1127 = vmatpush1.bf16.msra.mxu0 %v1575_v24  ;;  %690 = vmatprep.subr.bf16.mxu1 %v1576_v25  ;;  %v198_v60 = vrot.slane %v184_v56, %v1924_v51  ;;  %1323 = vst.sshfl [vmem:[#allocation2 + $0x18] sm:$0x2 pattern:$0x73625140] %v184_v56  ;;  %v1617_v63 = vld [vmem:[%s2193_s1 + $0xc0] ss:$8 sps:$4 sm:$0xff]  }
  0x1d   : > { %1128 = vmatprep.subr.bf16.mxu0 %v1578_v26  ;;  %v199_v61 = vcombine.low %v191_v57, %v191_v57  ;;  %v1620_v2 = vld [vmem:[%s2193_s1 + $0xd4] ss:$8 sps:$4 sm:$0xff]   ;;  %v1622_v3 = vld [vmem:[%s2193_s1 + $0x2d0] ss:$8 sps:$4 sm:$0xff]   ;;  %v1624_v5 = vld [vmem:[%s2193_s1 + $0x2e4] ss:$8 sps:$4 sm:$0xff]  }
  0x1e   : > { %v200_v0 = vcombine.low %v198_v60, %v198_v60  ;;  %v1623_v4 = vld [vmem:[%s2193_s1 + $0xd0] ss:$8 sps:$4 sm:$0xff]   ;;  %v1626_v6 = vld [vmem:[%s2193_s1 + $0xe4] ss:$8 sps:$4 sm:$0xff]   ;;  %v1628_v7 = vld [vmem:[%s2193_s1 + $0x2e0] ss:$8 sps:$4 sm:$0xff]  }
  0x1f   : > { %691 = vmatpush1.bf16.msra.mxu1 %v1580_v27  ;;  %205 = vst [vmem:[#allocation2] sm:$0x10] %v199_v61  ;;  %v1629_v8 = vld [vmem:[%s2193_s1 + $0xe0] ss:$8 sps:$4 sm:$0xff]   ;;  %v1630_v10 = vld [vmem:[%s2193_s1 + $0x2f4] ss:$8 sps:$4 sm:$0xff]  }
  0x20   : > { %1129 = vmatpush1.bf16.msra.mxu0 %v1581_v28  ;;  %692 = vmatprep.subr.bf16.mxu1 %v1582_v29  ;;  %206 = vst [vmem:[#allocation2 + $0x8] sm:$0x10] %v200_v0  ;;  %v1632_v13 = vld [vmem:[%s2193_s1 + $0xf4] ss:$8 sps:$4 sm:$0xff]   ;;  %v1634_v16 = vld [vmem:[%s2193_s1 + $0x2f0] ss:$8 sps:$4 sm:$0xff]  }
  0x21   : > { %1130 = vmatprep.subr.bf16.mxu0 %v1584_v30  ;;  %v1635_v20 = vld [vmem:[%s2193_s1 + $0xf0] ss:$8 sps:$4 sm:$0xff]   ;;  %v1638_v26 = vld [vmem:[%s2193_s1 + $0x304] ss:$8 sps:$4 sm:$0xff]   ;;  %v1636_v29 = vld [vmem:[%s2193_s1 + $0x300] ss:$8 sps:$4 sm:$0xff]  }
  0x22   : > { %v1641_v28 = vld [vmem:[%s2193_s1 + $0x104] ss:$8 sps:$4 sm:$0xff]   ;;  %v1648_v39 = vld [vmem:[%s2193_s1 + $0x320] ss:$8 sps:$4 sm:$0xff]   ;;  %v1666_v53 = vld [vmem:[%s2193_s1 + $0x350] ss:$8 sps:$4 sm:$0xff]  }
  0x23   : > { %693 = vmatpush1.bf16.msra.mxu1 %v1586_v31  ;;  %v1653_v38 = vld [vmem:[%s2193_s1 + $0x124] ss:$8 sps:$4 sm:$0xff]   ;;  %v1651_v40 = vld [vmem:[%s2193_s1 + $0x120] ss:$8 sps:$4 sm:$0xff]   ;;  %v212_v61 = vld [vmem:[#allocation2 + $0x18] sm:$0xf8] }
  0x24   : > { %1131 = vmatpush1.bf16.msra.mxu0 %v1587_v32  ;;  %694 = vmatprep.subr.bf16.mxu1 %v1588_v33  ;;  %v1639_v32 = vld [vmem:[%s2193_s1 + $0x100] ss:$8 sps:$4 sm:$0xff]   ;;  %v1644_v33 = vld [vmem:[%s2193_s1 + $0x314] ss:$8 sps:$4 sm:$0xff]   ;;  %v1662_v45 = vld [vmem:[%s2193_s1 + $0x344] ss:$8 sps:$4 sm:$0xff]  }
  0x25   : > { %1132 = vmatprep.subr.bf16.mxu0 %v1590_v34  ;;  %v1647_v34 = vld [vmem:[%s2193_s1 + $0x114] ss:$8 sps:$4 sm:$0xff]   ;;  %v1677_v56 = vld [vmem:[%s2193_s1 + $0x164] ss:$8 sps:$4 sm:$0xff]   ;;  %v1672_v57 = vld [vmem:[%s2193_s1 + $0x360] ss:$8 sps:$4 sm:$0xff]  }
  0x26   : > { %v209_v9 = vld [vmem:[#allocation2] sm:$0xf8]  ;;  %v785_v0 = vshrl.u32 %v212_v61, 16 }
  0x27   : > { %695 = vmatpush1.bf16.msra.mxu1 %v1592_v35  ;;  %v761_v11 = vshrl.u32 %v209_v9, 16  ;;  %v764_v12 = vshll.u32 %v209_v9, 16  ;;  %v278_v14 = vld [vmem:[#allocation2 + $0x8] sm:$0xf0]  ;;  %v277_v25 = vld [vmem:[#allocation2] sm:$0xf0] }
  0x28   : > { %1133 = vmatpush1.bf16.msra.mxu0 %v1593_v36  ;;  %696 = vmatprep.subr.bf16.mxu1 %v1594_v37  ;;  %v210_v15 = vld [vmem:[#allocation2 + $0x8] sm:$0xf8]  ;;  %v351_v17 = vrot.slane %v278_v14, 4  ;;  %v350_v30 = vrot.slane %v277_v25, 4  ;;  %v1642_v35 = vld [vmem:[%s2193_s1 + $0x310] ss:$8 sps:$4 sm:$0xff]  }
  0x29   : > { %1134 = vmatprep.subr.bf16.mxu0 %v1596_v41  ;;  %v769_v18 = vshrl.u32 %v210_v15, 16  ;;  %v772_v19 = vshll.u32 %v210_v15, 16  ;;  %v763_v21 = vrot.slane %v761_v11, 3  ;;  %v766_v22 = vrot.slane %v764_v12, 4  ;;  %v1645_v36 = vld [vmem:[%s2193_s1 + $0x110] ss:$8 sps:$4 sm:$0xff]  }
  0x2a   : > { %710 = vmatprep.mubr.bf16.mxu1 %v351_v17  ;;  %v1650_v37 = vld [vmem:[%s2193_s1 + $0x324] ss:$8 sps:$4 sm:$0xff]   ;;  %v1656_v41 = vld [vmem:[%s2193_s1 + $0x334] ss:$8 sps:$4 sm:$0xff]   ;;  %v1684_v9 = vld [vmem:[%s2193_s1 + $0x380] ss:$8 sps:$4 sm:$0xff]  }
  0x2b   : > { %697 = vmatpush1.bf16.msra.mxu1 %v1598_v42  ;;  %v771_v23 = vrot.slane %v769_v18, 3  ;;  %v774_v24 = vrot.slane %v772_v19, 4  ;;  %v767_v31 = vor.u32 %v766_v22, %v763_v21  ;;  %v1659_v42 = vld [vmem:[%s2193_s1 + $0x134] ss:$8 sps:$4 sm:$0xff]   ;;  %v1693_v14 = vld [vmem:[%s2193_s1 + $0x190] ss:$8 sps:$4 sm:$0xff]  }
  0x2c   : > { %1135 = vmatpush1.bf16.msra.mxu0 %v1599_v43  ;;  %698 = vmatprep.subr.bf16.mxu1 %v1600_v44  ;;  %v1654_v43 = vld [vmem:[%s2193_s1 + $0x330] ss:$8 sps:$4 sm:$0xff]   ;;  %v1692_v11 = vld [vmem:[%s2193_s1 + $0x394] ss:$8 sps:$4 sm:$0xff]   ;;  %v1698_v15 = vld [vmem:[%s2193_s1 + $0x3a4] ss:$8 sps:$4 sm:$0xff]  }
  0x2d   : > { %1136 = vmatprep.subr.bf16.mxu0 %v1602_v47  ;;  %v775_v27 = vor.u32 %v774_v24, %v771_v23  ;;  %v1657_v44 = vld [vmem:[%s2193_s1 + $0x130] ss:$8 sps:$4 sm:$0xff]   ;;  %v1665_v47 = vld [vmem:[%s2193_s1 + $0x144] ss:$8 sps:$4 sm:$0xff]   ;;  %v1695_v12 = vld [vmem:[%s2193_s1 + $0x194] ss:$8 sps:$4 sm:$0xff]  }
  0x2e   : > { %v1696_v17 = vld [vmem:[%s2193_s1 + $0x3a0] ss:$8 sps:$4 sm:$0xff]   ;;  %v1704_v19 = vld [vmem:[%s2193_s1 + $0x3b4] ss:$8 sps:$4 sm:$0xff]   ;;  %v1702_v21 = vld [vmem:[%s2193_s1 + $0x3b0] ss:$8 sps:$4 sm:$0xff]  }
  0x2f   : > { %699 = vmatpush1.bf16.msra.mxu1 %v1604_v48  ;;  %1148 = vmatprep.mubr.bf16.mxu0 %v775_v27  ;;  %v1660_v48 = vld [vmem:[%s2193_s1 + $0x340] ss:$8 sps:$4 sm:$0xff]   ;;  %v1705_v22 = vld [vmem:[%s2193_s1 + $0x1b0] ss:$8 sps:$4 sm:$0xff]   ;;  %v1710_v23 = vld [vmem:[%s2193_s1 + $0x3c4] ss:$8 sps:$4 sm:$0xff]  }
  0x30   : > { %1137 = vmatpush1.bf16.msra.mxu0 %v1605_v49  ;;  %700 = vmatprep.subr.bf16.mxu1 %v1606_v50  ;;  %v1663_v49 = vld [vmem:[%s2193_s1 + $0x140] ss:$8 sps:$4 sm:$0xff]   ;;  %v1668_v50 = vld [vmem:[%s2193_s1 + $0x354] ss:$8 sps:$4 sm:$0xff]   ;;  %v1713_v24 = vld [vmem:[%s2193_s1 + $0x1c4] ss:$8 sps:$4 sm:$0xff]  }
  0x31   : > { %1138 = vmatprep.subr.bf16.mxu0 %v1608_v52  ;;  %v1671_v52 = vld [vmem:[%s2193_s1 + $0x154] ss:$8 sps:$4 sm:$0xff]   ;;  %v1699_v18 = vld [vmem:[%s2193_s1 + $0x1a0] ss:$8 sps:$4 sm:$0xff]  }
  0x32   : > { %v1708_v25 = vld [vmem:[%s2193_s1 + $0x3c0] ss:$8 sps:$4 sm:$0xff]   ;;  %v1716_v27 = vld [vmem:[%s2193_s1 + $0x3d4] ss:$8 sps:$4 sm:$0xff]  }
  0x33   : > { %701 = vmatpush1.bf16.msra.mxu1 %v1610_v54  ;;  %v1669_v54 = vld [vmem:[%s2193_s1 + $0x150] ss:$8 sps:$4 sm:$0xff]  }
  0x34   : > { %1139 = vmatpush1.bf16.msra.mxu0 %v1611_v55  ;;  %702 = vmatprep.subr.bf16.mxu1 %v1612_v58  ;;  %v1674_v55 = vld [vmem:[%s2193_s1 + $0x364] ss:$8 sps:$4 sm:$0xff]   ;;  %v280_v58 = vld [vmem:[#allocation2 + $0x18] sm:$0xf0] }
  0x35   : > { %1140 = vmatprep.subr.bf16.mxu0 %v1614_v59  ;;  %v1675_v59 = vld [vmem:[%s2193_s1 + $0x160] ss:$8 sps:$4 sm:$0xff]   ;;  %v353_v60 = vrot.slane %v280_v58, 4 }
  0x37   : > { %703 = vmatpush1.bf16.msra.mxu1 %v1616_v62  ;;  %v1680_v62 = vld [vmem:[%s2193_s1 + $0x374] ss:$8 sps:$4 sm:$0xff]  }
  0x38   : > { %1141 = vmatpush1.bf16.msra.mxu0 %v1617_v63  ;;  %704 = vmatprep.subr.bf16.mxu1 %v1618_v1  ;;  %v1683_v63 = vld [vmem:[%s2193_s1 + $0x174] ss:$8 sps:$4 sm:$0xff]   ;;  %v788_v1 = vshll.u32 %v212_v61, 16 }
  0x39   : > { %1142 = vmatprep.subr.bf16.mxu0 %v1620_v2  ;;  %v787_v2 = vrot.slane %v785_v0, 3 }
  0x3b   : > { %705 = vmatpush1.bf16.msra.mxu1 %v1622_v3  ;;  %v790_v3 = vrot.slane %v788_v1, 4 }
  0x3c   : > { %1143 = vmatpush1.bf16.msra.mxu0 %v1623_v4  ;;  %706 = vmatprep.subr.bf16.mxu1 %v1624_v5  ;;  %v1678_v4 = vld [vmem:[%s2193_s1 + $0x370] ss:$8 sps:$4 sm:$0xff]  }
  0x3d   : > { %1144 = vmatprep.subr.bf16.mxu0 %v1626_v6  ;;  %v1681_v5 = vld [vmem:[%s2193_s1 + $0x170] ss:$8 sps:$4 sm:$0xff]   ;;  %v1686_v6 = vld [vmem:[%s2193_s1 + $0x384] ss:$8 sps:$4 sm:$0xff]  }
  0x3f   : > { %707 = vmatpush1.bf16.msra.mxu1 %v1628_v7  ;;  %v1689_v7 = vld [vmem:[%s2193_s1 + $0x184] ss:$8 sps:$4 sm:$0xff]  }
  0x40   : > { %1145 = vmatpush1.bf16.msra.mxu0 %v1629_v8  ;;  %708 = vmatprep.subr.bf16.mxu1 %v1630_v10  ;;  %v791_v8 = vor.u32 %v790_v3, %v787_v2  ;;  %v1687_v10 = vld [vmem:[%s2193_s1 + $0x180] ss:$8 sps:$4 sm:$0xff]  }
  0x41   : > { %1146 = vmatprep.subr.bf16.mxu0 %v1632_v13  ;;  %v1690_v13 = vld [vmem:[%s2193_s1 + $0x390] ss:$8 sps:$4 sm:$0xff]  }
  0x43   : > { %709 = vmatpush1.bf16.msra.mxu1 %v1634_v16  ;;  %v1701_v16 = vld [vmem:[%s2193_s1 + $0x1a4] ss:$8 sps:$4 sm:$0xff]  }
  0x44   : > { %1147 = vmatpush1.bf16.msra.mxu0 %v1635_v20  ;;  %719 = vmatprep.subr.bf16.mxu1 %v1638_v26  ;;  %v1707_v20 = vld [vmem:[%s2193_s1 + $0x1b4] ss:$8 sps:$4 sm:$0xff]   ;;  %v1711_v26 = vld [vmem:[%s2193_s1 + $0x1c0] ss:$8 sps:$4 sm:$0xff]  }
  0x45   : > { %1157 = vmatprep.subr.bf16.mxu0 %v1641_v28  ;;  %v1719_v28 = vld [vmem:[%s2193_s1 + $0x1d4] ss:$8 sps:$4 sm:$0xff]  }
  0x46   : > { %711 = vmatmul.mubr.bf16.vlgmr.msra.gmra.mrb[0].mxu1 %v350_v30  ;;  %v1717_v30 = vld [vmem:[%s2193_s1 + $0x1d0] ss:$8 sps:$4 sm:$0xff]  }
  0x47   : > { %1149 = vmatmul.mubr.bf16.vlgmr.msra.gmra.mrb[0].mxu0 %v767_v31  ;;  %720 = vmatpush1.bf16.msra.mxu1 %v1636_v29  ;;  %v1714_v29 = vld [vmem:[%s2193_s1 + $0x3d0] ss:$8 sps:$4 sm:$0xff]  }
  0x48   : > { %1158 = vmatpush1.bf16.msra.mxu0 %v1639_v32  ;;  %721 = vmatprep.subr.bf16.mxu1 %v1644_v33  ;;  %v211_v31 = vld [vmem:[#allocation2 + $0x10] sm:$0xf8]  ;;  %v1722_v32 = vld [vmem:[%s2193_s1 + $0x3e4] ss:$8 sps:$4 sm:$0xff]  }
  0x49   : > { %1159 = vmatprep.subr.bf16.mxu0 %v1647_v34  ;;  %751 = vmatprep.mubr.bf16.mxu1 %v353_v60  ;;  %v1725_v33 = vld [vmem:[%s2193_s1 + $0x1e4] ss:$8 sps:$4 sm:$0xff]   ;;  %v777_v34 = vshrl.u32 %v211_v31, 16 }
  0x4a   : > { %1189 = vmatprep.mubr.bf16.mxu0 %v791_v8 }
  0x4b   : > { %722 = vmatpush1.bf16.msra.mxu1 %v1642_v35  ;;  %v780_v35 = vshll.u32 %v211_v31, 16 }
  0x4c   : > { %1160 = vmatpush1.bf16.msra.mxu0 %v1645_v36  ;;  %723 = vmatprep.subr.bf16.mxu1 %v1650_v37  ;;  %v1720_v36 = vld [vmem:[%s2193_s1 + $0x3e0] ss:$8 sps:$4 sm:$0xff]  }
  0x4d   : > { %1161 = vmatprep.subr.bf16.mxu0 %v1653_v38  ;;  %v1723_v37 = vld [vmem:[%s2193_s1 + $0x1e0] ss:$8 sps:$4 sm:$0xff]   ;;  %v1728_v38 = vld [vmem:[%s2193_s1 + $0x3f4] ss:$8 sps:$4 sm:$0xff]  }
  0x4f   : > { %724 = vmatpush1.bf16.msra.mxu1 %v1648_v39  ;;  %v1731_v39 = vld [vmem:[%s2193_s1 + $0x1f4] ss:$8 sps:$4 sm:$0xff]  }
  0x50   : > { %1162 = vmatpush1.bf16.msra.mxu0 %v1651_v40  ;;  %725 = vmatprep.subr.bf16.mxu1 %v1656_v41  ;;  %v779_v40 = vrot.slane %v777_v34, 3  ;;  %v782_v41 = vrot.slane %v780_v35, 4 }
  0x51   : > { %1163 = vmatprep.subr.bf16.mxu0 %v1659_v42  ;;  %v1726_v42 = vld [vmem:[%s2193_s1 + $0x3f0] ss:$8 sps:$4 sm:$0xff]  }
  0x53   : > { %726 = vmatpush1.bf16.msra.mxu1 %v1654_v43  ;;  %v1729_v43 = vld [vmem:[%s2193_s1 + $0x1f0] ss:$8 sps:$4 sm:$0xff]  }
  0x54   : > { %1164 = vmatpush1.bf16.msra.mxu0 %v1657_v44  ;;  %727 = vmatprep.subr.bf16.mxu1 %v1662_v45  ;;  %v279_v44 = vld [vmem:[#allocation2 + $0x10] sm:$0xf0] }
  0x55   : > { %1165 = vmatprep.subr.bf16.mxu0 %v1665_v47  ;;  %v352_v45 = vrot.slane %v279_v44, 4  ;;  %v783_v47 = vor.u32 %v782_v41, %v779_v40 }
  0x57   : > { %728 = vmatpush1.bf16.msra.mxu1 %v1660_v48  ;;  %v1202_v48 = vsub.s32 0, %v1905_v46 }
  0x58   : > { %1166 = vmatpush1.bf16.msra.mxu0 %v1663_v49  ;;  %729 = vmatprep.subr.bf16.mxu1 %v1668_v50  ;;  %v1198_v49 = vld [vmem:[%s2194_s2] sm:$0xf]  ;;  %v1206_v50 = vsub.s32 2, %v1905_v46 }
  0x59   : > { %1167 = vmatprep.subr.bf16.mxu0 %v1671_v52  ;;  %v1222_v52 = vsub.s32 1, %v1905_v46 }
  0x5b   : > { %730 = vmatpush1.bf16.msra.mxu1 %v1666_v53  ;;  %v1226_v53 = vsub.s32 3, %v1905_v46 }
  0x5c   : > { %1168 = vmatpush1.bf16.msra.mxu0 %v1669_v54  ;;  %731 = vmatprep.subr.bf16.mxu1 %v1674_v55  ;;  %v1203_v54 = vrot.slane %v1198_v49, %v1202_v48  ;;  %v1207_v55 = vrot.slane %v1198_v49, %v1206_v50 }
  0x5d   : > { %1169 = vmatprep.subr.bf16.mxu0 %v1677_v56  ;;  %v1223_v56 = vrot.slane %v1198_v49, %v1222_v52 }
  0x5e   : > { %v1213_v58 = vrot.slane %v1203_v54, %v1202_v48  ;;  %v1217_v61 = vrot.slane %v1207_v55, %v1202_v48 }
  0x5f   : > { %732 = vmatpush1.bf16.msra.mxu1 %v1672_v57  ;;  %v1227_v57 = vrot.slane %v1198_v49, %v1226_v53 }
  0x60   : > { %1170 = vmatpush1.bf16.msra.mxu0 %v1675_v59  ;;  %733 = vmatprep.subr.bf16.mxu1 %v1680_v62 }
  0x61   : > { %1171 = vmatprep.subr.bf16.mxu0 %v1683_v63  ;;  %v1233_v63 = vrot.slane %v1223_v56, %v1222_v52  ;;  %v1237_v3 = vrot.slane %v1227_v57, %v1222_v52 }
  0x63   : > { %734 = vmatpush1.bf16.msra.mxu1 %v1678_v4 }
  0x64   : > { %1172 = vmatpush1.bf16.msra.mxu0 %v1681_v5  ;;  %735 = vmatprep.subr.bf16.mxu1 %v1686_v6 }
  0x65   : > { %1173 = vmatprep.subr.bf16.mxu0 %v1689_v7 }
  0x67   : > { %736 = vmatpush1.bf16.msra.mxu1 %v1684_v9 }
  0x68   : > { %1174 = vmatpush1.bf16.msra.mxu0 %v1687_v10  ;;  %737 = vmatprep.subr.bf16.mxu1 %v1692_v11 }
  0x69   : > { %1175 = vmatprep.subr.bf16.mxu0 %v1695_v12 }
  0x6b   : > { %738 = vmatpush1.bf16.msra.mxu1 %v1690_v13 }
  0x6c   : > { %1176 = vmatpush1.bf16.msra.mxu0 %v1693_v14  ;;  %739 = vmatprep.subr.bf16.mxu1 %v1698_v15 }
  0x6d   : > { %1177 = vmatprep.subr.bf16.mxu0 %v1701_v16 }
  0x6f   : > { %740 = vmatpush1.bf16.msra.mxu1 %v1696_v17 }
  0x70   : > { %1178 = vmatpush1.bf16.msra.mxu0 %v1699_v18  ;;  %741 = vmatprep.subr.bf16.mxu1 %v1704_v19 }
  0x71   : > { %1179 = vmatprep.subr.bf16.mxu0 %v1707_v20 }
  0x73   : > { %742 = vmatpush1.bf16.msra.mxu1 %v1702_v21 }
  0x74   : > { %1180 = vmatpush1.bf16.msra.mxu0 %v1705_v22  ;;  %743 = vmatprep.subr.bf16.mxu1 %v1710_v23 }
  0x75   : > { %1181 = vmatprep.subr.bf16.mxu0 %v1713_v24 }
  0x77   : > { %744 = vmatpush1.bf16.msra.mxu1 %v1708_v25 }
  0x78   : > { %1182 = vmatpush1.bf16.msra.mxu0 %v1711_v26  ;;  %745 = vmatprep.subr.bf16.mxu1 %v1716_v27 }
  0x79   : > { %1183 = vmatprep.subr.bf16.mxu0 %v1719_v28 }
  0x7b   : > { %746 = vmatpush1.bf16.msra.mxu1 %v1714_v29 }
  0x7c   : > { %1184 = vmatpush1.bf16.msra.mxu0 %v1717_v30  ;;  %747 = vmatprep.subr.bf16.mxu1 %v1722_v32 }
  0x7d   : > { %1185 = vmatprep.subr.bf16.mxu0 %v1725_v33 }
  0x7f   : > { %748 = vmatpush1.bf16.msra.mxu1 %v1720_v36 }
  0x80   : > { %1186 = vmatpush1.bf16.msra.mxu0 %v1723_v37  ;;  %749 = vmatprep.subr.bf16.mxu1 %v1728_v38 }
  0x81   : > { %1187 = vmatprep.subr.bf16.mxu0 %v1731_v39 }
  0x83   : > { %750 = vmatpush1.bf16.msra.mxu1 %v1726_v42 }
  0x84   : > { %1188 = vmatpush1.bf16.msra.mxu0 %v1729_v43 }
  0x86   : > { %752 = vmatmul.mubr.bf16.vlgmr.msra.gmra.mrb[0].mxu1 %v352_v45 }
  0x87   : > { %1190 = vmatmul.mubr.bf16.vlgmr.msra.gmra.mrb[0].mxu0 %v783_v47 }
 0x159   : > { %v753_v59 = vpop.f32.mrb[0].mxu1 }
 0x15a   : > { %v1191_v60 = vpop.f32.mrb[0].mxu0  ;;  %v755_v0 = vpop.f32.mrb[1].mxu1 }
 0x15b   : > { %v1520_v62 = vadd.f32 %v1191_v60, %v753_v59  ;;  %v1193_v1 = vpop.f32.mrb[1].mxu0  ;;  %v757_v4 = vpop.f32.mrb[2].mxu1 }
 0x15c   : > { %v1521_v2 = vadd.f32 %v1193_v1, %v755_v0  ;;  %v1195_v5 = vpop.f32.mrb[2].mxu0  ;;  %v758_v7 = vpop.f32.mrb[3].mxu1 }
 0x15d   : > { %v1218_v6 = vmul.f32 %v1520_v62, %v1213_v58  ;;  %v1196_v46 = vpop.f32.mrb[3].mxu0 }
 0x15e   : > { %v1219_v8 = vmul.f32 %v1521_v2, %v1217_v61 }
 0x15f   : > { %v1238_v9 = vadd.f32 %v1233_v63, %v1218_v6 }
 0x160   : > { %v1239_v10 = vadd.f32 %v1237_v3, %v1219_v8 }
 0x162   : > { %v1516_v11 = vpack.c.bf16 %v1239_v10, %v1238_v9 }
 0x164   : > { %v1251_v12 = vrot.slane %v1516_v11, %v1924_v51 }
 0x166   : > { %1517 = vst.sshfl [vmem:[%s165_s30] sm:$0x5 pattern:$0x73625140] %v1251_v12 }
 0x167 PF: > { %s13_s12 = sadd.s32 1, %s1738_s12  }
 0x168   : > { %p10_p4 = scmp.ge.s32.totalorder %s13_s12, 4  }
 0x16a   :  { %12 = sbr.rel (!%p10_p4) target bundleno = 1 (0x1), region = 63 }

// kernel: encoder_forward.15
= control target key start
LH: loop header
LB: loop body
LE: loop exit
PB: predicated region body
PF: predicated region fallthrough
CT: control target
= control target key end

     0   :  { %s3763_s12 = smov 0   ;;  %s4742_s0 = inlined_call_operand.vmem [shape: bf16[2,8,256], index: 0, kind: input, shape index: {}]   ;;  %s4743_s1 = inlined_call_operand.vmem [shape: bf16[3,3,256,256], index: 1, kind: input, shape index: {}]   ;;  %s4744_s2 = inlined_call_operand.vmem [shape: f32[3,2,256], index: 2, kind: input, shape index: {}]   ;;  %s4745_s3 = inlined_call_operand.vmem [shape: bf16[2,8,256], index: 3, kind: output, shape index: {}]  }
   0x1 LB: > { %s2682_s13 = sadd.s32 4294967295, %s3740_s12   ;;  %p2686_p0 = scmp.ge.s32.totalorder %s3740_s12, 1  ;;  %s3740_s12 = sphi %s3763_s12, %s13_s12  }
   0x2   : > { %p137_p1 = scmp.lt.s32.totalorder %s3740_s12, 3 }
   0x4   : > { %p138_p2 = pnand %p2686_p0, %p137_p1 }
   0x5   : > { %v3296_v0 = vld [vmem:[%s4743_s1 + $0x4] ss:$8 sps:$4 sm:$0xff] (!%p138_p2)   ;;  %v3298_v1 = vld [vmem:[%s4743_s1] ss:$8 sps:$4 sm:$0xff] (!%p138_p2)   ;;  %v3742_v2 = vmov (!%p138_p2), 0   ;;  %p161_p3 = scmp.lt.s32.totalorder (!%p138_p2), %s2682_s13, 1 }
   0x6   : > { %141 = sbr.rel (%p138_p2) target bundleno = 1058 (0x422), region = 32  ;;  %172 = vst [vmem:[#allocation2] sm:$0xff] (!%p138_p2), %v3742_v2  ;;  %173 = vst [vmem:[#allocation2 + $0x10] sm:$0xff] (!%p138_p2), %v3742_v2  ;;  %636 = vmatprep.subr.bf16.mxu0 (!%p138_p2), %v3296_v0  ;;  %v3299_v3 = vld [vmem:[%s4743_s1 + $0x14] ss:$8 sps:$4 sm:$0xff] (!%p138_p2)  }
   0x7   : > { %174 = vst [vmem:[#allocation3] sm:$0xff] (!%p138_p2), %v3742_v2  ;;  %175 = vst [vmem:[#allocation3 + $0x10] sm:$0xff] (!%p138_p2), %v3742_v2  ;;  %637 = vmatpush1.bf16.msra.mxu0 (!%p138_p2), %v3298_v1  ;;  %v3301_v4 = vld [vmem:[%s4743_s1 + $0x10] ss:$8 sps:$4 sm:$0xff] (!%p138_p2)   ;;  %v3302_v5 = vld [vmem:[%s4743_s1 + $0x24] ss:$8 sps:$4 sm:$0xff] (!%p138_p2)  }
   0x8   : > { %638 = vmatprep.subr.bf16.mxu0 (!%p138_p2), %v3299_v3  ;;  %v3304_v6 = vld [vmem:[%s4743_s1 + $0x20] ss:$8 sps:$4 sm:$0xff] (!%p138_p2)   ;;  %v3305_v7 = vld [vmem:[%s4743_s1 + $0x34] ss:$8 sps:$4 sm:$0xff] (!%p138_p2)   ;;  %v3307_v8 = vld [vmem:[%s4743_s1 + $0x30] ss:$8 sps:$4 sm:$0xff] (!%p138_p2)  }
   0x9   : > { %v3308_v9 = vld [vmem:[%s4743_s1 + $0x44] ss:$8 sps:$4 sm:$0xff] (!%p138_p2)   ;;  %v3310_v10 = vld [vmem:[%s4743_s1 + $0x40] ss:$8 sps:$4 sm:$0xff] (!%p138_p2)   ;;  %v3311_v11 = vld [vmem:[%s4743_s1 + $0x54] ss:$8 sps:$4 sm:$0xff] (!%p138_p2)  }
   0xa   : > { %v3313_v12 = vld [vmem:[%s4743_s1 + $0x50] ss:$8 sps:$4 sm:$0xff] (!%p138_p2)   ;;  %v3314_v13 = vld [vmem:[%s4743_s1 + $0x64] ss:$8 sps:$4 sm:$0xff] (!%p138_p2)   ;;  %v3316_v15 = vld [vmem:[%s4743_s1 + $0x60] ss:$8 sps:$4 sm:$0xff] (!%p138_p2)  }
   0xb   : > { %639 = vmatpush1.bf16.msra.mxu0 (!%p138_p2), %v3301_v4  ;;  %v3343_v14 = vld [vmem:[%s4743_s1 + $0x104] ss:$8 sps:$4 sm:$0xff] (!%p138_p2)   ;;  %v3346_v16 = vld [vmem:[%s4743_s1 + $0x100] ss:$8 sps:$4 sm:$0xff] (!%p138_p2)   ;;  %v3317_v20 = vld [vmem:[%s4743_s1 + $0x74] ss:$8 sps:$4 sm:$0xff] (!%p138_p2)  }
   0xc   : > { %640 = vmatprep.subr.bf16.mxu0 (!%p138_p2), %v3302_v5  ;;  %412 = vmatprep.subr.bf16.mxu1 (!%p138_p2), %v3343_v14  ;;  %v3350_v22 = vld [vmem:[%s4743_s1 + $0x114] ss:$8 sps:$4 sm:$0xff] (!%p138_p2)   ;;  %v3352_v23 = vld [vmem:[%s4743_s1 + $0x110] ss:$8 sps:$4 sm:$0xff] (!%p138_p2)   ;;  %v3320_v27 = vld [vmem:[%s4743_s1 + $0x84] ss:$8 sps:$4 sm:$0xff] (!%p138_p2)  }
   0xd   : > { %s4747_s13 = smov (!%p161_p3, %s2682_s13), 1  ;;  %v3832_v18 = vld [vmem:[#allocation2] sm:$0x88]  ;;  %413 = vmatpush1.bf16.msra.mxu1 %v3346_v16  ;;  %v3319_v26 = vld [vmem:[%s4743_s1 + $0x70] ss:$8 sps:$4 sm:$0xff]  }
   0xe   : > { %s3260_s9 = sshll.u32 %s4747_s13, 3  ;;  %414 = vmatprep.subr.bf16.mxu1 %v3350_v22  ;;  %v3356_v30 = vld [vmem:[%s4743_s1 + $0x124] ss:$8 sps:$4 sm:$0xff]   ;;  %v3358_v31 = vld [vmem:[%s4743_s1 + $0x120] ss:$8 sps:$4 sm:$0xff]  }
   0xf   : > { %641 = vmatpush1.bf16.msra.mxu0 %v3304_v6  ;;  %s3815_s16 = scalar_lea.vmem %s4742_s0, %s3260_s9  ;;  %v3322_v33 = vld [vmem:[%s4743_s1 + $0x80] ss:$8 sps:$4 sm:$0xff]   ;;  %v3362_v34 = vld [vmem:[%s4743_s1 + $0x134] ss:$8 sps:$4 sm:$0xff]   ;;  %v3364_v36 = vld [vmem:[%s4743_s1 + $0x130] ss:$8 sps:$4 sm:$0xff]   ;;  %s170_s24 = scalar_lea.vmem %s4745_s3, %s3260_s9 }
  0x10   : > { %642 = vmatprep.subr.bf16.mxu0 %v3305_v7  ;;  %v3830_v17 = vld [vmem:[%s3815_s16] sm:$0xff]  ;;  %v3323_v35 = vld [vmem:[%s4743_s1 + $0x94] ss:$8 sps:$4 sm:$0xff]   ;;  %v3325_v38 = vld [vmem:[%s4743_s1 + $0x90] ss:$8 sps:$4 sm:$0xff]  }
  0x11   : > { %v2724_v19 = vcombine.high %v3830_v17, %v3830_v17  ;;  %v2758_v21 = vcombine.high %v3832_v18, %v3830_v17  ;;  %415 = vmatpush1.bf16.msra.mxu1 %v3352_v23  ;;  %v3368_v37 = vld [vmem:[%s4743_s1 + $0x144] ss:$8 sps:$4 sm:$0xff]   ;;  %v3370_v40 = vld [vmem:[%s4743_s1 + $0x140] ss:$8 sps:$4 sm:$0xff]   ;;  %v3374_v41 = vld [vmem:[%s4743_s1 + $0x154] ss:$8 sps:$4 sm:$0xff]   ;;  %v2757_v53 = vcombine.low %v3832_v18, %v3830_v17 }
  0x12   : > { %416 = vmatprep.subr.bf16.mxu1 %v3356_v30  ;;  %v3326_v39 = vld [vmem:[%s4743_s1 + $0xa4] ss:$8 sps:$4 sm:$0xff]   ;;  %v3328_v42 = vld [vmem:[%s4743_s1 + $0xa0] ss:$8 sps:$4 sm:$0xff]   ;;  %v3329_v43 = vld [vmem:[%s4743_s1 + $0xb4] ss:$8 sps:$4 sm:$0xff]  }
  0x13   : > { %643 = vmatpush1.bf16.msra.mxu0 %v3307_v8  ;;  %444 = vmatprep.mubr.bf16.mxu1 %v2724_v19  ;;  %v467_v24 = vshrl.u32 %v2758_v21, 16  ;;  %v470_v25 = vshll.u32 %v2758_v21, 16  ;;  %v3376_v44 = vld [vmem:[%s4743_s1 + $0x150] ss:$8 sps:$4 sm:$0xff]   ;;  %v3380_v45 = vld [vmem:[%s4743_s1 + $0x164] ss:$8 sps:$4 sm:$0xff]  }
  0x14   : > { %644 = vmatprep.subr.bf16.mxu0 %v3308_v9  ;;  %v3331_v46 = vld [vmem:[%s4743_s1 + $0xb0] ss:$8 sps:$4 sm:$0xff]   ;;  %v3332_v47 = vld [vmem:[%s4743_s1 + $0xc4] ss:$8 sps:$4 sm:$0xff]   ;;  %v3382_v48 = vld [vmem:[%s4743_s1 + $0x160] ss:$8 sps:$4 sm:$0xff]  }
  0x15   : > { %v469_v28 = vrot.slane %v467_v24, 3  ;;  %v472_v29 = vrot.slane %v470_v25, 4  ;;  %417 = vmatpush1.bf16.msra.mxu1 %v3358_v31  ;;  %v3386_v49 = vld [vmem:[%s4743_s1 + $0x174] ss:$8 sps:$4 sm:$0xff]   ;;  %v3334_v50 = vld [vmem:[%s4743_s1 + $0xc0] ss:$8 sps:$4 sm:$0xff]  }
  0x16   : > { %418 = vmatprep.subr.bf16.mxu1 %v3362_v34  ;;  %v3335_v51 = vld [vmem:[%s4743_s1 + $0xd4] ss:$8 sps:$4 sm:$0xff]   ;;  %v3388_v52 = vld [vmem:[%s4743_s1 + $0x170] ss:$8 sps:$4 sm:$0xff]   ;;  %v3392_v54 = vld [vmem:[%s4743_s1 + $0x184] ss:$8 sps:$4 sm:$0xff]  }
  0x17   : > { %645 = vmatpush1.bf16.msra.mxu0 %v3310_v10  ;;  %v473_v32 = vor.u32 %v472_v29, %v469_v28  ;;  %v3337_v55 = vld [vmem:[%s4743_s1 + $0xd0] ss:$8 sps:$4 sm:$0xff]   ;;  %v3338_v56 = vld [vmem:[%s4743_s1 + $0xe4] ss:$8 sps:$4 sm:$0xff]   ;;  %v3394_v57 = vld [vmem:[%s4743_s1 + $0x180] ss:$8 sps:$4 sm:$0xff]  }
  0x18   : > { %646 = vmatprep.subr.bf16.mxu0 %v3311_v11  ;;  %v459_v58 = vshrl.u32 %v2757_v53, 16  ;;  %v462_v59 = vshll.u32 %v2757_v53, 16  ;;  %v3398_v60 = vld [vmem:[%s4743_s1 + $0x194] ss:$8 sps:$4 sm:$0xff]   ;;  %v3340_v61 = vld [vmem:[%s4743_s1 + $0xe0] ss:$8 sps:$4 sm:$0xff]  }
  0x19   : > { %668 = vmatprep.mubr.bf16.mxu0 %v473_v32  ;;  %419 = vmatpush1.bf16.msra.mxu1 %v3364_v36  ;;  %v3341_v62 = vld [vmem:[%s4743_s1 + $0xf4] ss:$8 sps:$4 sm:$0xff]   ;;  %v3400_v63 = vld [vmem:[%s4743_s1 + $0x190] ss:$8 sps:$4 sm:$0xff]   ;;  %v3404_v2 = vld [vmem:[%s4743_s1 + $0x1a4] ss:$8 sps:$4 sm:$0xff]  }
  0x1a   : > { %420 = vmatprep.subr.bf16.mxu1 %v3368_v37  ;;  %v461_v0 = vrot.slane %v459_v58, 3  ;;  %v464_v1 = vrot.slane %v462_v59, 4  ;;  %v3345_v3 = vld [vmem:[%s4743_s1 + $0xf0] ss:$8 sps:$4 sm:$0xff]   ;;  %v3349_v4 = vld [vmem:[%s4743_s1 + $0x204] ss:$8 sps:$4 sm:$0xff]  }
  0x1b   : > { %647 = vmatpush1.bf16.msra.mxu0 %v3313_v12  ;;  %v3406_v5 = vld [vmem:[%s4743_s1 + $0x1a0] ss:$8 sps:$4 sm:$0xff]   ;;  %v3410_v7 = vld [vmem:[%s4743_s1 + $0x1b4] ss:$8 sps:$4 sm:$0xff]   ;;  %v3412_v10 = vld [vmem:[%s4743_s1 + $0x1b0] ss:$8 sps:$4 sm:$0xff]  }
  0x1c   : > { %648 = vmatprep.subr.bf16.mxu0 %v3314_v13  ;;  %v465_v6 = vor.u32 %v464_v1, %v461_v0  ;;  %v3347_v8 = vld [vmem:[%s4743_s1 + $0x200] ss:$8 sps:$4 sm:$0xff]   ;;  %v3355_v9 = vld [vmem:[%s4743_s1 + $0x214] ss:$8 sps:$4 sm:$0xff]   ;;  %v3416_v12 = vld [vmem:[%s4743_s1 + $0x1c4] ss:$8 sps:$4 sm:$0xff]  }
  0x1d   : > { %421 = vmatpush1.bf16.msra.mxu1 %v3370_v40  ;;  %v3969_v11 = vld [vmem:[#allocation2 + $0x10] sm:$0x11]  ;;  %v3418_v19 = vld [vmem:[%s4743_s1 + $0x1c0] ss:$8 sps:$4 sm:$0xff]   ;;  %v3373_v28 = vld [vmem:[%s4743_s1 + $0x244] ss:$8 sps:$4 sm:$0xff]  }
  0x1e   : > { %422 = vmatprep.subr.bf16.mxu1 %v3374_v41  ;;  %v2824_v13 = vcombine.high %v3830_v17, %v3969_v11  ;;  %v3353_v14 = vld [vmem:[%s4743_s1 + $0x210] ss:$8 sps:$4 sm:$0xff]   ;;  %v3359_v22 = vld [vmem:[%s4743_s1 + $0x220] ss:$8 sps:$4 sm:$0xff]   ;;  %v3367_v23 = vld [vmem:[%s4743_s1 + $0x234] ss:$8 sps:$4 sm:$0xff]  }
  0x1f   : > { %649 = vmatpush1.bf16.msra.mxu0 %v3316_v15  ;;  %v3361_v15 = vld [vmem:[%s4743_s1 + $0x224] ss:$8 sps:$4 sm:$0xff]   ;;  %v3424_v25 = vld [vmem:[%s4743_s1 + $0x1d0] ss:$8 sps:$4 sm:$0xff]   ;;  %v3371_v29 = vld [vmem:[%s4743_s1 + $0x240] ss:$8 sps:$4 sm:$0xff]  }
  0x20   : > { %650 = vmatprep.subr.bf16.mxu0 %v3317_v20  ;;  %v728_v16 = vshrl.u32 %v2824_v13, 16  ;;  %v730_v18 = vshll.u32 %v2824_v13, 16  ;;  %v3422_v20 = vld [vmem:[%s4743_s1 + $0x1d4] ss:$8 sps:$4 sm:$0xff]   ;;  %v3430_v30 = vld [vmem:[%s4743_s1 + $0x1e0] ss:$8 sps:$4 sm:$0xff]  }
  0x21   : > { %423 = vmatpush1.bf16.msra.mxu1 %v3376_v44  ;;  %v3434_v31 = vld [vmem:[%s4743_s1 + $0x1f4] ss:$8 sps:$4 sm:$0xff]   ;;  %v3444_v34 = vld [vmem:[%s4743_s1 + $0x404] ss:$8 sps:$4 sm:$0xff]   ;;  %v3442_v37 = vld [vmem:[%s4743_s1 + $0x400] ss:$8 sps:$4 sm:$0xff]  }
  0x22   : > { %424 = vmatprep.subr.bf16.mxu1 %v3380_v45  ;;  %v732_v21 = vrot.slane %v730_v18, 1  ;;  %v3379_v32 = vld [vmem:[%s4743_s1 + $0x254] ss:$8 sps:$4 sm:$0xff]   ;;  %v3385_v36 = vld [vmem:[%s4743_s1 + $0x264] ss:$8 sps:$4 sm:$0xff]  }
  0x23   : > { %651 = vmatpush1.bf16.msra.mxu0 %v3319_v26  ;;  %v3428_v26 = vld [vmem:[%s4743_s1 + $0x1e4] ss:$8 sps:$4 sm:$0xff]   ;;  %v3383_v40 = vld [vmem:[%s4743_s1 + $0x260] ss:$8 sps:$4 sm:$0xff]   ;;  %v3391_v41 = vld [vmem:[%s4743_s1 + $0x274] ss:$8 sps:$4 sm:$0xff]  }
  0x24   : > { %652 = vmatprep.subr.bf16.mxu0 %v3320_v27  ;;  %v733_v24 = vor.u32 %v732_v21, %v728_v16  ;;  %v3365_v27 = vld [vmem:[%s4743_s1 + $0x230] ss:$8 sps:$4 sm:$0xff]   ;;  %v3397_v45 = vld [vmem:[%s4743_s1 + $0x284] ss:$8 sps:$4 sm:$0xff]   ;;  %v3419_v0 = vld [vmem:[%s4743_s1 + $0x2c0] ss:$8 sps:$4 sm:$0xff]  }
  0x25   : > { %425 = vmatpush1.bf16.msra.mxu1 %v3382_v48  ;;  %v3389_v44 = vld [vmem:[%s4743_s1 + $0x270] ss:$8 sps:$4 sm:$0xff]   ;;  %v3395_v48 = vld [vmem:[%s4743_s1 + $0x280] ss:$8 sps:$4 sm:$0xff]   ;;  %v3409_v53 = vld [vmem:[%s4743_s1 + $0x2a4] ss:$8 sps:$4 sm:$0xff]  }
  0x26   : > { %426 = vmatprep.subr.bf16.mxu1 %v3386_v49  ;;  %v3403_v49 = vld [vmem:[%s4743_s1 + $0x294] ss:$8 sps:$4 sm:$0xff]   ;;  %v3457_v58 = vld [vmem:[%s4743_s1 + $0x450] ss:$8 sps:$4 sm:$0xff]   ;;  %v3462_v59 = vld [vmem:[%s4743_s1 + $0x464] ss:$8 sps:$4 sm:$0xff]  }
  0x27   : > { %653 = vmatpush1.bf16.msra.mxu0 %v3322_v33  ;;  %v3436_v33 = vld [vmem:[%s4743_s1 + $0x1f0] ss:$8 sps:$4 sm:$0xff]   ;;  %v3427_v1 = vld [vmem:[%s4743_s1 + $0x2d4] ss:$8 sps:$4 sm:$0xff]   ;;  %v3472_v16 = vld [vmem:[%s4743_s1 + $0x4a0] ss:$8 sps:$4 sm:$0xff]  }
  0x28   : > { %654 = vmatprep.subr.bf16.mxu0 %v3323_v35  ;;  %v3377_v35 = vld [vmem:[%s4743_s1 + $0x250] ss:$8 sps:$4 sm:$0xff]   ;;  %v3474_v18 = vld [vmem:[%s4743_s1 + $0x4a4] ss:$8 sps:$4 sm:$0xff]  }
  0x29   : > { %427 = vmatpush1.bf16.msra.mxu1 %v3388_v52  ;;  %v3401_v52 = vld [vmem:[%s4743_s1 + $0x290] ss:$8 sps:$4 sm:$0xff]   ;;  %v3480_v21 = vld [vmem:[%s4743_s1 + $0x4c4] ss:$8 sps:$4 sm:$0xff]  }
  0x2a   : > { %428 = vmatprep.subr.bf16.mxu1 %v3392_v54  ;;  %v3454_v54 = vld [vmem:[%s4743_s1 + $0x440] ss:$8 sps:$4 sm:$0xff]  }
  0x2b   : > { %655 = vmatpush1.bf16.msra.mxu0 %v3325_v38  ;;  %v2723_v38 = vcombine.low %v3830_v17, %v3830_v17 }
  0x2c   : > { %656 = vmatprep.subr.bf16.mxu0 %v3326_v39  ;;  %v3447_v39 = vld [vmem:[%s4743_s1 + $0x414] ss:$8 sps:$4 sm:$0xff]  }
  0x2d   : > { %429 = vmatpush1.bf16.msra.mxu1 %v3394_v57  ;;  %v3415_v57 = vld [vmem:[%s4743_s1 + $0x2b4] ss:$8 sps:$4 sm:$0xff]  }
  0x2e   : > { %430 = vmatprep.subr.bf16.mxu1 %v3398_v60  ;;  %v3413_v60 = vld [vmem:[%s4743_s1 + $0x2b0] ss:$8 sps:$4 sm:$0xff]  }
  0x2f   : > { %657 = vmatpush1.bf16.msra.mxu0 %v3328_v42  ;;  %v3445_v42 = vld [vmem:[%s4743_s1 + $0x410] ss:$8 sps:$4 sm:$0xff]  }
  0x30   : > { %658 = vmatprep.subr.bf16.mxu0 %v3329_v43  ;;  %v3450_v43 = vld [vmem:[%s4743_s1 + $0x424] ss:$8 sps:$4 sm:$0xff]  }
  0x31   : > { %431 = vmatpush1.bf16.msra.mxu1 %v3400_v63  ;;  %v3465_v63 = vld [vmem:[%s4743_s1 + $0x474] ss:$8 sps:$4 sm:$0xff]  }
  0x32   : > { %432 = vmatprep.subr.bf16.mxu1 %v3404_v2  ;;  %v3463_v2 = vld [vmem:[%s4743_s1 + $0x470] ss:$8 sps:$4 sm:$0xff]  }
  0x33   : > { %659 = vmatpush1.bf16.msra.mxu0 %v3331_v46  ;;  %v3448_v46 = vld [vmem:[%s4743_s1 + $0x420] ss:$8 sps:$4 sm:$0xff]  }
  0x34   : > { %660 = vmatprep.subr.bf16.mxu0 %v3332_v47  ;;  %v3453_v47 = vld [vmem:[%s4743_s1 + $0x434] ss:$8 sps:$4 sm:$0xff]  }
  0x35   : > { %433 = vmatpush1.bf16.msra.mxu1 %v3406_v5  ;;  %v3433_v5 = vld [vmem:[%s4743_s1 + $0x2e4] ss:$8 sps:$4 sm:$0xff]  }
  0x36   : > { %434 = vmatprep.subr.bf16.mxu1 %v3410_v7  ;;  %v3466_v7 = vld [vmem:[%s4743_s1 + $0x480] ss:$8 sps:$4 sm:$0xff]  }
  0x37   : > { %661 = vmatpush1.bf16.msra.mxu0 %v3334_v50  ;;  %v3451_v50 = vld [vmem:[%s4743_s1 + $0x430] ss:$8 sps:$4 sm:$0xff]  }
  0x38   : > { %662 = vmatprep.subr.bf16.mxu0 %v3335_v51  ;;  %v3456_v51 = vld [vmem:[%s4743_s1 + $0x444] ss:$8 sps:$4 sm:$0xff]  }
  0x39   : > { %435 = vmatpush1.bf16.msra.mxu1 %v3412_v10 }
  0x3a   : > { %436 = vmatprep.subr.bf16.mxu1 %v3416_v12  ;;  %v3438_v12 = vld [vmem:[%s4743_s1 + $0x2f0] ss:$8 sps:$4 sm:$0xff]  }
  0x3b   : > { %663 = vmatpush1.bf16.msra.mxu0 %v3337_v55  ;;  %v3459_v55 = vld [vmem:[%s4743_s1 + $0x454] ss:$8 sps:$4 sm:$0xff]  }
  0x3c   : > { %664 = vmatprep.subr.bf16.mxu0 %v3338_v56  ;;  %v3407_v56 = vld [vmem:[%s4743_s1 + $0x2a0] ss:$8 sps:$4 sm:$0xff]  }
  0x3d   : > { %437 = vmatpush1.bf16.msra.mxu1 %v3418_v19  ;;  %v3477_v19 = vld [vmem:[%s4743_s1 + $0x4b4] ss:$8 sps:$4 sm:$0xff]  }
  0x3e   : > { %438 = vmatprep.subr.bf16.mxu1 %v3422_v20  ;;  %v3475_v20 = vld [vmem:[%s4743_s1 + $0x4b0] ss:$8 sps:$4 sm:$0xff]  }
  0x3f   : > { %665 = vmatpush1.bf16.msra.mxu0 %v3340_v61  ;;  %v3421_v61 = vld [vmem:[%s4743_s1 + $0x2c4] ss:$8 sps:$4 sm:$0xff]  }
  0x40   : > { %666 = vmatprep.subr.bf16.mxu0 %v3341_v62  ;;  %v3460_v62 = vld [vmem:[%s4743_s1 + $0x460] ss:$8 sps:$4 sm:$0xff]  }
  0x41   : > { %439 = vmatpush1.bf16.msra.mxu1 %v3424_v25  ;;  %v3486_v25 = vld [vmem:[%s4743_s1 + $0x4e4] ss:$8 sps:$4 sm:$0xff]  }
  0x42   : > { %440 = vmatprep.subr.bf16.mxu1 %v3428_v26  ;;  %v3484_v26 = vld [vmem:[%s4743_s1 + $0x4e0] ss:$8 sps:$4 sm:$0xff]  }
  0x43   : > { %667 = vmatpush1.bf16.msra.mxu0 %v3345_v3  ;;  %v3468_v3 = vld [vmem:[%s4743_s1 + $0x484] ss:$8 sps:$4 sm:$0xff]  }
  0x44   : > { %896 = vmatprep.subr.bf16.mxu0 %v3349_v4  ;;  %v3425_v4 = vld [vmem:[%s4743_s1 + $0x2d0] ss:$8 sps:$4 sm:$0xff]  }
  0x45   : > { %441 = vmatpush1.bf16.msra.mxu1 %v3430_v30 }
  0x46   : > { %669 = vmatmul.mubr.bf16.vlgmr.msra.gmra.mrb[0].mxu0 %v465_v6  ;;  %442 = vmatprep.subr.bf16.mxu1 %v3434_v31  ;;  %v2823_v6 = vcombine.low %v3830_v17, %v3969_v11  ;;  %v3440_v17 = vld [vmem:[%s4743_s1 + $0x2f4] ss:$8 sps:$4 sm:$0xff]   ;;  %v3469_v11 = vld [vmem:[%s4743_s1 + $0x490] ss:$8 sps:$4 sm:$0xff]  }
  0x47   : > { %897 = vmatpush1.bf16.msra.mxu0 %v3347_v8  ;;  %928 = vmatprep.mubr.bf16.mxu0 %v733_v24  ;;  %v3471_v8 = vld [vmem:[%s4743_s1 + $0x494] ss:$8 sps:$4 sm:$0xff]   ;;  %v3481_v24 = vld [vmem:[%s4743_s1 + $0x4d0] ss:$8 sps:$4 sm:$0xff]  }
  0x48   : > { %898 = vmatprep.subr.bf16.mxu0 %v3355_v9  ;;  %v3431_v9 = vld [vmem:[%s4743_s1 + $0x2e0] ss:$8 sps:$4 sm:$0xff]   ;;  %v723_v10 = vshll.u32 %v2823_v6, 16  ;;  %v721_v13 = vshrl.u32 %v2823_v6, 16 }
  0x49   : > { %443 = vmatpush1.bf16.msra.mxu1 %v3436_v33  ;;  %v3586_v6 = vld [vmem:[%s4743_s1 + $0x700] ss:$8 sps:$4 sm:$0xff]  }
  0x4a   : > { %1227 = vmatprep.subr.bf16.mxu1 %v3444_v34  ;;  %v941_v34 = vlaneseq }
  0x4b   : > { %899 = vmatpush1.bf16.msra.mxu0 %v3353_v14  ;;  %v725_v14 = vrot.slane %v723_v10, 1  ;;  %v3498_v10 = vld [vmem:[%s4743_s1 + $0x324] ss:$8 sps:$4 sm:$0xff]  }
  0x4c   : > { %900 = vmatprep.subr.bf16.mxu0 %v3361_v15  ;;  %445 = vmatmul.mubr.bf16.vlgmr.msra.gmra.mrb[0].mxu1 %v2723_v38 }
  0x4d   : > { %1228 = vmatpush1.bf16.msra.mxu1 %v3442_v37  ;;  %v726_v15 = vor.u32 %v725_v14, %v721_v13  ;;  %v939_v37 = vld [vmem:[%s4744_s2] sm:$0xf]  ;;  %v3589_v13 = vld [vmem:[%s4743_s1 + $0x710] ss:$8 sps:$4 sm:$0xff]  }
  0x4e   : > { %1229 = vmatprep.subr.bf16.mxu1 %v3447_v39  ;;  %v3496_v14 = vld [vmem:[%s4743_s1 + $0x320] ss:$8 sps:$4 sm:$0xff]  }
  0x4f   : > { %901 = vmatpush1.bf16.msra.mxu0 %v3359_v22  ;;  %v3478_v22 = vld [vmem:[%s4743_s1 + $0x4c0] ss:$8 sps:$4 sm:$0xff]  }
  0x50   : > { %902 = vmatprep.subr.bf16.mxu0 %v3367_v23  ;;  %v3483_v23 = vld [vmem:[%s4743_s1 + $0x4d4] ss:$8 sps:$4 sm:$0xff]  }
  0x51   : > { %1230 = vmatpush1.bf16.msra.mxu1 %v3445_v42 }
  0x52   : > { %1231 = vmatprep.subr.bf16.mxu1 %v3450_v43 }
  0x53   : > { %903 = vmatpush1.bf16.msra.mxu0 %v3365_v27  ;;  %v3489_v27 = vld [vmem:[%s4743_s1 + $0x4f4] ss:$8 sps:$4 sm:$0xff]  }
  0x54   : > { %904 = vmatprep.subr.bf16.mxu0 %v3373_v28  ;;  %v3487_v28 = vld [vmem:[%s4743_s1 + $0x4f0] ss:$8 sps:$4 sm:$0xff]  }
  0x55   : > { %1232 = vmatpush1.bf16.msra.mxu1 %v3448_v46 }
  0x56   : > { %1233 = vmatprep.subr.bf16.mxu1 %v3453_v47 }
  0x57   : > { %905 = vmatpush1.bf16.msra.mxu0 %v3371_v29  ;;  %v3492_v29 = vld [vmem:[%s4743_s1 + $0x304] ss:$8 sps:$4 sm:$0xff]  }
  0x58   : > { %906 = vmatprep.subr.bf16.mxu0 %v3379_v32 }
  0x59   : > { %1234 = vmatpush1.bf16.msra.mxu1 %v3451_v50 }
  0x5a   : > { %1235 = vmatprep.subr.bf16.mxu1 %v3456_v51 }
  0x5b   : > { %907 = vmatpush1.bf16.msra.mxu0 %v3377_v35  ;;  %v942_v35 = vshrl.u32 %v941_v34, 7  ;;  %v3604_v34 = vld [vmem:[%s4743_s1 + $0x760] ss:$8 sps:$4 sm:$0xff]  }
  0x5c   : > { %908 = vmatprep.subr.bf16.mxu0 %v3385_v36 }
  0x5d   : > { %1236 = vmatpush1.bf16.msra.mxu1 %v3454_v54  ;;  %v4187_v36 = vsub.s32 0, %v942_v35  ;;  %v4192_v38 = vsub.s32 2, %v942_v35  ;;  %v4194_v39 = vsub.s32 1, %v942_v35 }
  0x5e   : > { %1237 = vmatprep.subr.bf16.mxu1 %v3459_v55 }
  0x5f   : > { %909 = vmatpush1.bf16.msra.mxu0 %v3383_v40  ;;  %v4196_v40 = vsub.s32 3, %v942_v35  ;;  %v948_v42 = vrot.slane %v939_v37, %v4192_v38  ;;  %v964_v43 = vrot.slane %v939_v37, %v4194_v39  ;;  %v3511_v35 = vld [vmem:[%s4743_s1 + $0x370] ss:$8 sps:$4 sm:$0xff]  }
  0x60   : > { %910 = vmatprep.subr.bf16.mxu0 %v3391_v41  ;;  %v944_v41 = vrot.slane %v939_v37, %v4187_v36 }
  0x61   : > { %1238 = vmatpush1.bf16.msra.mxu1 %v3457_v58  ;;  %v958_v47 = vrot.slane %v948_v42, %v4187_v36  ;;  %v3607_v42 = vld [vmem:[%s4743_s1 + $0x770] ss:$8 sps:$4 sm:$0xff]  }
  0x62   : > { %1239 = vmatprep.subr.bf16.mxu1 %v3462_v59 }
  0x63   : > { %911 = vmatpush1.bf16.msra.mxu0 %v3389_v44  ;;  %v968_v44 = vrot.slane %v939_v37, %v4196_v40  ;;  %v3609_v37 = vld [vmem:[%s4743_s1 + $0x774] ss:$8 sps:$4 sm:$0xff]  }
  0x64   : > { %912 = vmatprep.subr.bf16.mxu0 %v3397_v45  ;;  %v954_v45 = vrot.slane %v944_v41, %v4187_v36  ;;  %v3516_v41 = vld [vmem:[%s4743_s1 + $0x384] ss:$8 sps:$4 sm:$0xff]  }
  0x65   : > { %1240 = vmatpush1.bf16.msra.mxu1 %v3460_v62 }
  0x66   : > { %1241 = vmatprep.subr.bf16.mxu1 %v3465_v63 }
  0x67   : > { %913 = vmatpush1.bf16.msra.mxu0 %v3395_v48 }
  0x68   : > { %914 = vmatprep.subr.bf16.mxu0 %v3403_v49  ;;  %v974_v49 = vrot.slane %v964_v43, %v4194_v39  ;;  %v3514_v43 = vld [vmem:[%s4743_s1 + $0x380] ss:$8 sps:$4 sm:$0xff]  }
  0x69   : > { %1242 = vmatpush1.bf16.msra.mxu1 %v3463_v2 }
  0x6a   : > { %1243 = vmatprep.subr.bf16.mxu1 %v3468_v3  ;;  %v3495_v3 = vld [vmem:[%s4743_s1 + $0x314] ss:$8 sps:$4 sm:$0xff]  }
  0x6b   : > { %915 = vmatpush1.bf16.msra.mxu0 %v3401_v52  ;;  %v978_v52 = vrot.slane %v968_v44, %v4194_v39  ;;  %v3612_v44 = vld [vmem:[%s4743_s1 + $0x784] ss:$8 sps:$4 sm:$0xff]  }
  0x6c   : > { %916 = vmatprep.subr.bf16.mxu0 %v3409_v53 }
  0x6d   : > { %1244 = vmatpush1.bf16.msra.mxu1 %v3466_v7  ;;  %v3493_v7 = vld [vmem:[%s4743_s1 + $0x310] ss:$8 sps:$4 sm:$0xff]  }
  0x6e   : > { %1245 = vmatprep.subr.bf16.mxu1 %v3471_v8 }
  0x6f   : > { %917 = vmatpush1.bf16.msra.mxu0 %v3407_v56 }
  0x70   : > { %918 = vmatprep.subr.bf16.mxu0 %v3415_v57 }
  0x71   : > { %1246 = vmatpush1.bf16.msra.mxu1 %v3469_v11  ;;  %v3591_v11 = vld [vmem:[%s4743_s1 + $0x714] ss:$8 sps:$4 sm:$0xff]  }
  0x72   : > { %1247 = vmatprep.subr.bf16.mxu1 %v3474_v18  ;;  %v3592_v18 = vld [vmem:[%s4743_s1 + $0x720] ss:$8 sps:$4 sm:$0xff]  }
  0x73   : > { %919 = vmatpush1.bf16.msra.mxu0 %v3413_v60 }
  0x74   : > { %920 = vmatprep.subr.bf16.mxu0 %v3421_v61  ;;  %v4206_v61 = vld [vmem:[#allocation3] sm:$0x88] }
  0x75   : > { %1248 = vmatpush1.bf16.msra.mxu1 %v3472_v16  ;;  %v3501_v16 = vld [vmem:[%s4743_s1 + $0x334] ss:$8 sps:$4 sm:$0xff]  }
  0x76   : > { %1249 = vmatprep.subr.bf16.mxu1 %v3477_v19  ;;  %v3499_v19 = vld [vmem:[%s4743_s1 + $0x330] ss:$8 sps:$4 sm:$0xff]  }
  0x77   : > { %921 = vmatpush1.bf16.msra.mxu0 %v3419_v0  ;;  %v3490_v0 = vld [vmem:[%s4743_s1 + $0x300] ss:$8 sps:$4 sm:$0xff]  }
  0x78   : > { %922 = vmatprep.subr.bf16.mxu0 %v3427_v1 }
  0x79   : > { %1250 = vmatpush1.bf16.msra.mxu1 %v3475_v20  ;;  %v3597_v20 = vld [vmem:[%s4743_s1 + $0x734] ss:$8 sps:$4 sm:$0xff]  }
  0x7a   : > { %1251 = vmatprep.subr.bf16.mxu1 %v3480_v21  ;;  %v3504_v21 = vld [vmem:[%s4743_s1 + $0x344] ss:$8 sps:$4 sm:$0xff]  }
  0x7b   : > { %923 = vmatpush1.bf16.msra.mxu0 %v3425_v4 }
  0x7c   : > { %924 = vmatprep.subr.bf16.mxu0 %v3433_v5 }
  0x7d   : > { %1252 = vmatpush1.bf16.msra.mxu1 %v3478_v22  ;;  %v3595_v22 = vld [vmem:[%s4743_s1 + $0x730] ss:$8 sps:$4 sm:$0xff]  }
  0x7e   : > { %1253 = vmatprep.subr.bf16.mxu1 %v3483_v23  ;;  %v3502_v23 = vld [vmem:[%s4743_s1 + $0x340] ss:$8 sps:$4 sm:$0xff]  }
  0x7f   : > { %925 = vmatpush1.bf16.msra.mxu0 %v3431_v9 }
  0x80   : > { %926 = vmatprep.subr.bf16.mxu0 %v3440_v17  ;;  %v3588_v17 = vld [vmem:[%s4743_s1 + $0x704] ss:$8 sps:$4 sm:$0xff]  }
  0x81   : > { %1254 = vmatpush1.bf16.msra.mxu1 %v3481_v24  ;;  %v3600_v24 = vld [vmem:[%s4743_s1 + $0x744] ss:$8 sps:$4 sm:$0xff]  }
  0x82   : > { %1255 = vmatprep.subr.bf16.mxu1 %v3486_v25  ;;  %v3507_v25 = vld [vmem:[%s4743_s1 + $0x354] ss:$8 sps:$4 sm:$0xff]  }
  0x83   : > { %927 = vmatpush1.bf16.msra.mxu0 %v3438_v12 }
  0x84   : > { %2043 = vmatprep.subr.bf16.mxu0 %v3588_v17 }
  0x85   : > { %1256 = vmatpush1.bf16.msra.mxu1 %v3484_v26  ;;  %v3598_v26 = vld [vmem:[%s4743_s1 + $0x740] ss:$8 sps:$4 sm:$0xff]  }
  0x86   : > { %929 = vmatmul.mubr.bf16.vlgmr.msra.gmra.mrb[0].mxu0 %v726_v15  ;;  %1257 = vmatprep.subr.bf16.mxu1 %v3489_v27  ;;  %v3594_v15 = vld [vmem:[%s4743_s1 + $0x724] ss:$8 sps:$4 sm:$0xff]   ;;  %v3505_v27 = vld [vmem:[%s4743_s1 + $0x350] ss:$8 sps:$4 sm:$0xff]  }
  0x87   : > { %2044 = vmatpush1.bf16.msra.mxu0 %v3586_v6  ;;  %v3535_v6 = vld [vmem:[%s4743_s1 + $0x3f0] ss:$8 sps:$4 sm:$0xff]  }
  0x88   : > { %2045 = vmatprep.subr.bf16.mxu0 %v3591_v11 }
  0x89   : > { %1258 = vmatpush1.bf16.msra.mxu1 %v3487_v28  ;;  %v3603_v28 = vld [vmem:[%s4743_s1 + $0x754] ss:$8 sps:$4 sm:$0xff]  }
  0x8a   : > { %1451 = vmatprep.subr.bf16.mxu1 %v3492_v29  ;;  %v3510_v29 = vld [vmem:[%s4743_s1 + $0x364] ss:$8 sps:$4 sm:$0xff]  }
  0x8b   : > { %2046 = vmatpush1.bf16.msra.mxu0 %v3589_v13  ;;  %v3543_v13 = vld [vmem:[%s4743_s1 + $0x514] ss:$8 sps:$4 sm:$0xff]  }
  0x8c   : > { %2047 = vmatprep.subr.bf16.mxu0 %v3594_v15  ;;  %v3541_v15 = vld [vmem:[%s4743_s1 + $0x510] ss:$8 sps:$4 sm:$0xff]  }
  0x8f   : > { %2048 = vmatpush1.bf16.msra.mxu0 %v3592_v18  ;;  %v3544_v18 = vld [vmem:[%s4743_s1 + $0x520] ss:$8 sps:$4 sm:$0xff]  }
  0x90   : > { %2049 = vmatprep.subr.bf16.mxu0 %v3597_v20  ;;  %v3547_v20 = vld [vmem:[%s4743_s1 + $0x530] ss:$8 sps:$4 sm:$0xff]  }
  0x93   : > { %2050 = vmatpush1.bf16.msra.mxu0 %v3595_v22  ;;  %v3550_v22 = vld [vmem:[%s4743_s1 + $0x540] ss:$8 sps:$4 sm:$0xff]  }
  0x94   : > { %2051 = vmatprep.subr.bf16.mxu0 %v3600_v24  ;;  %v3553_v24 = vld [vmem:[%s4743_s1 + $0x550] ss:$8 sps:$4 sm:$0xff]  }
  0x97   : > { %2052 = vmatpush1.bf16.msra.mxu0 %v3598_v26  ;;  %v3556_v26 = vld [vmem:[%s4743_s1 + $0x560] ss:$8 sps:$4 sm:$0xff]  }
  0x98   : > { %2053 = vmatprep.subr.bf16.mxu0 %v3603_v28  ;;  %v3559_v28 = vld [vmem:[%s4743_s1 + $0x570] ss:$8 sps:$4 sm:$0xff]  }
 0x11f   : > { %v446_v30 = vpop.f32.mrb[0].mxu1 }
 0x120   : > { %v448_v31 = vpop.f32.mrb[1].mxu1 }
 0x121   : > { %v450_v32 = vpop.f32.mrb[2].mxu1 }
 0x122   : > { %v451_v33 = vpop.f32.mrb[3].mxu1  ;;  %v3606_v32 = vld [vmem:[%s4743_s1 + $0x764] ss:$8 sps:$4 sm:$0xff]  }
 0x123   : > { %v3513_v33 = vld [vmem:[%s4743_s1 + $0x374] ss:$8 sps:$4 sm:$0xff]  }
 0x159   : > { %v930_v46 = vpop.f32.mrb[0].mxu0 }
 0x15a   : > { %v3265_v48 = vadd.f32 %v930_v46, %v446_v30  ;;  %v932_v50 = vpop.f32.mrb[1].mxu0  ;;  %v3601_v30 = vld [vmem:[%s4743_s1 + $0x750] ss:$8 sps:$4 sm:$0xff]   ;;  %v3610_v46 = vld [vmem:[%s4743_s1 + $0x780] ss:$8 sps:$4 sm:$0xff]  }
 0x15b   : > { %v3266_v51 = vadd.f32 %v932_v50, %v448_v31  ;;  %v934_v53 = vpop.f32.mrb[2].mxu0  ;;  %v3508_v31 = vld [vmem:[%s4743_s1 + $0x360] ss:$8 sps:$4 sm:$0xff]   ;;  %2054 = vmatpush1.bf16.msra.mxu0 %v3601_v30  ;;  %v3613_v50 = vld [vmem:[%s4743_s1 + $0x790] ss:$8 sps:$4 sm:$0xff]  }
 0x15c   : > { %v959_v54 = vmul.f32 %v3265_v48, %v954_v45  ;;  %v935_v55 = vpop.f32.mrb[3].mxu0  ;;  %2055 = vmatprep.subr.bf16.mxu0 %v3606_v32  ;;  %v3519_v45 = vld [vmem:[%s4743_s1 + $0x394] ss:$8 sps:$4 sm:$0xff]   ;;  %v3562_v30 = vld [vmem:[%s4743_s1 + $0x580] ss:$8 sps:$4 sm:$0xff]  }
 0x15d   : > { %v960_v56 = vmul.f32 %v3266_v51, %v958_v47  ;;  %v3517_v47 = vld [vmem:[%s4743_s1 + $0x390] ss:$8 sps:$4 sm:$0xff]   ;;  %v3615_v48 = vld [vmem:[%s4743_s1 + $0x794] ss:$8 sps:$4 sm:$0xff]   ;;  %v3520_v51 = vld [vmem:[%s4743_s1 + $0x3a0] ss:$8 sps:$4 sm:$0xff]  }
 0x15e   : > { %v979_v57 = vadd.f32 %v974_v49, %v959_v54  ;;  %v3522_v49 = vld [vmem:[%s4743_s1 + $0x3a4] ss:$8 sps:$4 sm:$0xff]   ;;  %v3525_v53 = vld [vmem:[%s4743_s1 + $0x3b4] ss:$8 sps:$4 sm:$0xff]   ;;  %v3616_v54 = vld [vmem:[%s4743_s1 + $0x7a0] ss:$8 sps:$4 sm:$0xff]  }
 0x15f   : > { %v980_v58 = vadd.f32 %v978_v52, %v960_v56  ;;  %2056 = vmatpush1.bf16.msra.mxu0 %v3604_v34  ;;  %v3618_v52 = vld [vmem:[%s4743_s1 + $0x7a4] ss:$8 sps:$4 sm:$0xff]   ;;  %v3523_v55 = vld [vmem:[%s4743_s1 + $0x3b0] ss:$8 sps:$4 sm:$0xff]   ;;  %v3568_v34 = vld [vmem:[%s4743_s1 + $0x5a0] ss:$8 sps:$4 sm:$0xff]  }
 0x160   : > { %v981_v59 = vmax.f32 %v979_v57, 0.0  ;;  %2057 = vmatprep.subr.bf16.mxu0 %v3609_v37  ;;  %v3528_v56 = vld [vmem:[%s4743_s1 + $0x3c4] ss:$8 sps:$4 sm:$0xff]   ;;  %v3526_v57 = vld [vmem:[%s4743_s1 + $0x3c0] ss:$8 sps:$4 sm:$0xff]  }
 0x161   : > { %v982_v60 = vmax.f32 %v980_v58, 0.0  ;;  %v3531_v58 = vld [vmem:[%s4743_s1 + $0x3d4] ss:$8 sps:$4 sm:$0xff]   ;;  %v3565_v32 = vld [vmem:[%s4743_s1 + $0x590] ss:$8 sps:$4 sm:$0xff]  }
 0x162   : > { %v3731_v1 = vpack.c.bf16 %v981_v59, %v981_v59  ;;  %v3571_v37 = vld [vmem:[%s4743_s1 + $0x5b0] ss:$8 sps:$4 sm:$0xff]  }
 0x163   : > { %v4208_v62 = vpack.c.bf16 %v982_v60, %v981_v59  ;;  %v3730_v63 = vpack.c.bf16 %v982_v60, %v982_v60  ;;  %2058 = vmatpush1.bf16.msra.mxu0 %v3607_v42  ;;  %v4356_v59 = vld [vmem:[#allocation3 + $0x10] sm:$0x11]  ;;  %v3529_v60 = vld [vmem:[%s4743_s1 + $0x3d0] ss:$8 sps:$4 sm:$0xff]  }
 0x164   : > { %2059 = vmatprep.subr.bf16.mxu0 %v3612_v44  ;;  %v3574_v42 = vld [vmem:[%s4743_s1 + $0x5c0] ss:$8 sps:$4 sm:$0xff]   ;;  %v3577_v44 = vld [vmem:[%s4743_s1 + $0x5d0] ss:$8 sps:$4 sm:$0xff]  }
 0x165   : > { %v2957_v2 = vcombine.high %v4206_v61, %v4208_v62  ;;  %1259 = vmatprep.mubr.bf16.mxu1 %v3730_v63  ;;  %v2956_v63 = vcombine.low %v4206_v61, %v4208_v62 }
 0x166   : > { %1260 = vmatmul.mubr.bf16.vlgmr.msra.gmra.mrb[4].mxu1 %v3731_v1  ;;  %v3023_v1 = vcombine.high %v4208_v62, %v4356_v59 }
 0x167   : > { %v1282_v4 = vshrl.u32 %v2957_v2, 16  ;;  %v1285_v5 = vshll.u32 %v2957_v2, 16  ;;  %1452 = vmatpush1.bf16.msra.mxu1 %v3490_v0  ;;  %2060 = vmatpush1.bf16.msra.mxu0 %v3610_v46  ;;  %v3534_v0 = vld [vmem:[%s4743_s1 + $0x3e4] ss:$8 sps:$4 sm:$0xff]   ;;  %v3532_v2 = vld [vmem:[%s4743_s1 + $0x3e0] ss:$8 sps:$4 sm:$0xff]  }
 0x168   : > { %1453 = vmatprep.subr.bf16.mxu1 %v3495_v3  ;;  %2061 = vmatprep.subr.bf16.mxu0 %v3615_v48  ;;  %v3537_v3 = vld [vmem:[%s4743_s1 + $0x3f4] ss:$8 sps:$4 sm:$0xff]   ;;  %v1277_v61 = vshll.u32 %v2956_v63, 16  ;;  %v1543_v11 = vshrl.u32 %v3023_v1, 16  ;;  %v3582_v46 = vld [vmem:[%s4743_s1 + $0x5e4] ss:$8 sps:$4 sm:$0xff]  }
 0x169   : > { %v1284_v8 = vrot.slane %v1282_v4, 3  ;;  %v1287_v9 = vrot.slane %v1285_v5, 4  ;;  %v1274_v4 = vshrl.u32 %v2956_v63, 16  ;;  %v1545_v5 = vshll.u32 %v3023_v1, 16  ;;  %v3585_v48 = vld [vmem:[%s4743_s1 + $0x5f4] ss:$8 sps:$4 sm:$0xff]  }
 0x16a   : > { %v3633_v63 = vld [vmem:[%s4743_s1 + $0x7f4] ss:$8 sps:$4 sm:$0xff]   ;;  %v3636_v1 = vld [vmem:[%s4743_s1 + $0x604] ss:$8 sps:$4 sm:$0xff]  }
 0x16b   : > { %v1288_v12 = vor.u32 %v1287_v9, %v1284_v8  ;;  %1454 = vmatpush1.bf16.msra.mxu1 %v3493_v7  ;;  %2062 = vmatpush1.bf16.msra.mxu0 %v3613_v50  ;;  %v1276_v7 = vrot.slane %v1274_v4, 3  ;;  %v1279_v8 = vrot.slane %v1277_v61, 4  ;;  %v3540_v9 = vld [vmem:[%s4743_s1 + $0x504] ss:$8 sps:$4 sm:$0xff]   ;;  %v1547_v17 = vrot.slane %v1545_v5, 1 }
 0x16c   : > { %1455 = vmatprep.subr.bf16.mxu1 %v3498_v10  ;;  %2063 = vmatprep.subr.bf16.mxu0 %v3618_v52  ;;  %v3538_v10 = vld [vmem:[%s4743_s1 + $0x500] ss:$8 sps:$4 sm:$0xff]  }
 0x16d   : > { %1483 = vmatprep.mubr.bf16.mxu1 %v1288_v12  ;;  %v1280_v12 = vor.u32 %v1279_v8, %v1276_v7 }
 0x16f   : > { %1456 = vmatpush1.bf16.msra.mxu1 %v3496_v14  ;;  %2064 = vmatpush1.bf16.msra.mxu0 %v3616_v54  ;;  %v1548_v14 = vor.u32 %v1547_v17, %v1543_v11  ;;  %v3619_v54 = vld [vmem:[%s4743_s1 + $0x7b0] ss:$8 sps:$4 sm:$0xff]  }
 0x170   : > { %1457 = vmatprep.subr.bf16.mxu1 %v3501_v16  ;;  %v3546_v16 = vld [vmem:[%s4743_s1 + $0x524] ss:$8 sps:$4 sm:$0xff]  }
 0x173   : > { %1458 = vmatpush1.bf16.msra.mxu1 %v3499_v19  ;;  %v3549_v19 = vld [vmem:[%s4743_s1 + $0x534] ss:$8 sps:$4 sm:$0xff]  }
 0x174   : > { %1459 = vmatprep.subr.bf16.mxu1 %v3504_v21  ;;  %v3552_v21 = vld [vmem:[%s4743_s1 + $0x544] ss:$8 sps:$4 sm:$0xff]  }
 0x177   : > { %1460 = vmatpush1.bf16.msra.mxu1 %v3502_v23  ;;  %v3555_v23 = vld [vmem:[%s4743_s1 + $0x554] ss:$8 sps:$4 sm:$0xff]  }
 0x178   : > { %1461 = vmatprep.subr.bf16.mxu1 %v3507_v25  ;;  %v3558_v25 = vld [vmem:[%s4743_s1 + $0x564] ss:$8 sps:$4 sm:$0xff]  }
 0x17b   : > { %1462 = vmatpush1.bf16.msra.mxu1 %v3505_v27  ;;  %v3561_v27 = vld [vmem:[%s4743_s1 + $0x574] ss:$8 sps:$4 sm:$0xff]  }
 0x17c   : > { %1463 = vmatprep.subr.bf16.mxu1 %v3510_v29  ;;  %v3564_v29 = vld [vmem:[%s4743_s1 + $0x584] ss:$8 sps:$4 sm:$0xff]  }
 0x17f   : > { %1464 = vmatpush1.bf16.msra.mxu1 %v3508_v31  ;;  %v3567_v31 = vld [vmem:[%s4743_s1 + $0x594] ss:$8 sps:$4 sm:$0xff]  }
 0x180   : > { %1465 = vmatprep.subr.bf16.mxu1 %v3513_v33  ;;  %v3570_v33 = vld [vmem:[%s4743_s1 + $0x5a4] ss:$8 sps:$4 sm:$0xff]  }
 0x183   : > { %1466 = vmatpush1.bf16.msra.mxu1 %v3511_v35  ;;  %v3573_v35 = vld [vmem:[%s4743_s1 + $0x5b4] ss:$8 sps:$4 sm:$0xff]  }
 0x184   : > { %1467 = vmatprep.subr.bf16.mxu1 %v3516_v41  ;;  %v3576_v41 = vld [vmem:[%s4743_s1 + $0x5c4] ss:$8 sps:$4 sm:$0xff]  }
 0x187   : > { %1468 = vmatpush1.bf16.msra.mxu1 %v3514_v43  ;;  %v3579_v43 = vld [vmem:[%s4743_s1 + $0x5d4] ss:$8 sps:$4 sm:$0xff]  }
 0x188   : > { %1469 = vmatprep.subr.bf16.mxu1 %v3519_v45  ;;  %v3022_v45 = vcombine.low %v4208_v62, %v4356_v59  ;;  %v3583_v62 = vld [vmem:[%s4743_s1 + $0x5f0] ss:$8 sps:$4 sm:$0xff]   ;;  %v3630_v59 = vld [vmem:[%s4743_s1 + $0x7e4] ss:$8 sps:$4 sm:$0xff]  }
 0x18b   : > { %1470 = vmatpush1.bf16.msra.mxu1 %v3517_v47  ;;  %v3580_v47 = vld [vmem:[%s4743_s1 + $0x5e0] ss:$8 sps:$4 sm:$0xff]  }
 0x18c   : > { %1471 = vmatprep.subr.bf16.mxu1 %v3522_v49  ;;  %v1538_v49 = vshll.u32 %v3022_v45, 16 }
 0x18e   : > { %v1540_v50 = vrot.slane %v1538_v49, 1  ;;  %v3660_v49 = vld [vmem:[%s4743_s1 + $0x684] ss:$8 sps:$4 sm:$0xff]  }
 0x18f   : > { %1472 = vmatpush1.bf16.msra.mxu1 %v3520_v51  ;;  %v1536_v51 = vshrl.u32 %v3022_v45, 16  ;;  %v3654_v45 = vld [vmem:[%s4743_s1 + $0x664] ss:$8 sps:$4 sm:$0xff]  }
 0x190   : > { %1473 = vmatprep.subr.bf16.mxu1 %v3525_v53  ;;  %v3621_v53 = vld [vmem:[%s4743_s1 + $0x7b4] ss:$8 sps:$4 sm:$0xff]  }
 0x191   : > { %v1541_v52 = vor.u32 %v1540_v50, %v1536_v51  ;;  %2065 = vmatprep.subr.bf16.mxu0 %v3621_v53  ;;  %v3663_v50 = vld [vmem:[%s4743_s1 + $0x694] ss:$8 sps:$4 sm:$0xff]   ;;  %v3661_v51 = vld [vmem:[%s4743_s1 + $0x690] ss:$8 sps:$4 sm:$0xff]   ;;  %v3664_v53 = vld [vmem:[%s4743_s1 + $0x6a0] ss:$8 sps:$4 sm:$0xff]  }
 0x192   : > { %2066 = vmatpush1.bf16.msra.mxu0 %v3619_v54  ;;  %v3669_v54 = vld [vmem:[%s4743_s1 + $0x6b4] ss:$8 sps:$4 sm:$0xff]  }
 0x193   : > { %1474 = vmatpush1.bf16.msra.mxu1 %v3523_v55  ;;  %v3624_v55 = vld [vmem:[%s4743_s1 + $0x7c4] ss:$8 sps:$4 sm:$0xff]  }
 0x194   : > { %1475 = vmatprep.subr.bf16.mxu1 %v3528_v56  ;;  %v3622_v56 = vld [vmem:[%s4743_s1 + $0x7c0] ss:$8 sps:$4 sm:$0xff]   ;;  %2067 = vmatprep.subr.bf16.mxu0 %v3624_v55  ;;  %v3667_v55 = vld [vmem:[%s4743_s1 + $0x6b0] ss:$8 sps:$4 sm:$0xff]  }
 0x196   : > { %2068 = vmatpush1.bf16.msra.mxu0 %v3622_v56  ;;  %v3672_v56 = vld [vmem:[%s4743_s1 + $0x6c4] ss:$8 sps:$4 sm:$0xff]  }
 0x197   : > { %1476 = vmatpush1.bf16.msra.mxu1 %v3526_v57  ;;  %v3627_v57 = vld [vmem:[%s4743_s1 + $0x7d4] ss:$8 sps:$4 sm:$0xff]  }
 0x198   : > { %1477 = vmatprep.subr.bf16.mxu1 %v3531_v58  ;;  %v3625_v58 = vld [vmem:[%s4743_s1 + $0x7d0] ss:$8 sps:$4 sm:$0xff]   ;;  %2069 = vmatprep.subr.bf16.mxu0 %v3627_v57  ;;  %v3670_v57 = vld [vmem:[%s4743_s1 + $0x6c0] ss:$8 sps:$4 sm:$0xff]  }
 0x19a   : > { %2070 = vmatpush1.bf16.msra.mxu0 %v3625_v58  ;;  %v3675_v58 = vld [vmem:[%s4743_s1 + $0x6d4] ss:$8 sps:$4 sm:$0xff]  }
 0x19b   : > { %1478 = vmatpush1.bf16.msra.mxu1 %v3529_v60  ;;  %v3628_v60 = vld [vmem:[%s4743_s1 + $0x7e0] ss:$8 sps:$4 sm:$0xff]   ;;  %2071 = vmatprep.subr.bf16.mxu0 %v3630_v59  ;;  %v4603_v59 = vld [vmem:[#allocation2 + $0x10] sm:$0x11] }
 0x19c   : > { %1479 = vmatprep.subr.bf16.mxu1 %v3534_v0  ;;  %v3631_v0 = vld [vmem:[%s4743_s1 + $0x7f0] ss:$8 sps:$4 sm:$0xff]  }
 0x19e   : > { %2072 = vmatpush1.bf16.msra.mxu0 %v3628_v60  ;;  %v3673_v60 = vld [vmem:[%s4743_s1 + $0x6d0] ss:$8 sps:$4 sm:$0xff]  }
 0x19f   : > { %1480 = vmatpush1.bf16.msra.mxu1 %v3532_v2  ;;  %2073 = vmatprep.subr.bf16.mxu0 %v3633_v63  ;;  %v3056_v2 = vld [vmem:[%s4744_s2 + $0x4] sm:$0xf] }
 0x1a0   : > { %1481 = vmatprep.subr.bf16.mxu1 %v3537_v3  ;;  %v1760_v3 = vrot.slane %v3056_v2, %v4187_v36  ;;  %v1764_v4 = vrot.slane %v3056_v2, %v4192_v38  ;;  %v1780_v61 = vrot.slane %v3056_v2, %v4194_v39  ;;  %v1784_v5 = vrot.slane %v3056_v2, %v4196_v40  ;;  %v3676_v2 = vld [vmem:[%s4743_s1 + $0x6e0] ss:$8 sps:$4 sm:$0xff]  }
 0x1a2   : > { %2074 = vmatpush1.bf16.msra.mxu0 %v3631_v0  ;;  %v1774_v7 = vrot.slane %v1764_v4, %v4187_v36  ;;  %v1790_v8 = vrot.slane %v1780_v61, %v4194_v39  ;;  %v1794_v17 = vrot.slane %v1784_v5, %v4194_v39  ;;  %v3678_v0 = vld [vmem:[%s4743_s1 + $0x6e4] ss:$8 sps:$4 sm:$0xff]  }
 0x1a3   : > { %1482 = vmatpush1.bf16.msra.mxu1 %v3535_v6  ;;  %2267 = vmatprep.subr.bf16.mxu0 %v3636_v1  ;;  %v1770_v6 = vrot.slane %v1760_v3, %v4187_v36  ;;  %v3681_v3 = vld [vmem:[%s4743_s1 + $0x6f4] ss:$8 sps:$4 sm:$0xff]  }
 0x1a4   : > { %1711 = vmatprep.subr.bf16.mxu1 %v3540_v9 }
 0x1a6   : > { %1484 = vmatmul.mubr.bf16.vlgmr.msra.gmra.mrb[4].mxu1 %v1280_v12 }
 0x1a7   : > { %1712 = vmatpush1.bf16.msra.mxu1 %v3538_v10  ;;  %1743 = vmatprep.mubr.bf16.mxu1 %v1548_v14 }
 0x1a8   : > { %1713 = vmatprep.subr.bf16.mxu1 %v3543_v13 }
 0x1ab   : > { %1714 = vmatpush1.bf16.msra.mxu1 %v3541_v15 }
 0x1ac   : > { %1715 = vmatprep.subr.bf16.mxu1 %v3546_v16 }
 0x1af   : > { %1716 = vmatpush1.bf16.msra.mxu1 %v3544_v18 }
 0x1b0   : > { %1717 = vmatprep.subr.bf16.mxu1 %v3549_v19 }
 0x1b3   : > { %1718 = vmatpush1.bf16.msra.mxu1 %v3547_v20  ;;  %v4519_v20 = vld [vmem:[#allocation2] sm:$0x88] }
 0x1b4   : > { %1719 = vmatprep.subr.bf16.mxu1 %v3552_v21 }
 0x1b7   : > { %1720 = vmatpush1.bf16.msra.mxu1 %v3550_v22 }
 0x1b8   : > { %1721 = vmatprep.subr.bf16.mxu1 %v3555_v23  ;;  %v3634_v23 = vld [vmem:[%s4743_s1 + $0x600] ss:$8 sps:$4 sm:$0xff]  }
 0x1bb   : > { %1722 = vmatpush1.bf16.msra.mxu1 %v3553_v24 }
 0x1bc   : > { %1723 = vmatprep.subr.bf16.mxu1 %v3558_v25 }
 0x1bf   : > { %1724 = vmatpush1.bf16.msra.mxu1 %v3556_v26  ;;  %v3639_v26 = vld [vmem:[%s4743_s1 + $0x614] ss:$8 sps:$4 sm:$0xff]  }
 0x1c0   : > { %1725 = vmatprep.subr.bf16.mxu1 %v3561_v27 }
 0x1c3   : > { %1726 = vmatpush1.bf16.msra.mxu1 %v3559_v28 }
 0x1c4   : > { %1727 = vmatprep.subr.bf16.mxu1 %v3564_v29  ;;  %v3637_v29 = vld [vmem:[%s4743_s1 + $0x610] ss:$8 sps:$4 sm:$0xff]  }
 0x1c7   : > { %1728 = vmatpush1.bf16.msra.mxu1 %v3562_v30 }
 0x1c8   : > { %1729 = vmatprep.subr.bf16.mxu1 %v3567_v31 }
 0x1cb   : > { %1730 = vmatpush1.bf16.msra.mxu1 %v3565_v32  ;;  %v3642_v32 = vld [vmem:[%s4743_s1 + $0x624] ss:$8 sps:$4 sm:$0xff]  }
 0x1cc   : > { %1731 = vmatprep.subr.bf16.mxu1 %v3570_v33 }
 0x1cf   : > { %1732 = vmatpush1.bf16.msra.mxu1 %v3568_v34  ;;  %v3640_v34 = vld [vmem:[%s4743_s1 + $0x620] ss:$8 sps:$4 sm:$0xff]  }
 0x1d0   : > { %1733 = vmatprep.subr.bf16.mxu1 %v3573_v35  ;;  %v3645_v35 = vld [vmem:[%s4743_s1 + $0x634] ss:$8 sps:$4 sm:$0xff]  }
 0x1d3   : > { %1734 = vmatpush1.bf16.msra.mxu1 %v3571_v37  ;;  %v3643_v37 = vld [vmem:[%s4743_s1 + $0x630] ss:$8 sps:$4 sm:$0xff]  }
 0x1d4   : > { %1735 = vmatprep.subr.bf16.mxu1 %v3576_v41  ;;  %v3648_v41 = vld [vmem:[%s4743_s1 + $0x644] ss:$8 sps:$4 sm:$0xff]  }
 0x1d7   : > { %1736 = vmatpush1.bf16.msra.mxu1 %v3574_v42  ;;  %v3646_v42 = vld [vmem:[%s4743_s1 + $0x640] ss:$8 sps:$4 sm:$0xff]  }
 0x1d8   : > { %1737 = vmatprep.subr.bf16.mxu1 %v3579_v43  ;;  %v3651_v43 = vld [vmem:[%s4743_s1 + $0x654] ss:$8 sps:$4 sm:$0xff]  }
 0x1db   : > { %1738 = vmatpush1.bf16.msra.mxu1 %v3577_v44  ;;  %v3649_v44 = vld [vmem:[%s4743_s1 + $0x650] ss:$8 sps:$4 sm:$0xff]  }
 0x1dc   : > { %1739 = vmatprep.subr.bf16.mxu1 %v3582_v46  ;;  %v3652_v46 = vld [vmem:[%s4743_s1 + $0x660] ss:$8 sps:$4 sm:$0xff]  }
 0x1df   : > { %1740 = vmatpush1.bf16.msra.mxu1 %v3580_v47  ;;  %v3657_v47 = vld [vmem:[%s4743_s1 + $0x674] ss:$8 sps:$4 sm:$0xff]  }
 0x1e0   : > { %1741 = vmatprep.subr.bf16.mxu1 %v3585_v48  ;;  %v3655_v48 = vld [vmem:[%s4743_s1 + $0x670] ss:$8 sps:$4 sm:$0xff]  }
 0x1e3   : > { %1742 = vmatpush1.bf16.msra.mxu1 %v3583_v62  ;;  %v3658_v62 = vld [vmem:[%s4743_s1 + $0x680] ss:$8 sps:$4 sm:$0xff]  }
 0x1e6   : > { %1744 = vmatmul.mubr.bf16.vlgmr.msra.gmra.mrb[4].mxu1 %v1541_v52  ;;  %v3666_v52 = vld [vmem:[%s4743_s1 + $0x6a4] ss:$8 sps:$4 sm:$0xff]  }
 0x2b9   : > { %v1745_v9 = vpop.f32.mrb[4].mxu1 }
 0x2ba   : > { %v1775_v10 = vmul.f32 %v1770_v6, %v1745_v9  ;;  %v1747_v11 = vpop.f32.mrb[5].mxu1  ;;  %v3679_v6 = vld [vmem:[%s4743_s1 + $0x6f0] ss:$8 sps:$4 sm:$0xff]   ;;  %v3684_v9 = vld [vmem:[%s4743_s1 + $0x804] ss:$8 sps:$4 sm:$0xff]  }
 0x2bb   : > { %v1776_v12 = vmul.f32 %v1774_v7, %v1747_v11  ;;  %v1749_v13 = vpop.f32.mrb[6].mxu1 }
 0x2bc   : > { %v1795_v14 = vadd.f32 %v1790_v8, %v1775_v10  ;;  %v1750_v15 = vpop.f32.mrb[7].mxu1  ;;  %v3682_v10 = vld [vmem:[%s4743_s1 + $0x800] ss:$8 sps:$4 sm:$0xff]   ;;  %v3687_v13 = vld [vmem:[%s4743_s1 + $0x814] ss:$8 sps:$4 sm:$0xff]  }
 0x2bd   : > { %v1796_v16 = vadd.f32 %v1794_v17, %v1776_v12  ;;  %v3685_v15 = vld [vmem:[%s4743_s1 + $0x810] ss:$8 sps:$4 sm:$0xff]  }
 0x2be   : > { %v1797_v18 = vmax.f32 %v1795_v14, 0.0 }
 0x2bf   : > { %v1798_v19 = vmax.f32 %v1796_v16, 0.0  ;;  %v3690_v16 = vld [vmem:[%s4743_s1 + $0x824] ss:$8 sps:$4 sm:$0xff]  }
 0x2c0   : > { %v3733_v24 = vpack.c.bf16 %v1797_v18, %v1797_v18 }
 0x2c1   : > { %v4521_v21 = vpack.c.bf16 %v1798_v19, %v1797_v18  ;;  %v3732_v22 = vpack.c.bf16 %v1798_v19, %v1798_v19  ;;  %v3688_v18 = vld [vmem:[%s4743_s1 + $0x820] ss:$8 sps:$4 sm:$0xff]   ;;  %v3693_v19 = vld [vmem:[%s4743_s1 + $0x834] ss:$8 sps:$4 sm:$0xff]  }
 0x2c3   : > { %v3157_v25 = vcombine.high %v4519_v20, %v4521_v21  ;;  %2075 = vmatprep.mubr.bf16.mxu0 %v3732_v22  ;;  %v3156_v63 = vcombine.low %v4519_v20, %v4521_v21  ;;  %v3223_v1 = vcombine.high %v4521_v21, %v4603_v59  ;;  %v3691_v20 = vld [vmem:[%s4743_s1 + $0x830] ss:$8 sps:$4 sm:$0xff]   ;;  %v3696_v22 = vld [vmem:[%s4743_s1 + $0x844] ss:$8 sps:$4 sm:$0xff]  }
 0x2c4   : > { %2076 = vmatmul.mubr.bf16.vlgmr.msra.gmra.mrb[4].mxu0 %v3733_v24  ;;  %v3699_v24 = vld [vmem:[%s4743_s1 + $0x854] ss:$8 sps:$4 sm:$0xff]  }
 0x2c5   : > { %v2098_v27 = vshrl.u32 %v3157_v25, 16  ;;  %v2101_v28 = vshll.u32 %v3157_v25, 16  ;;  %2268 = vmatpush1.bf16.msra.mxu0 %v3634_v23  ;;  %v2090_v4 = vshrl.u32 %v3156_v63, 16  ;;  %v2093_v61 = vshll.u32 %v3156_v63, 16  ;;  %v3694_v23 = vld [vmem:[%s4743_s1 + $0x840] ss:$8 sps:$4 sm:$0xff]  }
 0x2c6   : > { %2269 = vmatprep.subr.bf16.mxu0 %v3639_v26  ;;  %v2361_v5 = vshll.u32 %v3223_v1, 16  ;;  %v2359_v11 = vshrl.u32 %v3223_v1, 16  ;;  %v3697_v25 = vld [vmem:[%s4743_s1 + $0x850] ss:$8 sps:$4 sm:$0xff]   ;;  %v3702_v26 = vld [vmem:[%s4743_s1 + $0x864] ss:$8 sps:$4 sm:$0xff]  }
 0x2c7   : > { %v2100_v30 = vrot.slane %v2098_v27, 3  ;;  %v2103_v31 = vrot.slane %v2101_v28, 4  ;;  %v2092_v7 = vrot.slane %v2090_v4, 3  ;;  %v2095_v8 = vrot.slane %v2093_v61, 4  ;;  %v3700_v27 = vld [vmem:[%s4743_s1 + $0x860] ss:$8 sps:$4 sm:$0xff]  }
 0x2c8   : > { %v2363_v17 = vrot.slane %v2361_v5, 1  ;;  %v3705_v28 = vld [vmem:[%s4743_s1 + $0x874] ss:$8 sps:$4 sm:$0xff]  }
 0x2c9   : > { %v2104_v33 = vor.u32 %v2103_v31, %v2100_v30  ;;  %2270 = vmatpush1.bf16.msra.mxu0 %v3637_v29  ;;  %v2096_v12 = vor.u32 %v2095_v8, %v2092_v7  ;;  %v3703_v29 = vld [vmem:[%s4743_s1 + $0x870] ss:$8 sps:$4 sm:$0xff]   ;;  %v3708_v30 = vld [vmem:[%s4743_s1 + $0x884] ss:$8 sps:$4 sm:$0xff]   ;;  %v3706_v31 = vld [vmem:[%s4743_s1 + $0x880] ss:$8 sps:$4 sm:$0xff]  }
 0x2ca   : > { %2271 = vmatprep.subr.bf16.mxu0 %v3642_v32  ;;  %v2364_v14 = vor.u32 %v2363_v17, %v2359_v11  ;;  %v3711_v32 = vld [vmem:[%s4743_s1 + $0x894] ss:$8 sps:$4 sm:$0xff]  }
 0x2cb   : > { %2299 = vmatprep.mubr.bf16.mxu0 %v2104_v33  ;;  %v3709_v33 = vld [vmem:[%s4743_s1 + $0x890] ss:$8 sps:$4 sm:$0xff]  }
 0x2cd   : > { %2272 = vmatpush1.bf16.msra.mxu0 %v3640_v34  ;;  %v3714_v34 = vld [vmem:[%s4743_s1 + $0x8a4] ss:$8 sps:$4 sm:$0xff]  }
 0x2ce   : > { %2273 = vmatprep.subr.bf16.mxu0 %v3645_v35  ;;  %v3712_v35 = vld [vmem:[%s4743_s1 + $0x8a0] ss:$8 sps:$4 sm:$0xff]  }
 0x2d1   : > { %2274 = vmatpush1.bf16.msra.mxu0 %v3643_v37  ;;  %v3717_v37 = vld [vmem:[%s4743_s1 + $0x8b4] ss:$8 sps:$4 sm:$0xff]  }
 0x2d2   : > { %2275 = vmatprep.subr.bf16.mxu0 %v3648_v41  ;;  %v3715_v41 = vld [vmem:[%s4743_s1 + $0x8b0] ss:$8 sps:$4 sm:$0xff]  }
 0x2d5   : > { %2276 = vmatpush1.bf16.msra.mxu0 %v3646_v42  ;;  %v3720_v42 = vld [vmem:[%s4743_s1 + $0x8c4] ss:$8 sps:$4 sm:$0xff]  }
 0x2d6   : > { %2277 = vmatprep.subr.bf16.mxu0 %v3651_v43  ;;  %v3718_v43 = vld [vmem:[%s4743_s1 + $0x8c0] ss:$8 sps:$4 sm:$0xff]  }
 0x2d9   : > { %2278 = vmatpush1.bf16.msra.mxu0 %v3649_v44  ;;  %v3723_v44 = vld [vmem:[%s4743_s1 + $0x8d4] ss:$8 sps:$4 sm:$0xff]  }
 0x2da   : > { %2279 = vmatprep.subr.bf16.mxu0 %v3654_v45  ;;  %v3721_v45 = vld [vmem:[%s4743_s1 + $0x8d0] ss:$8 sps:$4 sm:$0xff]  }
 0x2dd   : > { %2280 = vmatpush1.bf16.msra.mxu0 %v3652_v46  ;;  %v3222_v46 = vcombine.low %v4521_v21, %v4603_v59  ;;  %v3727_v21 = vld [vmem:[%s4743_s1 + $0x8f0] ss:$8 sps:$4 sm:$0xff]   ;;  %v2613_v59 = vld [vmem:[%s3815_s16] sm:$0xff] }
 0x2de   : > { %2281 = vmatprep.subr.bf16.mxu0 %v3657_v47  ;;  %v3726_v47 = vld [vmem:[%s4743_s1 + $0x8e4] ss:$8 sps:$4 sm:$0xff]  }
 0x2e1   : > { %2282 = vmatpush1.bf16.msra.mxu0 %v3655_v48  ;;  %v3724_v48 = vld [vmem:[%s4743_s1 + $0x8e0] ss:$8 sps:$4 sm:$0xff]  }
 0x2e2   : > { %2283 = vmatprep.subr.bf16.mxu0 %v3660_v49  ;;  %v3729_v49 = vld [vmem:[%s4743_s1 + $0x8f4] ss:$8 sps:$4 sm:$0xff]  }
 0x2e5   : > { %2284 = vmatpush1.bf16.msra.mxu0 %v3658_v62  ;;  %v2354_v62 = vshll.u32 %v3222_v46, 16 }
 0x2e6   : > { %2285 = vmatprep.subr.bf16.mxu0 %v3663_v50 }
 0x2e7   : > { %v2356_v50 = vrot.slane %v2354_v62, 1 }
 0x2e9   : > { %2286 = vmatpush1.bf16.msra.mxu0 %v3661_v51  ;;  %v2352_v51 = vshrl.u32 %v3222_v46, 16 }
 0x2ea   : > { %2287 = vmatprep.subr.bf16.mxu0 %v3666_v52 }
 0x2eb   : > { %v2357_v52 = vor.u32 %v2356_v50, %v2352_v51 }
 0x2ed   : > { %2288 = vmatpush1.bf16.msra.mxu0 %v3664_v53  ;;  %v3256_v53 = vld [vmem:[%s4744_s2 + $0x8] sm:$0xf] }
 0x2ee   : > { %2289 = vmatprep.subr.bf16.mxu0 %v3669_v54  ;;  %v2576_v54 = vrot.slane %v3256_v53, %v4187_v36 }
 0x2f1   : > { %2290 = vmatpush1.bf16.msra.mxu0 %v3667_v55  ;;  %v2580_v55 = vrot.slane %v3256_v53, %v4192_v38  ;;  %v2615_v38 = vunpack.c.h.bf16 %v2613_v59 }
 0x2f2   : > { %2291 = vmatprep.subr.bf16.mxu0 %v3672_v56  ;;  %v2596_v56 = vrot.slane %v3256_v53, %v4194_v39 }
 0x2f4   : > { %v2606_v63 = vrot.slane %v2596_v56, %v4194_v39 }
 0x2f5   : > { %2292 = vmatpush1.bf16.msra.mxu0 %v3670_v57  ;;  %v2600_v57 = vrot.slane %v3256_v53, %v4196_v40 }
 0x2f6   : > { %2293 = vmatprep.subr.bf16.mxu0 %v3675_v58  ;;  %v2586_v58 = vrot.slane %v2576_v54, %v4187_v36 }
 0x2f7   : > { %v2610_v1 = vrot.slane %v2600_v57, %v4194_v39 }
 0x2f9   : > { %2294 = vmatpush1.bf16.msra.mxu0 %v3673_v60  ;;  %v2590_v60 = vrot.slane %v2580_v55, %v4187_v36 }
 0x2fa   : > { %2295 = vmatprep.subr.bf16.mxu0 %v3678_v0 }
 0x2fd   : > { %2296 = vmatpush1.bf16.msra.mxu0 %v3676_v2 }
 0x2fe   : > { %2297 = vmatprep.subr.bf16.mxu0 %v3681_v3  ;;  %v2614_v3 = vunpack.c.l.bf16 %v2613_v59 }
 0x301   : > { %2298 = vmatpush1.bf16.msra.mxu0 %v3679_v6 }
 0x302   : > { %2527 = vmatprep.subr.bf16.mxu0 %v3684_v9 }
 0x304   : > { %2300 = vmatmul.mubr.bf16.vlgmr.msra.gmra.mrb[4].mxu0 %v2096_v12 }
 0x305   : > { %2528 = vmatpush1.bf16.msra.mxu0 %v3682_v10  ;;  %2559 = vmatprep.mubr.bf16.mxu0 %v2364_v14 }
 0x306   : > { %2529 = vmatprep.subr.bf16.mxu0 %v3687_v13 }
 0x309   : > { %2530 = vmatpush1.bf16.msra.mxu0 %v3685_v15 }
 0x30a   : > { %2531 = vmatprep.subr.bf16.mxu0 %v3690_v16 }
 0x30d   : > { %2532 = vmatpush1.bf16.msra.mxu0 %v3688_v18 }
 0x30e   : > { %2533 = vmatprep.subr.bf16.mxu0 %v3693_v19 }
 0x311   : > { %2534 = vmatpush1.bf16.msra.mxu0 %v3691_v20 }
 0x312   : > { %2535 = vmatprep.subr.bf16.mxu0 %v3696_v22 }
 0x315   : > { %2536 = vmatpush1.bf16.msra.mxu0 %v3694_v23 }
 0x316   : > { %2537 = vmatprep.subr.bf16.mxu0 %v3699_v24 }
 0x319   : > { %2538 = vmatpush1.bf16.msra.mxu0 %v3697_v25 }
 0x31a   : > { %2539 = vmatprep.subr.bf16.mxu0 %v3702_v26 }
 0x31d   : > { %2540 = vmatpush1.bf16.msra.mxu0 %v3700_v27 }
 0x31e   : > { %2541 = vmatprep.subr.bf16.mxu0 %v3705_v28 }
 0x321   : > { %2542 = vmatpush1.bf16.msra.mxu0 %v3703_v29 }
 0x322   : > { %2543 = vmatprep.subr.bf16.mxu0 %v3708_v30 }
 0x325   : > { %2544 = vmatpush1.bf16.msra.mxu0 %v3706_v31 }
 0x326   : > { %2545 = vmatprep.subr.bf16.mxu0 %v3711_v32 }
 0x329   : > { %2546 = vmatpush1.bf16.msra.mxu0 %v3709_v33 }
 0x32a   : > { %2547 = vmatprep.subr.bf16.mxu0 %v3714_v34 }
 0x32d   : > { %2548 = vmatpush1.bf16.msra.mxu0 %v3712_v35 }
 0x32e   : > { %2549 = vmatprep.subr.bf16.mxu0 %v3717_v37 }
 0x331   : > { %2550 = vmatpush1.bf16.msra.mxu0 %v3715_v41 }
 0x332   : > { %2551 = vmatprep.subr.bf16.mxu0 %v3720_v42 }
 0x335   : > { %2552 = vmatpush1.bf16.msra.mxu0 %v3718_v43 }
 0x336   : > { %2553 = vmatprep.subr.bf16.mxu0 %v3723_v44 }
 0x339   : > { %2554 = vmatpush1.bf16.msra.mxu0 %v3721_v45 }
 0x33a   : > { %2555 = vmatprep.subr.bf16.mxu0 %v3726_v47 }
 0x33d   : > { %2556 = vmatpush1.bf16.msra.mxu0 %v3724_v48 }
 0x33e   : > { %2557 = vmatprep.subr.bf16.mxu0 %v3729_v49 }
 0x341   : > { %2558 = vmatpush1.bf16.msra.mxu0 %v3727_v21 }
 0x344   : > { %2560 = vmatmul.mubr.bf16.vlgmr.msra.gmra.mrb[4].mxu0 %v2357_v52 }
 0x417   : > { %v2561_v0 = vpop.f32.mrb[4].mxu0 }
 0x418   : > { %v2591_v2 = vmul.f32 %v2586_v58, %v2561_v0  ;;  %v2563_v4 = vpop.f32.mrb[5].mxu0 }
 0x419   : > { %v2592_v61 = vmul.f32 %v2590_v60, %v2563_v4  ;;  %v2565_v5 = vpop.f32.mrb[6].mxu0 }
 0x41a   : > { %v2611_v6 = vadd.f32 %v2606_v63, %v2591_v2  ;;  %v2566_v7 = vpop.f32.mrb[7].mxu0 }
 0x41b   : > { %v2612_v40 = vadd.f32 %v2610_v1, %v2592_v61 }
 0x41c   : > { %v2616_v8 = vadd.f32 %v2614_v3, %v2611_v6 }
 0x41d   : > { %v2617_v9 = vadd.f32 %v2615_v38, %v2612_v40 }
 0x41f   : > { %v3264_v36 = vpack.c.bf16 %v2617_v9, %v2616_v8 }
 0x421   : > { %2626 = vst [vmem:[%s170_s24] sm:$0xff] %v3264_v36 }
 0x422 PF: > { %s13_s12 = sadd.s32 1, %s3740_s12  }
 0x423   : > { %p10_p4 = scmp.ge.s32.totalorder %s13_s12, 4  }
 0x425   :  { %12 = sbr.rel (!%p10_p4) target bundleno = 1 (0x1), region = 72 }

// kernel: encoder_forward.17
= control target key start
LH: loop header
LB: loop body
LE: loop exit
PB: predicated region body
PF: predicated region fallthrough
CT: control target
= control target key end

     0   :  { %s1759_s12 = smov 0   ;;  %s2178_s0 = inlined_call_operand.vmem [shape: bf16[2,4,512], index: 0, kind: input, shape index: {}]   ;;  %s2179_s1 = inlined_call_operand.vmem [shape: bf16[2,512,256], index: 1, kind: input, shape index: {}]   ;;  %s2180_s2 = inlined_call_operand.vmem [shape: f32[2,256], index: 2, kind: input, shape index: {}]   ;;  %s2181_s3 = inlined_call_operand.vmem [shape: bf16[2,4,256], index: 3, kind: output, shape index: {}]  }
   0x1 LB: > { %s1307_s13 = sadd.s32 4294967295, %s1735_s12   ;;  %p1311_p0 = scmp.ge.s32.totalorder %s1735_s12, 1  ;;  %s1735_s12 = sphi %s1759_s12, %s13_s12  }
   0x2   : > { %p137_p1 = scmp.lt.s32.totalorder %s1735_s12, 3 }
   0x4   : > { %p138_p2 = pnand %p1311_p0, %p137_p1 }
   0x5   : > { %v1536_v0 = vld [vmem:[%s2179_s1 + $0x204] ss:$8 sps:$4 sm:$0xff] (!%p138_p2)   ;;  %v1737_v2 = vmov (!%p138_p2), 0   ;;  %v1540_v3 = vld [vmem:[%s2179_s1 + $0x200] ss:$8 sps:$4 sm:$0xff] (!%p138_p2)   ;;  %p161_p3 = scmp.lt.s32.totalorder (!%p138_p2), %s1307_s13, 1  ;;  %v186_v39 = vlaneseq (!%p138_p2) }
   0x6   : > { %141 = sbr.rel (%p138_p2) target bundleno = 357 (0x165), region = 32  ;;  %v1538_v1 = vld [vmem:[%s2179_s1 + $0x4] ss:$8 sps:$4 sm:$0xff] (!%p138_p2)   ;;  %177 = vst [vmem:[#allocation2 + $0x8] sm:$0xc0] (!%p138_p2), %v1737_v2  ;;  %676 = vmatprep.subr.bf16.mxu1 (!%p138_p2), %v1536_v0 }
   0x7   : > { %172 = vst [vmem:[#allocation2] sm:$0xf] (!%p138_p2), %v1737_v2  ;;  %173 = vst [vmem:[#allocation2 + $0x8] sm:$0xf] (!%p138_p2), %v1737_v2  ;;  %v1541_v4 = vld [vmem:[%s2179_s1] ss:$8 sps:$4 sm:$0xff] (!%p138_p2)   ;;  %1114 = vmatprep.subr.bf16.mxu0 (!%p138_p2), %v1538_v1  ;;  %677 = vmatpush1.bf16.msra.mxu1 (!%p138_p2), %v1540_v3 }
   0x8   : > { %174 = vst [vmem:[#allocation2 + $0x10] sm:$0xf] (!%p138_p2), %v1737_v2  ;;  %175 = vst [vmem:[#allocation2 + $0x18] sm:$0xf] (!%p138_p2), %v1737_v2  ;;  %v1542_v5 = vld [vmem:[%s2179_s1 + $0x214] ss:$8 sps:$4 sm:$0xff] (!%p138_p2)   ;;  %1115 = vmatpush1.bf16.msra.mxu0 (!%p138_p2), %v1541_v4 }
   0x9   : > { %176 = vst [vmem:[#allocation2] sm:$0xc0] (!%p138_p2), %v1737_v2  ;;  %178 = vst [vmem:[#allocation2 + $0x10] sm:$0xc0] (!%p138_p2), %v1737_v2  ;;  %v1544_v6 = vld [vmem:[%s2179_s1 + $0x14] ss:$8 sps:$4 sm:$0xff] (!%p138_p2)   ;;  %678 = vmatprep.subr.bf16.mxu1 (!%p138_p2), %v1542_v5 }
   0xa   : > { %179 = vst [vmem:[#allocation2 + $0x18] sm:$0xc0] (!%p138_p2), %v1737_v2  ;;  %v1546_v7 = vld [vmem:[%s2179_s1 + $0x210] ss:$8 sps:$4 sm:$0xff] (!%p138_p2)   ;;  %1116 = vmatprep.subr.bf16.mxu0 (!%p138_p2), %v1544_v6  ;;  %v1548_v9 = vld [vmem:[%s2179_s1 + $0x224] ss:$8 sps:$4 sm:$0xff] (!%p138_p2)  }
   0xb   : > { %v1547_v8 = vld [vmem:[%s2179_s1 + $0x10] ss:$8 sps:$4 sm:$0xff] (!%p138_p2)   ;;  %v1550_v10 = vld [vmem:[%s2179_s1 + $0x24] ss:$8 sps:$4 sm:$0xff] (!%p138_p2)   ;;  %v1552_v11 = vld [vmem:[%s2179_s1 + $0x220] ss:$8 sps:$4 sm:$0xff] (!%p138_p2)   ;;  %679 = vmatpush1.bf16.msra.mxu1 (!%p138_p2), %v1546_v7 }
   0xc   : > { %v1553_v12 = vld [vmem:[%s2179_s1 + $0x20] ss:$8 sps:$4 sm:$0xff] (!%p138_p2)   ;;  %1117 = vmatpush1.bf16.msra.mxu0 (!%p138_p2), %v1547_v8  ;;  %v1554_v13 = vld [vmem:[%s2179_s1 + $0x234] ss:$8 sps:$4 sm:$0xff] (!%p138_p2)   ;;  %680 = vmatprep.subr.bf16.mxu1 (!%p138_p2), %v1548_v9  ;;  %v1558_v15 = vld [vmem:[%s2179_s1 + $0x230] ss:$8 sps:$4 sm:$0xff] (!%p138_p2)  }
   0xd   : > { %1118 = vmatprep.subr.bf16.mxu0 %v1550_v10  ;;  %v1556_v14 = vld [vmem:[%s2179_s1 + $0x34] ss:$8 sps:$4 sm:$0xff]   ;;  %v1559_v16 = vld [vmem:[%s2179_s1 + $0x30] ss:$8 sps:$4 sm:$0xff]   ;;  %v1560_v17 = vld [vmem:[%s2179_s1 + $0x244] ss:$8 sps:$4 sm:$0xff]  }
   0xe   : > { %v1562_v18 = vld [vmem:[%s2179_s1 + $0x44] ss:$8 sps:$4 sm:$0xff]   ;;  %v1564_v19 = vld [vmem:[%s2179_s1 + $0x240] ss:$8 sps:$4 sm:$0xff]   ;;  %v1566_v21 = vld [vmem:[%s2179_s1 + $0x254] ss:$8 sps:$4 sm:$0xff]  }
   0xf   : > { %681 = vmatpush1.bf16.msra.mxu1 %v1552_v11  ;;  %v1565_v20 = vld [vmem:[%s2179_s1 + $0x40] ss:$8 sps:$4 sm:$0xff]   ;;  %v1568_v22 = vld [vmem:[%s2179_s1 + $0x54] ss:$8 sps:$4 sm:$0xff]   ;;  %v1570_v23 = vld [vmem:[%s2179_s1 + $0x250] ss:$8 sps:$4 sm:$0xff]  }
  0x10   : > { %1119 = vmatpush1.bf16.msra.mxu0 %v1553_v12  ;;  %682 = vmatprep.subr.bf16.mxu1 %v1554_v13  ;;  %v1571_v24 = vld [vmem:[%s2179_s1 + $0x50] ss:$8 sps:$4 sm:$0xff]   ;;  %v1572_v25 = vld [vmem:[%s2179_s1 + $0x264] ss:$8 sps:$4 sm:$0xff]   ;;  %v1576_v27 = vld [vmem:[%s2179_s1 + $0x260] ss:$8 sps:$4 sm:$0xff]  }
  0x11   : > { %1120 = vmatprep.subr.bf16.mxu0 %v1556_v14  ;;  %v1574_v26 = vld [vmem:[%s2179_s1 + $0x64] ss:$8 sps:$4 sm:$0xff]   ;;  %v1577_v28 = vld [vmem:[%s2179_s1 + $0x60] ss:$8 sps:$4 sm:$0xff]   ;;  %v1578_v29 = vld [vmem:[%s2179_s1 + $0x274] ss:$8 sps:$4 sm:$0xff]  }
  0x12   : > { %v1580_v30 = vld [vmem:[%s2179_s1 + $0x74] ss:$8 sps:$4 sm:$0xff]   ;;  %v1582_v31 = vld [vmem:[%s2179_s1 + $0x270] ss:$8 sps:$4 sm:$0xff]   ;;  %v1584_v33 = vld [vmem:[%s2179_s1 + $0x284] ss:$8 sps:$4 sm:$0xff]  }
  0x13   : > { %683 = vmatpush1.bf16.msra.mxu1 %v1558_v15  ;;  %v1583_v32 = vld [vmem:[%s2179_s1 + $0x70] ss:$8 sps:$4 sm:$0xff]   ;;  %v1586_v34 = vld [vmem:[%s2179_s1 + $0x84] ss:$8 sps:$4 sm:$0xff]   ;;  %v1588_v35 = vld [vmem:[%s2179_s1 + $0x280] ss:$8 sps:$4 sm:$0xff]  }
  0x14   : > { %1121 = vmatpush1.bf16.msra.mxu0 %v1559_v16  ;;  %684 = vmatprep.subr.bf16.mxu1 %v1560_v17  ;;  %v1589_v36 = vld [vmem:[%s2179_s1 + $0x80] ss:$8 sps:$4 sm:$0xff]   ;;  %v1738_v37 = vmov 1983009808   ;;  %v1590_v40 = vld [vmem:[%s2179_s1 + $0x294] ss:$8 sps:$4 sm:$0xff]  }
  0x15   : > { %1122 = vmatprep.subr.bf16.mxu0 %v1562_v18  ;;  %v184_v38 = vunpack.c.l.s4 %v1738_v37  ;;  %s2183_s13 = smov (!%p161_p3, %s1307_s13), 1  ;;  %v1592_v41 = vld [vmem:[%s2179_s1 + $0x94] ss:$8 sps:$4 sm:$0xff]   ;;  %v1594_v42 = vld [vmem:[%s2179_s1 + $0x290] ss:$8 sps:$4 sm:$0xff]   ;;  %v1890_v44 = vshrl.u32 %v186_v39, 7 }
  0x16   : > { %v1595_v45 = vld [vmem:[%s2179_s1 + $0x90] ss:$8 sps:$4 sm:$0xff]   ;;  %v1596_v46 = vld [vmem:[%s2179_s1 + $0x2a4] ss:$8 sps:$4 sm:$0xff]   ;;  %s1514_s21 = sshll.u32 %s2183_s13, 3  ;;  %s1515_s26 = sshll.u32 %s2183_s13, 2 }
  0x17   : > { %685 = vmatpush1.bf16.msra.mxu1 %v1564_v19  ;;  %v185_v43 = vunpack.c.0.s8 %v184_v38  ;;  %v1598_v47 = vld [vmem:[%s2179_s1 + $0xa4] ss:$8 sps:$4 sm:$0xff]   ;;  %v1600_v48 = vld [vmem:[%s2179_s1 + $0x2a0] ss:$8 sps:$4 sm:$0xff]   ;;  %s165_s30 = scalar_lea.vmem %s2178_s0, %s1514_s21  ;;  %v1602_v51 = vld [vmem:[%s2179_s1 + $0x2b4] ss:$8 sps:$4 sm:$0xff]   ;;  %s170_s29 = scalar_lea.vmem %s2181_s3, %s1515_s26 }
  0x18   : > { %1123 = vmatpush1.bf16.msra.mxu0 %v1565_v20  ;;  %686 = vmatprep.subr.bf16.mxu1 %v1566_v21  ;;  %v1601_v49 = vld [vmem:[%s2179_s1 + $0xa0] ss:$8 sps:$4 sm:$0xff]   ;;  %v1604_v52 = vld [vmem:[%s2179_s1 + $0xb4] ss:$8 sps:$4 sm:$0xff]   ;;  %v1606_v54 = vld [vmem:[%s2179_s1 + $0x2b0] ss:$8 sps:$4 sm:$0xff]  }
  0x19   : > { %1124 = vmatprep.subr.bf16.mxu0 %v1568_v22  ;;  %v188_v50 = vsub.s32 %v185_v43, %v1890_v44  ;;  %v180_v53 = vld [vmem:[%s165_s30] sm:$0xff]  ;;  %v1607_v57 = vld [vmem:[%s2179_s1 + $0xb0] ss:$8 sps:$4 sm:$0xff]   ;;  %v1614_v1 = vld [vmem:[%s2179_s1 + $0x2d4] ss:$8 sps:$4 sm:$0xff]  }
  0x1a   : > { %v182_v55 = vcombine.high %v180_v53, %v180_v53  ;;  %1316 = vst.sshfl [vmem:[#allocation2 + $0x8] sm:$0xc pattern:$0x76325410] %v180_v53  ;;  %v1608_v58 = vld [vmem:[%s2179_s1 + $0x2c4] ss:$8 sps:$4 sm:$0xff]  }
  0x1b   : > { %687 = vmatpush1.bf16.msra.mxu1 %v1570_v23  ;;  %v189_v56 = vrot.slane %v180_v53, %v188_v50  ;;  %v1610_v59 = vld [vmem:[%s2179_s1 + $0xc4] ss:$8 sps:$4 sm:$0xff]   ;;  %v1612_v62 = vld [vmem:[%s2179_s1 + $0x2c0] ss:$8 sps:$4 sm:$0xff]   ;;  %v1616_v2 = vld [vmem:[%s2179_s1 + $0xd4] ss:$8 sps:$4 sm:$0xff]  }
  0x1c   : > { %1125 = vmatpush1.bf16.msra.mxu0 %v1571_v24  ;;  %688 = vmatprep.subr.bf16.mxu1 %v1572_v25  ;;  %v196_v60 = vrot.slane %v182_v55, %v188_v50  ;;  %1317 = vst.sshfl [vmem:[#allocation2 + $0x18] sm:$0xc pattern:$0x76325410] %v182_v55  ;;  %v1613_v0 = vld [vmem:[%s2179_s1 + $0xc0] ss:$8 sps:$4 sm:$0xff]  }
  0x1d   : > { %1126 = vmatprep.subr.bf16.mxu0 %v1574_v26  ;;  %v197_v61 = vcombine.low %v189_v56, %v189_v56  ;;  %v1618_v5 = vld [vmem:[%s2179_s1 + $0x2d0] ss:$8 sps:$4 sm:$0xff]   ;;  %v1620_v10 = vld [vmem:[%s2179_s1 + $0x2e4] ss:$8 sps:$4 sm:$0xff]   ;;  %v1624_v15 = vld [vmem:[%s2179_s1 + $0x2e0] ss:$8 sps:$4 sm:$0xff]  }
  0x1e   : > { %v198_v63 = vcombine.low %v196_v60, %v196_v60  ;;  %v1619_v9 = vld [vmem:[%s2179_s1 + $0xd0] ss:$8 sps:$4 sm:$0xff]   ;;  %v1622_v11 = vld [vmem:[%s2179_s1 + $0xe4] ss:$8 sps:$4 sm:$0xff]   ;;  %v1625_v19 = vld [vmem:[%s2179_s1 + $0xe0] ss:$8 sps:$4 sm:$0xff]  }
  0x1f   : > { %689 = vmatpush1.bf16.msra.mxu1 %v1576_v27  ;;  %203 = vst [vmem:[#allocation2] sm:$0x30] %v197_v61  ;;  %v1626_v20 = vld [vmem:[%s2179_s1 + $0x2f4] ss:$8 sps:$4 sm:$0xff]   ;;  %v1630_v22 = vld [vmem:[%s2179_s1 + $0x2f0] ss:$8 sps:$4 sm:$0xff]  }
  0x20   : > { %1127 = vmatpush1.bf16.msra.mxu0 %v1577_v28  ;;  %690 = vmatprep.subr.bf16.mxu1 %v1578_v29  ;;  %205 = vst [vmem:[#allocation2 + $0x10] sm:$0x30] %v198_v63  ;;  %v1628_v21 = vld [vmem:[%s2179_s1 + $0xf4] ss:$8 sps:$4 sm:$0xff]   ;;  %v1631_v23 = vld [vmem:[%s2179_s1 + $0xf0] ss:$8 sps:$4 sm:$0xff]  }
  0x21   : > { %1128 = vmatprep.subr.bf16.mxu0 %v1580_v30  ;;  %v276_v3 = vld [vmem:[#allocation2 + $0x8] sm:$0xf0]  ;;  %v1633_v29 = vld [vmem:[%s2179_s1 + $0x300] ss:$8 sps:$4 sm:$0xff]   ;;  %v1651_v43 = vld [vmem:[%s2179_s1 + $0x330] ss:$8 sps:$4 sm:$0xff]  }
  0x22   : > { %v208_v4 = vld [vmem:[#allocation2 + $0x8] sm:$0xf8]  ;;  %v349_v6 = vrot.slane %v276_v3, 4  ;;  %v1665_v50 = vld [vmem:[%s2179_s1 + $0x354] ss:$8 sps:$4 sm:$0xff]  }
  0x23   : > { %691 = vmatpush1.bf16.msra.mxu1 %v1582_v31  ;;  %v767_v7 = vshrl.u32 %v208_v4, 16  ;;  %v770_v8 = vshll.u32 %v208_v4, 16  ;;  %v1635_v26 = vld [vmem:[%s2179_s1 + $0x304] ss:$8 sps:$4 sm:$0xff]   ;;  %v1645_v39 = vld [vmem:[%s2179_s1 + $0x320] ss:$8 sps:$4 sm:$0xff]  }
  0x24   : > { %1129 = vmatpush1.bf16.msra.mxu0 %v1583_v32  ;;  %692 = vmatprep.subr.bf16.mxu1 %v1584_v33  ;;  %v1638_v28 = vld [vmem:[%s2179_s1 + $0x104] ss:$8 sps:$4 sm:$0xff]   ;;  %v1636_v32 = vld [vmem:[%s2179_s1 + $0x100] ss:$8 sps:$4 sm:$0xff]   ;;  %v1641_v33 = vld [vmem:[%s2179_s1 + $0x314] ss:$8 sps:$4 sm:$0xff]  }
  0x25   : > { %1130 = vmatprep.subr.bf16.mxu0 %v1586_v34  ;;  %v769_v12 = vrot.slane %v767_v7, 3  ;;  %v772_v13 = vrot.slane %v770_v8, 4  ;;  %708 = vmatprep.mubr.bf16.mxu1 %v349_v6  ;;  %v1644_v34 = vld [vmem:[%s2179_s1 + $0x114] ss:$8 sps:$4 sm:$0xff]   ;;  %v1647_v37 = vld [vmem:[%s2179_s1 + $0x324] ss:$8 sps:$4 sm:$0xff]  }
  0x26   : > { %v207_v14 = vld [vmem:[#allocation2] sm:$0xf8]  ;;  %v1666_v53 = vld [vmem:[%s2179_s1 + $0x150] ss:$8 sps:$4 sm:$0xff]   ;;  %v1677_v61 = vld [vmem:[%s2179_s1 + $0x374] ss:$8 sps:$4 sm:$0xff]  }
  0x27   : > { %693 = vmatpush1.bf16.msra.mxu1 %v1588_v35  ;;  %v773_v16 = vor.u32 %v772_v13, %v769_v12  ;;  %v759_v17 = vshrl.u32 %v207_v14, 16  ;;  %v762_v18 = vshll.u32 %v207_v14, 16  ;;  %v275_v27 = vld [vmem:[#allocation2] sm:$0xf0]  ;;  %v1639_v35 = vld [vmem:[%s2179_s1 + $0x310] ss:$8 sps:$4 sm:$0xff]  }
  0x28   : > { %1131 = vmatpush1.bf16.msra.mxu0 %v1589_v36  ;;  %694 = vmatprep.subr.bf16.mxu1 %v1590_v40  ;;  %v348_v30 = vrot.slane %v275_v27, 4  ;;  %v1642_v36 = vld [vmem:[%s2179_s1 + $0x110] ss:$8 sps:$4 sm:$0xff]   ;;  %v1650_v38 = vld [vmem:[%s2179_s1 + $0x124] ss:$8 sps:$4 sm:$0xff]  }
  0x29   : > { %1132 = vmatprep.subr.bf16.mxu0 %v1592_v41  ;;  %1146 = vmatprep.mubr.bf16.mxu0 %v773_v16  ;;  %v761_v24 = vrot.slane %v759_v17, 3  ;;  %v764_v25 = vrot.slane %v762_v18, 4  ;;  %v1648_v40 = vld [vmem:[%s2179_s1 + $0x120] ss:$8 sps:$4 sm:$0xff]   ;;  %v1653_v41 = vld [vmem:[%s2179_s1 + $0x334] ss:$8 sps:$4 sm:$0xff]  }
  0x2a   : > { %v1674_v55 = vld [vmem:[%s2179_s1 + $0x164] ss:$8 sps:$4 sm:$0xff]   ;;  %v1669_v56 = vld [vmem:[%s2179_s1 + $0x360] ss:$8 sps:$4 sm:$0xff]   ;;  %v210_v60 = vld [vmem:[#allocation2 + $0x18] sm:$0xf8] }
  0x2b   : > { %695 = vmatpush1.bf16.msra.mxu1 %v1594_v42  ;;  %v765_v31 = vor.u32 %v764_v25, %v761_v24  ;;  %v1656_v42 = vld [vmem:[%s2179_s1 + $0x134] ss:$8 sps:$4 sm:$0xff]   ;;  %v783_v63 = vshrl.u32 %v210_v60, 16  ;;  %v1675_v3 = vld [vmem:[%s2179_s1 + $0x370] ss:$8 sps:$4 sm:$0xff]  }
  0x2c   : > { %1133 = vmatpush1.bf16.msra.mxu0 %v1595_v45  ;;  %696 = vmatprep.subr.bf16.mxu1 %v1596_v46  ;;  %v1654_v45 = vld [vmem:[%s2179_s1 + $0x130] ss:$8 sps:$4 sm:$0xff]   ;;  %v1659_v46 = vld [vmem:[%s2179_s1 + $0x344] ss:$8 sps:$4 sm:$0xff]   ;;  %v1681_v8 = vld [vmem:[%s2179_s1 + $0x380] ss:$8 sps:$4 sm:$0xff]  }
  0x2d   : > { %1134 = vmatprep.subr.bf16.mxu0 %v1598_v47  ;;  %v1662_v47 = vld [vmem:[%s2179_s1 + $0x144] ss:$8 sps:$4 sm:$0xff]   ;;  %v1678_v4 = vld [vmem:[%s2179_s1 + $0x170] ss:$8 sps:$4 sm:$0xff]   ;;  %v1693_v16 = vld [vmem:[%s2179_s1 + $0x3a0] ss:$8 sps:$4 sm:$0xff]  }
  0x2e   : > { %v1686_v6 = vld [vmem:[%s2179_s1 + $0x184] ss:$8 sps:$4 sm:$0xff]   ;;  %v1687_v12 = vld [vmem:[%s2179_s1 + $0x390] ss:$8 sps:$4 sm:$0xff]   ;;  %v1696_v17 = vld [vmem:[%s2179_s1 + $0x1a0] ss:$8 sps:$4 sm:$0xff]  }
  0x2f   : > { %697 = vmatpush1.bf16.msra.mxu1 %v1600_v48  ;;  %v1657_v48 = vld [vmem:[%s2179_s1 + $0x340] ss:$8 sps:$4 sm:$0xff]   ;;  %v1690_v13 = vld [vmem:[%s2179_s1 + $0x190] ss:$8 sps:$4 sm:$0xff]   ;;  %v1695_v14 = vld [vmem:[%s2179_s1 + $0x3a4] ss:$8 sps:$4 sm:$0xff]  }
  0x30   : > { %1135 = vmatpush1.bf16.msra.mxu0 %v1601_v49  ;;  %698 = vmatprep.subr.bf16.mxu1 %v1602_v51  ;;  %v1660_v49 = vld [vmem:[%s2179_s1 + $0x140] ss:$8 sps:$4 sm:$0xff]   ;;  %v1668_v51 = vld [vmem:[%s2179_s1 + $0x154] ss:$8 sps:$4 sm:$0xff]  }
  0x31   : > { %1136 = vmatprep.subr.bf16.mxu0 %v1604_v52  ;;  %v1663_v52 = vld [vmem:[%s2179_s1 + $0x350] ss:$8 sps:$4 sm:$0xff]   ;;  %v1701_v18 = vld [vmem:[%s2179_s1 + $0x3b4] ss:$8 sps:$4 sm:$0xff]   ;;  %v1705_v24 = vld [vmem:[%s2179_s1 + $0x3c0] ss:$8 sps:$4 sm:$0xff]  }
  0x32   : > { %v1708_v25 = vld [vmem:[%s2179_s1 + $0x1c0] ss:$8 sps:$4 sm:$0xff]   ;;  %v1716_v27 = vld [vmem:[%s2179_s1 + $0x1d4] ss:$8 sps:$4 sm:$0xff]  }
  0x33   : > { %699 = vmatpush1.bf16.msra.mxu1 %v1606_v54  ;;  %v1671_v54 = vld [vmem:[%s2179_s1 + $0x364] ss:$8 sps:$4 sm:$0xff]  }
  0x34   : > { %1137 = vmatpush1.bf16.msra.mxu0 %v1607_v57  ;;  %700 = vmatprep.subr.bf16.mxu1 %v1608_v58  ;;  %v278_v57 = vld [vmem:[#allocation2 + $0x18] sm:$0xf0]  ;;  %v1672_v58 = vld [vmem:[%s2179_s1 + $0x160] ss:$8 sps:$4 sm:$0xff]  }
  0x35   : > { %1138 = vmatprep.subr.bf16.mxu0 %v1610_v59  ;;  %v351_v59 = vrot.slane %v278_v57, 4 }
  0x37   : > { %701 = vmatpush1.bf16.msra.mxu1 %v1612_v62  ;;  %v1680_v62 = vld [vmem:[%s2179_s1 + $0x174] ss:$8 sps:$4 sm:$0xff]  }
  0x38   : > { %1139 = vmatpush1.bf16.msra.mxu0 %v1613_v0  ;;  %702 = vmatprep.subr.bf16.mxu1 %v1614_v1  ;;  %v786_v0 = vshll.u32 %v210_v60, 16  ;;  %v785_v1 = vrot.slane %v783_v63, 3 }
  0x39   : > { %1140 = vmatprep.subr.bf16.mxu0 %v1616_v2 }
  0x3a   : > { %v788_v2 = vrot.slane %v786_v0, 4 }
  0x3b   : > { %703 = vmatpush1.bf16.msra.mxu1 %v1618_v5  ;;  %v1683_v5 = vld [vmem:[%s2179_s1 + $0x384] ss:$8 sps:$4 sm:$0xff]  }
  0x3c   : > { %1141 = vmatpush1.bf16.msra.mxu0 %v1619_v9  ;;  %704 = vmatprep.subr.bf16.mxu1 %v1620_v10  ;;  %v789_v7 = vor.u32 %v788_v2, %v785_v1  ;;  %v1684_v9 = vld [vmem:[%s2179_s1 + $0x180] ss:$8 sps:$4 sm:$0xff]   ;;  %v1689_v10 = vld [vmem:[%s2179_s1 + $0x394] ss:$8 sps:$4 sm:$0xff]  }
  0x3d   : > { %1142 = vmatprep.subr.bf16.mxu0 %v1622_v11  ;;  %v1692_v11 = vld [vmem:[%s2179_s1 + $0x194] ss:$8 sps:$4 sm:$0xff]  }
  0x3f   : > { %705 = vmatpush1.bf16.msra.mxu1 %v1624_v15  ;;  %v1698_v15 = vld [vmem:[%s2179_s1 + $0x1a4] ss:$8 sps:$4 sm:$0xff]  }
  0x40   : > { %1143 = vmatpush1.bf16.msra.mxu0 %v1625_v19  ;;  %706 = vmatprep.subr.bf16.mxu1 %v1626_v20  ;;  %v1704_v19 = vld [vmem:[%s2179_s1 + $0x1b4] ss:$8 sps:$4 sm:$0xff]   ;;  %v1699_v20 = vld [vmem:[%s2179_s1 + $0x3b0] ss:$8 sps:$4 sm:$0xff]  }
  0x41   : > { %1144 = vmatprep.subr.bf16.mxu0 %v1628_v21  ;;  %v1702_v21 = vld [vmem:[%s2179_s1 + $0x1b0] ss:$8 sps:$4 sm:$0xff]  }
  0x43   : > { %707 = vmatpush1.bf16.msra.mxu1 %v1630_v22  ;;  %v1707_v22 = vld [vmem:[%s2179_s1 + $0x3c4] ss:$8 sps:$4 sm:$0xff]  }
  0x44   : > { %1145 = vmatpush1.bf16.msra.mxu0 %v1631_v23  ;;  %717 = vmatprep.subr.bf16.mxu1 %v1635_v26  ;;  %v1710_v23 = vld [vmem:[%s2179_s1 + $0x1c4] ss:$8 sps:$4 sm:$0xff]   ;;  %v1713_v26 = vld [vmem:[%s2179_s1 + $0x3d4] ss:$8 sps:$4 sm:$0xff]  }
  0x45   : > { %1155 = vmatprep.subr.bf16.mxu0 %v1638_v28  ;;  %v1711_v28 = vld [vmem:[%s2179_s1 + $0x3d0] ss:$8 sps:$4 sm:$0xff]  }
  0x46   : > { %709 = vmatmul.mubr.bf16.vlgmr.msra.gmra.mrb[0].mxu1 %v348_v30  ;;  %v209_v30 = vld [vmem:[#allocation2 + $0x10] sm:$0xf8] }
  0x47   : > { %1147 = vmatmul.mubr.bf16.vlgmr.msra.gmra.mrb[0].mxu0 %v765_v31  ;;  %718 = vmatpush1.bf16.msra.mxu1 %v1633_v29  ;;  %v1714_v29 = vld [vmem:[%s2179_s1 + $0x1d0] ss:$8 sps:$4 sm:$0xff]   ;;  %v1719_v31 = vld [vmem:[%s2179_s1 + $0x3e4] ss:$8 sps:$4 sm:$0xff]  }
  0x48   : > { %1156 = vmatpush1.bf16.msra.mxu0 %v1636_v32  ;;  %719 = vmatprep.subr.bf16.mxu1 %v1641_v33  ;;  %v1722_v32 = vld [vmem:[%s2179_s1 + $0x1e4] ss:$8 sps:$4 sm:$0xff]   ;;  %v775_v33 = vshrl.u32 %v209_v30, 16 }
  0x49   : > { %1157 = vmatprep.subr.bf16.mxu0 %v1644_v34  ;;  %749 = vmatprep.mubr.bf16.mxu1 %v351_v59  ;;  %v778_v34 = vshll.u32 %v209_v30, 16 }
  0x4a   : > { %1187 = vmatprep.mubr.bf16.mxu0 %v789_v7 }
  0x4b   : > { %720 = vmatpush1.bf16.msra.mxu1 %v1639_v35  ;;  %v1717_v35 = vld [vmem:[%s2179_s1 + $0x3e0] ss:$8 sps:$4 sm:$0xff]  }
  0x4c   : > { %1158 = vmatpush1.bf16.msra.mxu0 %v1642_v36  ;;  %721 = vmatprep.subr.bf16.mxu1 %v1647_v37  ;;  %v1720_v36 = vld [vmem:[%s2179_s1 + $0x1e0] ss:$8 sps:$4 sm:$0xff]   ;;  %v1725_v37 = vld [vmem:[%s2179_s1 + $0x3f4] ss:$8 sps:$4 sm:$0xff]  }
  0x4d   : > { %1159 = vmatprep.subr.bf16.mxu0 %v1650_v38  ;;  %v1728_v38 = vld [vmem:[%s2179_s1 + $0x1f4] ss:$8 sps:$4 sm:$0xff]  }
  0x4f   : > { %722 = vmatpush1.bf16.msra.mxu1 %v1645_v39  ;;  %v777_v39 = vrot.slane %v775_v33, 3 }
  0x50   : > { %1160 = vmatpush1.bf16.msra.mxu0 %v1648_v40  ;;  %723 = vmatprep.subr.bf16.mxu1 %v1653_v41  ;;  %v780_v40 = vrot.slane %v778_v34, 4  ;;  %v1723_v41 = vld [vmem:[%s2179_s1 + $0x3f0] ss:$8 sps:$4 sm:$0xff]  }
  0x51   : > { %1161 = vmatprep.subr.bf16.mxu0 %v1656_v42  ;;  %v1726_v42 = vld [vmem:[%s2179_s1 + $0x1f0] ss:$8 sps:$4 sm:$0xff]  }
  0x53   : > { %724 = vmatpush1.bf16.msra.mxu1 %v1651_v43  ;;  %v277_v43 = vld [vmem:[#allocation2 + $0x10] sm:$0xf0] }
  0x54   : > { %1162 = vmatpush1.bf16.msra.mxu0 %v1654_v45  ;;  %725 = vmatprep.subr.bf16.mxu1 %v1659_v46  ;;  %v350_v45 = vrot.slane %v277_v43, 4  ;;  %v781_v46 = vor.u32 %v780_v40, %v777_v39 }
  0x55   : > { %1163 = vmatprep.subr.bf16.mxu0 %v1662_v47  ;;  %v1200_v47 = vsub.s32 0, %v1890_v44 }
  0x57   : > { %726 = vmatpush1.bf16.msra.mxu1 %v1657_v48  ;;  %v1196_v48 = vld [vmem:[%s2180_s2] sm:$0xf] }
  0x58   : > { %1164 = vmatpush1.bf16.msra.mxu0 %v1660_v49  ;;  %727 = vmatprep.subr.bf16.mxu1 %v1665_v50  ;;  %v1204_v49 = vsub.s32 2, %v1890_v44  ;;  %v1220_v50 = vsub.s32 1, %v1890_v44 }
  0x59   : > { %1165 = vmatprep.subr.bf16.mxu0 %v1668_v51  ;;  %v1224_v51 = vsub.s32 3, %v1890_v44 }
  0x5b   : > { %728 = vmatpush1.bf16.msra.mxu1 %v1663_v52  ;;  %v1201_v52 = vrot.slane %v1196_v48, %v1200_v47 }
  0x5c   : > { %1166 = vmatpush1.bf16.msra.mxu0 %v1666_v53  ;;  %729 = vmatprep.subr.bf16.mxu1 %v1671_v54  ;;  %v1205_v53 = vrot.slane %v1196_v48, %v1204_v49  ;;  %v1221_v54 = vrot.slane %v1196_v48, %v1220_v50 }
  0x5d   : > { %1167 = vmatprep.subr.bf16.mxu0 %v1674_v55  ;;  %v1225_v55 = vrot.slane %v1196_v48, %v1224_v51 }
  0x5e   : > { %v1215_v59 = vrot.slane %v1205_v53, %v1200_v47 }
  0x5f   : > { %730 = vmatpush1.bf16.msra.mxu1 %v1669_v56  ;;  %v1211_v56 = vrot.slane %v1201_v52, %v1200_v47  ;;  %v1235_v1 = vrot.slane %v1225_v55, %v1220_v50 }
  0x60   : > { %1168 = vmatpush1.bf16.msra.mxu0 %v1672_v58  ;;  %731 = vmatprep.subr.bf16.mxu1 %v1677_v61  ;;  %v1231_v61 = vrot.slane %v1221_v54, %v1220_v50 }
  0x61   : > { %1169 = vmatprep.subr.bf16.mxu0 %v1680_v62 }
  0x63   : > { %732 = vmatpush1.bf16.msra.mxu1 %v1675_v3 }
  0x64   : > { %1170 = vmatpush1.bf16.msra.mxu0 %v1678_v4  ;;  %733 = vmatprep.subr.bf16.mxu1 %v1683_v5 }
  0x65   : > { %1171 = vmatprep.subr.bf16.mxu0 %v1686_v6 }
  0x67   : > { %734 = vmatpush1.bf16.msra.mxu1 %v1681_v8 }
  0x68   : > { %1172 = vmatpush1.bf16.msra.mxu0 %v1684_v9  ;;  %735 = vmatprep.subr.bf16.mxu1 %v1689_v10 }
  0x69   : > { %1173 = vmatprep.subr.bf16.mxu0 %v1692_v11 }
  0x6b   : > { %736 = vmatpush1.bf16.msra.mxu1 %v1687_v12 }
  0x6c   : > { %1174 = vmatpush1.bf16.msra.mxu0 %v1690_v13  ;;  %737 = vmatprep.subr.bf16.mxu1 %v1695_v14 }
  0x6d   : > { %1175 = vmatprep.subr.bf16.mxu0 %v1698_v15 }
  0x6f   : > { %738 = vmatpush1.bf16.msra.mxu1 %v1693_v16 }
  0x70   : > { %1176 = vmatpush1.bf16.msra.mxu0 %v1696_v17  ;;  %739 = vmatprep.subr.bf16.mxu1 %v1701_v18 }
  0x71   : > { %1177 = vmatprep.subr.bf16.mxu0 %v1704_v19 }
  0x73   : > { %740 = vmatpush1.bf16.msra.mxu1 %v1699_v20 }
  0x74   : > { %1178 = vmatpush1.bf16.msra.mxu0 %v1702_v21  ;;  %741 = vmatprep.subr.bf16.mxu1 %v1707_v22 }
  0x75   : > { %1179 = vmatprep.subr.bf16.mxu0 %v1710_v23 }
  0x77   : > { %742 = vmatpush1.bf16.msra.mxu1 %v1705_v24 }
  0x78   : > { %1180 = vmatpush1.bf16.msra.mxu0 %v1708_v25  ;;  %743 = vmatprep.subr.bf16.mxu1 %v1713_v26 }
  0x79   : > { %1181 = vmatprep.subr.bf16.mxu0 %v1716_v27 }
  0x7b   : > { %744 = vmatpush1.bf16.msra.mxu1 %v1711_v28 }
  0x7c   : > { %1182 = vmatpush1.bf16.msra.mxu0 %v1714_v29  ;;  %745 = vmatprep.subr.bf16.mxu1 %v1719_v31 }
  0x7d   : > { %1183 = vmatprep.subr.bf16.mxu0 %v1722_v32 }
  0x7f   : > { %746 = vmatpush1.bf16.msra.mxu1 %v1717_v35 }
  0x80   : > { %1184 = vmatpush1.bf16.msra.mxu0 %v1720_v36  ;;  %747 = vmatprep.subr.bf16.mxu1 %v1725_v37 }
  0x81   : > { %1185 = vmatprep.subr.bf16.mxu0 %v1728_v38 }
  0x83   : > { %748 = vmatpush1.bf16.msra.mxu1 %v1723_v41 }
  0x84   : > { %1186 = vmatpush1.bf16.msra.mxu0 %v1726_v42 }
  0x86   : > { %750 = vmatmul.mubr.bf16.vlgmr.msra.gmra.mrb[0].mxu1 %v350_v45 }
  0x87   : > { %1188 = vmatmul.mubr.bf16.vlgmr.msra.gmra.mrb[0].mxu0 %v781_v46 }
 0x159   : > { %v751_v57 = vpop.f32.mrb[0].mxu1 }
 0x15a   : > { %v1189_v58 = vpop.f32.mrb[0].mxu0  ;;  %v753_v62 = vpop.f32.mrb[1].mxu1 }
 0x15b   : > { %v1516_v60 = vadd.f32 %v1189_v58, %v751_v57  ;;  %v1191_v63 = vpop.f32.mrb[1].mxu0  ;;  %v755_v2 = vpop.f32.mrb[2].mxu1 }
 0x15c   : > { %v1517_v0 = vadd.f32 %v1191_v63, %v753_v62  ;;  %v1193_v3 = vpop.f32.mrb[2].mxu0  ;;  %v756_v5 = vpop.f32.mrb[3].mxu1 }
 0x15d   : > { %v1216_v4 = vmul.f32 %v1516_v60, %v1211_v56  ;;  %v1194_v44 = vpop.f32.mrb[3].mxu0 }
 0x15e   : > { %v1217_v6 = vmul.f32 %v1517_v0, %v1215_v59 }
 0x15f   : > { %v1236_v7 = vadd.f32 %v1231_v61, %v1216_v4 }
 0x160   : > { %v1237_v8 = vadd.f32 %v1235_v1, %v1217_v6 }
 0x162   : > { %v1510_v9 = vpack.c.bf16 %v1237_v8, %v1236_v7 }
 0x164   : > { %1511 = vst.sshfl [vmem:[%s170_s29] sm:$0x33 pattern:$0x76325410] %v1510_v9 }
 0x165 PF: > { %s13_s12 = sadd.s32 1, %s1735_s12  }
 0x166   : > { %p10_p4 = scmp.ge.s32.totalorder %s13_s12, 4  }
 0x168   :  { %12 = sbr.rel (!%p10_p4) target bundleno = 1 (0x1), region = 63 }

// kernel: encoder_forward.23
= control target key start
LH: loop header
LB: loop body
LE: loop exit
PB: predicated region body
PF: predicated region fallthrough
CT: control target
= control target key end

     0   :  { %8 = vsyncpa [#allocation3], 0  ;;  %s788_s0 = inlined_call_operand.vmem [shape: bf16[2,2,256], index: 0, kind: input, shape index: {}]   ;;  %s789_s1 = inlined_call_operand.vmem [shape: bf16[256,128], index: 1, kind: input, shape index: {}]   ;;  %s790_s2 = inlined_call_operand.vmem [shape: f32[2,128], index: 2, kind: input, shape index: {}]   ;;  %s791_s3 = inlined_call_operand.hbm [shape: f32[2,2,128], index: 3, kind: output, shape index: {}]  }
   0x1   :  { %10 = vsyncpa [#allocation3 + $0x1], 0  ;;  %s637_s12 = smov 0   ;;  %s639_s13 = smov 0  }
   0x2   :  { %s641_s14 = smov 0   ;;  %s643_s15 = smov 0  }
   0x3 LB: > { %s658_s16 = sadd.s32 4294967295, %s613_s15   ;;  %s446_s17 = sadd.s32 4294967294, %s613_s15   ;;  %s613_s15 = sphi %s643_s15, %s797_s15   ;;  %s609_s14 = sphi %s641_s14, %s796_s14   ;;  %s605_s13 = sphi %s639_s13, %s795_s13   ;;  %s601_s12 = sphi %s637_s12, %s794_s12  }
   0x4   : > { %s662_s18 = sadd.s32 1, %s613_s15   ;;  %s91_s19 = sadd.s32 1, %s609_s14 }
   0x5   : > { %s88_s20 = ssub.s32 %s613_s15, %s662_s18  ;;  %p101_p0 = scmp.ne.s32.totalorder %s609_s14, %s605_s13 }
   0x6   : > { %p89_p1 = scmp.eq.s32.totalorder %s88_s20, 0  ;;  %p102_p2 = scmp.eq.s32.totalorder %s658_s16, 1 }
   0x7   : > { %p107_p3 = scmp.ne.s32.totalorder %s605_s13, %s601_s12  ;;  %p108_p4 = scmp.eq.s32.totalorder %s446_s17, 1 }
   0x8   : > { %s673_s21 = scalar_select %p89_p1, %s609_s14, %s91_s19  }
   0x9   : > { %p675_p5 = por %p102_p2, %p101_p0  ;;  %p679_p6 = por %p108_p4, %p107_p3 }
   0xa   : > { %p449_p7 = scmp.ge.s32.totalorder %s613_s15, 1  ;;  %p139_p8 = scmp.lt.s32.totalorder %s613_s15, 3 }
   0xc   : > { %p140_p9 = pnand %p449_p7, %p139_p8 }
   0xd   : > { %v535_v0 = vld [vmem:[%s789_s1 + $0x40] sm:$0xff] (!%p140_p9)   ;;  %v537_v2 = vld [vmem:[%s789_s1 + $0x48] sm:$0xff] (!%p140_p9)   ;;  %p162_p10 = scmp.lt.s32.totalorder (!%p140_p9), %s658_s16, 1  ;;  %v539_v4 = vld [vmem:[%s789_s1 + $0x50] sm:$0xff] (!%p140_p9)   ;;  %v212_v9 = vlaneseq (!%p140_p9)  ;;  %v615_v13 = vmov (!%p140_p9), 1966171168  }
   0xe   : > { %143 = sbr.rel (%p140_p9) target bundleno = 279 (0x117), region = 32  ;;  %v536_v1 = vld [vmem:[%s789_s1] sm:$0xff] (!%p140_p9)   ;;  %473 = vmatprep.subr.bf16.mxu0 (!%p140_p9), %v535_v0  ;;  %v538_v3 = vld [vmem:[%s789_s1 + $0x8] sm:$0xff] (!%p140_p9)   ;;  %v540_v5 = vld [vmem:[%s789_s1 + $0x10] sm:$0xff] (!%p140_p9)   ;;  %v210_v14 = vunpack.c.l.s4 (!%p140_p9), %v615_v13  ;;  %s159_s25 = sand.u32 (!%p140_p9), 1, %s605_s13  }
   0xf   : > { %474 = vmatpush3.bf16.msra.mxu0 (!%p140_p9), %v536_v1  ;;  %v541_v6 = vld [vmem:[%s789_s1 + $0x58] sm:$0xff] (!%p140_p9)   ;;  %v543_v8 = vld [vmem:[%s789_s1 + $0x60] sm:$0xff] (!%p140_p9)   ;;  %v545_v11 = vld [vmem:[%s789_s1 + $0x68] sm:$0xff] (!%p140_p9)   ;;  %v213_v15 = vshrl.u32 (!%p140_p9), %v212_v9, 7  ;;  %s470_s29 = sshll.u32 (!%p140_p9), %s658_s16, 5  ;;  %s374_s8 = scalar_lea.sflag (!%p140_p9), [#allocation3], %s159_s25 }
  0x10   : > { %475 = vmatprep.subr.bf16.mxu0 (!%p140_p9), %v537_v2  ;;  %v542_v7 = vld [vmem:[%s789_s1 + $0x18] sm:$0xff] (!%p140_p9)   ;;  %v544_v10 = vld [vmem:[%s789_s1 + $0x20] sm:$0xff] (!%p140_p9)   ;;  %v546_v16 = vld [vmem:[%s789_s1 + $0x28] sm:$0xff] (!%p140_p9)   ;;  %v211_v18 = vunpack.c.0.s8 (!%p140_p9), %v210_v14 }
  0x11   : > { %v547_v19 = vld [vmem:[%s789_s1 + $0x70] sm:$0xff] (!%p140_p9)   ;;  %v549_v23 = vld [vmem:[%s789_s1 + $0x78] sm:$0xff] (!%p140_p9)   ;;  %v364_v26 = vsub.s32 (!%p140_p9), 0, %v213_v15  ;;  %v361_v27 = vld [vmem:[%s790_s2] sm:$0x3] (!%p140_p9)  ;;  %v369_v28 = vsub.s32 (!%p140_p9), 1, %v213_v15 }
  0x12   : > { %v214_v20 = vsub.s32 (!%p140_p9), %v211_v18, %v213_v15  ;;  %v548_v21 = vld [vmem:[%s789_s1 + $0x30] sm:$0xff] (!%p140_p9)   ;;  %v550_v24 = vld [vmem:[%s789_s1 + $0x38] sm:$0xff] (!%p140_p9)  }
  0x13   : > { %476 = vmatpush3.bf16.msra.mxu0 (!%p140_p9), %v538_v3  ;;  %v365_v30 = vrot.slane (!%p140_p9), %v361_v27, %v364_v26  ;;  %v370_v33 = vrot.slane (!%p140_p9), %v361_v27, %v369_v28 }
  0x14   : > { %477 = vmatprep.subr.bf16.mxu0 (!%p140_p9), %v539_v4 }
  0x15   : > { %s163_s7 = scalar_select %p162_p10, %s658_s16, 1 }
  0x16   : > { %s616_s16 = smov [#allocation2]  }
  0x17   : > { %s451_s17 = sshll.u32 %s163_s7, 1  ;;  %478 = vmatpush3.bf16.msra.mxu0 %v540_v5  ;;  %s746_s7 = scalar_lea.hbm %s791_s3, %s470_s29 }
  0x18   : > { %479 = vmatprep.subr.bf16.mxu0 %v541_v6  ;;  %s165_s28 = scalar_lea.vmem %s788_s0, %s451_s17  ;;  %s555_s10 = sshll.u32 %s616_s16, 4  ;;  %s556_s10 = int_to_ptr.vmem [resolvable:$false] %s555_s10 }
  0x19   : > { %v452_v12 = vld.sshfl [vmem:[%s165_s28] sm:$0x11 pattern:$0x75316420]  ;;  %s450_s28 = sshll.u32 %s159_s25, 1  ;;  %s557_s11 = scalar_lea.vmem %s556_s10, 64 }
  0x1a   : > { %v208_v17 = vcombine.high %v452_v12, %v452_v12  ;;  %v215_v25 = vrot.slane %v452_v12, %v214_v20  ;;  %s161_s30 = scalar_lea.vmem [#allocation2], %s450_s28 }
  0x1b   : > { %480 = vmatpush3.bf16.msra.mxu0 %v542_v7  ;;  %s387_s4 = sshll.u32 %s161_s30, 4  ;;  %s748_s4 = int_to_ptr.vmem [resolvable:$true] %s387_s4 }
  0x1c   : > { %481 = vmatprep.subr.bf16.mxu0 %v543_v8  ;;  %v222_v22 = vrot.slane %v208_v17, %v214_v20  ;;  %s551_s9 = scalar_lea.vmem %s748_s4, 32  ;;  %p558_p0 = scmp.lt.s32.totalorder %s748_s4, %s556_s10 }
  0x1d   : > { %p552_p11 = scmp.ne.s32.totalorder %s748_s4, %s551_s9  ;;  %p559_p1 = scmp.lt.s32.totalorder %s557_s11, %s551_s9 }
  0x1e   : > { %353 = vmatprep.mubr.bf16.mxu0 %v222_v22 }
  0x1f   : > { %482 = vmatpush3.bf16.msra.mxu0 %v544_v10  ;;  %p553_p12 = pnand %p552_p11, %p675_p5  ;;  %p560_p2 = por %p559_p1, %p558_p0 }
  0x20   : > { %483 = vmatprep.subr.bf16.mxu0 %v545_v11 }
  0x21   : > { %p554_p13 = pneg %p553_p12 }
  0x23   : > { %484 = vmatpush3.bf16.msra.mxu0 %v546_v16  ;;  %p561_p3 = pnand %p560_p2, %p554_p13 }
  0x24   : > { %485 = vmatprep.subr.bf16.mxu0 %v547_v19 }
  0x27   : > { %486 = vmatpush3.bf16.msra.mxu0 %v548_v21 }
  0x28   : > { %487 = vmatprep.subr.bf16.mxu0 %v549_v23 }
  0x2b   : > { %488 = vmatpush3.bf16.msra.mxu0 %v550_v24 }
  0x2e   : > { %354 = vmatmul.mubr.bf16.vlgmr.msra.gmra.mrb[0].mxu0 %v215_v25 }
 0x101   : > { %v489_v29 = vpop.f32.mrb[0].mxu0 }
 0x102   : > { %v490_v31 = vpop.f32.mrb[1].mxu0 }
 0x103   : > { %v491_v32 = vadd.f32 %v490_v31, %v489_v29  ;;  %v492_v34 = vpop.f32.mrb[2].mxu0 }
 0x104   : > { %v493_v35 = vpop.f32.mrb[3].mxu0 }
 0x105   : > { %v366_v36 = vmul.f32 %v491_v32, %v365_v30 }
 0x107   : > { %v371_v37 = vadd.f32 %v370_v33, %v366_v36 }
 0x109   : > { %372 = vst [vmem:[%s161_s30] sm:$0x3] %v371_v37 }
 0x10a   : > { %564 = shalt.err (!%p561_p3)
}
 0x10b   : > { %s565_s17 = scalar_lea.hbm %s746_s7, 32  ;;  %s569_s24 = scalar_lea.hbm %s791_s3, 64 }
 0x10c   : > { %p566_p4 = scmp.ne.s32.totalorder %s746_s7, %s565_s17  ;;  %p570_p9 = scmp.lt.u32.totalorder %s746_s7, %s791_s3 }
 0x10d   : > { %p571_p10 = scmp.lt.u32.totalorder %s569_s24, %s565_s17  ;;  %p573_p12 = scmp.lt.u32.totalorder %s565_s17, %s746_s7 }
 0x10e   : > { %p567_p7 = pnand %p566_p4, %p675_p5 }
 0x10f   : > { %p572_p11 = por %p571_p10, %p570_p9 }
 0x110   : > { %p568_p8 = pneg %p567_p7 }
 0x111   : > { %p574_p13 = por %p573_p12, %p572_p11 }
 0x113   : > { %p575_p0 = pnand %p574_p13, %p568_p8 }
 0x115   : > { %578 = shalt.err (!%p575_p0)
}
 0x116   : > { %495 = dma.vmem_to_hbm [thread:$0]  (%p675_p5), %s748_s4, 32, %s746_s7, %s374_s8  }
 0x117 PF: > { %p501_p1 = scmp.ge.s32.totalorder %s613_s15, 2  ;;  %s399_s27 = sand.u32 1, %s601_s12  }
 0x118   : > { %s400_s28 = scalar_lea.sflag [#allocation3], %s399_s27 }
 0x119   : > { %p498_p2 = pnand %p501_p1, %p679_p6 }
 0x11b   : > { %596 = dma.done.wait (!%p498_p2), %s400_s28, 32  }
 0x11c   : > { %598 = vsyncadd (!%p498_p2), %s400_s28, 4294967264  ;;  %p13_p3 = scmp.ge.s32.totalorder %s662_s18, 4   ;;  %s794_s12 = smov %s605_s13 }
 0x11d   : > { %s795_s13 = smov %s609_s14  ;;  %s796_s14 = smov %s673_s21 }
 0x11e   : > { %s797_s15 = smov %s662_s18  ;;  %15 = sbr.rel (!%p13_p3) target bundleno = 3 (0x3), region = 67 }
 0x125   :  { %405 = vsyncpa [#allocation3], 1 }
 0x126   :  { %407 = vsyncpa [#allocation3 + $0x1], 1 }

// kernel: encoder_forward.18
= control target key start
LH: loop header
LB: loop body
LE: loop exit
PB: predicated region body
PF: predicated region fallthrough
CT: control target
= control target key end

     0   :  { %s3792_s12 = smov 0   ;;  %s4775_s0 = inlined_call_operand.vmem [shape: bf16[2,4,256], index: 0, kind: input, shape index: {}]   ;;  %s4776_s1 = inlined_call_operand.vmem [shape: bf16[3,3,256,256], index: 1, kind: input, shape index: {}]   ;;  %s4777_s2 = inlined_call_operand.vmem [shape: f32[3,2,256], index: 2, kind: input, shape index: {}]   ;;  %s4778_s3 = inlined_call_operand.vmem [shape: bf16[2,4,256], index: 3, kind: output, shape index: {}]  }
   0x1 LB: > { %s2700_s13 = sadd.s32 4294967295, %s3769_s12   ;;  %p2704_p0 = scmp.ge.s32.totalorder %s3769_s12, 1  ;;  %s3769_s12 = sphi %s3792_s12, %s13_s12  }
   0x2   : > { %p137_p1 = scmp.lt.s32.totalorder %s3769_s12, 3 }
   0x4   : > { %p138_p2 = pnand %p2704_p0, %p137_p1 }
   0x5   : > { %v3315_v0 = vld [vmem:[%s4776_s1 + $0x4] ss:$8 sps:$4 sm:$0xff] (!%p138_p2)   ;;  %v3317_v1 = vld [vmem:[%s4776_s1] ss:$8 sps:$4 sm:$0xff] (!%p138_p2)   ;;  %v3771_v2 = vmov (!%p138_p2), 0   ;;  %p161_p3 = scmp.lt.s32.totalorder (!%p138_p2), %s2700_s13, 1 }
   0x6   : > { %141 = sbr.rel (%p138_p2) target bundleno = 1078 (0x436), region = 32  ;;  %172 = vst [vmem:[#allocation2] sm:$0xff] (!%p138_p2), %v3771_v2  ;;  %173 = vst [vmem:[#allocation2 + $0x8] sm:$0xcc] (!%p138_p2), %v3771_v2  ;;  %647 = vmatprep.subr.bf16.mxu0 (!%p138_p2), %v3315_v0  ;;  %v3318_v3 = vld [vmem:[%s4776_s1 + $0x14] ss:$8 sps:$4 sm:$0xff] (!%p138_p2)  }
   0x7   : > { %174 = vst [vmem:[#allocation2 + $0x10] sm:$0xff] (!%p138_p2), %v3771_v2  ;;  %175 = vst [vmem:[#allocation3] sm:$0xff] (!%p138_p2), %v3771_v2  ;;  %648 = vmatpush1.bf16.msra.mxu0 (!%p138_p2), %v3317_v1  ;;  %v3320_v4 = vld [vmem:[%s4776_s1 + $0x10] ss:$8 sps:$4 sm:$0xff] (!%p138_p2)   ;;  %v3321_v5 = vld [vmem:[%s4776_s1 + $0x24] ss:$8 sps:$4 sm:$0xff] (!%p138_p2)  }
   0x8   : > { %176 = vst [vmem:[#allocation3 + $0x8] sm:$0xcc] (!%p138_p2), %v3771_v2  ;;  %177 = vst [vmem:[#allocation3 + $0x10] sm:$0xff] (!%p138_p2), %v3771_v2  ;;  %649 = vmatprep.subr.bf16.mxu0 (!%p138_p2), %v3318_v3  ;;  %v3323_v6 = vld [vmem:[%s4776_s1 + $0x20] ss:$8 sps:$4 sm:$0xff] (!%p138_p2)  }
   0x9   : > { %v3324_v7 = vld [vmem:[%s4776_s1 + $0x34] ss:$8 sps:$4 sm:$0xff] (!%p138_p2)   ;;  %v3326_v8 = vld [vmem:[%s4776_s1 + $0x30] ss:$8 sps:$4 sm:$0xff] (!%p138_p2)   ;;  %v3327_v9 = vld [vmem:[%s4776_s1 + $0x44] ss:$8 sps:$4 sm:$0xff] (!%p138_p2)  }
   0xa   : > { %v3329_v10 = vld [vmem:[%s4776_s1 + $0x40] ss:$8 sps:$4 sm:$0xff] (!%p138_p2)   ;;  %v3330_v11 = vld [vmem:[%s4776_s1 + $0x54] ss:$8 sps:$4 sm:$0xff] (!%p138_p2)   ;;  %v3332_v12 = vld [vmem:[%s4776_s1 + $0x50] ss:$8 sps:$4 sm:$0xff] (!%p138_p2)  }
   0xb   : > { %650 = vmatpush1.bf16.msra.mxu0 (!%p138_p2), %v3320_v4  ;;  %v3333_v13 = vld [vmem:[%s4776_s1 + $0x64] ss:$8 sps:$4 sm:$0xff] (!%p138_p2)   ;;  %v3335_v15 = vld [vmem:[%s4776_s1 + $0x60] ss:$8 sps:$4 sm:$0xff] (!%p138_p2)   ;;  %v3336_v18 = vld [vmem:[%s4776_s1 + $0x74] ss:$8 sps:$4 sm:$0xff] (!%p138_p2)  }
   0xc   : > { %651 = vmatprep.subr.bf16.mxu0 (!%p138_p2), %v3321_v5  ;;  %v3362_v14 = vld [vmem:[%s4776_s1 + $0x104] ss:$8 sps:$4 sm:$0xff] (!%p138_p2)   ;;  %v3365_v16 = vld [vmem:[%s4776_s1 + $0x100] ss:$8 sps:$4 sm:$0xff] (!%p138_p2)   ;;  %v3371_v19 = vld [vmem:[%s4776_s1 + $0x114] ss:$8 sps:$4 sm:$0xff] (!%p138_p2)  }
   0xd   : > { %s4780_s13 = smov (!%p161_p3, %s2700_s13), 1  ;;  %423 = vmatprep.subr.bf16.mxu1 %v3362_v14  ;;  %v3373_v20 = vld [vmem:[%s4776_s1 + $0x110] ss:$8 sps:$4 sm:$0xff]   ;;  %v3339_v22 = vld [vmem:[%s4776_s1 + $0x84] ss:$8 sps:$4 sm:$0xff]  }
   0xe   : > { %s3280_s9 = sshll.u32 %s4780_s13, 2  ;;  %424 = vmatpush1.bf16.msra.mxu1 %v3365_v16  ;;  %v3338_v21 = vld [vmem:[%s4776_s1 + $0x70] ss:$8 sps:$4 sm:$0xff]   ;;  %v3377_v23 = vld [vmem:[%s4776_s1 + $0x124] ss:$8 sps:$4 sm:$0xff]  }
   0xf   : > { %652 = vmatpush1.bf16.msra.mxu0 %v3323_v6  ;;  %s3847_s18 = scalar_lea.vmem %s4775_s0, %s3280_s9  ;;  %425 = vmatprep.subr.bf16.mxu1 %v3371_v19  ;;  %v3379_v24 = vld [vmem:[%s4776_s1 + $0x120] ss:$8 sps:$4 sm:$0xff]   ;;  %v3383_v26 = vld [vmem:[%s4776_s1 + $0x134] ss:$8 sps:$4 sm:$0xff]   ;;  %v3385_v31 = vld [vmem:[%s4776_s1 + $0x130] ss:$8 sps:$4 sm:$0xff]   ;;  %s170_s24 = scalar_lea.vmem %s4778_s3, %s3280_s9 }
  0x10   : > { %653 = vmatprep.subr.bf16.mxu0 %v3324_v7  ;;  %v2709_v17 = vld.sshfl [vmem:[%s3847_s18] sm:$0x33 pattern:$0x76325410]  ;;  %v3342_v29 = vld [vmem:[%s4776_s1 + $0x94] ss:$8 sps:$4 sm:$0xff]  }
  0x11   : > { %188 = vst [vmem:[#allocation2 + $0x8] sm:$0x33] %v2709_v17  ;;  %v189_v25 = vld [vmem:[#allocation2] sm:$0x88]  ;;  %v3344_v36 = vld [vmem:[%s4776_s1 + $0x90] ss:$8 sps:$4 sm:$0xff]  }
  0x12   : > { %426 = vmatpush1.bf16.msra.mxu1 %v3373_v20  ;;  %v3341_v27 = vld [vmem:[%s4776_s1 + $0x80] ss:$8 sps:$4 sm:$0xff]   ;;  %v3389_v33 = vld [vmem:[%s4776_s1 + $0x144] ss:$8 sps:$4 sm:$0xff]   ;;  %v3395_v42 = vld [vmem:[%s4776_s1 + $0x154] ss:$8 sps:$4 sm:$0xff]  }
  0x13   : > { %654 = vmatpush1.bf16.msra.mxu0 %v3326_v8  ;;  %427 = vmatprep.subr.bf16.mxu1 %v3377_v23  ;;  %v3345_v37 = vld [vmem:[%s4776_s1 + $0xa4] ss:$8 sps:$4 sm:$0xff]   ;;  %v3391_v40 = vld [vmem:[%s4776_s1 + $0x140] ss:$8 sps:$4 sm:$0xff]   ;;  %v3348_v44 = vld [vmem:[%s4776_s1 + $0xb4] ss:$8 sps:$4 sm:$0xff]  }
  0x14   : > { %655 = vmatprep.subr.bf16.mxu0 %v3327_v9  ;;  %v3347_v43 = vld [vmem:[%s4776_s1 + $0xa0] ss:$8 sps:$4 sm:$0xff]   ;;  %v3397_v45 = vld [vmem:[%s4776_s1 + $0x150] ss:$8 sps:$4 sm:$0xff]   ;;  %v3401_v46 = vld [vmem:[%s4776_s1 + $0x164] ss:$8 sps:$4 sm:$0xff]  }
  0x15   : > { %v3350_v47 = vld [vmem:[%s4776_s1 + $0xb0] ss:$8 sps:$4 sm:$0xff]   ;;  %v3351_v48 = vld [vmem:[%s4776_s1 + $0xc4] ss:$8 sps:$4 sm:$0xff]   ;;  %v3403_v49 = vld [vmem:[%s4776_s1 + $0x160] ss:$8 sps:$4 sm:$0xff]  }
  0x16   : > { %428 = vmatpush1.bf16.msra.mxu1 %v3379_v24  ;;  %v3407_v50 = vld [vmem:[%s4776_s1 + $0x174] ss:$8 sps:$4 sm:$0xff]   ;;  %v3353_v51 = vld [vmem:[%s4776_s1 + $0xc0] ss:$8 sps:$4 sm:$0xff]   ;;  %v3409_v53 = vld [vmem:[%s4776_s1 + $0x170] ss:$8 sps:$4 sm:$0xff]  }
  0x17   : > { %656 = vmatpush1.bf16.msra.mxu0 %v3329_v10  ;;  %429 = vmatprep.subr.bf16.mxu1 %v3383_v26  ;;  %v3354_v52 = vld [vmem:[%s4776_s1 + $0xd4] ss:$8 sps:$4 sm:$0xff]   ;;  %v3413_v55 = vld [vmem:[%s4776_s1 + $0x184] ss:$8 sps:$4 sm:$0xff]   ;;  %v3356_v56 = vld [vmem:[%s4776_s1 + $0xd0] ss:$8 sps:$4 sm:$0xff]  }
  0x18   : > { %657 = vmatprep.subr.bf16.mxu0 %v3330_v11  ;;  %v3886_v28 = vld [vmem:[#allocation2 + $0x8] sm:$0xff]  ;;  %v3419_v61 = vld [vmem:[%s4776_s1 + $0x194] ss:$8 sps:$4 sm:$0xff]   ;;  %v3421_v0 = vld [vmem:[%s4776_s1 + $0x190] ss:$8 sps:$4 sm:$0xff]  }
  0x19   : > { %v2777_v30 = vcombine.high %v189_v25, %v3886_v28  ;;  %v2743_v32 = vcombine.high %v3886_v28, %v3886_v28  ;;  %v2776_v54 = vcombine.low %v189_v25, %v3886_v28  ;;  %v3357_v57 = vld [vmem:[%s4776_s1 + $0xe4] ss:$8 sps:$4 sm:$0xff]   ;;  %v3415_v58 = vld [vmem:[%s4776_s1 + $0x180] ss:$8 sps:$4 sm:$0xff]   ;;  %v3360_v63 = vld [vmem:[%s4776_s1 + $0xf4] ss:$8 sps:$4 sm:$0xff]  }
  0x1a   : > { %430 = vmatpush1.bf16.msra.mxu1 %v3385_v31  ;;  %v3359_v62 = vld [vmem:[%s4776_s1 + $0xe0] ss:$8 sps:$4 sm:$0xff]   ;;  %v3425_v3 = vld [vmem:[%s4776_s1 + $0x1a4] ss:$8 sps:$4 sm:$0xff]   ;;  %v3364_v4 = vld [vmem:[%s4776_s1 + $0xf0] ss:$8 sps:$4 sm:$0xff]  }
  0x1b   : > { %658 = vmatpush1.bf16.msra.mxu0 %v3332_v12  ;;  %v478_v34 = vshrl.u32 %v2777_v30, 16  ;;  %v481_v35 = vshll.u32 %v2777_v30, 16  ;;  %455 = vmatprep.mubr.bf16.mxu1 %v2743_v32  ;;  %v470_v59 = vshrl.u32 %v2776_v54, 16  ;;  %v473_v60 = vshll.u32 %v2776_v54, 16  ;;  %v3370_v5 = vld [vmem:[%s4776_s1 + $0x204] ss:$8 sps:$4 sm:$0xff]  }
  0x1c   : > { %659 = vmatprep.subr.bf16.mxu0 %v3333_v13  ;;  %431 = vmatprep.subr.bf16.mxu1 %v3389_v33  ;;  %v3427_v6 = vld [vmem:[%s4776_s1 + $0x1a0] ss:$8 sps:$4 sm:$0xff]   ;;  %v3431_v8 = vld [vmem:[%s4776_s1 + $0x1b4] ss:$8 sps:$4 sm:$0xff]   ;;  %v3433_v11 = vld [vmem:[%s4776_s1 + $0x1b0] ss:$8 sps:$4 sm:$0xff]  }
  0x1d   : > { %v480_v38 = vrot.slane %v478_v34, 3  ;;  %v483_v39 = vrot.slane %v481_v35, 4  ;;  %v472_v1 = vrot.slane %v470_v59, 3  ;;  %v475_v2 = vrot.slane %v473_v60, 4  ;;  %v3368_v9 = vld [vmem:[%s4776_s1 + $0x200] ss:$8 sps:$4 sm:$0xff]  }
  0x1e   : > { %432 = vmatpush1.bf16.msra.mxu1 %v3391_v40  ;;  %v3376_v10 = vld [vmem:[%s4776_s1 + $0x214] ss:$8 sps:$4 sm:$0xff]   ;;  %v3437_v12 = vld [vmem:[%s4776_s1 + $0x1c4] ss:$8 sps:$4 sm:$0xff]   ;;  %v3374_v14 = vld [vmem:[%s4776_s1 + $0x210] ss:$8 sps:$4 sm:$0xff]  }
  0x1f   : > { %660 = vmatpush1.bf16.msra.mxu0 %v3335_v15  ;;  %v484_v41 = vor.u32 %v483_v39, %v480_v38  ;;  %433 = vmatprep.subr.bf16.mxu1 %v3395_v42  ;;  %v476_v7 = vor.u32 %v475_v2, %v472_v1  ;;  %v3997_v13 = vld [vmem:[#allocation2 + $0x10] sm:$0x11]  ;;  %v3382_v16 = vld [vmem:[%s4776_s1 + $0x224] ss:$8 sps:$4 sm:$0xff]   ;;  %v3439_v17 = vld [vmem:[%s4776_s1 + $0x1c0] ss:$8 sps:$4 sm:$0xff]   ;;  %v2742_v39 = vcombine.low %v3886_v28, %v3886_v28 }
  0x20   : > { %661 = vmatprep.subr.bf16.mxu0 %v3336_v18  ;;  %v2843_v15 = vcombine.high %v3886_v28, %v3997_v13  ;;  %v3443_v20 = vld [vmem:[%s4776_s1 + $0x1d4] ss:$8 sps:$4 sm:$0xff]   ;;  %v3445_v24 = vld [vmem:[%s4776_s1 + $0x1d0] ss:$8 sps:$4 sm:$0xff]   ;;  %v3449_v26 = vld [vmem:[%s4776_s1 + $0x1e4] ss:$8 sps:$4 sm:$0xff]  }
  0x21   : > { %679 = vmatprep.mubr.bf16.mxu0 %v484_v41  ;;  %v3388_v23 = vld [vmem:[%s4776_s1 + $0x234] ss:$8 sps:$4 sm:$0xff]   ;;  %v3392_v30 = vld [vmem:[%s4776_s1 + $0x240] ss:$8 sps:$4 sm:$0xff]   ;;  %v3457_v34 = vld [vmem:[%s4776_s1 + $0x1f0] ss:$8 sps:$4 sm:$0xff]  }
  0x22   : > { %434 = vmatpush1.bf16.msra.mxu1 %v3397_v45  ;;  %v739_v18 = vshrl.u32 %v2843_v15, 16  ;;  %v741_v19 = vshll.u32 %v2843_v15, 16  ;;  %v3451_v31 = vld [vmem:[%s4776_s1 + $0x1e0] ss:$8 sps:$4 sm:$0xff]   ;;  %v3455_v32 = vld [vmem:[%s4776_s1 + $0x1f4] ss:$8 sps:$4 sm:$0xff]  }
  0x23   : > { %662 = vmatpush1.bf16.msra.mxu0 %v3338_v21  ;;  %435 = vmatprep.subr.bf16.mxu1 %v3401_v46  ;;  %v3380_v21 = vld [vmem:[%s4776_s1 + $0x220] ss:$8 sps:$4 sm:$0xff]   ;;  %v3400_v33 = vld [vmem:[%s4776_s1 + $0x254] ss:$8 sps:$4 sm:$0xff]   ;;  %v3465_v35 = vld [vmem:[%s4776_s1 + $0x404] ss:$8 sps:$4 sm:$0xff]  }
  0x24   : > { %663 = vmatprep.subr.bf16.mxu0 %v3339_v22  ;;  %v743_v22 = vrot.slane %v741_v19, 1  ;;  %v3463_v38 = vld [vmem:[%s4776_s1 + $0x400] ss:$8 sps:$4 sm:$0xff]   ;;  %v3468_v40 = vld [vmem:[%s4776_s1 + $0x414] ss:$8 sps:$4 sm:$0xff]  }
  0x25   : > { %v3404_v41 = vld [vmem:[%s4776_s1 + $0x260] ss:$8 sps:$4 sm:$0xff]   ;;  %v3412_v42 = vld [vmem:[%s4776_s1 + $0x274] ss:$8 sps:$4 sm:$0xff]   ;;  %v3410_v45 = vld [vmem:[%s4776_s1 + $0x270] ss:$8 sps:$4 sm:$0xff]  }
  0x26   : > { %436 = vmatpush1.bf16.msra.mxu1 %v3403_v49  ;;  %v744_v25 = vor.u32 %v743_v22, %v739_v18  ;;  %v3418_v46 = vld [vmem:[%s4776_s1 + $0x284] ss:$8 sps:$4 sm:$0xff]   ;;  %v3416_v49 = vld [vmem:[%s4776_s1 + $0x280] ss:$8 sps:$4 sm:$0xff]   ;;  %v3478_v59 = vld [vmem:[%s4776_s1 + $0x450] ss:$8 sps:$4 sm:$0xff]  }
  0x27   : > { %664 = vmatpush1.bf16.msra.mxu0 %v3341_v27  ;;  %437 = vmatprep.subr.bf16.mxu1 %v3407_v50  ;;  %v3386_v27 = vld [vmem:[%s4776_s1 + $0x230] ss:$8 sps:$4 sm:$0xff]   ;;  %v3424_v50 = vld [vmem:[%s4776_s1 + $0x294] ss:$8 sps:$4 sm:$0xff]   ;;  %v3430_v54 = vld [vmem:[%s4776_s1 + $0x2a4] ss:$8 sps:$4 sm:$0xff]  }
  0x28   : > { %665 = vmatprep.subr.bf16.mxu0 %v3342_v29  ;;  %v3394_v29 = vld [vmem:[%s4776_s1 + $0x244] ss:$8 sps:$4 sm:$0xff]   ;;  %v3440_v1 = vld [vmem:[%s4776_s1 + $0x2c0] ss:$8 sps:$4 sm:$0xff]   ;;  %v3448_v2 = vld [vmem:[%s4776_s1 + $0x2d4] ss:$8 sps:$4 sm:$0xff]  }
  0x29   : > { %v3483_v60 = vld [vmem:[%s4776_s1 + $0x464] ss:$8 sps:$4 sm:$0xff]   ;;  %v3498_v19 = vld [vmem:[%s4776_s1 + $0x4b4] ss:$8 sps:$4 sm:$0xff]   ;;  %v3499_v22 = vld [vmem:[%s4776_s1 + $0x4c0] ss:$8 sps:$4 sm:$0xff]  }
  0x2a   : > { %438 = vmatpush1.bf16.msra.mxu1 %v3409_v53  ;;  %v3422_v53 = vld [vmem:[%s4776_s1 + $0x290] ss:$8 sps:$4 sm:$0xff]   ;;  %v3495_v18 = vld [vmem:[%s4776_s1 + $0x4a4] ss:$8 sps:$4 sm:$0xff]  }
  0x2b   : > { %666 = vmatpush1.bf16.msra.mxu0 %v3344_v36  ;;  %439 = vmatprep.subr.bf16.mxu1 %v3413_v55  ;;  %v3398_v36 = vld [vmem:[%s4776_s1 + $0x250] ss:$8 sps:$4 sm:$0xff]   ;;  %v3475_v55 = vld [vmem:[%s4776_s1 + $0x440] ss:$8 sps:$4 sm:$0xff]  }
  0x2c   : > { %667 = vmatprep.subr.bf16.mxu0 %v3345_v37  ;;  %v3406_v37 = vld [vmem:[%s4776_s1 + $0x264] ss:$8 sps:$4 sm:$0xff]  }
  0x2e   : > { %440 = vmatpush1.bf16.msra.mxu1 %v3415_v58  ;;  %v3436_v58 = vld [vmem:[%s4776_s1 + $0x2b4] ss:$8 sps:$4 sm:$0xff]  }
  0x2f   : > { %668 = vmatpush1.bf16.msra.mxu0 %v3347_v43  ;;  %441 = vmatprep.subr.bf16.mxu1 %v3419_v61  ;;  %v3466_v43 = vld [vmem:[%s4776_s1 + $0x410] ss:$8 sps:$4 sm:$0xff]  }
  0x30   : > { %669 = vmatprep.subr.bf16.mxu0 %v3348_v44  ;;  %v3471_v44 = vld [vmem:[%s4776_s1 + $0x424] ss:$8 sps:$4 sm:$0xff]   ;;  %v3434_v61 = vld [vmem:[%s4776_s1 + $0x2b0] ss:$8 sps:$4 sm:$0xff]  }
  0x32   : > { %442 = vmatpush1.bf16.msra.mxu1 %v3421_v0  ;;  %v3486_v0 = vld [vmem:[%s4776_s1 + $0x474] ss:$8 sps:$4 sm:$0xff]  }
  0x33   : > { %670 = vmatpush1.bf16.msra.mxu0 %v3350_v47  ;;  %443 = vmatprep.subr.bf16.mxu1 %v3425_v3  ;;  %v3469_v47 = vld [vmem:[%s4776_s1 + $0x420] ss:$8 sps:$4 sm:$0xff]   ;;  %v3484_v3 = vld [vmem:[%s4776_s1 + $0x470] ss:$8 sps:$4 sm:$0xff]  }
  0x34   : > { %671 = vmatprep.subr.bf16.mxu0 %v3351_v48  ;;  %v3474_v48 = vld [vmem:[%s4776_s1 + $0x434] ss:$8 sps:$4 sm:$0xff]  }
  0x36   : > { %444 = vmatpush1.bf16.msra.mxu1 %v3427_v6  ;;  %v3454_v6 = vld [vmem:[%s4776_s1 + $0x2e4] ss:$8 sps:$4 sm:$0xff]  }
  0x37   : > { %672 = vmatpush1.bf16.msra.mxu0 %v3353_v51  ;;  %445 = vmatprep.subr.bf16.mxu1 %v3431_v8  ;;  %v3472_v51 = vld [vmem:[%s4776_s1 + $0x430] ss:$8 sps:$4 sm:$0xff]   ;;  %v3487_v8 = vld [vmem:[%s4776_s1 + $0x480] ss:$8 sps:$4 sm:$0xff]  }
  0x38   : > { %673 = vmatprep.subr.bf16.mxu0 %v3354_v52  ;;  %v3477_v52 = vld [vmem:[%s4776_s1 + $0x444] ss:$8 sps:$4 sm:$0xff]  }
  0x3a   : > { %446 = vmatpush1.bf16.msra.mxu1 %v3433_v11 }
  0x3b   : > { %674 = vmatpush1.bf16.msra.mxu0 %v3356_v56  ;;  %447 = vmatprep.subr.bf16.mxu1 %v3437_v12  ;;  %v3480_v56 = vld [vmem:[%s4776_s1 + $0x454] ss:$8 sps:$4 sm:$0xff]   ;;  %v3490_v12 = vld [vmem:[%s4776_s1 + $0x490] ss:$8 sps:$4 sm:$0xff]  }
  0x3c   : > { %675 = vmatprep.subr.bf16.mxu0 %v3357_v57  ;;  %v3428_v57 = vld [vmem:[%s4776_s1 + $0x2a0] ss:$8 sps:$4 sm:$0xff]  }
  0x3e   : > { %448 = vmatpush1.bf16.msra.mxu1 %v3439_v17  ;;  %v3493_v17 = vld [vmem:[%s4776_s1 + $0x4a0] ss:$8 sps:$4 sm:$0xff]  }
  0x3f   : > { %676 = vmatpush1.bf16.msra.mxu0 %v3359_v62  ;;  %449 = vmatprep.subr.bf16.mxu1 %v3443_v20  ;;  %v3442_v62 = vld [vmem:[%s4776_s1 + $0x2c4] ss:$8 sps:$4 sm:$0xff]   ;;  %v3496_v20 = vld [vmem:[%s4776_s1 + $0x4b0] ss:$8 sps:$4 sm:$0xff]  }
  0x40   : > { %677 = vmatprep.subr.bf16.mxu0 %v3360_v63  ;;  %v3481_v63 = vld [vmem:[%s4776_s1 + $0x460] ss:$8 sps:$4 sm:$0xff]  }
  0x42   : > { %450 = vmatpush1.bf16.msra.mxu1 %v3445_v24  ;;  %v3502_v24 = vld [vmem:[%s4776_s1 + $0x4d0] ss:$8 sps:$4 sm:$0xff]  }
  0x43   : > { %678 = vmatpush1.bf16.msra.mxu0 %v3364_v4  ;;  %451 = vmatprep.subr.bf16.mxu1 %v3449_v26  ;;  %v3489_v4 = vld [vmem:[%s4776_s1 + $0x484] ss:$8 sps:$4 sm:$0xff]  }
  0x44   : > { %907 = vmatprep.subr.bf16.mxu0 %v3370_v5  ;;  %v3446_v5 = vld [vmem:[%s4776_s1 + $0x2d0] ss:$8 sps:$4 sm:$0xff]   ;;  %v3507_v26 = vld [vmem:[%s4776_s1 + $0x4e4] ss:$8 sps:$4 sm:$0xff]  }
  0x46   : > { %680 = vmatmul.mubr.bf16.vlgmr.msra.gmra.mrb[0].mxu0 %v476_v7  ;;  %452 = vmatpush1.bf16.msra.mxu1 %v3451_v31  ;;  %v2842_v7 = vcombine.low %v3886_v28, %v3997_v13  ;;  %v3461_v28 = vld [vmem:[%s4776_s1 + $0x2f4] ss:$8 sps:$4 sm:$0xff]   ;;  %v3459_v13 = vld [vmem:[%s4776_s1 + $0x2f0] ss:$8 sps:$4 sm:$0xff]  }
  0x47   : > { %908 = vmatpush1.bf16.msra.mxu0 %v3368_v9  ;;  %939 = vmatprep.mubr.bf16.mxu0 %v744_v25  ;;  %v3492_v9 = vld [vmem:[%s4776_s1 + $0x494] ss:$8 sps:$4 sm:$0xff]   ;;  %v3505_v25 = vld [vmem:[%s4776_s1 + $0x4e0] ss:$8 sps:$4 sm:$0xff]  }
  0x48   : > { %909 = vmatprep.subr.bf16.mxu0 %v3376_v10  ;;  %453 = vmatprep.subr.bf16.mxu1 %v3455_v32  ;;  %v3452_v10 = vld [vmem:[%s4776_s1 + $0x2e0] ss:$8 sps:$4 sm:$0xff]   ;;  %v734_v11 = vshll.u32 %v2842_v7, 16 }
  0x4a   : > { %454 = vmatpush1.bf16.msra.mxu1 %v3457_v34  ;;  %v736_v15 = vrot.slane %v734_v11, 1  ;;  %v3615_v11 = vld [vmem:[%s4776_s1 + $0x704] ss:$8 sps:$4 sm:$0xff]  }
  0x4b   : > { %910 = vmatpush1.bf16.msra.mxu0 %v3374_v14  ;;  %1238 = vmatprep.subr.bf16.mxu1 %v3465_v35  ;;  %v732_v14 = vshrl.u32 %v2842_v7, 16  ;;  %v952_v35 = vlaneseq }
  0x4c   : > { %911 = vmatprep.subr.bf16.mxu0 %v3382_v16 }
  0x4d   : > { %456 = vmatmul.mubr.bf16.vlgmr.msra.gmra.mrb[0].mxu1 %v2742_v39  ;;  %v737_v16 = vor.u32 %v736_v15, %v732_v14  ;;  %v3616_v15 = vld [vmem:[%s4776_s1 + $0x710] ss:$8 sps:$4 sm:$0xff]  }
  0x4e   : > { %1239 = vmatpush1.bf16.msra.mxu1 %v3463_v38  ;;  %v950_v38 = vld [vmem:[%s4777_s2] sm:$0xf] }
  0x4f   : > { %912 = vmatpush1.bf16.msra.mxu0 %v3380_v21  ;;  %1240 = vmatprep.subr.bf16.mxu1 %v3468_v40  ;;  %v3501_v21 = vld [vmem:[%s4776_s1 + $0x4c4] ss:$8 sps:$4 sm:$0xff]  }
  0x50   : > { %913 = vmatprep.subr.bf16.mxu0 %v3388_v23  ;;  %v3504_v23 = vld [vmem:[%s4776_s1 + $0x4d4] ss:$8 sps:$4 sm:$0xff]  }
  0x52   : > { %1241 = vmatpush1.bf16.msra.mxu1 %v3466_v43 }
  0x53   : > { %914 = vmatpush1.bf16.msra.mxu0 %v3386_v27  ;;  %1242 = vmatprep.subr.bf16.mxu1 %v3471_v44  ;;  %v3510_v27 = vld [vmem:[%s4776_s1 + $0x4f4] ss:$8 sps:$4 sm:$0xff]  }
  0x54   : > { %915 = vmatprep.subr.bf16.mxu0 %v3394_v29  ;;  %v3508_v29 = vld [vmem:[%s4776_s1 + $0x4f0] ss:$8 sps:$4 sm:$0xff]  }
  0x56   : > { %1243 = vmatpush1.bf16.msra.mxu1 %v3469_v47 }
  0x57   : > { %916 = vmatpush1.bf16.msra.mxu0 %v3392_v30  ;;  %1244 = vmatprep.subr.bf16.mxu1 %v3474_v48  ;;  %v3514_v30 = vld [vmem:[%s4776_s1 + $0x304] ss:$8 sps:$4 sm:$0xff]  }
  0x58   : > { %917 = vmatprep.subr.bf16.mxu0 %v3400_v33 }
  0x5a   : > { %1245 = vmatpush1.bf16.msra.mxu1 %v3472_v51 }
  0x5b   : > { %918 = vmatpush1.bf16.msra.mxu0 %v3398_v36  ;;  %1246 = vmatprep.subr.bf16.mxu1 %v3477_v52  ;;  %v953_v36 = vshrl.u32 %v952_v35, 7  ;;  %v3538_v35 = vld [vmem:[%s4776_s1 + $0x374] ss:$8 sps:$4 sm:$0xff]  }
  0x5c   : > { %919 = vmatprep.subr.bf16.mxu0 %v3406_v37 }
  0x5d   : > { %v4212_v37 = vsub.s32 0, %v953_v36  ;;  %v4217_v39 = vsub.s32 2, %v953_v36  ;;  %v4219_v40 = vsub.s32 1, %v953_v36 }
  0x5e   : > { %1247 = vmatpush1.bf16.msra.mxu1 %v3475_v55 }
  0x5f   : > { %920 = vmatpush1.bf16.msra.mxu0 %v3404_v41  ;;  %1248 = vmatprep.subr.bf16.mxu1 %v3480_v56  ;;  %v4221_v41 = vsub.s32 3, %v953_v36  ;;  %v959_v43 = vrot.slane %v950_v38, %v4217_v39  ;;  %v975_v44 = vrot.slane %v950_v38, %v4219_v40  ;;  %v3631_v36 = vld [vmem:[%s4776_s1 + $0x760] ss:$8 sps:$4 sm:$0xff]  }
  0x60   : > { %921 = vmatprep.subr.bf16.mxu0 %v3412_v42  ;;  %v955_v42 = vrot.slane %v950_v38, %v4212_v37 }
  0x61   : > { %v969_v48 = vrot.slane %v959_v43, %v4212_v37  ;;  %v3541_v43 = vld [vmem:[%s4776_s1 + $0x384] ss:$8 sps:$4 sm:$0xff]  }
  0x62   : > { %1249 = vmatpush1.bf16.msra.mxu1 %v3478_v59 }
  0x63   : > { %922 = vmatpush1.bf16.msra.mxu0 %v3410_v45  ;;  %1250 = vmatprep.subr.bf16.mxu1 %v3483_v60  ;;  %v979_v45 = vrot.slane %v950_v38, %v4221_v41  ;;  %v3536_v38 = vld [vmem:[%s4776_s1 + $0x370] ss:$8 sps:$4 sm:$0xff]  }
  0x64   : > { %923 = vmatprep.subr.bf16.mxu0 %v3418_v46  ;;  %v965_v46 = vrot.slane %v955_v42, %v4212_v37  ;;  %v3636_v42 = vld [vmem:[%s4776_s1 + $0x774] ss:$8 sps:$4 sm:$0xff]  }
  0x66   : > { %1251 = vmatpush1.bf16.msra.mxu1 %v3481_v63  ;;  %v4231_v63 = vld [vmem:[#allocation3] sm:$0x88] }
  0x67   : > { %924 = vmatpush1.bf16.msra.mxu0 %v3416_v49  ;;  %1252 = vmatprep.subr.bf16.mxu1 %v3486_v0 }
  0x68   : > { %925 = vmatprep.subr.bf16.mxu0 %v3424_v50  ;;  %v985_v50 = vrot.slane %v975_v44, %v4219_v40  ;;  %v3634_v44 = vld [vmem:[%s4776_s1 + $0x770] ss:$8 sps:$4 sm:$0xff]  }
  0x6a   : > { %1253 = vmatpush1.bf16.msra.mxu1 %v3484_v3 }
  0x6b   : > { %926 = vmatpush1.bf16.msra.mxu0 %v3422_v53  ;;  %1254 = vmatprep.subr.bf16.mxu1 %v3489_v4  ;;  %v989_v53 = vrot.slane %v979_v45, %v4219_v40  ;;  %v3539_v45 = vld [vmem:[%s4776_s1 + $0x380] ss:$8 sps:$4 sm:$0xff]  }
  0x6c   : > { %927 = vmatprep.subr.bf16.mxu0 %v3430_v54 }
  0x6e   : > { %1255 = vmatpush1.bf16.msra.mxu1 %v3487_v8  ;;  %v3613_v8 = vld [vmem:[%s4776_s1 + $0x700] ss:$8 sps:$4 sm:$0xff]  }
  0x6f   : > { %928 = vmatpush1.bf16.msra.mxu0 %v3428_v57  ;;  %1256 = vmatprep.subr.bf16.mxu1 %v3492_v9  ;;  %v3516_v9 = vld [vmem:[%s4776_s1 + $0x310] ss:$8 sps:$4 sm:$0xff]  }
  0x70   : > { %929 = vmatprep.subr.bf16.mxu0 %v3436_v58 }
  0x72   : > { %1257 = vmatpush1.bf16.msra.mxu1 %v3490_v12  ;;  %v3523_v12 = vld [vmem:[%s4776_s1 + $0x324] ss:$8 sps:$4 sm:$0xff]  }
  0x73   : > { %930 = vmatpush1.bf16.msra.mxu0 %v3434_v61  ;;  %1258 = vmatprep.subr.bf16.mxu1 %v3495_v18  ;;  %v3526_v18 = vld [vmem:[%s4776_s1 + $0x334] ss:$8 sps:$4 sm:$0xff]  }
  0x74   : > { %931 = vmatprep.subr.bf16.mxu0 %v3442_v62 }
  0x76   : > { %1259 = vmatpush1.bf16.msra.mxu1 %v3493_v17  ;;  %v3621_v17 = vld [vmem:[%s4776_s1 + $0x724] ss:$8 sps:$4 sm:$0xff]  }
  0x77   : > { %932 = vmatpush1.bf16.msra.mxu0 %v3440_v1  ;;  %1260 = vmatprep.subr.bf16.mxu1 %v3498_v19  ;;  %v3619_v19 = vld [vmem:[%s4776_s1 + $0x720] ss:$8 sps:$4 sm:$0xff]  }
  0x78   : > { %933 = vmatprep.subr.bf16.mxu0 %v3448_v2  ;;  %v3512_v2 = vld [vmem:[%s4776_s1 + $0x300] ss:$8 sps:$4 sm:$0xff]  }
  0x7a   : > { %1261 = vmatpush1.bf16.msra.mxu1 %v3496_v20  ;;  %v3524_v20 = vld [vmem:[%s4776_s1 + $0x330] ss:$8 sps:$4 sm:$0xff]  }
  0x7b   : > { %934 = vmatpush1.bf16.msra.mxu0 %v3446_v5  ;;  %1262 = vmatprep.subr.bf16.mxu1 %v3501_v21  ;;  %v3518_v5 = vld [vmem:[%s4776_s1 + $0x314] ss:$8 sps:$4 sm:$0xff]  }
  0x7c   : > { %935 = vmatprep.subr.bf16.mxu0 %v3454_v6  ;;  %v3624_v21 = vld [vmem:[%s4776_s1 + $0x734] ss:$8 sps:$4 sm:$0xff]  }
  0x7e   : > { %1263 = vmatpush1.bf16.msra.mxu1 %v3499_v22  ;;  %v3529_v22 = vld [vmem:[%s4776_s1 + $0x344] ss:$8 sps:$4 sm:$0xff]  }
  0x7f   : > { %936 = vmatpush1.bf16.msra.mxu0 %v3452_v10  ;;  %1264 = vmatprep.subr.bf16.mxu1 %v3504_v23  ;;  %v3622_v23 = vld [vmem:[%s4776_s1 + $0x730] ss:$8 sps:$4 sm:$0xff]  }
  0x80   : > { %937 = vmatprep.subr.bf16.mxu0 %v3461_v28 }
  0x82   : > { %1265 = vmatpush1.bf16.msra.mxu1 %v3502_v24  ;;  %v3527_v24 = vld [vmem:[%s4776_s1 + $0x340] ss:$8 sps:$4 sm:$0xff]  }
  0x83   : > { %938 = vmatpush1.bf16.msra.mxu0 %v3459_v13  ;;  %1266 = vmatprep.subr.bf16.mxu1 %v3507_v26  ;;  %v3618_v13 = vld [vmem:[%s4776_s1 + $0x714] ss:$8 sps:$4 sm:$0xff]  }
  0x84   : > { %2054 = vmatprep.subr.bf16.mxu0 %v3615_v11  ;;  %v3532_v26 = vld [vmem:[%s4776_s1 + $0x354] ss:$8 sps:$4 sm:$0xff]  }
  0x86   : > { %940 = vmatmul.mubr.bf16.vlgmr.msra.gmra.mrb[0].mxu0 %v737_v16  ;;  %1267 = vmatpush1.bf16.msra.mxu1 %v3505_v25  ;;  %v3521_v16 = vld [vmem:[%s4776_s1 + $0x320] ss:$8 sps:$4 sm:$0xff]   ;;  %v3627_v25 = vld [vmem:[%s4776_s1 + $0x744] ss:$8 sps:$4 sm:$0xff]  }
  0x87   : > { %1268 = vmatprep.subr.bf16.mxu1 %v3510_v27  ;;  %2055 = vmatpush1.bf16.msra.mxu0 %v3613_v8  ;;  %v3625_v27 = vld [vmem:[%s4776_s1 + $0x740] ss:$8 sps:$4 sm:$0xff]   ;;  %v3560_v8 = vld [vmem:[%s4776_s1 + $0x3f0] ss:$8 sps:$4 sm:$0xff]  }
  0x88   : > { %2056 = vmatprep.subr.bf16.mxu0 %v3618_v13 }
  0x8a   : > { %1269 = vmatpush1.bf16.msra.mxu1 %v3508_v29  ;;  %v3530_v29 = vld [vmem:[%s4776_s1 + $0x350] ss:$8 sps:$4 sm:$0xff]  }
  0x8b   : > { %1462 = vmatprep.subr.bf16.mxu1 %v3514_v30  ;;  %2057 = vmatpush1.bf16.msra.mxu0 %v3616_v15  ;;  %v3630_v30 = vld [vmem:[%s4776_s1 + $0x754] ss:$8 sps:$4 sm:$0xff]  }
  0x8c   : > { %2058 = vmatprep.subr.bf16.mxu0 %v3621_v17  ;;  %v3570_v15 = vld [vmem:[%s4776_s1 + $0x514] ss:$8 sps:$4 sm:$0xff]   ;;  %v3568_v17 = vld [vmem:[%s4776_s1 + $0x510] ss:$8 sps:$4 sm:$0xff]  }
  0x8f   : > { %2059 = vmatpush1.bf16.msra.mxu0 %v3619_v19  ;;  %v3571_v19 = vld [vmem:[%s4776_s1 + $0x520] ss:$8 sps:$4 sm:$0xff]  }
  0x90   : > { %2060 = vmatprep.subr.bf16.mxu0 %v3624_v21  ;;  %v3574_v21 = vld [vmem:[%s4776_s1 + $0x530] ss:$8 sps:$4 sm:$0xff]  }
  0x93   : > { %2061 = vmatpush1.bf16.msra.mxu0 %v3622_v23  ;;  %v3577_v23 = vld [vmem:[%s4776_s1 + $0x540] ss:$8 sps:$4 sm:$0xff]  }
  0x94   : > { %2062 = vmatprep.subr.bf16.mxu0 %v3627_v25  ;;  %v3580_v25 = vld [vmem:[%s4776_s1 + $0x550] ss:$8 sps:$4 sm:$0xff]  }
  0x97   : > { %2063 = vmatpush1.bf16.msra.mxu0 %v3625_v27  ;;  %v3583_v27 = vld [vmem:[%s4776_s1 + $0x560] ss:$8 sps:$4 sm:$0xff]  }
  0x98   : > { %2064 = vmatprep.subr.bf16.mxu0 %v3630_v30  ;;  %v3586_v30 = vld [vmem:[%s4776_s1 + $0x570] ss:$8 sps:$4 sm:$0xff]  }
 0x120   : > { %v457_v31 = vpop.f32.mrb[0].mxu1 }
 0x121   : > { %v459_v32 = vpop.f32.mrb[1].mxu1 }
 0x122   : > { %v461_v33 = vpop.f32.mrb[2].mxu1 }
 0x123   : > { %v462_v34 = vpop.f32.mrb[3].mxu1  ;;  %v3533_v33 = vld [vmem:[%s4776_s1 + $0x360] ss:$8 sps:$4 sm:$0xff]  }
 0x124   : > { %v3633_v34 = vld [vmem:[%s4776_s1 + $0x764] ss:$8 sps:$4 sm:$0xff]  }
 0x159   : > { %v941_v47 = vpop.f32.mrb[0].mxu0 }
 0x15a   : > { %v3284_v49 = vadd.f32 %v941_v47, %v457_v31  ;;  %v943_v51 = vpop.f32.mrb[1].mxu0  ;;  %v3535_v31 = vld [vmem:[%s4776_s1 + $0x364] ss:$8 sps:$4 sm:$0xff]   ;;  %v3544_v47 = vld [vmem:[%s4776_s1 + $0x394] ss:$8 sps:$4 sm:$0xff]  }
 0x15b   : > { %v3285_v52 = vadd.f32 %v943_v51, %v459_v32  ;;  %v945_v54 = vpop.f32.mrb[2].mxu0  ;;  %v3628_v32 = vld [vmem:[%s4776_s1 + $0x750] ss:$8 sps:$4 sm:$0xff]   ;;  %v3547_v51 = vld [vmem:[%s4776_s1 + $0x3a4] ss:$8 sps:$4 sm:$0xff]  }
 0x15c   : > { %v970_v55 = vmul.f32 %v3284_v49, %v965_v46  ;;  %v946_v56 = vpop.f32.mrb[3].mxu0  ;;  %2065 = vmatpush1.bf16.msra.mxu0 %v3628_v32  ;;  %v3639_v46 = vld [vmem:[%s4776_s1 + $0x784] ss:$8 sps:$4 sm:$0xff]   ;;  %v3542_v49 = vld [vmem:[%s4776_s1 + $0x390] ss:$8 sps:$4 sm:$0xff]  }
 0x15d   : > { %v971_v57 = vmul.f32 %v3285_v52, %v969_v48  ;;  %2066 = vmatprep.subr.bf16.mxu0 %v3633_v34  ;;  %v3637_v48 = vld [vmem:[%s4776_s1 + $0x780] ss:$8 sps:$4 sm:$0xff]   ;;  %v3640_v52 = vld [vmem:[%s4776_s1 + $0x790] ss:$8 sps:$4 sm:$0xff]   ;;  %v3645_v54 = vld [vmem:[%s4776_s1 + $0x7a4] ss:$8 sps:$4 sm:$0xff]  }
 0x15e   : > { %v990_v58 = vadd.f32 %v985_v50, %v970_v55  ;;  %v3642_v50 = vld [vmem:[%s4776_s1 + $0x794] ss:$8 sps:$4 sm:$0xff]   ;;  %v3643_v56 = vld [vmem:[%s4776_s1 + $0x7a0] ss:$8 sps:$4 sm:$0xff]   ;;  %v3592_v34 = vld [vmem:[%s4776_s1 + $0x590] ss:$8 sps:$4 sm:$0xff]  }
 0x15f   : > { %v991_v59 = vadd.f32 %v989_v53, %v971_v57  ;;  %v3545_v53 = vld [vmem:[%s4776_s1 + $0x3a0] ss:$8 sps:$4 sm:$0xff]   ;;  %v3550_v55 = vld [vmem:[%s4776_s1 + $0x3b4] ss:$8 sps:$4 sm:$0xff]   ;;  %v3548_v57 = vld [vmem:[%s4776_s1 + $0x3b0] ss:$8 sps:$4 sm:$0xff]  }
 0x160   : > { %v992_v60 = vmax.f32 %v990_v58, 0.0  ;;  %2067 = vmatpush1.bf16.msra.mxu0 %v3631_v36  ;;  %v3553_v58 = vld [vmem:[%s4776_s1 + $0x3c4] ss:$8 sps:$4 sm:$0xff]   ;;  %v3589_v32 = vld [vmem:[%s4776_s1 + $0x580] ss:$8 sps:$4 sm:$0xff]  }
 0x161   : > { %v993_v61 = vmax.f32 %v991_v59, 0.0  ;;  %2068 = vmatprep.subr.bf16.mxu0 %v3636_v42  ;;  %v3551_v59 = vld [vmem:[%s4776_s1 + $0x3c0] ss:$8 sps:$4 sm:$0xff]   ;;  %v3598_v42 = vld [vmem:[%s4776_s1 + $0x5b0] ss:$8 sps:$4 sm:$0xff]  }
 0x162   : > { %v3595_v36 = vld [vmem:[%s4776_s1 + $0x5a0] ss:$8 sps:$4 sm:$0xff]  }
 0x163   : > { %v3282_v62 = vpack.c.bf16 %v993_v61, %v992_v60  ;;  %v3556_v60 = vld [vmem:[%s4776_s1 + $0x3d4] ss:$8 sps:$4 sm:$0xff]   ;;  %v4385_v61 = vld [vmem:[#allocation3 + $0x10] sm:$0x11] }
 0x164   : > { %2069 = vmatpush1.bf16.msra.mxu0 %v3634_v44  ;;  %v3601_v44 = vld [vmem:[%s4776_s1 + $0x5c0] ss:$8 sps:$4 sm:$0xff]  }
 0x165   : > { %1002 = vst [vmem:[#allocation3 + $0x8] sm:$0x33] %v3282_v62  ;;  %2070 = vmatprep.subr.bf16.mxu0 %v3639_v46  ;;  %v3554_v62 = vld [vmem:[%s4776_s1 + $0x3d0] ss:$8 sps:$4 sm:$0xff]  }
 0x166   : > { %v3604_v46 = vld [vmem:[%s4776_s1 + $0x5d0] ss:$8 sps:$4 sm:$0xff]  }
 0x168   : > { %2071 = vmatpush1.bf16.msra.mxu0 %v3637_v48  ;;  %v3609_v48 = vld [vmem:[%s4776_s1 + $0x5e4] ss:$8 sps:$4 sm:$0xff]  }
 0x169   : > { %2072 = vmatprep.subr.bf16.mxu0 %v3642_v50  ;;  %v3612_v50 = vld [vmem:[%s4776_s1 + $0x5f4] ss:$8 sps:$4 sm:$0xff]  }
 0x16c   : > { %v4233_v0 = vld [vmem:[#allocation3 + $0x8] sm:$0xff]  ;;  %2073 = vmatpush1.bf16.msra.mxu0 %v3640_v52 }
 0x16d   : > { %v2942_v1 = vcombine.high %v4233_v0, %v4233_v0  ;;  %v2941_v3 = vcombine.low %v4233_v0, %v4233_v0  ;;  %v2976_v4 = vcombine.high %v4231_v63, %v4233_v0  ;;  %2074 = vmatprep.subr.bf16.mxu0 %v3645_v54 }
 0x16f   : > { %1270 = vmatprep.mubr.bf16.mxu1 %v2942_v1  ;;  %v1293_v6 = vshrl.u32 %v2976_v4, 16  ;;  %v1296_v7 = vshll.u32 %v2976_v4, 16  ;;  %v2975_v1 = vcombine.low %v4231_v63, %v4233_v0  ;;  %v3557_v4 = vld [vmem:[%s4776_s1 + $0x3e0] ss:$8 sps:$4 sm:$0xff]  }
 0x170   : > { %1271 = vmatmul.mubr.bf16.vlgmr.msra.gmra.mrb[4].mxu1 %v2941_v3  ;;  %2075 = vmatpush1.bf16.msra.mxu0 %v3643_v56  ;;  %v3042_v3 = vcombine.high %v4233_v0, %v4385_v61  ;;  %v3646_v56 = vld [vmem:[%s4776_s1 + $0x7b0] ss:$8 sps:$4 sm:$0xff]  }
 0x171   : > { %1463 = vmatpush1.bf16.msra.mxu1 %v3512_v2  ;;  %v1295_v10 = vrot.slane %v1293_v6, 3  ;;  %v1298_v28 = vrot.slane %v1296_v7, 4  ;;  %v3559_v2 = vld [vmem:[%s4776_s1 + $0x3e4] ss:$8 sps:$4 sm:$0xff]   ;;  %v1285_v6 = vshrl.u32 %v2975_v1, 16  ;;  %v1288_v63 = vshll.u32 %v2975_v1, 16 }
 0x172   : > { %1464 = vmatprep.subr.bf16.mxu1 %v3518_v5  ;;  %v3562_v5 = vld [vmem:[%s4776_s1 + $0x3f4] ss:$8 sps:$4 sm:$0xff]   ;;  %v1556_v7 = vshll.u32 %v3042_v3, 16  ;;  %v1554_v13 = vshrl.u32 %v3042_v3, 16  ;;  %v3664_v3 = vld [vmem:[%s4776_s1 + $0x604] ss:$8 sps:$4 sm:$0xff]  }
 0x173   : > { %v1299_v14 = vor.u32 %v1298_v28, %v1295_v10  ;;  %v1290_v10 = vrot.slane %v1288_v63, 4  ;;  %v3565_v28 = vld [vmem:[%s4776_s1 + $0x504] ss:$8 sps:$4 sm:$0xff]   ;;  %v3660_v1 = vld [vmem:[%s4776_s1 + $0x7f4] ss:$8 sps:$4 sm:$0xff]  }
 0x174   : > { %v1558_v11 = vrot.slane %v1556_v7, 1 }
 0x175   : > { %1465 = vmatpush1.bf16.msra.mxu1 %v3516_v9  ;;  %1494 = vmatprep.mubr.bf16.mxu1 %v1299_v14  ;;  %v1287_v9 = vrot.slane %v1285_v6, 3 }
 0x176   : > { %1466 = vmatprep.subr.bf16.mxu1 %v3523_v12  ;;  %v3563_v12 = vld [vmem:[%s4776_s1 + $0x500] ss:$8 sps:$4 sm:$0xff]  }
 0x177   : > { %v1291_v14 = vor.u32 %v1290_v10, %v1287_v9 }
 0x179   : > { %1467 = vmatpush1.bf16.msra.mxu1 %v3521_v16  ;;  %v1559_v16 = vor.u32 %v1558_v11, %v1554_v13 }
 0x17a   : > { %1468 = vmatprep.subr.bf16.mxu1 %v3526_v18  ;;  %v3573_v18 = vld [vmem:[%s4776_s1 + $0x524] ss:$8 sps:$4 sm:$0xff]  }
 0x17d   : > { %1469 = vmatpush1.bf16.msra.mxu1 %v3524_v20  ;;  %v3576_v20 = vld [vmem:[%s4776_s1 + $0x534] ss:$8 sps:$4 sm:$0xff]  }
 0x17e   : > { %1470 = vmatprep.subr.bf16.mxu1 %v3529_v22  ;;  %v3579_v22 = vld [vmem:[%s4776_s1 + $0x544] ss:$8 sps:$4 sm:$0xff]  }
 0x181   : > { %1471 = vmatpush1.bf16.msra.mxu1 %v3527_v24  ;;  %v3582_v24 = vld [vmem:[%s4776_s1 + $0x554] ss:$8 sps:$4 sm:$0xff]  }
 0x182   : > { %1472 = vmatprep.subr.bf16.mxu1 %v3532_v26  ;;  %v3585_v26 = vld [vmem:[%s4776_s1 + $0x564] ss:$8 sps:$4 sm:$0xff]  }
 0x185   : > { %1473 = vmatpush1.bf16.msra.mxu1 %v3530_v29  ;;  %v3588_v29 = vld [vmem:[%s4776_s1 + $0x574] ss:$8 sps:$4 sm:$0xff]  }
 0x186   : > { %1474 = vmatprep.subr.bf16.mxu1 %v3535_v31  ;;  %v3591_v31 = vld [vmem:[%s4776_s1 + $0x584] ss:$8 sps:$4 sm:$0xff]  }
 0x189   : > { %1475 = vmatpush1.bf16.msra.mxu1 %v3533_v33  ;;  %v3594_v33 = vld [vmem:[%s4776_s1 + $0x594] ss:$8 sps:$4 sm:$0xff]  }
 0x18a   : > { %1476 = vmatprep.subr.bf16.mxu1 %v3538_v35  ;;  %v3597_v35 = vld [vmem:[%s4776_s1 + $0x5a4] ss:$8 sps:$4 sm:$0xff]  }
 0x18d   : > { %1477 = vmatpush1.bf16.msra.mxu1 %v3536_v38  ;;  %v3600_v38 = vld [vmem:[%s4776_s1 + $0x5b4] ss:$8 sps:$4 sm:$0xff]  }
 0x18e   : > { %1478 = vmatprep.subr.bf16.mxu1 %v3541_v43  ;;  %v3603_v43 = vld [vmem:[%s4776_s1 + $0x5c4] ss:$8 sps:$4 sm:$0xff]  }
 0x191   : > { %1479 = vmatpush1.bf16.msra.mxu1 %v3539_v45  ;;  %v3606_v45 = vld [vmem:[%s4776_s1 + $0x5d4] ss:$8 sps:$4 sm:$0xff]  }
 0x192   : > { %1480 = vmatprep.subr.bf16.mxu1 %v3544_v47  ;;  %v3041_v47 = vcombine.low %v4233_v0, %v4385_v61  ;;  %v3610_v0 = vld [vmem:[%s4776_s1 + $0x5f0] ss:$8 sps:$4 sm:$0xff]   ;;  %v3655_v61 = vld [vmem:[%s4776_s1 + $0x7e0] ss:$8 sps:$4 sm:$0xff]  }
 0x195   : > { %1481 = vmatpush1.bf16.msra.mxu1 %v3542_v49  ;;  %v3607_v49 = vld [vmem:[%s4776_s1 + $0x5e0] ss:$8 sps:$4 sm:$0xff]  }
 0x196   : > { %1482 = vmatprep.subr.bf16.mxu1 %v3547_v51  ;;  %v1549_v51 = vshll.u32 %v3041_v47, 16 }
 0x198   : > { %v1551_v52 = vrot.slane %v1549_v51, 1  ;;  %v3686_v51 = vld [vmem:[%s4776_s1 + $0x670] ss:$8 sps:$4 sm:$0xff]  }
 0x199   : > { %1483 = vmatpush1.bf16.msra.mxu1 %v3545_v53  ;;  %v1547_v53 = vshrl.u32 %v3041_v47, 16  ;;  %v3680_v47 = vld [vmem:[%s4776_s1 + $0x650] ss:$8 sps:$4 sm:$0xff]  }
 0x19a   : > { %1484 = vmatprep.subr.bf16.mxu1 %v3550_v55  ;;  %v3648_v55 = vld [vmem:[%s4776_s1 + $0x7b4] ss:$8 sps:$4 sm:$0xff]  }
 0x19b   : > { %v1552_v54 = vor.u32 %v1551_v52, %v1547_v53  ;;  %2076 = vmatprep.subr.bf16.mxu0 %v3648_v55  ;;  %v3689_v52 = vld [vmem:[%s4776_s1 + $0x680] ss:$8 sps:$4 sm:$0xff]   ;;  %v3694_v53 = vld [vmem:[%s4776_s1 + $0x694] ss:$8 sps:$4 sm:$0xff]   ;;  %v3697_v55 = vld [vmem:[%s4776_s1 + $0x6a4] ss:$8 sps:$4 sm:$0xff]  }
 0x19c   : > { %2077 = vmatpush1.bf16.msra.mxu0 %v3646_v56  ;;  %v3695_v56 = vld [vmem:[%s4776_s1 + $0x6a0] ss:$8 sps:$4 sm:$0xff]  }
 0x19d   : > { %1485 = vmatpush1.bf16.msra.mxu1 %v3548_v57  ;;  %v3651_v57 = vld [vmem:[%s4776_s1 + $0x7c4] ss:$8 sps:$4 sm:$0xff]  }
 0x19e   : > { %1486 = vmatprep.subr.bf16.mxu1 %v3553_v58  ;;  %v3649_v58 = vld [vmem:[%s4776_s1 + $0x7c0] ss:$8 sps:$4 sm:$0xff]   ;;  %2078 = vmatprep.subr.bf16.mxu0 %v3651_v57  ;;  %v3700_v57 = vld [vmem:[%s4776_s1 + $0x6b4] ss:$8 sps:$4 sm:$0xff]  }
 0x1a0   : > { %2079 = vmatpush1.bf16.msra.mxu0 %v3649_v58  ;;  %v3698_v58 = vld [vmem:[%s4776_s1 + $0x6b0] ss:$8 sps:$4 sm:$0xff]  }
 0x1a1   : > { %1487 = vmatpush1.bf16.msra.mxu1 %v3551_v59  ;;  %v3654_v59 = vld [vmem:[%s4776_s1 + $0x7d4] ss:$8 sps:$4 sm:$0xff]  }
 0x1a2   : > { %1488 = vmatprep.subr.bf16.mxu1 %v3556_v60  ;;  %v3652_v60 = vld [vmem:[%s4776_s1 + $0x7d0] ss:$8 sps:$4 sm:$0xff]   ;;  %2080 = vmatprep.subr.bf16.mxu0 %v3654_v59  ;;  %v3703_v59 = vld [vmem:[%s4776_s1 + $0x6c4] ss:$8 sps:$4 sm:$0xff]  }
 0x1a4   : > { %2081 = vmatpush1.bf16.msra.mxu0 %v3652_v60  ;;  %v3701_v60 = vld [vmem:[%s4776_s1 + $0x6c0] ss:$8 sps:$4 sm:$0xff]  }
 0x1a5   : > { %1489 = vmatpush1.bf16.msra.mxu1 %v3554_v62  ;;  %v3657_v62 = vld [vmem:[%s4776_s1 + $0x7e4] ss:$8 sps:$4 sm:$0xff]  }
 0x1a6   : > { %1490 = vmatprep.subr.bf16.mxu1 %v3559_v2  ;;  %2082 = vmatprep.subr.bf16.mxu0 %v3657_v62  ;;  %v3658_v2 = vld [vmem:[%s4776_s1 + $0x7f0] ss:$8 sps:$4 sm:$0xff]  }
 0x1a7   : > { %v4636_v62 = vld [vmem:[#allocation2 + $0x10] sm:$0x11] }
 0x1a8   : > { %2083 = vmatpush1.bf16.msra.mxu0 %v3655_v61  ;;  %v3706_v61 = vld [vmem:[%s4776_s1 + $0x6d4] ss:$8 sps:$4 sm:$0xff]  }
 0x1a9   : > { %1491 = vmatpush1.bf16.msra.mxu1 %v3557_v4  ;;  %2084 = vmatprep.subr.bf16.mxu0 %v3660_v1  ;;  %v3075_v4 = vld [vmem:[%s4777_s2 + $0x4] sm:$0xf]  ;;  %v3704_v1 = vld [vmem:[%s4776_s1 + $0x6d0] ss:$8 sps:$4 sm:$0xff]  }
 0x1aa   : > { %1492 = vmatprep.subr.bf16.mxu1 %v3562_v5  ;;  %v1771_v5 = vrot.slane %v3075_v4, %v4212_v37  ;;  %v1775_v6 = vrot.slane %v3075_v4, %v4217_v39  ;;  %v1791_v63 = vrot.slane %v3075_v4, %v4219_v40  ;;  %v1795_v7 = vrot.slane %v3075_v4, %v4221_v41 }
 0x1ac   : > { %2085 = vmatpush1.bf16.msra.mxu0 %v3658_v2  ;;  %v1785_v9 = vrot.slane %v1775_v6, %v4212_v37  ;;  %v1801_v10 = vrot.slane %v1791_v63, %v4219_v40  ;;  %v1805_v11 = vrot.slane %v1795_v7, %v4219_v40  ;;  %v3712_v6 = vld [vmem:[%s4776_s1 + $0x6f4] ss:$8 sps:$4 sm:$0xff]  }
 0x1ad   : > { %1493 = vmatpush1.bf16.msra.mxu1 %v3560_v8  ;;  %2278 = vmatprep.subr.bf16.mxu0 %v3664_v3  ;;  %v1781_v8 = vrot.slane %v1771_v5, %v4212_v37  ;;  %v3709_v3 = vld [vmem:[%s4776_s1 + $0x6e4] ss:$8 sps:$4 sm:$0xff]   ;;  %v3707_v5 = vld [vmem:[%s4776_s1 + $0x6e0] ss:$8 sps:$4 sm:$0xff]  }
 0x1ae   : > { %1722 = vmatprep.subr.bf16.mxu1 %v3565_v28 }
 0x1b0   : > { %1495 = vmatmul.mubr.bf16.vlgmr.msra.gmra.mrb[4].mxu1 %v1291_v14 }
 0x1b1   : > { %1723 = vmatpush1.bf16.msra.mxu1 %v3563_v12  ;;  %1754 = vmatprep.mubr.bf16.mxu1 %v1559_v16 }
 0x1b2   : > { %1724 = vmatprep.subr.bf16.mxu1 %v3570_v15 }
 0x1b5   : > { %1725 = vmatpush1.bf16.msra.mxu1 %v3568_v17 }
 0x1b6   : > { %1726 = vmatprep.subr.bf16.mxu1 %v3573_v18 }
 0x1b9   : > { %1727 = vmatpush1.bf16.msra.mxu1 %v3571_v19 }
 0x1ba   : > { %1728 = vmatprep.subr.bf16.mxu1 %v3576_v20 }
 0x1bd   : > { %1729 = vmatpush1.bf16.msra.mxu1 %v3574_v21 }
 0x1be   : > { %1730 = vmatprep.subr.bf16.mxu1 %v3579_v22  ;;  %v4548_v22 = vld [vmem:[#allocation2] sm:$0x88] }
 0x1c1   : > { %1731 = vmatpush1.bf16.msra.mxu1 %v3577_v23 }
 0x1c2   : > { %1732 = vmatprep.subr.bf16.mxu1 %v3582_v24 }
 0x1c5   : > { %1733 = vmatpush1.bf16.msra.mxu1 %v3580_v25  ;;  %v3662_v25 = vld [vmem:[%s4776_s1 + $0x600] ss:$8 sps:$4 sm:$0xff]  }
 0x1c6   : > { %1734 = vmatprep.subr.bf16.mxu1 %v3585_v26 }
 0x1c9   : > { %1735 = vmatpush1.bf16.msra.mxu1 %v3583_v27 }
 0x1ca   : > { %1736 = vmatprep.subr.bf16.mxu1 %v3588_v29  ;;  %v3668_v29 = vld [vmem:[%s4776_s1 + $0x614] ss:$8 sps:$4 sm:$0xff]  }
 0x1cd   : > { %1737 = vmatpush1.bf16.msra.mxu1 %v3586_v30 }
 0x1ce   : > { %1738 = vmatprep.subr.bf16.mxu1 %v3591_v31 }
 0x1d1   : > { %1739 = vmatpush1.bf16.msra.mxu1 %v3589_v32  ;;  %v3666_v32 = vld [vmem:[%s4776_s1 + $0x610] ss:$8 sps:$4 sm:$0xff]  }
 0x1d2   : > { %1740 = vmatprep.subr.bf16.mxu1 %v3594_v33 }
 0x1d5   : > { %1741 = vmatpush1.bf16.msra.mxu1 %v3592_v34 }
 0x1d6   : > { %1742 = vmatprep.subr.bf16.mxu1 %v3597_v35  ;;  %v3673_v35 = vld [vmem:[%s4776_s1 + $0x624] ss:$8 sps:$4 sm:$0xff]  }
 0x1d9   : > { %1743 = vmatpush1.bf16.msra.mxu1 %v3595_v36 }
 0x1da   : > { %1744 = vmatprep.subr.bf16.mxu1 %v3600_v38  ;;  %v3671_v38 = vld [vmem:[%s4776_s1 + $0x620] ss:$8 sps:$4 sm:$0xff]  }
 0x1dd   : > { %1745 = vmatpush1.bf16.msra.mxu1 %v3598_v42  ;;  %v3676_v42 = vld [vmem:[%s4776_s1 + $0x634] ss:$8 sps:$4 sm:$0xff]  }
 0x1de   : > { %1746 = vmatprep.subr.bf16.mxu1 %v3603_v43  ;;  %v3674_v43 = vld [vmem:[%s4776_s1 + $0x630] ss:$8 sps:$4 sm:$0xff]  }
 0x1e1   : > { %1747 = vmatpush1.bf16.msra.mxu1 %v3601_v44  ;;  %v3679_v44 = vld [vmem:[%s4776_s1 + $0x644] ss:$8 sps:$4 sm:$0xff]  }
 0x1e2   : > { %1748 = vmatprep.subr.bf16.mxu1 %v3606_v45  ;;  %v3677_v45 = vld [vmem:[%s4776_s1 + $0x640] ss:$8 sps:$4 sm:$0xff]  }
 0x1e5   : > { %1749 = vmatpush1.bf16.msra.mxu1 %v3604_v46  ;;  %v3682_v46 = vld [vmem:[%s4776_s1 + $0x654] ss:$8 sps:$4 sm:$0xff]  }
 0x1e6   : > { %1750 = vmatprep.subr.bf16.mxu1 %v3609_v48  ;;  %v3685_v48 = vld [vmem:[%s4776_s1 + $0x664] ss:$8 sps:$4 sm:$0xff]  }
 0x1e9   : > { %1751 = vmatpush1.bf16.msra.mxu1 %v3607_v49  ;;  %v3683_v49 = vld [vmem:[%s4776_s1 + $0x660] ss:$8 sps:$4 sm:$0xff]  }
 0x1ea   : > { %1752 = vmatprep.subr.bf16.mxu1 %v3612_v50  ;;  %v3688_v50 = vld [vmem:[%s4776_s1 + $0x674] ss:$8 sps:$4 sm:$0xff]  }
 0x1ed   : > { %1753 = vmatpush1.bf16.msra.mxu1 %v3610_v0  ;;  %v3691_v0 = vld [vmem:[%s4776_s1 + $0x684] ss:$8 sps:$4 sm:$0xff]  }
 0x1f0   : > { %1755 = vmatmul.mubr.bf16.vlgmr.msra.gmra.mrb[4].mxu1 %v1552_v54  ;;  %v3692_v54 = vld [vmem:[%s4776_s1 + $0x690] ss:$8 sps:$4 sm:$0xff]  }
 0x2c3   : > { %v1756_v28 = vpop.f32.mrb[4].mxu1 }
 0x2c4   : > { %v1786_v12 = vmul.f32 %v1781_v8, %v1756_v28  ;;  %v1758_v13 = vpop.f32.mrb[5].mxu1 }
 0x2c5   : > { %v1787_v14 = vmul.f32 %v1785_v9, %v1758_v13  ;;  %v1760_v15 = vpop.f32.mrb[6].mxu1  ;;  %v3710_v9 = vld [vmem:[%s4776_s1 + $0x6f0] ss:$8 sps:$4 sm:$0xff]   ;;  %v3713_v13 = vld [vmem:[%s4776_s1 + $0x800] ss:$8 sps:$4 sm:$0xff]  }
 0x2c6   : > { %v1806_v16 = vadd.f32 %v1801_v10, %v1786_v12  ;;  %v1761_v17 = vpop.f32.mrb[7].mxu1 }
 0x2c7   : > { %v1807_v18 = vadd.f32 %v1805_v11, %v1787_v14  ;;  %v3715_v11 = vld [vmem:[%s4776_s1 + $0x804] ss:$8 sps:$4 sm:$0xff]  }
 0x2c8   : > { %v1808_v19 = vmax.f32 %v1806_v16, 0.0  ;;  %v3720_v16 = vld [vmem:[%s4776_s1 + $0x814] ss:$8 sps:$4 sm:$0xff]  }
 0x2c9   : > { %v1809_v20 = vmax.f32 %v1807_v18, 0.0  ;;  %v3718_v18 = vld [vmem:[%s4776_s1 + $0x810] ss:$8 sps:$4 sm:$0xff]  }
 0x2cb   : > { %v3283_v21 = vpack.c.bf16 %v1809_v20, %v1808_v19  ;;  %v3723_v19 = vld [vmem:[%s4776_s1 + $0x824] ss:$8 sps:$4 sm:$0xff]   ;;  %v3721_v20 = vld [vmem:[%s4776_s1 + $0x820] ss:$8 sps:$4 sm:$0xff]  }
 0x2cd   : > { %1818 = vst [vmem:[#allocation2 + $0x8] sm:$0x33] %v3283_v21  ;;  %v3726_v21 = vld [vmem:[%s4776_s1 + $0x834] ss:$8 sps:$4 sm:$0xff]  }
 0x2d4   : > { %v4550_v23 = vld [vmem:[#allocation2 + $0x8] sm:$0xff] }
 0x2d5   : > { %v3142_v24 = vcombine.high %v4550_v23, %v4550_v23  ;;  %v3141_v26 = vcombine.low %v4550_v23, %v4550_v23  ;;  %v3176_v27 = vcombine.high %v4548_v22, %v4550_v23  ;;  %v3175_v2 = vcombine.low %v4548_v22, %v4550_v23  ;;  %v3724_v22 = vld [vmem:[%s4776_s1 + $0x830] ss:$8 sps:$4 sm:$0xff]  }
 0x2d6   : > { %v3242_v4 = vcombine.high %v4550_v23, %v4636_v62 }
 0x2d7   : > { %2086 = vmatprep.mubr.bf16.mxu0 %v3142_v24  ;;  %v2109_v30 = vshrl.u32 %v3176_v27, 16  ;;  %v2112_v31 = vshll.u32 %v3176_v27, 16  ;;  %v2101_v63 = vshrl.u32 %v3175_v2, 16  ;;  %v2104_v7 = vshll.u32 %v3175_v2, 16  ;;  %v3729_v24 = vld [vmem:[%s4776_s1 + $0x844] ss:$8 sps:$4 sm:$0xff]  }
 0x2d8   : > { %2087 = vmatmul.mubr.bf16.vlgmr.msra.gmra.mrb[4].mxu0 %v3141_v26  ;;  %v2372_v8 = vshll.u32 %v3242_v4, 16  ;;  %v2370_v14 = vshrl.u32 %v3242_v4, 16  ;;  %v3732_v26 = vld [vmem:[%s4776_s1 + $0x854] ss:$8 sps:$4 sm:$0xff]   ;;  %v3730_v27 = vld [vmem:[%s4776_s1 + $0x850] ss:$8 sps:$4 sm:$0xff]  }
 0x2d9   : > { %2279 = vmatpush1.bf16.msra.mxu0 %v3662_v25  ;;  %v2111_v33 = vrot.slane %v2109_v30, 3  ;;  %v2114_v34 = vrot.slane %v2112_v31, 4  ;;  %v2103_v10 = vrot.slane %v2101_v63, 3  ;;  %v2106_v28 = vrot.slane %v2104_v7, 4  ;;  %v3727_v25 = vld [vmem:[%s4776_s1 + $0x840] ss:$8 sps:$4 sm:$0xff]  }
 0x2da   : > { %2280 = vmatprep.subr.bf16.mxu0 %v3668_v29  ;;  %v2374_v12 = vrot.slane %v2372_v8, 1  ;;  %v3735_v29 = vld [vmem:[%s4776_s1 + $0x864] ss:$8 sps:$4 sm:$0xff]   ;;  %v3733_v30 = vld [vmem:[%s4776_s1 + $0x860] ss:$8 sps:$4 sm:$0xff]  }
 0x2db   : > { %v2115_v36 = vor.u32 %v2114_v34, %v2111_v33  ;;  %v2107_v15 = vor.u32 %v2106_v28, %v2103_v10  ;;  %v3738_v31 = vld [vmem:[%s4776_s1 + $0x874] ss:$8 sps:$4 sm:$0xff]   ;;  %v3741_v33 = vld [vmem:[%s4776_s1 + $0x884] ss:$8 sps:$4 sm:$0xff]   ;;  %v3739_v34 = vld [vmem:[%s4776_s1 + $0x880] ss:$8 sps:$4 sm:$0xff]  }
 0x2dc   : > { %v2375_v17 = vor.u32 %v2374_v12, %v2370_v14 }
 0x2dd   : > { %2281 = vmatpush1.bf16.msra.mxu0 %v3666_v32  ;;  %2310 = vmatprep.mubr.bf16.mxu0 %v2115_v36  ;;  %v3736_v32 = vld [vmem:[%s4776_s1 + $0x870] ss:$8 sps:$4 sm:$0xff]  }
 0x2de   : > { %2282 = vmatprep.subr.bf16.mxu0 %v3673_v35  ;;  %v3744_v35 = vld [vmem:[%s4776_s1 + $0x894] ss:$8 sps:$4 sm:$0xff]   ;;  %v3742_v36 = vld [vmem:[%s4776_s1 + $0x890] ss:$8 sps:$4 sm:$0xff]  }
 0x2e1   : > { %2283 = vmatpush1.bf16.msra.mxu0 %v3671_v38  ;;  %v3747_v38 = vld [vmem:[%s4776_s1 + $0x8a4] ss:$8 sps:$4 sm:$0xff]  }
 0x2e2   : > { %2284 = vmatprep.subr.bf16.mxu0 %v3676_v42  ;;  %v3745_v42 = vld [vmem:[%s4776_s1 + $0x8a0] ss:$8 sps:$4 sm:$0xff]  }
 0x2e5   : > { %2285 = vmatpush1.bf16.msra.mxu0 %v3674_v43  ;;  %v3750_v43 = vld [vmem:[%s4776_s1 + $0x8b4] ss:$8 sps:$4 sm:$0xff]  }
 0x2e6   : > { %2286 = vmatprep.subr.bf16.mxu0 %v3679_v44  ;;  %v3748_v44 = vld [vmem:[%s4776_s1 + $0x8b0] ss:$8 sps:$4 sm:$0xff]  }
 0x2e9   : > { %2287 = vmatpush1.bf16.msra.mxu0 %v3677_v45  ;;  %v3753_v45 = vld [vmem:[%s4776_s1 + $0x8c4] ss:$8 sps:$4 sm:$0xff]  }
 0x2ea   : > { %2288 = vmatprep.subr.bf16.mxu0 %v3682_v46  ;;  %v3751_v46 = vld [vmem:[%s4776_s1 + $0x8c0] ss:$8 sps:$4 sm:$0xff]  }
 0x2ed   : > { %2289 = vmatpush1.bf16.msra.mxu0 %v3680_v47  ;;  %v3756_v47 = vld [vmem:[%s4776_s1 + $0x8d4] ss:$8 sps:$4 sm:$0xff]  }
 0x2ee   : > { %2290 = vmatprep.subr.bf16.mxu0 %v3685_v48  ;;  %v3754_v48 = vld [vmem:[%s4776_s1 + $0x8d0] ss:$8 sps:$4 sm:$0xff]  }
 0x2f1   : > { %2291 = vmatpush1.bf16.msra.mxu0 %v3683_v49  ;;  %v3241_v49 = vcombine.low %v4550_v23, %v4636_v62  ;;  %v3760_v23 = vld [vmem:[%s4776_s1 + $0x8f0] ss:$8 sps:$4 sm:$0xff]  }
 0x2f2   : > { %2292 = vmatprep.subr.bf16.mxu0 %v3688_v50  ;;  %v3759_v50 = vld [vmem:[%s4776_s1 + $0x8e4] ss:$8 sps:$4 sm:$0xff]  }
 0x2f5   : > { %2293 = vmatpush1.bf16.msra.mxu0 %v3686_v51  ;;  %v3757_v51 = vld [vmem:[%s4776_s1 + $0x8e0] ss:$8 sps:$4 sm:$0xff]  }
 0x2f6   : > { %2294 = vmatprep.subr.bf16.mxu0 %v3691_v0  ;;  %v3762_v0 = vld [vmem:[%s4776_s1 + $0x8f4] ss:$8 sps:$4 sm:$0xff]  }
 0x2f9   : > { %2295 = vmatpush1.bf16.msra.mxu0 %v3689_v52  ;;  %v2365_v52 = vshll.u32 %v3241_v49, 16 }
 0x2fa   : > { %2296 = vmatprep.subr.bf16.mxu0 %v3694_v53 }
 0x2fb   : > { %v2367_v53 = vrot.slane %v2365_v52, 1 }
 0x2fd   : > { %2297 = vmatpush1.bf16.msra.mxu0 %v3692_v54  ;;  %v2363_v54 = vshrl.u32 %v3241_v49, 16 }
 0x2fe   : > { %2298 = vmatprep.subr.bf16.mxu0 %v3697_v55 }
 0x2ff   : > { %v2368_v55 = vor.u32 %v2367_v53, %v2363_v54 }
 0x301   : > { %2299 = vmatpush1.bf16.msra.mxu0 %v3695_v56  ;;  %v3275_v56 = vld [vmem:[%s4777_s2 + $0x8] sm:$0xf] }
 0x302   : > { %2300 = vmatprep.subr.bf16.mxu0 %v3700_v57  ;;  %v2587_v57 = vrot.slane %v3275_v56, %v4212_v37 }
 0x304   : > { %v2597_v62 = vrot.slane %v2587_v57, %v4212_v37 }
 0x305   : > { %2301 = vmatpush1.bf16.msra.mxu0 %v3698_v58  ;;  %v2591_v58 = vrot.slane %v3275_v56, %v4217_v39 }
 0x306   : > { %2302 = vmatprep.subr.bf16.mxu0 %v3703_v59  ;;  %v2607_v59 = vrot.slane %v3275_v56, %v4219_v40 }
 0x307   : > { %v2601_v2 = vrot.slane %v2591_v58, %v4212_v37 }
 0x309   : > { %2303 = vmatpush1.bf16.msra.mxu0 %v3701_v60  ;;  %v2624_v60 = vld [vmem:[%s3847_s18] sm:$0xf] }
 0x30a   : > { %2304 = vmatprep.subr.bf16.mxu0 %v3706_v61  ;;  %v2611_v61 = vrot.slane %v3275_v56, %v4221_v41 }
 0x30d   : > { %2305 = vmatpush1.bf16.msra.mxu0 %v3704_v1  ;;  %v2625_v1 = vunpack.c.l.bf16 %v2624_v60 }
 0x30e   : > { %2306 = vmatprep.subr.bf16.mxu0 %v3709_v3  ;;  %v2617_v3 = vrot.slane %v2607_v59, %v4219_v40 }
 0x30f   : > { %v2627_v39 = vcombine.high %v2625_v1, %v2625_v1 }
 0x311   : > { %2307 = vmatpush1.bf16.msra.mxu0 %v3707_v5  ;;  %v2621_v5 = vrot.slane %v2611_v61, %v4219_v40 }
 0x312   : > { %2308 = vmatprep.subr.bf16.mxu0 %v3712_v6 }
 0x315   : > { %2309 = vmatpush1.bf16.msra.mxu0 %v3710_v9 }
 0x316   : > { %2538 = vmatprep.subr.bf16.mxu0 %v3715_v11 }
 0x318   : > { %2311 = vmatmul.mubr.bf16.vlgmr.msra.gmra.mrb[4].mxu0 %v2107_v15 }
 0x319   : > { %2539 = vmatpush1.bf16.msra.mxu0 %v3713_v13  ;;  %2570 = vmatprep.mubr.bf16.mxu0 %v2375_v17 }
 0x31a   : > { %2540 = vmatprep.subr.bf16.mxu0 %v3720_v16 }
 0x31d   : > { %2541 = vmatpush1.bf16.msra.mxu0 %v3718_v18 }
 0x31e   : > { %2542 = vmatprep.subr.bf16.mxu0 %v3723_v19 }
 0x321   : > { %2543 = vmatpush1.bf16.msra.mxu0 %v3721_v20 }
 0x322   : > { %2544 = vmatprep.subr.bf16.mxu0 %v3726_v21 }
 0x325   : > { %2545 = vmatpush1.bf16.msra.mxu0 %v3724_v22 }
 0x326   : > { %2546 = vmatprep.subr.bf16.mxu0 %v3729_v24 }
 0x329   : > { %2547 = vmatpush1.bf16.msra.mxu0 %v3727_v25 }
 0x32a   : > { %2548 = vmatprep.subr.bf16.mxu0 %v3732_v26 }
 0x32d   : > { %2549 = vmatpush1.bf16.msra.mxu0 %v3730_v27 }
 0x32e   : > { %2550 = vmatprep.subr.bf16.mxu0 %v3735_v29 }
 0x331   : > { %2551 = vmatpush1.bf16.msra.mxu0 %v3733_v30 }
 0x332   : > { %2552 = vmatprep.subr.bf16.mxu0 %v3738_v31 }
 0x335   : > { %2553 = vmatpush1.bf16.msra.mxu0 %v3736_v32 }
 0x336   : > { %2554 = vmatprep.subr.bf16.mxu0 %v3741_v33 }
 0x339   : > { %2555 = vmatpush1.bf16.msra.mxu0 %v3739_v34 }
 0x33a   : > { %2556 = vmatprep.subr.bf16.mxu0 %v3744_v35 }
 0x33d   : > { %2557 = vmatpush1.bf16.msra.mxu0 %v3742_v36 }
 0x33e   : > { %2558 = vmatprep.subr.bf16.mxu0 %v3747_v38 }
 0x341   : > { %2559 = vmatpush1.bf16.msra.mxu0 %v3745_v42 }
 0x342   : > { %2560 = vmatprep.subr.bf16.mxu0 %v3750_v43 }
 0x345   : > { %2561 = vmatpush1.bf16.msra.mxu0 %v3748_v44 }
 0x346   : > { %2562 = vmatprep.subr.bf16.mxu0 %v3753_v45 }
 0x349   : > { %2563 = vmatpush1.bf16.msra.mxu0 %v3751_v46 }
 0x34a   : > { %2564 = vmatprep.subr.bf16.mxu0 %v3756_v47 }
 0x34d   : > { %2565 = vmatpush1.bf16.msra.mxu0 %v3754_v48 }
 0x34e   : > { %2566 = vmatprep.subr.bf16.mxu0 %v3759_v50 }
 0x351   : > { %2567 = vmatpush1.bf16.msra.mxu0 %v3757_v51 }
 0x352   : > { %2568 = vmatprep.subr.bf16.mxu0 %v3762_v0 }
 0x355   : > { %2569 = vmatpush1.bf16.msra.mxu0 %v3760_v23 }
 0x358   : > { %2571 = vmatmul.mubr.bf16.vlgmr.msra.gmra.mrb[4].mxu0 %v2368_v55 }
 0x42b   : > { %v2572_v4 = vpop.f32.mrb[4].mxu0 }
 0x42c   : > { %v2602_v6 = vmul.f32 %v2597_v62, %v2572_v4  ;;  %v2574_v63 = vpop.f32.mrb[5].mxu0 }
 0x42d   : > { %v2603_v7 = vmul.f32 %v2601_v2, %v2574_v63  ;;  %v2576_v8 = vpop.f32.mrb[6].mxu0 }
 0x42e   : > { %v2622_v9 = vadd.f32 %v2617_v3, %v2602_v6  ;;  %v2577_v10 = vpop.f32.mrb[7].mxu0 }
 0x42f   : > { %v2623_v28 = vadd.f32 %v2621_v5, %v2603_v7 }
 0x430   : > { %v2629_v41 = vadd.f32 %v2625_v1, %v2622_v9 }
 0x431   : > { %v2630_v11 = vadd.f32 %v2627_v39, %v2623_v28 }
 0x433   : > { %v3276_v37 = vpack.c.bf16 %v2630_v11, %v2629_v41 }
 0x435   : > { %3277 = vst.sshfl [vmem:[%s170_s24] sm:$0x33 pattern:$0x76325410] %v3276_v37 }
 0x436 PF: > { %s13_s12 = sadd.s32 1, %s3769_s12  }
 0x437   : > { %p10_p4 = scmp.ge.s32.totalorder %s13_s12, 4  }
 0x439   :  { %12 = sbr.rel (!%p10_p4) target bundleno = 1 (0x1), region = 72 }

// kernel: encoder_forward.21
= control target key start
LH: loop header
LB: loop body
LE: loop exit
PB: predicated region body
PF: predicated region fallthrough
CT: control target
= control target key end

     0   :  { %s3808_s12 = smov 0   ;;  %s4799_s0 = inlined_call_operand.vmem [shape: bf16[2,2,256], index: 0, kind: input, shape index: {}]   ;;  %s4800_s1 = inlined_call_operand.vmem [shape: bf16[3,3,256,256], index: 1, kind: input, shape index: {}]   ;;  %s4801_s2 = inlined_call_operand.vmem [shape: f32[3,2,256], index: 2, kind: input, shape index: {}]   ;;  %s4802_s3 = inlined_call_operand.vmem [shape: bf16[2,2,256], index: 3, kind: output, shape index: {}]  }
   0x1 LB: > { %s2715_s13 = sadd.s32 4294967295, %s3783_s12   ;;  %p2719_p0 = scmp.ge.s32.totalorder %s3783_s12, 1  ;;  %s3783_s12 = sphi %s3808_s12, %s13_s12  }
   0x2   : > { %p136_p1 = scmp.lt.s32.totalorder %s3783_s12, 3 }
   0x4   : > { %p137_p2 = pnand %p2719_p0, %p136_p1 }
   0x5   : > { %v3329_v0 = vld [vmem:[%s4800_s1 + $0x4] ss:$8 sps:$4 sm:$0xff] (!%p137_p2)   ;;  %v3331_v1 = vld [vmem:[%s4800_s1] ss:$8 sps:$4 sm:$0xff] (!%p137_p2)   ;;  %v3785_v2 = vmov (!%p137_p2), 0   ;;  %p158_p3 = scmp.lt.s32.totalorder (!%p137_p2), %s2715_s13, 1 }
   0x6   : > { %140 = sbr.rel (%p137_p2) target bundleno = 1080 (0x438), region = 32  ;;  %167 = vst [vmem:[#allocation2] sm:$0xff] (!%p137_p2), %v3785_v2  ;;  %168 = vst [vmem:[#allocation2 + $0x8] sm:$0xee] (!%p137_p2), %v3785_v2  ;;  %649 = vmatprep.subr.bf16.mxu0 (!%p137_p2), %v3329_v0  ;;  %v3332_v3 = vld [vmem:[%s4800_s1 + $0x14] ss:$8 sps:$4 sm:$0xff] (!%p137_p2)  }
   0x7   : > { %169 = vst [vmem:[#allocation2 + $0x10] sm:$0xff] (!%p137_p2), %v3785_v2  ;;  %170 = vst [vmem:[#allocation3] sm:$0xff] (!%p137_p2), %v3785_v2  ;;  %650 = vmatpush1.bf16.msra.mxu0 (!%p137_p2), %v3331_v1  ;;  %v3334_v4 = vld [vmem:[%s4800_s1 + $0x10] ss:$8 sps:$4 sm:$0xff] (!%p137_p2)   ;;  %v3335_v5 = vld [vmem:[%s4800_s1 + $0x24] ss:$8 sps:$4 sm:$0xff] (!%p137_p2)  }
   0x8   : > { %171 = vst [vmem:[#allocation3 + $0x8] sm:$0xee] (!%p137_p2), %v3785_v2  ;;  %172 = vst [vmem:[#allocation3 + $0x10] sm:$0xff] (!%p137_p2), %v3785_v2  ;;  %651 = vmatprep.subr.bf16.mxu0 (!%p137_p2), %v3332_v3  ;;  %v3337_v6 = vld [vmem:[%s4800_s1 + $0x20] ss:$8 sps:$4 sm:$0xff] (!%p137_p2)  }
   0x9   : > { %v3338_v7 = vld [vmem:[%s4800_s1 + $0x34] ss:$8 sps:$4 sm:$0xff] (!%p137_p2)   ;;  %v3340_v8 = vld [vmem:[%s4800_s1 + $0x30] ss:$8 sps:$4 sm:$0xff] (!%p137_p2)   ;;  %v3341_v9 = vld [vmem:[%s4800_s1 + $0x44] ss:$8 sps:$4 sm:$0xff] (!%p137_p2)  }
   0xa   : > { %v3343_v10 = vld [vmem:[%s4800_s1 + $0x40] ss:$8 sps:$4 sm:$0xff] (!%p137_p2)   ;;  %v3344_v11 = vld [vmem:[%s4800_s1 + $0x54] ss:$8 sps:$4 sm:$0xff] (!%p137_p2)   ;;  %v3346_v12 = vld [vmem:[%s4800_s1 + $0x50] ss:$8 sps:$4 sm:$0xff] (!%p137_p2)  }
   0xb   : > { %652 = vmatpush1.bf16.msra.mxu0 (!%p137_p2), %v3334_v4  ;;  %v3347_v13 = vld [vmem:[%s4800_s1 + $0x64] ss:$8 sps:$4 sm:$0xff] (!%p137_p2)   ;;  %v3349_v15 = vld [vmem:[%s4800_s1 + $0x60] ss:$8 sps:$4 sm:$0xff] (!%p137_p2)   ;;  %v3350_v18 = vld [vmem:[%s4800_s1 + $0x74] ss:$8 sps:$4 sm:$0xff] (!%p137_p2)  }
   0xc   : > { %653 = vmatprep.subr.bf16.mxu0 (!%p137_p2), %v3335_v5  ;;  %v3376_v14 = vld [vmem:[%s4800_s1 + $0x104] ss:$8 sps:$4 sm:$0xff] (!%p137_p2)   ;;  %v3379_v16 = vld [vmem:[%s4800_s1 + $0x100] ss:$8 sps:$4 sm:$0xff] (!%p137_p2)   ;;  %v3385_v19 = vld [vmem:[%s4800_s1 + $0x114] ss:$8 sps:$4 sm:$0xff] (!%p137_p2)  }
   0xd   : > { %s4804_s13 = smov (!%p158_p3, %s2715_s13), 1  ;;  %425 = vmatprep.subr.bf16.mxu1 %v3376_v14  ;;  %v3387_v20 = vld [vmem:[%s4800_s1 + $0x110] ss:$8 sps:$4 sm:$0xff]   ;;  %v3353_v22 = vld [vmem:[%s4800_s1 + $0x84] ss:$8 sps:$4 sm:$0xff]  }
   0xe   : > { %s2720_s9 = sshll.u32 %s4804_s13, 1  ;;  %426 = vmatpush1.bf16.msra.mxu1 %v3379_v16  ;;  %v3352_v21 = vld [vmem:[%s4800_s1 + $0x70] ss:$8 sps:$4 sm:$0xff]   ;;  %v3391_v23 = vld [vmem:[%s4800_s1 + $0x124] ss:$8 sps:$4 sm:$0xff]  }
   0xf   : > { %654 = vmatpush1.bf16.msra.mxu0 %v3337_v6  ;;  %s3863_s18 = scalar_lea.vmem %s4799_s0, %s2720_s9  ;;  %427 = vmatprep.subr.bf16.mxu1 %v3385_v19  ;;  %v3393_v24 = vld [vmem:[%s4800_s1 + $0x120] ss:$8 sps:$4 sm:$0xff]   ;;  %v3397_v26 = vld [vmem:[%s4800_s1 + $0x134] ss:$8 sps:$4 sm:$0xff]   ;;  %v3399_v31 = vld [vmem:[%s4800_s1 + $0x130] ss:$8 sps:$4 sm:$0xff]   ;;  %s165_s24 = scalar_lea.vmem %s4802_s3, %s2720_s9 }
  0x10   : > { %655 = vmatprep.subr.bf16.mxu0 %v3338_v7  ;;  %v2722_v17 = vld.sshfl [vmem:[%s3863_s18] sm:$0x5 pattern:$0x73625140]  ;;  %v191_v25 = vld [vmem:[#allocation2] sm:$0x88] }
  0x11   : > { %2723 = vst.sshfl [vmem:[#allocation2 + $0x8] sm:$0x5 pattern:$0x75316420] %v2722_v17  ;;  %v3355_v27 = vld [vmem:[%s4800_s1 + $0x80] ss:$8 sps:$4 sm:$0xff]  }
  0x12   : > { %428 = vmatpush1.bf16.msra.mxu1 %v3387_v20  ;;  %v3356_v29 = vld [vmem:[%s4800_s1 + $0x94] ss:$8 sps:$4 sm:$0xff]   ;;  %v3403_v33 = vld [vmem:[%s4800_s1 + $0x144] ss:$8 sps:$4 sm:$0xff]   ;;  %v3358_v36 = vld [vmem:[%s4800_s1 + $0x90] ss:$8 sps:$4 sm:$0xff]  }
  0x13   : > { %656 = vmatpush1.bf16.msra.mxu0 %v3340_v8  ;;  %429 = vmatprep.subr.bf16.mxu1 %v3391_v23  ;;  %v3359_v37 = vld [vmem:[%s4800_s1 + $0xa4] ss:$8 sps:$4 sm:$0xff]   ;;  %v3405_v40 = vld [vmem:[%s4800_s1 + $0x140] ss:$8 sps:$4 sm:$0xff]   ;;  %v3409_v42 = vld [vmem:[%s4800_s1 + $0x154] ss:$8 sps:$4 sm:$0xff]  }
  0x14   : > { %657 = vmatprep.subr.bf16.mxu0 %v3341_v9  ;;  %v3361_v43 = vld [vmem:[%s4800_s1 + $0xa0] ss:$8 sps:$4 sm:$0xff]   ;;  %v3362_v44 = vld [vmem:[%s4800_s1 + $0xb4] ss:$8 sps:$4 sm:$0xff]   ;;  %v3411_v45 = vld [vmem:[%s4800_s1 + $0x150] ss:$8 sps:$4 sm:$0xff]  }
  0x15   : > { %v3415_v46 = vld [vmem:[%s4800_s1 + $0x164] ss:$8 sps:$4 sm:$0xff]   ;;  %v3364_v47 = vld [vmem:[%s4800_s1 + $0xb0] ss:$8 sps:$4 sm:$0xff]   ;;  %v3417_v49 = vld [vmem:[%s4800_s1 + $0x160] ss:$8 sps:$4 sm:$0xff]  }
  0x16   : > { %430 = vmatpush1.bf16.msra.mxu1 %v3393_v24  ;;  %v3365_v48 = vld [vmem:[%s4800_s1 + $0xc4] ss:$8 sps:$4 sm:$0xff]   ;;  %v3421_v50 = vld [vmem:[%s4800_s1 + $0x174] ss:$8 sps:$4 sm:$0xff]   ;;  %v3367_v51 = vld [vmem:[%s4800_s1 + $0xc0] ss:$8 sps:$4 sm:$0xff]  }
  0x17   : > { %658 = vmatpush1.bf16.msra.mxu0 %v3343_v10  ;;  %431 = vmatprep.subr.bf16.mxu1 %v3397_v26  ;;  %v3368_v52 = vld [vmem:[%s4800_s1 + $0xd4] ss:$8 sps:$4 sm:$0xff]   ;;  %v3423_v53 = vld [vmem:[%s4800_s1 + $0x170] ss:$8 sps:$4 sm:$0xff]   ;;  %v3427_v55 = vld [vmem:[%s4800_s1 + $0x184] ss:$8 sps:$4 sm:$0xff]  }
  0x18   : > { %659 = vmatprep.subr.bf16.mxu0 %v3344_v11  ;;  %v3902_v28 = vld [vmem:[#allocation2 + $0x8] sm:$0xff]  ;;  %v3370_v56 = vld [vmem:[%s4800_s1 + $0xd0] ss:$8 sps:$4 sm:$0xff]   ;;  %v3433_v61 = vld [vmem:[%s4800_s1 + $0x194] ss:$8 sps:$4 sm:$0xff]  }
  0x19   : > { %v2791_v30 = vcombine.high %v191_v25, %v3902_v28  ;;  %v2757_v32 = vcombine.high %v3902_v28, %v3902_v28  ;;  %v2790_v54 = vcombine.low %v191_v25, %v3902_v28  ;;  %v3371_v57 = vld [vmem:[%s4800_s1 + $0xe4] ss:$8 sps:$4 sm:$0xff]   ;;  %v3429_v58 = vld [vmem:[%s4800_s1 + $0x180] ss:$8 sps:$4 sm:$0xff]   ;;  %v3374_v63 = vld [vmem:[%s4800_s1 + $0xf4] ss:$8 sps:$4 sm:$0xff]  }
  0x1a   : > { %432 = vmatpush1.bf16.msra.mxu1 %v3399_v31  ;;  %v3373_v62 = vld [vmem:[%s4800_s1 + $0xe0] ss:$8 sps:$4 sm:$0xff]   ;;  %v3435_v0 = vld [vmem:[%s4800_s1 + $0x190] ss:$8 sps:$4 sm:$0xff]   ;;  %v3439_v3 = vld [vmem:[%s4800_s1 + $0x1a4] ss:$8 sps:$4 sm:$0xff]  }
  0x1b   : > { %660 = vmatpush1.bf16.msra.mxu0 %v3346_v12  ;;  %v480_v34 = vshrl.u32 %v2791_v30, 16  ;;  %v483_v35 = vshll.u32 %v2791_v30, 16  ;;  %457 = vmatprep.mubr.bf16.mxu1 %v2757_v32  ;;  %v472_v59 = vshrl.u32 %v2790_v54, 16  ;;  %v475_v60 = vshll.u32 %v2790_v54, 16  ;;  %v3378_v4 = vld [vmem:[%s4800_s1 + $0xf0] ss:$8 sps:$4 sm:$0xff]  }
  0x1c   : > { %661 = vmatprep.subr.bf16.mxu0 %v3347_v13  ;;  %433 = vmatprep.subr.bf16.mxu1 %v3403_v33  ;;  %v3384_v5 = vld [vmem:[%s4800_s1 + $0x204] ss:$8 sps:$4 sm:$0xff]   ;;  %v3441_v6 = vld [vmem:[%s4800_s1 + $0x1a0] ss:$8 sps:$4 sm:$0xff]   ;;  %v3445_v8 = vld [vmem:[%s4800_s1 + $0x1b4] ss:$8 sps:$4 sm:$0xff]  }
  0x1d   : > { %v482_v38 = vrot.slane %v480_v34, 3  ;;  %v485_v39 = vrot.slane %v483_v35, 4  ;;  %v474_v1 = vrot.slane %v472_v59, 3  ;;  %v477_v2 = vrot.slane %v475_v60, 4  ;;  %v3382_v9 = vld [vmem:[%s4800_s1 + $0x200] ss:$8 sps:$4 sm:$0xff]  }
  0x1e   : > { %434 = vmatpush1.bf16.msra.mxu1 %v3405_v40  ;;  %v3390_v10 = vld [vmem:[%s4800_s1 + $0x214] ss:$8 sps:$4 sm:$0xff]   ;;  %v3447_v11 = vld [vmem:[%s4800_s1 + $0x1b0] ss:$8 sps:$4 sm:$0xff]   ;;  %v3451_v12 = vld [vmem:[%s4800_s1 + $0x1c4] ss:$8 sps:$4 sm:$0xff]  }
  0x1f   : > { %662 = vmatpush1.bf16.msra.mxu0 %v3349_v15  ;;  %v486_v41 = vor.u32 %v485_v39, %v482_v38  ;;  %435 = vmatprep.subr.bf16.mxu1 %v3409_v42  ;;  %v478_v7 = vor.u32 %v477_v2, %v474_v1  ;;  %v4013_v13 = vld [vmem:[#allocation2 + $0x10] sm:$0x11]  ;;  %v3396_v16 = vld [vmem:[%s4800_s1 + $0x224] ss:$8 sps:$4 sm:$0xff]   ;;  %v3453_v17 = vld [vmem:[%s4800_s1 + $0x1c0] ss:$8 sps:$4 sm:$0xff]   ;;  %v2756_v39 = vcombine.low %v3902_v28, %v3902_v28 }
  0x20   : > { %663 = vmatprep.subr.bf16.mxu0 %v3350_v18  ;;  %v3388_v14 = vld [vmem:[%s4800_s1 + $0x210] ss:$8 sps:$4 sm:$0xff]   ;;  %v2857_v15 = vcombine.high %v3902_v28, %v4013_v13  ;;  %v3457_v20 = vld [vmem:[%s4800_s1 + $0x1d4] ss:$8 sps:$4 sm:$0xff]   ;;  %v3463_v26 = vld [vmem:[%s4800_s1 + $0x1e4] ss:$8 sps:$4 sm:$0xff]  }
  0x21   : > { %681 = vmatprep.mubr.bf16.mxu0 %v486_v41  ;;  %v3402_v23 = vld [vmem:[%s4800_s1 + $0x234] ss:$8 sps:$4 sm:$0xff]   ;;  %v3459_v24 = vld [vmem:[%s4800_s1 + $0x1d0] ss:$8 sps:$4 sm:$0xff]   ;;  %v3406_v30 = vld [vmem:[%s4800_s1 + $0x240] ss:$8 sps:$4 sm:$0xff]  }
  0x22   : > { %436 = vmatpush1.bf16.msra.mxu1 %v3411_v45  ;;  %v741_v18 = vshrl.u32 %v2857_v15, 16  ;;  %v743_v19 = vshll.u32 %v2857_v15, 16  ;;  %v3465_v31 = vld [vmem:[%s4800_s1 + $0x1e0] ss:$8 sps:$4 sm:$0xff]   ;;  %v3469_v32 = vld [vmem:[%s4800_s1 + $0x1f4] ss:$8 sps:$4 sm:$0xff]  }
  0x23   : > { %664 = vmatpush1.bf16.msra.mxu0 %v3352_v21  ;;  %437 = vmatprep.subr.bf16.mxu1 %v3415_v46  ;;  %v3394_v21 = vld [vmem:[%s4800_s1 + $0x220] ss:$8 sps:$4 sm:$0xff]   ;;  %v3414_v33 = vld [vmem:[%s4800_s1 + $0x254] ss:$8 sps:$4 sm:$0xff]   ;;  %v3471_v34 = vld [vmem:[%s4800_s1 + $0x1f0] ss:$8 sps:$4 sm:$0xff]  }
  0x24   : > { %665 = vmatprep.subr.bf16.mxu0 %v3353_v22  ;;  %v745_v22 = vrot.slane %v743_v19, 1  ;;  %v3479_v35 = vld [vmem:[%s4800_s1 + $0x404] ss:$8 sps:$4 sm:$0xff]   ;;  %v3477_v38 = vld [vmem:[%s4800_s1 + $0x400] ss:$8 sps:$4 sm:$0xff]  }
  0x25   : > { %v3482_v40 = vld [vmem:[%s4800_s1 + $0x414] ss:$8 sps:$4 sm:$0xff]   ;;  %v3418_v41 = vld [vmem:[%s4800_s1 + $0x260] ss:$8 sps:$4 sm:$0xff]   ;;  %v3424_v45 = vld [vmem:[%s4800_s1 + $0x270] ss:$8 sps:$4 sm:$0xff]  }
  0x26   : > { %438 = vmatpush1.bf16.msra.mxu1 %v3417_v49  ;;  %v746_v25 = vor.u32 %v745_v22, %v741_v18  ;;  %v3426_v42 = vld [vmem:[%s4800_s1 + $0x274] ss:$8 sps:$4 sm:$0xff]   ;;  %v3432_v46 = vld [vmem:[%s4800_s1 + $0x284] ss:$8 sps:$4 sm:$0xff]   ;;  %v3430_v49 = vld [vmem:[%s4800_s1 + $0x280] ss:$8 sps:$4 sm:$0xff]  }
  0x27   : > { %666 = vmatpush1.bf16.msra.mxu0 %v3355_v27  ;;  %439 = vmatprep.subr.bf16.mxu1 %v3421_v50  ;;  %v3400_v27 = vld [vmem:[%s4800_s1 + $0x230] ss:$8 sps:$4 sm:$0xff]   ;;  %v3438_v50 = vld [vmem:[%s4800_s1 + $0x294] ss:$8 sps:$4 sm:$0xff]   ;;  %v3444_v54 = vld [vmem:[%s4800_s1 + $0x2a4] ss:$8 sps:$4 sm:$0xff]  }
  0x28   : > { %667 = vmatprep.subr.bf16.mxu0 %v3356_v29  ;;  %v3408_v29 = vld [vmem:[%s4800_s1 + $0x244] ss:$8 sps:$4 sm:$0xff]   ;;  %v3492_v59 = vld [vmem:[%s4800_s1 + $0x450] ss:$8 sps:$4 sm:$0xff]   ;;  %v3454_v1 = vld [vmem:[%s4800_s1 + $0x2c0] ss:$8 sps:$4 sm:$0xff]  }
  0x29   : > { %v3497_v60 = vld [vmem:[%s4800_s1 + $0x464] ss:$8 sps:$4 sm:$0xff]   ;;  %v3462_v2 = vld [vmem:[%s4800_s1 + $0x2d4] ss:$8 sps:$4 sm:$0xff]   ;;  %v3513_v22 = vld [vmem:[%s4800_s1 + $0x4c0] ss:$8 sps:$4 sm:$0xff]  }
  0x2a   : > { %440 = vmatpush1.bf16.msra.mxu1 %v3423_v53  ;;  %v3436_v53 = vld [vmem:[%s4800_s1 + $0x290] ss:$8 sps:$4 sm:$0xff]   ;;  %v3509_v18 = vld [vmem:[%s4800_s1 + $0x4a4] ss:$8 sps:$4 sm:$0xff]   ;;  %v3512_v19 = vld [vmem:[%s4800_s1 + $0x4b4] ss:$8 sps:$4 sm:$0xff]  }
  0x2b   : > { %668 = vmatpush1.bf16.msra.mxu0 %v3358_v36  ;;  %441 = vmatprep.subr.bf16.mxu1 %v3427_v55  ;;  %v3412_v36 = vld [vmem:[%s4800_s1 + $0x250] ss:$8 sps:$4 sm:$0xff]   ;;  %v3489_v55 = vld [vmem:[%s4800_s1 + $0x440] ss:$8 sps:$4 sm:$0xff]  }
  0x2c   : > { %669 = vmatprep.subr.bf16.mxu0 %v3359_v37  ;;  %v3420_v37 = vld [vmem:[%s4800_s1 + $0x264] ss:$8 sps:$4 sm:$0xff]  }
  0x2e   : > { %442 = vmatpush1.bf16.msra.mxu1 %v3429_v58  ;;  %v3450_v58 = vld [vmem:[%s4800_s1 + $0x2b4] ss:$8 sps:$4 sm:$0xff]  }
  0x2f   : > { %670 = vmatpush1.bf16.msra.mxu0 %v3361_v43  ;;  %443 = vmatprep.subr.bf16.mxu1 %v3433_v61  ;;  %v3480_v43 = vld [vmem:[%s4800_s1 + $0x410] ss:$8 sps:$4 sm:$0xff]  }
  0x30   : > { %671 = vmatprep.subr.bf16.mxu0 %v3362_v44  ;;  %v3485_v44 = vld [vmem:[%s4800_s1 + $0x424] ss:$8 sps:$4 sm:$0xff]   ;;  %v3448_v61 = vld [vmem:[%s4800_s1 + $0x2b0] ss:$8 sps:$4 sm:$0xff]  }
  0x32   : > { %444 = vmatpush1.bf16.msra.mxu1 %v3435_v0  ;;  %v3500_v0 = vld [vmem:[%s4800_s1 + $0x474] ss:$8 sps:$4 sm:$0xff]  }
  0x33   : > { %672 = vmatpush1.bf16.msra.mxu0 %v3364_v47  ;;  %445 = vmatprep.subr.bf16.mxu1 %v3439_v3  ;;  %v3483_v47 = vld [vmem:[%s4800_s1 + $0x420] ss:$8 sps:$4 sm:$0xff]   ;;  %v3498_v3 = vld [vmem:[%s4800_s1 + $0x470] ss:$8 sps:$4 sm:$0xff]  }
  0x34   : > { %673 = vmatprep.subr.bf16.mxu0 %v3365_v48  ;;  %v3488_v48 = vld [vmem:[%s4800_s1 + $0x434] ss:$8 sps:$4 sm:$0xff]  }
  0x36   : > { %446 = vmatpush1.bf16.msra.mxu1 %v3441_v6  ;;  %v3468_v6 = vld [vmem:[%s4800_s1 + $0x2e4] ss:$8 sps:$4 sm:$0xff]  }
  0x37   : > { %674 = vmatpush1.bf16.msra.mxu0 %v3367_v51  ;;  %447 = vmatprep.subr.bf16.mxu1 %v3445_v8  ;;  %v3486_v51 = vld [vmem:[%s4800_s1 + $0x430] ss:$8 sps:$4 sm:$0xff]   ;;  %v3501_v8 = vld [vmem:[%s4800_s1 + $0x480] ss:$8 sps:$4 sm:$0xff]  }
  0x38   : > { %675 = vmatprep.subr.bf16.mxu0 %v3368_v52  ;;  %v3491_v52 = vld [vmem:[%s4800_s1 + $0x444] ss:$8 sps:$4 sm:$0xff]  }
  0x3a   : > { %448 = vmatpush1.bf16.msra.mxu1 %v3447_v11 }
  0x3b   : > { %676 = vmatpush1.bf16.msra.mxu0 %v3370_v56  ;;  %449 = vmatprep.subr.bf16.mxu1 %v3451_v12  ;;  %v3494_v56 = vld [vmem:[%s4800_s1 + $0x454] ss:$8 sps:$4 sm:$0xff]   ;;  %v3504_v12 = vld [vmem:[%s4800_s1 + $0x490] ss:$8 sps:$4 sm:$0xff]  }
  0x3c   : > { %677 = vmatprep.subr.bf16.mxu0 %v3371_v57  ;;  %v3442_v57 = vld [vmem:[%s4800_s1 + $0x2a0] ss:$8 sps:$4 sm:$0xff]  }
  0x3e   : > { %450 = vmatpush1.bf16.msra.mxu1 %v3453_v17  ;;  %v3507_v17 = vld [vmem:[%s4800_s1 + $0x4a0] ss:$8 sps:$4 sm:$0xff]  }
  0x3f   : > { %678 = vmatpush1.bf16.msra.mxu0 %v3373_v62  ;;  %451 = vmatprep.subr.bf16.mxu1 %v3457_v20  ;;  %v3456_v62 = vld [vmem:[%s4800_s1 + $0x2c4] ss:$8 sps:$4 sm:$0xff]   ;;  %v3510_v20 = vld [vmem:[%s4800_s1 + $0x4b0] ss:$8 sps:$4 sm:$0xff]  }
  0x40   : > { %679 = vmatprep.subr.bf16.mxu0 %v3374_v63  ;;  %v3495_v63 = vld [vmem:[%s4800_s1 + $0x460] ss:$8 sps:$4 sm:$0xff]  }
  0x42   : > { %452 = vmatpush1.bf16.msra.mxu1 %v3459_v24  ;;  %v3516_v24 = vld [vmem:[%s4800_s1 + $0x4d0] ss:$8 sps:$4 sm:$0xff]  }
  0x43   : > { %680 = vmatpush1.bf16.msra.mxu0 %v3378_v4  ;;  %453 = vmatprep.subr.bf16.mxu1 %v3463_v26  ;;  %v3503_v4 = vld [vmem:[%s4800_s1 + $0x484] ss:$8 sps:$4 sm:$0xff]  }
  0x44   : > { %909 = vmatprep.subr.bf16.mxu0 %v3384_v5  ;;  %v3460_v5 = vld [vmem:[%s4800_s1 + $0x2d0] ss:$8 sps:$4 sm:$0xff]   ;;  %v3521_v26 = vld [vmem:[%s4800_s1 + $0x4e4] ss:$8 sps:$4 sm:$0xff]  }
  0x46   : > { %682 = vmatmul.mubr.bf16.vlgmr.msra.gmra.mrb[0].mxu0 %v478_v7  ;;  %454 = vmatpush1.bf16.msra.mxu1 %v3465_v31  ;;  %v2856_v7 = vcombine.low %v3902_v28, %v4013_v13  ;;  %v3475_v28 = vld [vmem:[%s4800_s1 + $0x2f4] ss:$8 sps:$4 sm:$0xff]   ;;  %v3473_v13 = vld [vmem:[%s4800_s1 + $0x2f0] ss:$8 sps:$4 sm:$0xff]  }
  0x47   : > { %910 = vmatpush1.bf16.msra.mxu0 %v3382_v9  ;;  %941 = vmatprep.mubr.bf16.mxu0 %v746_v25  ;;  %v3506_v9 = vld [vmem:[%s4800_s1 + $0x494] ss:$8 sps:$4 sm:$0xff]   ;;  %v3519_v25 = vld [vmem:[%s4800_s1 + $0x4e0] ss:$8 sps:$4 sm:$0xff]  }
  0x48   : > { %911 = vmatprep.subr.bf16.mxu0 %v3390_v10  ;;  %455 = vmatprep.subr.bf16.mxu1 %v3469_v32  ;;  %v3466_v10 = vld [vmem:[%s4800_s1 + $0x2e0] ss:$8 sps:$4 sm:$0xff]   ;;  %v736_v11 = vshll.u32 %v2856_v7, 16 }
  0x4a   : > { %456 = vmatpush1.bf16.msra.mxu1 %v3471_v34  ;;  %v738_v15 = vrot.slane %v736_v11, 1  ;;  %v3629_v11 = vld [vmem:[%s4800_s1 + $0x704] ss:$8 sps:$4 sm:$0xff]  }
  0x4b   : > { %912 = vmatpush1.bf16.msra.mxu0 %v3388_v14  ;;  %1240 = vmatprep.subr.bf16.mxu1 %v3479_v35  ;;  %v734_v14 = vshrl.u32 %v2856_v7, 16  ;;  %v954_v35 = vlaneseq }
  0x4c   : > { %913 = vmatprep.subr.bf16.mxu0 %v3396_v16 }
  0x4d   : > { %458 = vmatmul.mubr.bf16.vlgmr.msra.gmra.mrb[0].mxu1 %v2756_v39  ;;  %v739_v16 = vor.u32 %v738_v15, %v734_v14  ;;  %v3630_v15 = vld [vmem:[%s4800_s1 + $0x710] ss:$8 sps:$4 sm:$0xff]  }
  0x4e   : > { %1241 = vmatpush1.bf16.msra.mxu1 %v3477_v38  ;;  %v952_v38 = vld [vmem:[%s4801_s2] sm:$0xf] }
  0x4f   : > { %914 = vmatpush1.bf16.msra.mxu0 %v3394_v21  ;;  %1242 = vmatprep.subr.bf16.mxu1 %v3482_v40  ;;  %v3515_v21 = vld [vmem:[%s4800_s1 + $0x4c4] ss:$8 sps:$4 sm:$0xff]  }
  0x50   : > { %915 = vmatprep.subr.bf16.mxu0 %v3402_v23  ;;  %v3518_v23 = vld [vmem:[%s4800_s1 + $0x4d4] ss:$8 sps:$4 sm:$0xff]  }
  0x52   : > { %1243 = vmatpush1.bf16.msra.mxu1 %v3480_v43 }
  0x53   : > { %916 = vmatpush1.bf16.msra.mxu0 %v3400_v27  ;;  %1244 = vmatprep.subr.bf16.mxu1 %v3485_v44  ;;  %v3524_v27 = vld [vmem:[%s4800_s1 + $0x4f4] ss:$8 sps:$4 sm:$0xff]  }
  0x54   : > { %917 = vmatprep.subr.bf16.mxu0 %v3408_v29  ;;  %v3522_v29 = vld [vmem:[%s4800_s1 + $0x4f0] ss:$8 sps:$4 sm:$0xff]  }
  0x56   : > { %1245 = vmatpush1.bf16.msra.mxu1 %v3483_v47 }
  0x57   : > { %918 = vmatpush1.bf16.msra.mxu0 %v3406_v30  ;;  %1246 = vmatprep.subr.bf16.mxu1 %v3488_v48  ;;  %v3528_v30 = vld [vmem:[%s4800_s1 + $0x304] ss:$8 sps:$4 sm:$0xff]  }
  0x58   : > { %919 = vmatprep.subr.bf16.mxu0 %v3414_v33 }
  0x5a   : > { %1247 = vmatpush1.bf16.msra.mxu1 %v3486_v51 }
  0x5b   : > { %920 = vmatpush1.bf16.msra.mxu0 %v3412_v36  ;;  %1248 = vmatprep.subr.bf16.mxu1 %v3491_v52  ;;  %v4228_v36 = vshrl.u32 %v954_v35, 7  ;;  %v3552_v35 = vld [vmem:[%s4800_s1 + $0x374] ss:$8 sps:$4 sm:$0xff]  }
  0x5c   : > { %921 = vmatprep.subr.bf16.mxu0 %v3420_v37 }
  0x5d   : > { %v4231_v37 = vsub.s32 0, %v4228_v36  ;;  %v4237_v39 = vsub.s32 2, %v4228_v36  ;;  %v4240_v40 = vsub.s32 1, %v4228_v36 }
  0x5e   : > { %1249 = vmatpush1.bf16.msra.mxu1 %v3489_v55 }
  0x5f   : > { %922 = vmatpush1.bf16.msra.mxu0 %v3418_v41  ;;  %1250 = vmatprep.subr.bf16.mxu1 %v3494_v56  ;;  %v4243_v41 = vsub.s32 3, %v4228_v36  ;;  %v961_v43 = vrot.slane %v952_v38, %v4237_v39  ;;  %v977_v44 = vrot.slane %v952_v38, %v4240_v40 }
  0x60   : > { %923 = vmatprep.subr.bf16.mxu0 %v3426_v42  ;;  %v957_v42 = vrot.slane %v952_v38, %v4231_v37 }
  0x61   : > { %v971_v48 = vrot.slane %v961_v43, %v4231_v37  ;;  %v3650_v43 = vld [vmem:[%s4800_s1 + $0x774] ss:$8 sps:$4 sm:$0xff]  }
  0x62   : > { %1251 = vmatpush1.bf16.msra.mxu1 %v3492_v59 }
  0x63   : > { %924 = vmatpush1.bf16.msra.mxu0 %v3424_v45  ;;  %1252 = vmatprep.subr.bf16.mxu1 %v3497_v60  ;;  %v981_v45 = vrot.slane %v952_v38, %v4243_v41  ;;  %v3645_v38 = vld [vmem:[%s4800_s1 + $0x760] ss:$8 sps:$4 sm:$0xff]  }
  0x64   : > { %925 = vmatprep.subr.bf16.mxu0 %v3432_v46  ;;  %v967_v46 = vrot.slane %v957_v42, %v4231_v37  ;;  %v3550_v42 = vld [vmem:[%s4800_s1 + $0x370] ss:$8 sps:$4 sm:$0xff]  }
  0x66   : > { %1253 = vmatpush1.bf16.msra.mxu1 %v3495_v63  ;;  %v4253_v63 = vld [vmem:[#allocation3] sm:$0x88] }
  0x67   : > { %926 = vmatpush1.bf16.msra.mxu0 %v3430_v49  ;;  %1254 = vmatprep.subr.bf16.mxu1 %v3500_v0 }
  0x68   : > { %927 = vmatprep.subr.bf16.mxu0 %v3438_v50  ;;  %v987_v50 = vrot.slane %v977_v44, %v4240_v40  ;;  %v3555_v44 = vld [vmem:[%s4800_s1 + $0x384] ss:$8 sps:$4 sm:$0xff]  }
  0x6a   : > { %1255 = vmatpush1.bf16.msra.mxu1 %v3498_v3 }
  0x6b   : > { %928 = vmatpush1.bf16.msra.mxu0 %v3436_v53  ;;  %1256 = vmatprep.subr.bf16.mxu1 %v3503_v4  ;;  %v991_v53 = vrot.slane %v981_v45, %v4240_v40  ;;  %v3648_v45 = vld [vmem:[%s4800_s1 + $0x770] ss:$8 sps:$4 sm:$0xff]  }
  0x6c   : > { %929 = vmatprep.subr.bf16.mxu0 %v3444_v54 }
  0x6e   : > { %1257 = vmatpush1.bf16.msra.mxu1 %v3501_v8  ;;  %v3627_v8 = vld [vmem:[%s4800_s1 + $0x700] ss:$8 sps:$4 sm:$0xff]  }
  0x6f   : > { %930 = vmatpush1.bf16.msra.mxu0 %v3442_v57  ;;  %1258 = vmatprep.subr.bf16.mxu1 %v3506_v9  ;;  %v3530_v9 = vld [vmem:[%s4800_s1 + $0x310] ss:$8 sps:$4 sm:$0xff]  }
  0x70   : > { %931 = vmatprep.subr.bf16.mxu0 %v3450_v58 }
  0x72   : > { %1259 = vmatpush1.bf16.msra.mxu1 %v3504_v12  ;;  %v3537_v12 = vld [vmem:[%s4800_s1 + $0x324] ss:$8 sps:$4 sm:$0xff]  }
  0x73   : > { %932 = vmatpush1.bf16.msra.mxu0 %v3448_v61  ;;  %1260 = vmatprep.subr.bf16.mxu1 %v3509_v18  ;;  %v3540_v18 = vld [vmem:[%s4800_s1 + $0x334] ss:$8 sps:$4 sm:$0xff]  }
  0x74   : > { %933 = vmatprep.subr.bf16.mxu0 %v3456_v62 }
  0x76   : > { %1261 = vmatpush1.bf16.msra.mxu1 %v3507_v17  ;;  %v3635_v17 = vld [vmem:[%s4800_s1 + $0x724] ss:$8 sps:$4 sm:$0xff]  }
  0x77   : > { %934 = vmatpush1.bf16.msra.mxu0 %v3454_v1  ;;  %1262 = vmatprep.subr.bf16.mxu1 %v3512_v19  ;;  %v3633_v19 = vld [vmem:[%s4800_s1 + $0x720] ss:$8 sps:$4 sm:$0xff]  }
  0x78   : > { %935 = vmatprep.subr.bf16.mxu0 %v3462_v2  ;;  %v3526_v2 = vld [vmem:[%s4800_s1 + $0x300] ss:$8 sps:$4 sm:$0xff]  }
  0x7a   : > { %1263 = vmatpush1.bf16.msra.mxu1 %v3510_v20  ;;  %v3538_v20 = vld [vmem:[%s4800_s1 + $0x330] ss:$8 sps:$4 sm:$0xff]  }
  0x7b   : > { %936 = vmatpush1.bf16.msra.mxu0 %v3460_v5  ;;  %1264 = vmatprep.subr.bf16.mxu1 %v3515_v21  ;;  %v3532_v5 = vld [vmem:[%s4800_s1 + $0x314] ss:$8 sps:$4 sm:$0xff]  }
  0x7c   : > { %937 = vmatprep.subr.bf16.mxu0 %v3468_v6  ;;  %v3638_v21 = vld [vmem:[%s4800_s1 + $0x734] ss:$8 sps:$4 sm:$0xff]  }
  0x7e   : > { %1265 = vmatpush1.bf16.msra.mxu1 %v3513_v22  ;;  %v3543_v22 = vld [vmem:[%s4800_s1 + $0x344] ss:$8 sps:$4 sm:$0xff]  }
  0x7f   : > { %938 = vmatpush1.bf16.msra.mxu0 %v3466_v10  ;;  %1266 = vmatprep.subr.bf16.mxu1 %v3518_v23  ;;  %v3636_v23 = vld [vmem:[%s4800_s1 + $0x730] ss:$8 sps:$4 sm:$0xff]  }
  0x80   : > { %939 = vmatprep.subr.bf16.mxu0 %v3475_v28 }
  0x82   : > { %1267 = vmatpush1.bf16.msra.mxu1 %v3516_v24  ;;  %v3541_v24 = vld [vmem:[%s4800_s1 + $0x340] ss:$8 sps:$4 sm:$0xff]  }
  0x83   : > { %940 = vmatpush1.bf16.msra.mxu0 %v3473_v13  ;;  %1268 = vmatprep.subr.bf16.mxu1 %v3521_v26  ;;  %v3632_v13 = vld [vmem:[%s4800_s1 + $0x714] ss:$8 sps:$4 sm:$0xff]  }
  0x84   : > { %2056 = vmatprep.subr.bf16.mxu0 %v3629_v11  ;;  %v3546_v26 = vld [vmem:[%s4800_s1 + $0x354] ss:$8 sps:$4 sm:$0xff]   ;;  %v3579_v11 = vld [vmem:[%s4800_s1 + $0x504] ss:$8 sps:$4 sm:$0xff]  }
  0x86   : > { %942 = vmatmul.mubr.bf16.vlgmr.msra.gmra.mrb[0].mxu0 %v739_v16  ;;  %1269 = vmatpush1.bf16.msra.mxu1 %v3519_v25  ;;  %v3535_v16 = vld [vmem:[%s4800_s1 + $0x320] ss:$8 sps:$4 sm:$0xff]   ;;  %v3641_v25 = vld [vmem:[%s4800_s1 + $0x744] ss:$8 sps:$4 sm:$0xff]  }
  0x87   : > { %1270 = vmatprep.subr.bf16.mxu1 %v3524_v27  ;;  %2057 = vmatpush1.bf16.msra.mxu0 %v3627_v8  ;;  %v3639_v27 = vld [vmem:[%s4800_s1 + $0x740] ss:$8 sps:$4 sm:$0xff]  }
  0x88   : > { %2058 = vmatprep.subr.bf16.mxu0 %v3632_v13  ;;  %v3577_v13 = vld [vmem:[%s4800_s1 + $0x500] ss:$8 sps:$4 sm:$0xff]  }
  0x8a   : > { %1271 = vmatpush1.bf16.msra.mxu1 %v3522_v29  ;;  %v3544_v29 = vld [vmem:[%s4800_s1 + $0x350] ss:$8 sps:$4 sm:$0xff]  }
  0x8b   : > { %1464 = vmatprep.subr.bf16.mxu1 %v3528_v30  ;;  %2059 = vmatpush1.bf16.msra.mxu0 %v3630_v15  ;;  %v3644_v30 = vld [vmem:[%s4800_s1 + $0x754] ss:$8 sps:$4 sm:$0xff]  }
  0x8c   : > { %2060 = vmatprep.subr.bf16.mxu0 %v3635_v17 }
  0x8f   : > { %2061 = vmatpush1.bf16.msra.mxu0 %v3633_v19  ;;  %v3587_v19 = vld [vmem:[%s4800_s1 + $0x524] ss:$8 sps:$4 sm:$0xff]  }
  0x90   : > { %2062 = vmatprep.subr.bf16.mxu0 %v3638_v21  ;;  %v3590_v21 = vld [vmem:[%s4800_s1 + $0x534] ss:$8 sps:$4 sm:$0xff]  }
  0x93   : > { %2063 = vmatpush1.bf16.msra.mxu0 %v3636_v23  ;;  %v3593_v23 = vld [vmem:[%s4800_s1 + $0x544] ss:$8 sps:$4 sm:$0xff]  }
  0x94   : > { %2064 = vmatprep.subr.bf16.mxu0 %v3641_v25  ;;  %v3596_v25 = vld [vmem:[%s4800_s1 + $0x554] ss:$8 sps:$4 sm:$0xff]  }
  0x97   : > { %2065 = vmatpush1.bf16.msra.mxu0 %v3639_v27  ;;  %v3599_v27 = vld [vmem:[%s4800_s1 + $0x564] ss:$8 sps:$4 sm:$0xff]  }
  0x98   : > { %2066 = vmatprep.subr.bf16.mxu0 %v3644_v30  ;;  %v3602_v30 = vld [vmem:[%s4800_s1 + $0x574] ss:$8 sps:$4 sm:$0xff]  }
 0x120   : > { %v459_v31 = vpop.f32.mrb[0].mxu1 }
 0x121   : > { %v461_v32 = vpop.f32.mrb[1].mxu1 }
 0x122   : > { %v463_v33 = vpop.f32.mrb[2].mxu1 }
 0x123   : > { %v464_v34 = vpop.f32.mrb[3].mxu1  ;;  %v3547_v33 = vld [vmem:[%s4800_s1 + $0x360] ss:$8 sps:$4 sm:$0xff]  }
 0x124   : > { %v3647_v34 = vld [vmem:[%s4800_s1 + $0x764] ss:$8 sps:$4 sm:$0xff]  }
 0x159   : > { %v943_v47 = vpop.f32.mrb[0].mxu0 }
 0x15a   : > { %v3296_v49 = vadd.f32 %v943_v47, %v459_v31  ;;  %v945_v51 = vpop.f32.mrb[1].mxu0  ;;  %v3549_v31 = vld [vmem:[%s4800_s1 + $0x364] ss:$8 sps:$4 sm:$0xff]  }
 0x15b   : > { %v3297_v52 = vadd.f32 %v945_v51, %v461_v32  ;;  %v947_v54 = vpop.f32.mrb[2].mxu0  ;;  %v3642_v32 = vld [vmem:[%s4800_s1 + $0x750] ss:$8 sps:$4 sm:$0xff]   ;;  %v3653_v47 = vld [vmem:[%s4800_s1 + $0x784] ss:$8 sps:$4 sm:$0xff]  }
 0x15c   : > { %v972_v55 = vmul.f32 %v3296_v49, %v967_v46  ;;  %v948_v56 = vpop.f32.mrb[3].mxu0  ;;  %2067 = vmatpush1.bf16.msra.mxu0 %v3642_v32  ;;  %v3553_v46 = vld [vmem:[%s4800_s1 + $0x380] ss:$8 sps:$4 sm:$0xff]   ;;  %v3656_v51 = vld [vmem:[%s4800_s1 + $0x794] ss:$8 sps:$4 sm:$0xff]  }
 0x15d   : > { %v973_v57 = vmul.f32 %v3297_v52, %v971_v48  ;;  %2068 = vmatprep.subr.bf16.mxu0 %v3647_v34  ;;  %v3558_v48 = vld [vmem:[%s4800_s1 + $0x394] ss:$8 sps:$4 sm:$0xff]   ;;  %v3651_v49 = vld [vmem:[%s4800_s1 + $0x780] ss:$8 sps:$4 sm:$0xff]   ;;  %v3561_v52 = vld [vmem:[%s4800_s1 + $0x3a4] ss:$8 sps:$4 sm:$0xff]  }
 0x15e   : > { %v992_v58 = vadd.f32 %v987_v50, %v972_v55  ;;  %v3556_v50 = vld [vmem:[%s4800_s1 + $0x390] ss:$8 sps:$4 sm:$0xff]   ;;  %v3559_v54 = vld [vmem:[%s4800_s1 + $0x3a0] ss:$8 sps:$4 sm:$0xff]   ;;  %v3659_v55 = vld [vmem:[%s4800_s1 + $0x7a4] ss:$8 sps:$4 sm:$0xff]  }
 0x15f   : > { %v993_v59 = vadd.f32 %v991_v53, %v973_v57  ;;  %v3654_v53 = vld [vmem:[%s4800_s1 + $0x790] ss:$8 sps:$4 sm:$0xff]   ;;  %v3564_v56 = vld [vmem:[%s4800_s1 + $0x3b4] ss:$8 sps:$4 sm:$0xff]   ;;  %v3657_v57 = vld [vmem:[%s4800_s1 + $0x7a0] ss:$8 sps:$4 sm:$0xff]  }
 0x160   : > { %v994_v60 = vmax.f32 %v992_v58, 0.0  ;;  %2069 = vmatpush1.bf16.msra.mxu0 %v3645_v38  ;;  %v3562_v58 = vld [vmem:[%s4800_s1 + $0x3b0] ss:$8 sps:$4 sm:$0xff]   ;;  %v3605_v32 = vld [vmem:[%s4800_s1 + $0x584] ss:$8 sps:$4 sm:$0xff]  }
 0x161   : > { %v995_v61 = vmax.f32 %v993_v59, 0.0  ;;  %2070 = vmatprep.subr.bf16.mxu0 %v3650_v43  ;;  %v3567_v59 = vld [vmem:[%s4800_s1 + $0x3c4] ss:$8 sps:$4 sm:$0xff]   ;;  %v3608_v34 = vld [vmem:[%s4800_s1 + $0x594] ss:$8 sps:$4 sm:$0xff]  }
 0x162   : > { %v3611_v38 = vld [vmem:[%s4800_s1 + $0x5a4] ss:$8 sps:$4 sm:$0xff]   ;;  %v3614_v43 = vld [vmem:[%s4800_s1 + $0x5b4] ss:$8 sps:$4 sm:$0xff]  }
 0x163   : > { %v3294_v62 = vpack.c.bf16 %v995_v61, %v994_v60  ;;  %v3565_v60 = vld [vmem:[%s4800_s1 + $0x3c0] ss:$8 sps:$4 sm:$0xff]   ;;  %v3570_v61 = vld [vmem:[%s4800_s1 + $0x3d4] ss:$8 sps:$4 sm:$0xff]  }
 0x164   : > { %2071 = vmatpush1.bf16.msra.mxu0 %v3648_v45  ;;  %v3617_v45 = vld [vmem:[%s4800_s1 + $0x5c4] ss:$8 sps:$4 sm:$0xff]  }
 0x165   : > { %1004 = vst [vmem:[#allocation3 + $0x8] sm:$0x11] %v3294_v62  ;;  %2072 = vmatprep.subr.bf16.mxu0 %v3653_v47  ;;  %v4407_v62 = vld [vmem:[#allocation3 + $0x10] sm:$0x11]  ;;  %v3620_v47 = vld [vmem:[%s4800_s1 + $0x5d4] ss:$8 sps:$4 sm:$0xff]  }
 0x168   : > { %2073 = vmatpush1.bf16.msra.mxu0 %v3651_v49 }
 0x169   : > { %2074 = vmatprep.subr.bf16.mxu0 %v3656_v51  ;;  %v3621_v51 = vld [vmem:[%s4800_s1 + $0x5e0] ss:$8 sps:$4 sm:$0xff]  }
 0x16c   : > { %v4255_v0 = vld [vmem:[#allocation3 + $0x8] sm:$0xff]  ;;  %2075 = vmatpush1.bf16.msra.mxu0 %v3654_v53 }
 0x16d   : > { %v2956_v1 = vcombine.high %v4255_v0, %v4255_v0  ;;  %v2955_v3 = vcombine.low %v4255_v0, %v4255_v0  ;;  %v2990_v4 = vcombine.high %v4253_v63, %v4255_v0  ;;  %2076 = vmatprep.subr.bf16.mxu0 %v3659_v55  ;;  %v3055_v49 = vcombine.low %v4255_v0, %v4407_v62 }
 0x16f   : > { %1272 = vmatprep.mubr.bf16.mxu1 %v2956_v1  ;;  %v1295_v6 = vshrl.u32 %v2990_v4, 16  ;;  %v1298_v7 = vshll.u32 %v2990_v4, 16  ;;  %v3568_v1 = vld [vmem:[%s4800_s1 + $0x3d0] ss:$8 sps:$4 sm:$0xff]   ;;  %v3056_v4 = vcombine.high %v4255_v0, %v4407_v62  ;;  %v1551_v53 = vshll.u32 %v3055_v49, 16 }
 0x170   : > { %1273 = vmatmul.mubr.bf16.vlgmr.msra.gmra.mrb[4].mxu1 %v2955_v3  ;;  %2077 = vmatpush1.bf16.msra.mxu0 %v3657_v57  ;;  %v3573_v3 = vld [vmem:[%s4800_s1 + $0x3e4] ss:$8 sps:$4 sm:$0xff]   ;;  %v1549_v55 = vshrl.u32 %v3055_v49, 16  ;;  %v3662_v57 = vld [vmem:[%s4800_s1 + $0x7b4] ss:$8 sps:$4 sm:$0xff]  }
 0x171   : > { %1465 = vmatpush1.bf16.msra.mxu1 %v3526_v2  ;;  %v1297_v10 = vrot.slane %v1295_v6, 3  ;;  %v1300_v28 = vrot.slane %v1298_v7, 4  ;;  %v2989_v2 = vcombine.low %v4253_v63, %v4255_v0  ;;  %v3576_v6 = vld [vmem:[%s4800_s1 + $0x3f4] ss:$8 sps:$4 sm:$0xff]   ;;  %v1558_v8 = vshll.u32 %v3056_v4, 16  ;;  %2078 = vmatprep.subr.bf16.mxu0 %v3662_v57 }
 0x172   : > { %1466 = vmatprep.subr.bf16.mxu1 %v3532_v5  ;;  %v3571_v5 = vld [vmem:[%s4800_s1 + $0x3e0] ss:$8 sps:$4 sm:$0xff]   ;;  %v3624_v0 = vld [vmem:[%s4800_s1 + $0x5f0] ss:$8 sps:$4 sm:$0xff]   ;;  %v3696_v49 = vld [vmem:[%s4800_s1 + $0x654] ss:$8 sps:$4 sm:$0xff]  }
 0x173   : > { %v1301_v14 = vor.u32 %v1300_v28, %v1297_v10  ;;  %v1287_v7 = vshrl.u32 %v2989_v2, 16  ;;  %v1290_v63 = vshll.u32 %v2989_v2, 16  ;;  %v3666_v62 = vld [vmem:[%s4800_s1 + $0x7d0] ss:$8 sps:$4 sm:$0xff]   ;;  %v3671_v2 = vld [vmem:[%s4800_s1 + $0x7e4] ss:$8 sps:$4 sm:$0xff]  }
 0x174   : > { %v3706_v57 = vld [vmem:[%s4800_s1 + $0x690] ss:$8 sps:$4 sm:$0xff]  }
 0x175   : > { %1467 = vmatpush1.bf16.msra.mxu1 %v3530_v9  ;;  %1496 = vmatprep.mubr.bf16.mxu1 %v1301_v14  ;;  %v3574_v9 = vld [vmem:[%s4800_s1 + $0x3f0] ss:$8 sps:$4 sm:$0xff]   ;;  %v1289_v10 = vrot.slane %v1287_v7, 3  ;;  %v1292_v28 = vrot.slane %v1290_v63, 4  ;;  %v1556_v14 = vshrl.u32 %v3056_v4, 16 }
 0x176   : > { %1468 = vmatprep.subr.bf16.mxu1 %v3537_v12  ;;  %v1560_v12 = vrot.slane %v1558_v8, 1  ;;  %v3672_v4 = vld [vmem:[%s4800_s1 + $0x7f0] ss:$8 sps:$4 sm:$0xff]  }
 0x177   : > { %v1293_v15 = vor.u32 %v1292_v28, %v1289_v10 }
 0x178   : > { %v1561_v17 = vor.u32 %v1560_v12, %v1556_v14 }
 0x179   : > { %1469 = vmatpush1.bf16.msra.mxu1 %v3535_v16  ;;  %v3584_v16 = vld [vmem:[%s4800_s1 + $0x514] ss:$8 sps:$4 sm:$0xff]  }
 0x17a   : > { %1470 = vmatprep.subr.bf16.mxu1 %v3540_v18  ;;  %v3582_v18 = vld [vmem:[%s4800_s1 + $0x510] ss:$8 sps:$4 sm:$0xff]  }
 0x17d   : > { %1471 = vmatpush1.bf16.msra.mxu1 %v3538_v20  ;;  %v3585_v20 = vld [vmem:[%s4800_s1 + $0x520] ss:$8 sps:$4 sm:$0xff]  }
 0x17e   : > { %1472 = vmatprep.subr.bf16.mxu1 %v3543_v22  ;;  %v3588_v22 = vld [vmem:[%s4800_s1 + $0x530] ss:$8 sps:$4 sm:$0xff]  }
 0x181   : > { %1473 = vmatpush1.bf16.msra.mxu1 %v3541_v24  ;;  %v3591_v24 = vld [vmem:[%s4800_s1 + $0x540] ss:$8 sps:$4 sm:$0xff]  }
 0x182   : > { %1474 = vmatprep.subr.bf16.mxu1 %v3546_v26  ;;  %v3594_v26 = vld [vmem:[%s4800_s1 + $0x550] ss:$8 sps:$4 sm:$0xff]  }
 0x185   : > { %1475 = vmatpush1.bf16.msra.mxu1 %v3544_v29  ;;  %v3597_v29 = vld [vmem:[%s4800_s1 + $0x560] ss:$8 sps:$4 sm:$0xff]  }
 0x186   : > { %1476 = vmatprep.subr.bf16.mxu1 %v3549_v31  ;;  %v3600_v31 = vld [vmem:[%s4800_s1 + $0x570] ss:$8 sps:$4 sm:$0xff]  }
 0x189   : > { %1477 = vmatpush1.bf16.msra.mxu1 %v3547_v33  ;;  %v3603_v33 = vld [vmem:[%s4800_s1 + $0x580] ss:$8 sps:$4 sm:$0xff]  }
 0x18a   : > { %1478 = vmatprep.subr.bf16.mxu1 %v3552_v35  ;;  %v3606_v35 = vld [vmem:[%s4800_s1 + $0x590] ss:$8 sps:$4 sm:$0xff]  }
 0x18d   : > { %1479 = vmatpush1.bf16.msra.mxu1 %v3550_v42  ;;  %v3609_v42 = vld [vmem:[%s4800_s1 + $0x5a0] ss:$8 sps:$4 sm:$0xff]  }
 0x18e   : > { %1480 = vmatprep.subr.bf16.mxu1 %v3555_v44  ;;  %v3612_v44 = vld [vmem:[%s4800_s1 + $0x5b0] ss:$8 sps:$4 sm:$0xff]  }
 0x191   : > { %1481 = vmatpush1.bf16.msra.mxu1 %v3553_v46  ;;  %v3615_v46 = vld [vmem:[%s4800_s1 + $0x5c0] ss:$8 sps:$4 sm:$0xff]  }
 0x192   : > { %1482 = vmatprep.subr.bf16.mxu1 %v3558_v48  ;;  %v3618_v48 = vld [vmem:[%s4800_s1 + $0x5d0] ss:$8 sps:$4 sm:$0xff]  }
 0x195   : > { %1483 = vmatpush1.bf16.msra.mxu1 %v3556_v50  ;;  %v3623_v50 = vld [vmem:[%s4800_s1 + $0x5e4] ss:$8 sps:$4 sm:$0xff]  }
 0x196   : > { %1484 = vmatprep.subr.bf16.mxu1 %v3561_v52  ;;  %v3626_v52 = vld [vmem:[%s4800_s1 + $0x5f4] ss:$8 sps:$4 sm:$0xff]  }
 0x199   : > { %1485 = vmatpush1.bf16.msra.mxu1 %v3559_v54  ;;  %v1553_v54 = vrot.slane %v1551_v53, 1  ;;  %v3702_v53 = vld [vmem:[%s4800_s1 + $0x674] ss:$8 sps:$4 sm:$0xff]  }
 0x19a   : > { %1486 = vmatprep.subr.bf16.mxu1 %v3564_v56 }
 0x19b   : > { %v1554_v56 = vor.u32 %v1553_v54, %v1549_v55  ;;  %v3705_v54 = vld [vmem:[%s4800_s1 + $0x684] ss:$8 sps:$4 sm:$0xff]   ;;  %v3703_v55 = vld [vmem:[%s4800_s1 + $0x680] ss:$8 sps:$4 sm:$0xff]  }
 0x19d   : > { %1487 = vmatpush1.bf16.msra.mxu1 %v3562_v58  ;;  %v3660_v58 = vld [vmem:[%s4800_s1 + $0x7b0] ss:$8 sps:$4 sm:$0xff]  }
 0x19e   : > { %1488 = vmatprep.subr.bf16.mxu1 %v3567_v59  ;;  %2079 = vmatpush1.bf16.msra.mxu0 %v3660_v58  ;;  %v3665_v59 = vld [vmem:[%s4800_s1 + $0x7c4] ss:$8 sps:$4 sm:$0xff]  }
 0x19f   : > { %2080 = vmatprep.subr.bf16.mxu0 %v3665_v59  ;;  %v3711_v58 = vld [vmem:[%s4800_s1 + $0x6a4] ss:$8 sps:$4 sm:$0xff]   ;;  %v3709_v59 = vld [vmem:[%s4800_s1 + $0x6a0] ss:$8 sps:$4 sm:$0xff]  }
 0x1a1   : > { %1489 = vmatpush1.bf16.msra.mxu1 %v3565_v60  ;;  %v3663_v60 = vld [vmem:[%s4800_s1 + $0x7c0] ss:$8 sps:$4 sm:$0xff]  }
 0x1a2   : > { %1490 = vmatprep.subr.bf16.mxu1 %v3570_v61  ;;  %2081 = vmatpush1.bf16.msra.mxu0 %v3663_v60  ;;  %v3668_v61 = vld [vmem:[%s4800_s1 + $0x7d4] ss:$8 sps:$4 sm:$0xff]  }
 0x1a3   : > { %2082 = vmatprep.subr.bf16.mxu0 %v3668_v61  ;;  %v3714_v60 = vld [vmem:[%s4800_s1 + $0x6b4] ss:$8 sps:$4 sm:$0xff]   ;;  %v3712_v61 = vld [vmem:[%s4800_s1 + $0x6b0] ss:$8 sps:$4 sm:$0xff]  }
 0x1a5   : > { %1491 = vmatpush1.bf16.msra.mxu1 %v3568_v1  ;;  %v3669_v1 = vld [vmem:[%s4800_s1 + $0x7e0] ss:$8 sps:$4 sm:$0xff]  }
 0x1a6   : > { %1492 = vmatprep.subr.bf16.mxu1 %v3573_v3  ;;  %2083 = vmatpush1.bf16.msra.mxu0 %v3666_v62  ;;  %v3674_v3 = vld [vmem:[%s4800_s1 + $0x7f4] ss:$8 sps:$4 sm:$0xff]   ;;  %v3717_v62 = vld [vmem:[%s4800_s1 + $0x6c4] ss:$8 sps:$4 sm:$0xff]  }
 0x1a7   : > { %2084 = vmatprep.subr.bf16.mxu0 %v3671_v2  ;;  %v3720_v2 = vld [vmem:[%s4800_s1 + $0x6d4] ss:$8 sps:$4 sm:$0xff]  }
 0x1a9   : > { %1493 = vmatpush1.bf16.msra.mxu1 %v3571_v5  ;;  %v3678_v5 = vld [vmem:[%s4800_s1 + $0x604] ss:$8 sps:$4 sm:$0xff]  }
 0x1aa   : > { %1494 = vmatprep.subr.bf16.mxu1 %v3576_v6  ;;  %2085 = vmatpush1.bf16.msra.mxu0 %v3669_v1  ;;  %v3089_v6 = vld [vmem:[%s4801_s2 + $0x4] sm:$0xf]  ;;  %v3715_v1 = vld [vmem:[%s4800_s1 + $0x6c0] ss:$8 sps:$4 sm:$0xff]  }
 0x1ab   : > { %2086 = vmatprep.subr.bf16.mxu0 %v3674_v3  ;;  %v1773_v7 = vrot.slane %v3089_v6, %v4231_v37  ;;  %v1777_v63 = vrot.slane %v3089_v6, %v4237_v39  ;;  %v1793_v8 = vrot.slane %v3089_v6, %v4240_v40  ;;  %v4658_v3 = vld [vmem:[#allocation2 + $0x10] sm:$0x11] }
 0x1ad   : > { %1495 = vmatpush1.bf16.msra.mxu1 %v3574_v9  ;;  %v1797_v9 = vrot.slane %v3089_v6, %v4243_v41  ;;  %v1783_v10 = vrot.slane %v1773_v7, %v4231_v37  ;;  %v1787_v28 = vrot.slane %v1777_v63, %v4231_v37  ;;  %v3723_v6 = vld [vmem:[%s4800_s1 + $0x6e4] ss:$8 sps:$4 sm:$0xff]   ;;  %v3721_v63 = vld [vmem:[%s4800_s1 + $0x6e0] ss:$8 sps:$4 sm:$0xff]  }
 0x1ae   : > { %1724 = vmatprep.subr.bf16.mxu1 %v3579_v11  ;;  %2087 = vmatpush1.bf16.msra.mxu0 %v3672_v4  ;;  %v1803_v11 = vrot.slane %v1793_v8, %v4240_v40  ;;  %v3718_v4 = vld [vmem:[%s4800_s1 + $0x6d0] ss:$8 sps:$4 sm:$0xff]   ;;  %v3726_v8 = vld [vmem:[%s4800_s1 + $0x6f4] ss:$8 sps:$4 sm:$0xff]  }
 0x1af   : > { %2280 = vmatprep.subr.bf16.mxu0 %v3678_v5 }
 0x1b0   : > { %1497 = vmatmul.mubr.bf16.vlgmr.msra.gmra.mrb[4].mxu1 %v1293_v15 }
 0x1b1   : > { %1725 = vmatpush1.bf16.msra.mxu1 %v3577_v13  ;;  %1756 = vmatprep.mubr.bf16.mxu1 %v1561_v17  ;;  %v1807_v13 = vrot.slane %v1797_v9, %v4240_v40 }
 0x1b2   : > { %1726 = vmatprep.subr.bf16.mxu1 %v3584_v16 }
 0x1b5   : > { %1727 = vmatpush1.bf16.msra.mxu1 %v3582_v18 }
 0x1b6   : > { %1728 = vmatprep.subr.bf16.mxu1 %v3587_v19 }
 0x1b9   : > { %1729 = vmatpush1.bf16.msra.mxu1 %v3585_v20 }
 0x1ba   : > { %1730 = vmatprep.subr.bf16.mxu1 %v3590_v21 }
 0x1bd   : > { %1731 = vmatpush1.bf16.msra.mxu1 %v3588_v22 }
 0x1be   : > { %1732 = vmatprep.subr.bf16.mxu1 %v3593_v23 }
 0x1c1   : > { %1733 = vmatpush1.bf16.msra.mxu1 %v3591_v24  ;;  %v4570_v24 = vld [vmem:[#allocation2] sm:$0x88] }
 0x1c2   : > { %1734 = vmatprep.subr.bf16.mxu1 %v3596_v25 }
 0x1c5   : > { %1735 = vmatpush1.bf16.msra.mxu1 %v3594_v26 }
 0x1c6   : > { %1736 = vmatprep.subr.bf16.mxu1 %v3599_v27  ;;  %v3676_v27 = vld [vmem:[%s4800_s1 + $0x600] ss:$8 sps:$4 sm:$0xff]  }
 0x1c9   : > { %1737 = vmatpush1.bf16.msra.mxu1 %v3597_v29 }
 0x1ca   : > { %1738 = vmatprep.subr.bf16.mxu1 %v3602_v30 }
 0x1cd   : > { %1739 = vmatpush1.bf16.msra.mxu1 %v3600_v31  ;;  %v3682_v31 = vld [vmem:[%s4800_s1 + $0x614] ss:$8 sps:$4 sm:$0xff]  }
 0x1ce   : > { %1740 = vmatprep.subr.bf16.mxu1 %v3605_v32 }
 0x1d1   : > { %1741 = vmatpush1.bf16.msra.mxu1 %v3603_v33 }
 0x1d2   : > { %1742 = vmatprep.subr.bf16.mxu1 %v3608_v34  ;;  %v3680_v34 = vld [vmem:[%s4800_s1 + $0x610] ss:$8 sps:$4 sm:$0xff]  }
 0x1d5   : > { %1743 = vmatpush1.bf16.msra.mxu1 %v3606_v35 }
 0x1d6   : > { %1744 = vmatprep.subr.bf16.mxu1 %v3611_v38 }
 0x1d9   : > { %1745 = vmatpush1.bf16.msra.mxu1 %v3609_v42  ;;  %v3687_v42 = vld [vmem:[%s4800_s1 + $0x624] ss:$8 sps:$4 sm:$0xff]  }
 0x1da   : > { %1746 = vmatprep.subr.bf16.mxu1 %v3614_v43 }
 0x1dd   : > { %1747 = vmatpush1.bf16.msra.mxu1 %v3612_v44  ;;  %v3685_v44 = vld [vmem:[%s4800_s1 + $0x620] ss:$8 sps:$4 sm:$0xff]  }
 0x1de   : > { %1748 = vmatprep.subr.bf16.mxu1 %v3617_v45  ;;  %v3690_v45 = vld [vmem:[%s4800_s1 + $0x634] ss:$8 sps:$4 sm:$0xff]  }
 0x1e1   : > { %1749 = vmatpush1.bf16.msra.mxu1 %v3615_v46  ;;  %v3688_v46 = vld [vmem:[%s4800_s1 + $0x630] ss:$8 sps:$4 sm:$0xff]  }
 0x1e2   : > { %1750 = vmatprep.subr.bf16.mxu1 %v3620_v47  ;;  %v3693_v47 = vld [vmem:[%s4800_s1 + $0x644] ss:$8 sps:$4 sm:$0xff]  }
 0x1e5   : > { %1751 = vmatpush1.bf16.msra.mxu1 %v3618_v48  ;;  %v3691_v48 = vld [vmem:[%s4800_s1 + $0x640] ss:$8 sps:$4 sm:$0xff]  }
 0x1e6   : > { %1752 = vmatprep.subr.bf16.mxu1 %v3623_v50  ;;  %v3694_v50 = vld [vmem:[%s4800_s1 + $0x650] ss:$8 sps:$4 sm:$0xff]  }
 0x1e9   : > { %1753 = vmatpush1.bf16.msra.mxu1 %v3621_v51  ;;  %v3699_v51 = vld [vmem:[%s4800_s1 + $0x664] ss:$8 sps:$4 sm:$0xff]  }
 0x1ea   : > { %1754 = vmatprep.subr.bf16.mxu1 %v3626_v52  ;;  %v3697_v52 = vld [vmem:[%s4800_s1 + $0x660] ss:$8 sps:$4 sm:$0xff]  }
 0x1ed   : > { %1755 = vmatpush1.bf16.msra.mxu1 %v3624_v0  ;;  %v3700_v0 = vld [vmem:[%s4800_s1 + $0x670] ss:$8 sps:$4 sm:$0xff]  }
 0x1f0   : > { %1757 = vmatmul.mubr.bf16.vlgmr.msra.gmra.mrb[4].mxu1 %v1554_v56  ;;  %v3708_v56 = vld [vmem:[%s4800_s1 + $0x694] ss:$8 sps:$4 sm:$0xff]  }
 0x2c3   : > { %v1758_v12 = vpop.f32.mrb[4].mxu1 }
 0x2c4   : > { %v1788_v14 = vmul.f32 %v1783_v10, %v1758_v12  ;;  %v1760_v15 = vpop.f32.mrb[5].mxu1 }
 0x2c5   : > { %v1789_v16 = vmul.f32 %v1787_v28, %v1760_v15  ;;  %v1762_v17 = vpop.f32.mrb[6].mxu1 }
 0x2c6   : > { %v1808_v18 = vadd.f32 %v1803_v11, %v1788_v14  ;;  %v1763_v19 = vpop.f32.mrb[7].mxu1  ;;  %v3724_v11 = vld [vmem:[%s4800_s1 + $0x6f0] ss:$8 sps:$4 sm:$0xff]   ;;  %v3729_v14 = vld [vmem:[%s4800_s1 + $0x804] ss:$8 sps:$4 sm:$0xff]  }
 0x2c7   : > { %v1809_v20 = vadd.f32 %v1807_v13, %v1789_v16  ;;  %v3727_v16 = vld [vmem:[%s4800_s1 + $0x800] ss:$8 sps:$4 sm:$0xff]   ;;  %v3734_v19 = vld [vmem:[%s4800_s1 + $0x814] ss:$8 sps:$4 sm:$0xff]  }
 0x2c8   : > { %v1810_v21 = vmax.f32 %v1808_v18, 0.0 }
 0x2c9   : > { %v1811_v22 = vmax.f32 %v1809_v20, 0.0 }
 0x2cb   : > { %v3295_v23 = vpack.c.bf16 %v1811_v22, %v1810_v21  ;;  %v3732_v21 = vld [vmem:[%s4800_s1 + $0x810] ss:$8 sps:$4 sm:$0xff]   ;;  %v3737_v22 = vld [vmem:[%s4800_s1 + $0x824] ss:$8 sps:$4 sm:$0xff]  }
 0x2cd   : > { %1820 = vst [vmem:[#allocation2 + $0x8] sm:$0x11] %v3295_v23  ;;  %v3735_v23 = vld [vmem:[%s4800_s1 + $0x820] ss:$8 sps:$4 sm:$0xff]  }
 0x2d4   : > { %v4572_v25 = vld [vmem:[#allocation2 + $0x8] sm:$0xff] }
 0x2d5   : > { %v3156_v26 = vcombine.high %v4572_v25, %v4572_v25  ;;  %v3155_v29 = vcombine.low %v4572_v25, %v4572_v25  ;;  %v3190_v30 = vcombine.high %v4570_v24, %v4572_v25  ;;  %v3189_v5 = vcombine.low %v4570_v24, %v4572_v25  ;;  %v3740_v24 = vld [vmem:[%s4800_s1 + $0x834] ss:$8 sps:$4 sm:$0xff]  }
 0x2d6   : > { %v3256_v7 = vcombine.high %v4572_v25, %v4658_v3 }
 0x2d7   : > { %2088 = vmatprep.mubr.bf16.mxu0 %v3156_v26  ;;  %v2111_v32 = vshrl.u32 %v3190_v30, 16  ;;  %v2114_v33 = vshll.u32 %v3190_v30, 16  ;;  %v2103_v9 = vshrl.u32 %v3189_v5, 16  ;;  %v2106_v10 = vshll.u32 %v3189_v5, 16  ;;  %v3738_v26 = vld [vmem:[%s4800_s1 + $0x830] ss:$8 sps:$4 sm:$0xff]  }
 0x2d8   : > { %2089 = vmatmul.mubr.bf16.vlgmr.msra.gmra.mrb[4].mxu0 %v3155_v29  ;;  %v2374_v28 = vshll.u32 %v3256_v7, 16  ;;  %v2372_v17 = vshrl.u32 %v3256_v7, 16  ;;  %v3741_v29 = vld [vmem:[%s4800_s1 + $0x840] ss:$8 sps:$4 sm:$0xff]   ;;  %v3746_v30 = vld [vmem:[%s4800_s1 + $0x854] ss:$8 sps:$4 sm:$0xff]  }
 0x2d9   : > { %2281 = vmatpush1.bf16.msra.mxu0 %v3676_v27  ;;  %v2113_v35 = vrot.slane %v2111_v32, 3  ;;  %v2116_v38 = vrot.slane %v2114_v33, 4  ;;  %v2105_v12 = vrot.slane %v2103_v9, 3  ;;  %v2108_v13 = vrot.slane %v2106_v10, 4  ;;  %v3743_v27 = vld [vmem:[%s4800_s1 + $0x844] ss:$8 sps:$4 sm:$0xff]  }
 0x2da   : > { %2282 = vmatprep.subr.bf16.mxu0 %v3682_v31  ;;  %v2376_v15 = vrot.slane %v2374_v28, 1  ;;  %v3744_v31 = vld [vmem:[%s4800_s1 + $0x850] ss:$8 sps:$4 sm:$0xff]   ;;  %v3749_v32 = vld [vmem:[%s4800_s1 + $0x864] ss:$8 sps:$4 sm:$0xff]  }
 0x2db   : > { %v2117_v43 = vor.u32 %v2116_v38, %v2113_v35  ;;  %v2109_v18 = vor.u32 %v2108_v13, %v2105_v12  ;;  %v3747_v33 = vld [vmem:[%s4800_s1 + $0x860] ss:$8 sps:$4 sm:$0xff]   ;;  %v3750_v35 = vld [vmem:[%s4800_s1 + $0x870] ss:$8 sps:$4 sm:$0xff]   ;;  %v3755_v38 = vld [vmem:[%s4800_s1 + $0x884] ss:$8 sps:$4 sm:$0xff]  }
 0x2dc   : > { %v2377_v20 = vor.u32 %v2376_v15, %v2372_v17  ;;  %v3787_v28 = vmov 1966171168  }
 0x2dd   : > { %2283 = vmatpush1.bf16.msra.mxu0 %v3680_v34  ;;  %2312 = vmatprep.mubr.bf16.mxu0 %v2117_v43  ;;  %v3752_v34 = vld [vmem:[%s4800_s1 + $0x874] ss:$8 sps:$4 sm:$0xff]  }
 0x2de   : > { %2284 = vmatprep.subr.bf16.mxu0 %v3687_v42  ;;  %v3753_v42 = vld [vmem:[%s4800_s1 + $0x880] ss:$8 sps:$4 sm:$0xff]   ;;  %v3758_v43 = vld [vmem:[%s4800_s1 + $0x894] ss:$8 sps:$4 sm:$0xff]  }
 0x2e1   : > { %2285 = vmatpush1.bf16.msra.mxu0 %v3685_v44  ;;  %v3756_v44 = vld [vmem:[%s4800_s1 + $0x890] ss:$8 sps:$4 sm:$0xff]  }
 0x2e2   : > { %2286 = vmatprep.subr.bf16.mxu0 %v3690_v45  ;;  %v3761_v45 = vld [vmem:[%s4800_s1 + $0x8a4] ss:$8 sps:$4 sm:$0xff]  }
 0x2e5   : > { %2287 = vmatpush1.bf16.msra.mxu0 %v3688_v46  ;;  %v3759_v46 = vld [vmem:[%s4800_s1 + $0x8a0] ss:$8 sps:$4 sm:$0xff]  }
 0x2e6   : > { %2288 = vmatprep.subr.bf16.mxu0 %v3693_v47  ;;  %v3764_v47 = vld [vmem:[%s4800_s1 + $0x8b4] ss:$8 sps:$4 sm:$0xff]  }
 0x2e9   : > { %2289 = vmatpush1.bf16.msra.mxu0 %v3691_v48  ;;  %v3762_v48 = vld [vmem:[%s4800_s1 + $0x8b0] ss:$8 sps:$4 sm:$0xff]  }
 0x2ea   : > { %2290 = vmatprep.subr.bf16.mxu0 %v3696_v49  ;;  %v3767_v49 = vld [vmem:[%s4800_s1 + $0x8c4] ss:$8 sps:$4 sm:$0xff]  }
 0x2ed   : > { %2291 = vmatpush1.bf16.msra.mxu0 %v3694_v50  ;;  %v3765_v50 = vld [vmem:[%s4800_s1 + $0x8c0] ss:$8 sps:$4 sm:$0xff]  }
 0x2ee   : > { %2292 = vmatprep.subr.bf16.mxu0 %v3699_v51  ;;  %v3770_v51 = vld [vmem:[%s4800_s1 + $0x8d4] ss:$8 sps:$4 sm:$0xff]  }
 0x2f1   : > { %2293 = vmatpush1.bf16.msra.mxu0 %v3697_v52  ;;  %v3768_v52 = vld [vmem:[%s4800_s1 + $0x8d0] ss:$8 sps:$4 sm:$0xff]  }
 0x2f2   : > { %2294 = vmatprep.subr.bf16.mxu0 %v3702_v53  ;;  %v3255_v53 = vcombine.low %v4572_v25, %v4658_v3  ;;  %v3774_v25 = vld [vmem:[%s4800_s1 + $0x8f0] ss:$8 sps:$4 sm:$0xff]  }
 0x2f5   : > { %2295 = vmatpush1.bf16.msra.mxu0 %v3700_v0  ;;  %v3773_v0 = vld [vmem:[%s4800_s1 + $0x8e4] ss:$8 sps:$4 sm:$0xff]  }
 0x2f6   : > { %2296 = vmatprep.subr.bf16.mxu0 %v3705_v54  ;;  %v3771_v54 = vld [vmem:[%s4800_s1 + $0x8e0] ss:$8 sps:$4 sm:$0xff]  }
 0x2f9   : > { %2297 = vmatpush1.bf16.msra.mxu0 %v3703_v55  ;;  %v3776_v55 = vld [vmem:[%s4800_s1 + $0x8f4] ss:$8 sps:$4 sm:$0xff]  }
 0x2fa   : > { %2298 = vmatprep.subr.bf16.mxu0 %v3708_v56  ;;  %v2367_v56 = vshll.u32 %v3255_v53, 16 }
 0x2fd   : > { %2299 = vmatpush1.bf16.msra.mxu0 %v3706_v57  ;;  %v2369_v57 = vrot.slane %v2367_v56, 1 }
 0x2fe   : > { %2300 = vmatprep.subr.bf16.mxu0 %v3711_v58  ;;  %v2365_v58 = vshrl.u32 %v3255_v53, 16 }
 0x301   : > { %2301 = vmatpush1.bf16.msra.mxu0 %v3709_v59  ;;  %v2370_v59 = vor.u32 %v2369_v57, %v2365_v58 }
 0x302   : > { %2302 = vmatprep.subr.bf16.mxu0 %v3714_v60  ;;  %v3786_v60 = vmov 1983009808  }
 0x305   : > { %2303 = vmatpush1.bf16.msra.mxu0 %v3712_v61  ;;  %v2630_v61 = vunpack.c.l.s4 %v3786_v60 }
 0x306   : > { %2304 = vmatprep.subr.bf16.mxu0 %v3717_v62  ;;  %v3289_v62 = vld [vmem:[%s4801_s2 + $0x8] sm:$0xf] }
 0x307   : > { %v2589_v3 = vrot.slane %v3289_v62, %v4231_v37  ;;  %v2609_v7 = vrot.slane %v3289_v62, %v4240_v40 }
 0x309   : > { %2305 = vmatpush1.bf16.msra.mxu0 %v3715_v1  ;;  %v2631_v1 = vunpack.c.0.s8 %v2630_v61  ;;  %v2619_v12 = vrot.slane %v2609_v7, %v4240_v40 }
 0x30a   : > { %2306 = vmatprep.subr.bf16.mxu0 %v3720_v2  ;;  %v2626_v2 = vld [vmem:[%s3863_s18] sm:$0x3] }
 0x30b   : > { %v2634_v5 = vsub.s32 %v2631_v1, %v4228_v36 }
 0x30d   : > { %2307 = vmatpush1.bf16.msra.mxu0 %v3718_v4  ;;  %v2627_v4 = vunpack.c.l.bf16 %v2626_v2 }
 0x30e   : > { %2308 = vmatprep.subr.bf16.mxu0 %v3723_v6  ;;  %v2593_v6 = vrot.slane %v3289_v62, %v4237_v39 }
 0x30f   : > { %v2635_v9 = vrot.slane %v2627_v4, %v2634_v5 }
 0x310   : > { %v2603_v10 = vrot.slane %v2593_v6, %v4231_v37 }
 0x311   : > { %2309 = vmatpush1.bf16.msra.mxu0 %v3721_v63  ;;  %v2613_v63 = vrot.slane %v3289_v62, %v4243_v41  ;;  %v2636_v17 = vcombine.high %v2635_v9, %v2635_v9 }
 0x312   : > { %2310 = vmatprep.subr.bf16.mxu0 %v3726_v8  ;;  %v2599_v8 = vrot.slane %v2589_v3, %v4231_v37 }
 0x315   : > { %2311 = vmatpush1.bf16.msra.mxu0 %v3724_v11  ;;  %v2647_v11 = vunpack.c.l.s4 %v3787_v28 }
 0x316   : > { %2540 = vmatprep.subr.bf16.mxu0 %v3729_v14  ;;  %v2623_v14 = vrot.slane %v2613_v63, %v4240_v40 }
 0x318   : > { %2313 = vmatmul.mubr.bf16.vlgmr.msra.gmra.mrb[4].mxu0 %v2109_v18  ;;  %v2648_v18 = vunpack.c.0.s8 %v2647_v11 }
 0x319   : > { %2541 = vmatpush1.bf16.msra.mxu0 %v3727_v16  ;;  %2572 = vmatprep.mubr.bf16.mxu0 %v2377_v20 }
 0x31a   : > { %2542 = vmatprep.subr.bf16.mxu0 %v3734_v19  ;;  %v2651_v37 = vsub.s32 %v2648_v18, %v4228_v36 }
 0x31d   : > { %2543 = vmatpush1.bf16.msra.mxu0 %v3732_v21 }
 0x31e   : > { %2544 = vmatprep.subr.bf16.mxu0 %v3737_v22 }
 0x321   : > { %2545 = vmatpush1.bf16.msra.mxu0 %v3735_v23 }
 0x322   : > { %2546 = vmatprep.subr.bf16.mxu0 %v3740_v24 }
 0x325   : > { %2547 = vmatpush1.bf16.msra.mxu0 %v3738_v26 }
 0x326   : > { %2548 = vmatprep.subr.bf16.mxu0 %v3743_v27 }
 0x329   : > { %2549 = vmatpush1.bf16.msra.mxu0 %v3741_v29 }
 0x32a   : > { %2550 = vmatprep.subr.bf16.mxu0 %v3746_v30 }
 0x32d   : > { %2551 = vmatpush1.bf16.msra.mxu0 %v3744_v31 }
 0x32e   : > { %2552 = vmatprep.subr.bf16.mxu0 %v3749_v32 }
 0x331   : > { %2553 = vmatpush1.bf16.msra.mxu0 %v3747_v33 }
 0x332   : > { %2554 = vmatprep.subr.bf16.mxu0 %v3752_v34 }
 0x335   : > { %2555 = vmatpush1.bf16.msra.mxu0 %v3750_v35 }
 0x336   : > { %2556 = vmatprep.subr.bf16.mxu0 %v3755_v38 }
 0x339   : > { %2557 = vmatpush1.bf16.msra.mxu0 %v3753_v42 }
 0x33a   : > { %2558 = vmatprep.subr.bf16.mxu0 %v3758_v43 }
 0x33d   : > { %2559 = vmatpush1.bf16.msra.mxu0 %v3756_v44 }
 0x33e   : > { %2560 = vmatprep.subr.bf16.mxu0 %v3761_v45 }
 0x341   : > { %2561 = vmatpush1.bf16.msra.mxu0 %v3759_v46 }
 0x342   : > { %2562 = vmatprep.subr.bf16.mxu0 %v3764_v47 }
 0x345   : > { %2563 = vmatpush1.bf16.msra.mxu0 %v3762_v48 }
 0x346   : > { %2564 = vmatprep.subr.bf16.mxu0 %v3767_v49 }
 0x349   : > { %2565 = vmatpush1.bf16.msra.mxu0 %v3765_v50 }
 0x34a   : > { %2566 = vmatprep.subr.bf16.mxu0 %v3770_v51 }
 0x34d   : > { %2567 = vmatpush1.bf16.msra.mxu0 %v3768_v52 }
 0x34e   : > { %2568 = vmatprep.subr.bf16.mxu0 %v3773_v0 }
 0x351   : > { %2569 = vmatpush1.bf16.msra.mxu0 %v3771_v54 }
 0x352   : > { %2570 = vmatprep.subr.bf16.mxu0 %v3776_v55 }
 0x355   : > { %2571 = vmatpush1.bf16.msra.mxu0 %v3774_v25 }
 0x358   : > { %2573 = vmatmul.mubr.bf16.vlgmr.msra.gmra.mrb[4].mxu0 %v2370_v59 }
 0x42b   : > { %v2574_v13 = vpop.f32.mrb[4].mxu0 }
 0x42c   : > { %v2604_v15 = vmul.f32 %v2599_v8, %v2574_v13  ;;  %v2576_v16 = vpop.f32.mrb[5].mxu0 }
 0x42d   : > { %v2605_v39 = vmul.f32 %v2603_v10, %v2576_v16  ;;  %v2578_v19 = vpop.f32.mrb[6].mxu0 }
 0x42e   : > { %v2624_v41 = vadd.f32 %v2619_v12, %v2604_v15  ;;  %v2579_v20 = vpop.f32.mrb[7].mxu0 }
 0x42f   : > { %v2625_v21 = vadd.f32 %v2623_v14, %v2605_v39 }
 0x430   : > { %v2639_v22 = vadd.f32 %v2635_v9, %v2624_v41 }
 0x431   : > { %v2640_v23 = vadd.f32 %v2636_v17, %v2625_v21 }
 0x433   : > { %v3290_v24 = vpack.c.bf16 %v2640_v23, %v2639_v22 }
 0x435   : > { %v2652_v40 = vrot.slane %v3290_v24, %v2651_v37 }
 0x437   : > { %3291 = vst.sshfl [vmem:[%s165_s24] sm:$0x5 pattern:$0x73625140] %v2652_v40 }
 0x438 PF: > { %s13_s12 = sadd.s32 1, %s3783_s12  }
 0x439   : > { %p10_p4 = scmp.ge.s32.totalorder %s13_s12, 4  }
 0x43b   :  { %12 = sbr.rel (!%p10_p4) target bundleno = 1 (0x1), region = 72 }

</bundles_post_ra>
